<compile_context>
chip_gen: v6e
topology: v6e:2x2x1
jax: 0.10.0
libtpu: 0.0.40
codegen_flags: <defaults>
</compile_context>

<pallas_src>
import functools
import math

import jax
import jax.numpy as jnp
from jax.experimental import pallas as pl
from jax.experimental.pallas import tpu as pltpu


# ----------------------------- hardware helpers --------------------------------
def _physical_vmem_bytes():
    try:
        return int(pltpu.get_tpu_info().vmem_capacity_bytes)
    except Exception:
        return 64 * 1024 * 1024          # conservative fallback (v7x-sized)


def _vmem_cap_bytes():
    # Leave ~16 MiB headroom for compiler-internal scratch:
    #   64 MiB chips (v7x) -> ~48 MiB, 128 MiB chips (v5e/v6e) -> ~112 MiB.
    return max(32 * 1024 * 1024, _physical_vmem_bytes() - 16 * 1024 * 1024)


def _num_tensorcores_per_chip():
    try:
        kind = jax.devices()[0].device_kind.lower()
    except Exception:
        return 1
    # v7x packs two TensorCores per chip; v5e / v6e have one.
    if "v7" in kind or "7x" in kind:
        return 2
    return 1


def _default_n_b_chunks(batch):
    n_tc = _num_tensorcores_per_chip()
    # Only split the batch when there are >=2 TCs to feed AND each chunk stays
    # a multiple of 16 rows (full bf16 (16,128) store tiles).
    if n_tc >= 2 and batch % (16 * n_tc) == 0:
        return n_tc
    return 1


def _vmem_estimate_bytes(blk_rows, b_chunk, d):
    """Everything the kernel keeps in VMEM for one grid step."""
    return (d * 3 * d * 2                 # resident bf16 weight
            + 3 * d * 4                   # resident f32 bias
            + 2 * blk_rows * d * 2        # x block, double-buffered, bf16
            + 2 * blk_rows * d * 2        # h block, double-buffered, bf16
            + 2 * b_chunk * d * 4         # C_T output block (double-buffered)
            + blk_rows * 3 * d * 4        # fused Z|F|O gate slab, f32
            + b_chunk * d * 4)            # carried cell state C


def _pick_t_blk(seq_len, b_chunk, d, vmem_cap, max_rows=1024):
    """Largest divisor of seq_len whose block fits the VMEM/row budgets."""
    best = 1
    for t in range(1, seq_len + 1):
        if seq_len % t:
            continue
        rows = t * b_chunk
        if rows > max_rows:
            break
        if _vmem_estimate_bytes(rows, b_chunk, d) > int(0.8 * vmem_cap):
            break
        best = t
    return best


# --------------------------------- kernel --------------------------------------
def _qrnn_block_kernel(x_ref, w_ref, b_ref, h_ref, c_out_ref, c_s, g_s, *,
                       n_sub, unroll):
    """One grid step = one (batch-chunk, time-block).

    x_ref:     (blk_rows, D)   bf16 input rows, row index = t*b_chunk + row
    w_ref:     (D, 3D)         bf16 fused Z/F/O weights, resident in VMEM
    b_ref:     (1, 3D)         f32 fused bias, resident in VMEM
    h_ref:     (blk_rows, D)   bf16 output H rows for this time block
    c_out_ref: (b_chunk, D)    f32 final cell state C_T (written on last block)
    c_s:       (b_chunk, D)    f32 cell state carried across time blocks
    g_s:       (blk_rows, 3D)  f32 fused gate slab (Z | F | O), in-place gates
    """
    ti = pl.program_id(1)

    @pl.when(ti == 0)
    def _():
        # hidden init = None in the reference => C_0 = 0 (reset per batch chunk)
        c_s[...] = jnp.zeros_like(c_s)

    b_chunk, d = c_s.shape
    blk_rows = g_s.shape[0]
    t_blk = blk_rows // b_chunk
    t_sub = t_blk // n_sub
    sub_rows = t_sub * b_chunk

    def gates(s):
        # ---- bulk, time-parallel part: one MXU matmul per sub-block ---------
        rows = pl.ds(s * sub_rows, sub_rows)
        g_s[rows, :] = (jnp.dot(x_ref[rows, :], w_ref[...],
                                preferred_element_type=jnp.float32)
                        + b_ref[...])
        # In-place nonlinearities on 128-lane-aligned gate slices (EUP).
        g_s[rows, 0:d] = jnp.tanh(g_s[rows, 0:d])                 # Z
        g_s[rows, d:3 * d] = jax.nn.sigmoid(g_s[rows, d:3 * d])   # F and O

    gates(0)
    c = c_s[...]
    for s in range(n_sub):
        if s + 1 < n_sub:
            # Issue the next sub-block's matmul now: no data dependency on the
            # recurrence below, so the MXU chews on it while the VPU runs the
            # (fully unrolled) forget-mult of the current sub-block.
            gates(s + 1)

        base = s * sub_rows

        def step(i, c, base=base):
            # ---- the only truly sequential part: forget-mult recurrence -----
            #   C_t = C_{t-1} + F_t*(Z_t - C_{t-1})   (== F*Z + (1-F)*C)
            #   H_t = sigmoid(O_t) * C_t   (stored straight to bf16 output)
            r0 = pl.multiple_of(base + i * b_chunk, b_chunk)
            rows = pl.ds(r0, b_chunk)
            z = g_s[rows, 0:d]
            f = g_s[rows, d:2 * d]
            o = g_s[rows, 2 * d:3 * d]
            c = c + f * (z - c)
            h_ref[rows, :] = (o * c).astype(h_ref.dtype)
            return c

        c = jax.lax.fori_loop(0, t_sub, step, c, unroll=unroll)

    c_s[...] = c

    @pl.when(ti == pl.num_programs(1) - 1)
    def _():
        c_out_ref[...] = c_s[...]


# -------------------------------- wrappers --------------------------------------
def _qrnn_layer_chunked(xc, w, b, *, seq_len, t_blk=None):
    """QRNN layer on batch-chunked layout.

    xc: (n_b, seq_len*Bc, D) bf16, row index = t*Bc + (batch row within chunk)
    w:  (D, 3D), b: (1, 3D)
    returns (H chunked (n_b, seq_len*Bc, D) bf16, C_T (n_b, Bc, D) f32)
    """
    n_b, rows, d = xc.shape
    assert rows % seq_len == 0
    b_chunk = rows // seq_len
    assert b_chunk % 16 == 0, "batch chunk must be a multiple of 16 (bf16 tiles)"
    assert d % 128 == 0, "hidden size must be lane (128) aligned"

    vmem_cap = _vmem_cap_bytes()
    if t_blk is None:
        t_blk = _pick_t_blk(seq_len, b_chunk, d, vmem_cap)
    assert seq_len % t_blk == 0, "seq_len must be a multiple of the time block"
    n_t = seq_len // t_blk
    blk_rows = t_blk * b_chunk

    # Sub-block split: keep the unrolled recurrence <= 8 steps per fori_loop and
    # give the scheduler a next-sub-block matmul to overlap with it.
    n_sub = 1
    while t_blk // n_sub > 8 and t_blk % (2 * n_sub) == 0:
        n_sub *= 2
    t_sub = t_blk // n_sub
    unroll = True if t_sub <= 8 else 8

    xc = xc.astype(jnp.bfloat16)
    w = w.astype(jnp.bfloat16)                 # bf16 operands for the MXU
    b = b.astype(jnp.float32).reshape(1, 3 * d)

    need = _vmem_estimate_bytes(blk_rows, b_chunk, d)
    vmem_limit = int(min(max(need * 5 // 4 + (4 << 20), 16 << 20), vmem_cap))

    grid_spec = pltpu.PrefetchScalarGridSpec(
        num_scalar_prefetch=0,
        grid=(n_b, n_t),                       # batch chunks x time blocks
        in_specs=[
            pl.BlockSpec((None, blk_rows, d), lambda bi, ti: (bi, ti, 0)),
            # Whole weight/bias resident in VMEM: single copy, no per-step DMA,
            # no double-buffering of the (large at real sizes) weight.
            pl.BlockSpec(memory_space=pltpu.MemorySpace.VMEM),
            pl.BlockSpec(memory_space=pltpu.MemorySpace.VMEM),
        ],
        out_specs=[
            pl.BlockSpec((None, blk_rows, d), lambda bi, ti: (bi, ti, 0)),
            pl.BlockSpec((None, b_chunk, d), lambda bi, ti: (bi, 0, 0)),
        ],
        scratch_shapes=[
            pltpu.VMEM((b_chunk, d), jnp.float32),       # carried cell state C
            pltpu.VMEM((blk_rows, 3 * d), jnp.float32),  # fused Z|F|O gate slab
        ],
    )

    kernel = functools.partial(_qrnn_block_kernel, n_sub=n_sub, unroll=unroll)

    h, c_last = pl.pallas_call(
        kernel,
        out_shape=(
            jax.ShapeDtypeStruct((n_b, rows, d), xc.dtype),
            jax.ShapeDtypeStruct((n_b, b_chunk, d), jnp.float32),
        ),
        grid_spec=grid_spec,
        compiler_params=pltpu.CompilerParams(
            # Time carries the recurrence -> "arbitrary"; batch chunks are
            # independent -> "parallel" (v7x megacore can split the batch).
            dimension_semantics=("parallel", "arbitrary"),
            vmem_limit_bytes=vmem_limit,
        ),
    )(xc, w, b)
    return h, c_last


def _to_chunked(x, n_b_chunks):
    """(S, B, D) -> (n_b, S*Bc, D); row index = t*Bc + (batch row within chunk)."""
    s, bsz, d = x.shape
    assert bsz % n_b_chunks == 0
    bc = bsz // n_b_chunks
    return (x.reshape(s, n_b_chunks, bc, d)
             .transpose(1, 0, 2, 3)
             .reshape(n_b_chunks, s * bc, d))


def _from_chunked(xc, seq_len, bsz):
    n_b, rows, d = xc.shape
    bc = bsz // n_b
    return (xc.reshape(n_b, seq_len, bc, d)
              .transpose(1, 0, 2, 3)
              .reshape(seq_len, bsz, d))


def qrnn_layer(x, w, b, *, t_blk=None, n_b_chunks=None):
    """Single QRNN layer (window=1, output_gate=True, zoneout=0), hidden init = 0.

    x: (S, B, D) -> (H: (S, B, D), C_S: (B, D))   [mirrors QRNNLayer.forward]
    Requires B / n_b_chunks to be a multiple of 16 and D a multiple of 128.
    """
    # TODO(synk): support a nonzero initial hidden state (hidden != None path).
    s, bsz, d = x.shape
    if n_b_chunks is None:
        n_b_chunks = _default_n_b_chunks(bsz)
    xc = _to_chunked(x.astype(jnp.bfloat16), n_b_chunks)
    hc, cc = _qrnn_layer_chunked(xc, w, b, seq_len=s, t_blk=t_blk)
    return _from_chunked(hc, s, bsz).astype(x.dtype), cc.reshape(bsz, d)


def model_forward(tokens, emb_table, layer_weights, layer_biases, *,
                  t_blk=None, n_b_chunks=None):
    """Embedding -> stacked QRNN layers -> out[:-1] (language-model trunk)."""
    s, bsz = tokens.shape
    if n_b_chunks is None:
        n_b_chunks = _default_n_b_chunks(bsz)
    x = jnp.take(emb_table, tokens, axis=0)               # gather: plain-JAX glue
    xc = _to_chunked(x.astype(jnp.bfloat16), n_b_chunks)  # bf16 inter-layer acts,
    # permuted into the chunked layout once for all layers (no per-layer transposes)
    # TODO(synk): fuse adjacent layers' projections per time block to avoid the
    # per-layer HBM round-trip of activations when VMEM allows.
    for w, b in zip(layer_weights, layer_biases):
        xc, _ = _qrnn_layer_chunked(xc, w, b, seq_len=s, t_blk=t_blk)
    out = _from_chunked(xc, s, bsz)
    return out[:-1].astype(jnp.float32)


# ----------------------------- pure-JAX reference -----------------------------
def _qrnn_layer_ref(x, w, b):
    d = w.shape[0]
    y = jnp.einsum("sbi,ij->sbj", x, w) + b[0]
    z = jnp.tanh(y[..., :d])
    f = jax.nn.sigmoid(y[..., d:2 * d])
    o = jax.nn.sigmoid(y[..., 2 * d:])

    def step(c, gates):
        z_t, f_t, o_t = gates
        c = f_t * z_t + (1.0 - f_t) * c
        return c, o_t * c

    c0 = jnp.zeros((x.shape[1], d), x.dtype)
    c_last, h = jax.lax.scan(step, c0, (z, f, o))
    return h, c_last


def _model_ref(tokens, emb_table, layer_weights, layer_biases):
    x = jnp.take(emb_table, tokens, axis=0)
    for w, b in zip(layer_weights, layer_biases):
        x, _ = _qrnn_layer_ref(x, w, b)
    return x[:-1]


if __name__ == "__main__":
    vocab = 100
    hidden = 128        # lane-aligned stand-in for hidden_size=1024
    num_layers = 3
    seq_len = 64
    batch = 32          # b_chunk = 32 (1 TC) or 16 (v7x, 2 TCs): always %16

    key = jax.random.PRNGKey(0)
    k_emb, k_tok, *k_layers = jax.random.split(key, 2 + 2 * num_layers)

    emb_table = jax.random.normal(k_emb, (vocab, hidden), dtype=jnp.float32)

    bound = 1.0 / math.sqrt(hidden)
    layer_weights, layer_biases = [], []
    for l in range(num_layers):
        w = jax.random.uniform(k_layers[2 * l], (hidden, 3 * hidden),
                               dtype=jnp.float32, minval=-bound, maxval=bound)
        b = jax.random.uniform(k_layers[2 * l + 1], (1, 3 * hidden),
                               dtype=jnp.float32, minval=-bound, maxval=bound)
        layer_weights.append(w)
        layer_biases.append(b)

    tokens = jax.random.randint(k_tok, (seq_len, batch), 0, vocab, dtype=jnp.int32)

    out = model_forward(tokens, emb_table, layer_weights, layer_biases)
    out = jax.block_until_ready(out)

    assert out.shape == (seq_len - 1, batch, hidden), out.shape
    assert bool(jnp.all(jnp.isfinite(out)))

    # Numerical check vs pure-JAX f32 reference (loose tolerance for bf16 matmuls
    # and bf16 inter-layer activations — a deliberate precision choice).
    ref = _model_ref(tokens, emb_table, layer_weights, layer_biases)
    assert bool(jnp.allclose(out, ref, atol=1e-1, rtol=1e-1))

    # Single-layer interface check (mirrors QRNNLayer.forward -> (H, C_T)).
    x0 = jnp.take(emb_table, tokens, axis=0)
    h1, c1 = qrnn_layer(x0, layer_weights[0], layer_biases[0])
    h1 = jax.block_until_ready(h1)
    assert h1.shape == (seq_len, batch, hidden) and c1.shape == (batch, hidden)
    h_ref, c_ref = _qrnn_layer_ref(x0, layer_weights[0], layer_biases[0])
    assert bool(jnp.allclose(h1.astype(jnp.float32), h_ref, atol=1e-1, rtol=1e-1))
    assert bool(jnp.allclose(c1, c_ref, atol=1e-1, rtol=1e-1))

    print("KERNEL_OK")
</pallas_src>

<mosaic_0001>
module attributes {stable_mosaic.version = 11 : i64} {
  func.func @_qrnn_block_kernel(%arg0: i32, %arg1: i32, %arg2: memref<1x1024x128xbf16, #tpu.memory_space<vmem>>, %arg3: memref<128x384xbf16, #tpu.memory_space<vmem>>, %arg4: memref<1x384xf32, #tpu.memory_space<vmem>>, %arg5: memref<1x1024x128xbf16, #tpu.memory_space<vmem>>, %arg6: memref<1x32x128xf32, #tpu.memory_space<vmem>>, %arg7: memref<32x128xf32, #tpu.memory_space<vmem>>, %arg8: memref<1024x384xf32, #tpu.memory_space<vmem>>) attributes {dimension_semantics = [#tpu.dimension_semantics<parallel>, #tpu.dimension_semantics<arbitrary>], iteration_bounds = array<i64: 1, 2>, scalar_prefetch = 0 : i64, scratch_operands = 2 : i64, tpu.core_type = #tpu.core_type<tc>, window_params = [{transform_indices = @transform_0, window_bounds = array<i64: 1, 1024, 128>}, {pipeline_mode = #tpu.pipeline_mode<synchronous>, transform_indices = @transform_1, window_bounds = array<i64: 128, 384>}, {pipeline_mode = #tpu.pipeline_mode<synchronous>, transform_indices = @transform_2, window_bounds = array<i64: 1, 384>}, {transform_indices = @transform_3, window_bounds = array<i64: 1, 1024, 128>}, {transform_indices = @transform_4, window_bounds = array<i64: 1, 32, 128>}]} {
    %c0_i32 = arith.constant 0 : i32
    %0 = arith.cmpi eq, %arg1, %c0_i32 : i32
    %1 = arith.extui %0 : i1 to i32
    %c0_i32_0 = arith.constant 0 : i32
    %2 = arith.cmpi ne, %1, %c0_i32_0 : i32
    scf.if %2 {
      %cst_325 = arith.constant 0.000000e+00 : f32
      %656 = vector.broadcast %cst_325 : f32 to vector<32x128xf32>
      %c0_326 = arith.constant 0 : index
      %c0_327 = arith.constant 0 : index
      %657 = vector.load %arg7[%c0_326, %c0_327] : memref<32x128xf32, #tpu.memory_space<vmem>>, vector<32x128xf32>
      tpu.vector_store %arg7[%c0_326, %c0_327], %656 {strides = array<i32>} : memref<32x128xf32, #tpu.memory_space<vmem>>, vector<32x128xf32>,
    } else {
    }
    %c0 = arith.constant 0 : index
    %c0_1 = arith.constant 0 : index
    %c0_2 = arith.constant 0 : index
    %3 = vector.load %arg2[%c0, %c0_1, %c0_2] : memref<1x1024x128xbf16, #tpu.memory_space<vmem>>, vector<1x256x128xbf16>
    %4 = vector.shape_cast %3 : vector<1x256x128xbf16> to vector<256x128xbf16>
    %c0_3 = arith.constant 0 : index
    %c0_4 = arith.constant 0 : index
    %5 = vector.load %arg3[%c0_3, %c0_4] : memref<128x384xbf16, #tpu.memory_space<vmem>>, vector<128x384xbf16>
    %cst = arith.constant dense<0.000000e+00> : vector<256x384xf32>
    %6 = tpu.matmul %4, %5, %cst {dimension_numbers = #tpu.dot_dimension_numbers<[1], [0], [0], [1], [0, 0, 1, 1], [], []>} : vector<256x128xbf16>, vector<128x384xbf16>, vector<256x384xf32> -> vector<256x384xf32>
    %c0_5 = arith.constant 0 : index
    %c0_6 = arith.constant 0 : index
    %7 = vector.load %arg4[%c0_5, %c0_6] : memref<1x384xf32, #tpu.memory_space<vmem>>, vector<1x384xf32>
    %8 = vector.broadcast %7 : vector<1x384xf32> to vector<256x384xf32>
    %9 = arith.addf %6, %8 : vector<256x384xf32>
    %c0_7 = arith.constant 0 : index
    %c0_8 = arith.constant 0 : index
    %10 = vector.load %arg8[%c0_7, %c0_8] : memref<1024x384xf32, #tpu.memory_space<vmem>>, vector<256x384xf32>
    tpu.vector_store %arg8[%c0_7, %c0_8], %9 {strides = array<i32>} : memref<1024x384xf32, #tpu.memory_space<vmem>>, vector<256x384xf32>,
    %c0_9 = arith.constant 0 : index
    %c0_10 = arith.constant 0 : index
    %11 = vector.load %arg8[%c0_9, %c0_10] : memref<1024x384xf32, #tpu.memory_space<vmem>>, vector<256x128xf32>
    %12 = math.tanh %11 : vector<256x128xf32>
    %c0_11 = arith.constant 0 : index
    %c0_12 = arith.constant 0 : index
    %13 = vector.load %arg8[%c0_11, %c0_12] : memref<1024x384xf32, #tpu.memory_space<vmem>>, vector<256x128xf32>
    tpu.vector_store %arg8[%c0_11, %c0_12], %12 {strides = array<i32>} : memref<1024x384xf32, #tpu.memory_space<vmem>>, vector<256x128xf32>,
    %c0_13 = arith.constant 0 : index
    %c128 = arith.constant 128 : index
    %14 = vector.load %arg8[%c0_13, %c128] : memref<1024x384xf32, #tpu.memory_space<vmem>>, vector<256x256xf32>
    %15 = arith.negf %14 : vector<256x256xf32>
    %16 = math.exp %15 : vector<256x256xf32>
    %cst_14 = arith.constant 1.000000e+00 : f32
    %17 = vector.broadcast %cst_14 : f32 to vector<256x256xf32>
    %18 = arith.addf %17, %16 : vector<256x256xf32>
    %19 = arith.divf %17, %18 : vector<256x256xf32>
    %c0_15 = arith.constant 0 : index
    %c128_16 = arith.constant 128 : index
    %20 = vector.load %arg8[%c0_15, %c128_16] : memref<1024x384xf32, #tpu.memory_space<vmem>>, vector<256x256xf32>
    tpu.vector_store %arg8[%c0_15, %c128_16], %19 {strides = array<i32>} : memref<1024x384xf32, #tpu.memory_space<vmem>>, vector<256x256xf32>,
    %c0_17 = arith.constant 0 : index
    %c0_18 = arith.constant 0 : index
    %21 = vector.load %arg7[%c0_17, %c0_18] : memref<32x128xf32, #tpu.memory_space<vmem>>, vector<32x128xf32>
    %c0_19 = arith.constant 0 : index
    %c256 = arith.constant 256 : index
    %c0_20 = arith.constant 0 : index
    %22 = vector.load %arg2[%c0_19, %c256, %c0_20] : memref<1x1024x128xbf16, #tpu.memory_space<vmem>>, vector<1x256x128xbf16>
    %23 = vector.shape_cast %22 : vector<1x256x128xbf16> to vector<256x128xbf16>
    %c0_21 = arith.constant 0 : index
    %c0_22 = arith.constant 0 : index
    %24 = vector.load %arg3[%c0_21, %c0_22] : memref<128x384xbf16, #tpu.memory_space<vmem>>, vector<128x384xbf16>
    %cst_23 = arith.constant dense<0.000000e+00> : vector<256x384xf32>
    %25 = tpu.matmul %23, %24, %cst_23 {dimension_numbers = #tpu.dot_dimension_numbers<[1], [0], [0], [1], [0, 0, 1, 1], [], []>} : vector<256x128xbf16>, vector<128x384xbf16>, vector<256x384xf32> -> vector<256x384xf32>
    %c0_24 = arith.constant 0 : index
    %c0_25 = arith.constant 0 : index
    %26 = vector.load %arg4[%c0_24, %c0_25] : memref<1x384xf32, #tpu.memory_space<vmem>>, vector<1x384xf32>
    %27 = vector.broadcast %26 : vector<1x384xf32> to vector<256x384xf32>
    %28 = arith.addf %25, %27 : vector<256x384xf32>
    %c256_26 = arith.constant 256 : index
    %c0_27 = arith.constant 0 : index
    %29 = vector.load %arg8[%c256_26, %c0_27] : memref<1024x384xf32, #tpu.memory_space<vmem>>, vector<256x384xf32>
    tpu.vector_store %arg8[%c256_26, %c0_27], %28 {strides = array<i32>} : memref<1024x384xf32, #tpu.memory_space<vmem>>, vector<256x384xf32>,
    %c256_28 = arith.constant 256 : index
    %c0_29 = arith.constant 0 : index
    %30 = vector.load %arg8[%c256_28, %c0_29] : memref<1024x384xf32, #tpu.memory_space<vmem>>, vector<256x128xf32>
    %31 = math.tanh %30 : vector<256x128xf32>
    %c256_30 = arith.constant 256 : index
    %c0_31 = arith.constant 0 : index
    %32 = vector.load %arg8[%c256_30, %c0_31] : memref<1024x384xf32, #tpu.memory_space<vmem>>, vector<256x128xf32>
    tpu.vector_store %arg8[%c256_30, %c0_31], %31 {strides = array<i32>} : memref<1024x384xf32, #tpu.memory_space<vmem>>, vector<256x128xf32>,
    %c256_32 = arith.constant 256 : index
    %c128_33 = arith.constant 128 : index
    %33 = vector.load %arg8[%c256_32, %c128_33] : memref<1024x384xf32, #tpu.memory_space<vmem>>, vector<256x256xf32>
    %34 = arith.negf %33 : vector<256x256xf32>
    %35 = math.exp %34 : vector<256x256xf32>
    %cst_34 = arith.constant 1.000000e+00 : f32
    %36 = vector.broadcast %cst_34 : f32 to vector<256x256xf32>
    %37 = arith.addf %36, %35 : vector<256x256xf32>
    %38 = arith.divf %36, %37 : vector<256x256xf32>
    %c256_35 = arith.constant 256 : index
    %c128_36 = arith.constant 128 : index
    %39 = vector.load %arg8[%c256_35, %c128_36] : memref<1024x384xf32, #tpu.memory_space<vmem>>, vector<256x256xf32>
    tpu.vector_store %arg8[%c256_35, %c128_36], %38 {strides = array<i32>} : memref<1024x384xf32, #tpu.memory_space<vmem>>, vector<256x256xf32>,
    %c0_i32_37 = arith.constant 0 : i32
    %c32_i32 = arith.constant 32 : i32
    %40 = arith.muli %c0_i32_37, %c32_i32 : i32
    %c0_i32_38 = arith.constant 0 : i32
    %41 = arith.addi %c0_i32_38, %40 : i32
    %42 = tpu.assume_multiple %41, 32 : i32
    %43 = arith.index_cast %42 : i32 to index
    %c0_39 = arith.constant 0 : index
    %44 = vector.load %arg8[%43, %c0_39] : memref<1024x384xf32, #tpu.memory_space<vmem>>, vector<32x128xf32>
    %45 = arith.index_cast %42 : i32 to index
    %c128_40 = arith.constant 128 : index
    %46 = vector.load %arg8[%45, %c128_40] : memref<1024x384xf32, #tpu.memory_space<vmem>>, vector<32x128xf32>
    %47 = arith.index_cast %42 : i32 to index
    %c256_41 = arith.constant 256 : index
    %48 = vector.load %arg8[%47, %c256_41] : memref<1024x384xf32, #tpu.memory_space<vmem>>, vector<32x128xf32>
    %49 = arith.subf %44, %21 : vector<32x128xf32>
    %50 = arith.mulf %46, %49 : vector<32x128xf32>
    %51 = arith.addf %21, %50 : vector<32x128xf32>
    %52 = arith.mulf %48, %51 : vector<32x128xf32>
    %53 = arith.truncf %52 : vector<32x128xf32> to vector<32x128xbf16>
    %c0_42 = arith.constant 0 : index
    %54 = arith.index_cast %42 : i32 to index
    %c0_43 = arith.constant 0 : index
    %55 = vector.load %arg5[%c0_42, %54, %c0_43] : memref<1x1024x128xbf16, #tpu.memory_space<vmem>>, vector<1x32x128xbf16>
    %56 = vector.shape_cast %55 : vector<1x32x128xbf16> to vector<32x128xbf16>
    %57 = vector.shape_cast %53 : vector<32x128xbf16> to vector<1x32x128xbf16>
    tpu.vector_store %arg5[%c0_42, %54, %c0_43], %57 {strides = array<i32>} : memref<1x1024x128xbf16, #tpu.memory_space<vmem>>, vector<1x32x128xbf16>,
    %c1_i32 = arith.constant 1 : i32
    %c32_i32_44 = arith.constant 32 : i32
    %58 = arith.muli %c1_i32, %c32_i32_44 : i32
    %c0_i32_45 = arith.constant 0 : i32
    %59 = arith.addi %c0_i32_45, %58 : i32
    %60 = tpu.assume_multiple %59, 32 : i32
    %61 = arith.index_cast %60 : i32 to index
    %c0_46 = arith.constant 0 : index
    %62 = vector.load %arg8[%61, %c0_46] : memref<1024x384xf32, #tpu.memory_space<vmem>>, vector<32x128xf32>
    %63 = arith.index_cast %60 : i32 to index
    %c128_47 = arith.constant 128 : index
    %64 = vector.load %arg8[%63, %c128_47] : memref<1024x384xf32, #tpu.memory_space<vmem>>, vector<32x128xf32>
    %65 = arith.index_cast %60 : i32 to index
    %c256_48 = arith.constant 256 : index
    %66 = vector.load %arg8[%65, %c256_48] : memref<1024x384xf32, #tpu.memory_space<vmem>>, vector<32x128xf32>
    %67 = arith.subf %62, %51 : vector<32x128xf32>
    %68 = arith.mulf %64, %67 : vector<32x128xf32>
    %69 = arith.addf %51, %68 : vector<32x128xf32>
    %70 = arith.mulf %66, %69 : vector<32x128xf32>
    %71 = arith.truncf %70 : vector<32x128xf32> to vector<32x128xbf16>
    %c0_49 = arith.constant 0 : index
    %72 = arith.index_cast %60 : i32 to index
    %c0_50 = arith.constant 0 : index
    %73 = vector.load %arg5[%c0_49, %72, %c0_50] : memref<1x1024x128xbf16, #tpu.memory_space<vmem>>, vector<1x32x128xbf16>
    %74 = vector.shape_cast %73 : vector<1x32x128xbf16> to vector<32x128xbf16>
    %75 = vector.shape_cast %71 : vector<32x128xbf16> to vector<1x32x128xbf16>
    tpu.vector_store %arg5[%c0_49, %72, %c0_50], %75 {strides = array<i32>} : memref<1x1024x128xbf16, #tpu.memory_space<vmem>>, vector<1x32x128xbf16>,
    %c2_i32 = arith.constant 2 : i32
    %c32_i32_51 = arith.constant 32 : i32
    %76 = arith.muli %c2_i32, %c32_i32_51 : i32
    %c0_i32_52 = arith.constant 0 : i32
    %77 = arith.addi %c0_i32_52, %76 : i32
    %78 = tpu.assume_multiple %77, 32 : i32
    %79 = arith.index_cast %78 : i32 to index
    %c0_53 = arith.constant 0 : index
    %80 = vector.load %arg8[%79, %c0_53] : memref<1024x384xf32, #tpu.memory_space<vmem>>, vector<32x128xf32>
    %81 = arith.index_cast %78 : i32 to index
    %c128_54 = arith.constant 128 : index
    %82 = vector.load %arg8[%81, %c128_54] : memref<1024x384xf32, #tpu.memory_space<vmem>>, vector<32x128xf32>
    %83 = arith.index_cast %78 : i32 to index
    %c256_55 = arith.constant 256 : index
    %84 = vector.load %arg8[%83, %c256_55] : memref<1024x384xf32, #tpu.memory_space<vmem>>, vector<32x128xf32>
    %85 = arith.subf %80, %69 : vector<32x128xf32>
    %86 = arith.mulf %82, %85 : vector<32x128xf32>
    %87 = arith.addf %69, %86 : vector<32x128xf32>
    %88 = arith.mulf %84, %87 : vector<32x128xf32>
    %89 = arith.truncf %88 : vector<32x128xf32> to vector<32x128xbf16>
    %c0_56 = arith.constant 0 : index
    %90 = arith.index_cast %78 : i32 to index
    %c0_57 = arith.constant 0 : index
    %91 = vector.load %arg5[%c0_56, %90, %c0_57] : memref<1x1024x128xbf16, #tpu.memory_space<vmem>>, vector<1x32x128xbf16>
    %92 = vector.shape_cast %91 : vector<1x32x128xbf16> to vector<32x128xbf16>
    %93 = vector.shape_cast %89 : vector<32x128xbf16> to vector<1x32x128xbf16>
    tpu.vector_store %arg5[%c0_56, %90, %c0_57], %93 {strides = array<i32>} : memref<1x1024x128xbf16, #tpu.memory_space<vmem>>, vector<1x32x128xbf16>,
    %c3_i32 = arith.constant 3 : i32
    %c32_i32_58 = arith.constant 32 : i32
    %94 = arith.muli %c3_i32, %c32_i32_58 : i32
    %c0_i32_59 = arith.constant 0 : i32
    %95 = arith.addi %c0_i32_59, %94 : i32
    %96 = tpu.assume_multiple %95, 32 : i32
    %97 = arith.index_cast %96 : i32 to index
    %c0_60 = arith.constant 0 : index
    %98 = vector.load %arg8[%97, %c0_60] : memref<1024x384xf32, #tpu.memory_space<vmem>>, vector<32x128xf32>
    %99 = arith.index_cast %96 : i32 to index
    %c128_61 = arith.constant 128 : index
    %100 = vector.load %arg8[%99, %c128_61] : memref<1024x384xf32, #tpu.memory_space<vmem>>, vector<32x128xf32>
    %101 = arith.index_cast %96 : i32 to index
    %c256_62 = arith.constant 256 : index
    %102 = vector.load %arg8[%101, %c256_62] : memref<1024x384xf32, #tpu.memory_space<vmem>>, vector<32x128xf32>
    %103 = arith.subf %98, %87 : vector<32x128xf32>
    %104 = arith.mulf %100, %103 : vector<32x128xf32>
    %105 = arith.addf %87, %104 : vector<32x128xf32>
    %106 = arith.mulf %102, %105 : vector<32x128xf32>
    %107 = arith.truncf %106 : vector<32x128xf32> to vector<32x128xbf16>
    %c0_63 = arith.constant 0 : index
    %108 = arith.index_cast %96 : i32 to index
    %c0_64 = arith.constant 0 : index
    %109 = vector.load %arg5[%c0_63, %108, %c0_64] : memref<1x1024x128xbf16, #tpu.memory_space<vmem>>, vector<1x32x128xbf16>
    %110 = vector.shape_cast %109 : vector<1x32x128xbf16> to vector<32x128xbf16>
    %111 = vector.shape_cast %107 : vector<32x128xbf16> to vector<1x32x128xbf16>
    tpu.vector_store %arg5[%c0_63, %108, %c0_64], %111 {strides = array<i32>} : memref<1x1024x128xbf16, #tpu.memory_space<vmem>>, vector<1x32x128xbf16>,
    %c4_i32 = arith.constant 4 : i32
    %c32_i32_65 = arith.constant 32 : i32
    %112 = arith.muli %c4_i32, %c32_i32_65 : i32
    %c0_i32_66 = arith.constant 0 : i32
    %113 = arith.addi %c0_i32_66, %112 : i32
    %114 = tpu.assume_multiple %113, 32 : i32
    %115 = arith.index_cast %114 : i32 to index
    %c0_67 = arith.constant 0 : index
    %116 = vector.load %arg8[%115, %c0_67] : memref<1024x384xf32, #tpu.memory_space<vmem>>, vector<32x128xf32>
    %117 = arith.index_cast %114 : i32 to index
    %c128_68 = arith.constant 128 : index
    %118 = vector.load %arg8[%117, %c128_68] : memref<1024x384xf32, #tpu.memory_space<vmem>>, vector<32x128xf32>
    %119 = arith.index_cast %114 : i32 to index
    %c256_69 = arith.constant 256 : index
    %120 = vector.load %arg8[%119, %c256_69] : memref<1024x384xf32, #tpu.memory_space<vmem>>, vector<32x128xf32>
    %121 = arith.subf %116, %105 : vector<32x128xf32>
    %122 = arith.mulf %118, %121 : vector<32x128xf32>
    %123 = arith.addf %105, %122 : vector<32x128xf32>
    %124 = arith.mulf %120, %123 : vector<32x128xf32>
    %125 = arith.truncf %124 : vector<32x128xf32> to vector<32x128xbf16>
    %c0_70 = arith.constant 0 : index
    %126 = arith.index_cast %114 : i32 to index
    %c0_71 = arith.constant 0 : index
    %127 = vector.load %arg5[%c0_70, %126, %c0_71] : memref<1x1024x128xbf16, #tpu.memory_space<vmem>>, vector<1x32x128xbf16>
    %128 = vector.shape_cast %127 : vector<1x32x128xbf16> to vector<32x128xbf16>
    %129 = vector.shape_cast %125 : vector<32x128xbf16> to vector<1x32x128xbf16>
    tpu.vector_store %arg5[%c0_70, %126, %c0_71], %129 {strides = array<i32>} : memref<1x1024x128xbf16, #tpu.memory_space<vmem>>, vector<1x32x128xbf16>,
    %c5_i32 = arith.constant 5 : i32
    %c32_i32_72 = arith.constant 32 : i32
    %130 = arith.muli %c5_i32, %c32_i32_72 : i32
    %c0_i32_73 = arith.constant 0 : i32
    %131 = arith.addi %c0_i32_73, %130 : i32
    %132 = tpu.assume_multiple %131, 32 : i32
    %133 = arith.index_cast %132 : i32 to index
    %c0_74 = arith.constant 0 : index
    %134 = vector.load %arg8[%133, %c0_74] : memref<1024x384xf32, #tpu.memory_space<vmem>>, vector<32x128xf32>
    %135 = arith.index_cast %132 : i32 to index
    %c128_75 = arith.constant 128 : index
    %136 = vector.load %arg8[%135, %c128_75] : memref<1024x384xf32, #tpu.memory_space<vmem>>, vector<32x128xf32>
    %137 = arith.index_cast %132 : i32 to index
    %c256_76 = arith.constant 256 : index
    %138 = vector.load %arg8[%137, %c256_76] : memref<1024x384xf32, #tpu.memory_space<vmem>>, vector<32x128xf32>
    %139 = arith.subf %134, %123 : vector<32x128xf32>
    %140 = arith.mulf %136, %139 : vector<32x128xf32>
    %141 = arith.addf %123, %140 : vector<32x128xf32>
    %142 = arith.mulf %138, %141 : vector<32x128xf32>
    %143 = arith.truncf %142 : vector<32x128xf32> to vector<32x128xbf16>
    %c0_77 = arith.constant 0 : index
    %144 = arith.index_cast %132 : i32 to index
    %c0_78 = arith.constant 0 : index
    %145 = vector.load %arg5[%c0_77, %144, %c0_78] : memref<1x1024x128xbf16, #tpu.memory_space<vmem>>, vector<1x32x128xbf16>
    %146 = vector.shape_cast %145 : vector<1x32x128xbf16> to vector<32x128xbf16>
    %147 = vector.shape_cast %143 : vector<32x128xbf16> to vector<1x32x128xbf16>
    tpu.vector_store %arg5[%c0_77, %144, %c0_78], %147 {strides = array<i32>} : memref<1x1024x128xbf16, #tpu.memory_space<vmem>>, vector<1x32x128xbf16>,
    %c6_i32 = arith.constant 6 : i32
    %c32_i32_79 = arith.constant 32 : i32
    %148 = arith.muli %c6_i32, %c32_i32_79 : i32
    %c0_i32_80 = arith.constant 0 : i32
    %149 = arith.addi %c0_i32_80, %148 : i32
    %150 = tpu.assume_multiple %149, 32 : i32
    %151 = arith.index_cast %150 : i32 to index
    %c0_81 = arith.constant 0 : index
    %152 = vector.load %arg8[%151, %c0_81] : memref<1024x384xf32, #tpu.memory_space<vmem>>, vector<32x128xf32>
    %153 = arith.index_cast %150 : i32 to index
    %c128_82 = arith.constant 128 : index
    %154 = vector.load %arg8[%153, %c128_82] : memref<1024x384xf32, #tpu.memory_space<vmem>>, vector<32x128xf32>
    %155 = arith.index_cast %150 : i32 to index
    %c256_83 = arith.constant 256 : index
    %156 = vector.load %arg8[%155, %c256_83] : memref<1024x384xf32, #tpu.memory_space<vmem>>, vector<32x128xf32>
    %157 = arith.subf %152, %141 : vector<32x128xf32>
    %158 = arith.mulf %154, %157 : vector<32x128xf32>
    %159 = arith.addf %141, %158 : vector<32x128xf32>
    %160 = arith.mulf %156, %159 : vector<32x128xf32>
    %161 = arith.truncf %160 : vector<32x128xf32> to vector<32x128xbf16>
    %c0_84 = arith.constant 0 : index
    %162 = arith.index_cast %150 : i32 to index
    %c0_85 = arith.constant 0 : index
    %163 = vector.load %arg5[%c0_84, %162, %c0_85] : memref<1x1024x128xbf16, #tpu.memory_space<vmem>>, vector<1x32x128xbf16>
    %164 = vector.shape_cast %163 : vector<1x32x128xbf16> to vector<32x128xbf16>
    %165 = vector.shape_cast %161 : vector<32x128xbf16> to vector<1x32x128xbf16>
    tpu.vector_store %arg5[%c0_84, %162, %c0_85], %165 {strides = array<i32>} : memref<1x1024x128xbf16, #tpu.memory_space<vmem>>, vector<1x32x128xbf16>,
    %c7_i32 = arith.constant 7 : i32
    %c32_i32_86 = arith.constant 32 : i32
    %166 = arith.muli %c7_i32, %c32_i32_86 : i32
    %c0_i32_87 = arith.constant 0 : i32
    %167 = arith.addi %c0_i32_87, %166 : i32
    %168 = tpu.assume_multiple %167, 32 : i32
    %169 = arith.index_cast %168 : i32 to index
    %c0_88 = arith.constant 0 : index
    %170 = vector.load %arg8[%169, %c0_88] : memref<1024x384xf32, #tpu.memory_space<vmem>>, vector<32x128xf32>
    %171 = arith.index_cast %168 : i32 to index
    %c128_89 = arith.constant 128 : index
    %172 = vector.load %arg8[%171, %c128_89] : memref<1024x384xf32, #tpu.memory_space<vmem>>, vector<32x128xf32>
    %173 = arith.index_cast %168 : i32 to index
    %c256_90 = arith.constant 256 : index
    %174 = vector.load %arg8[%173, %c256_90] : memref<1024x384xf32, #tpu.memory_space<vmem>>, vector<32x128xf32>
    %175 = arith.subf %170, %159 : vector<32x128xf32>
    %176 = arith.mulf %172, %175 : vector<32x128xf32>
    %177 = arith.addf %159, %176 : vector<32x128xf32>
    %178 = arith.mulf %174, %177 : vector<32x128xf32>
    %179 = arith.truncf %178 : vector<32x128xf32> to vector<32x128xbf16>
    %c0_91 = arith.constant 0 : index
    %180 = arith.index_cast %168 : i32 to index
    %c0_92 = arith.constant 0 : index
    %181 = vector.load %arg5[%c0_91, %180, %c0_92] : memref<1x1024x128xbf16, #tpu.memory_space<vmem>>, vector<1x32x128xbf16>
    %182 = vector.shape_cast %181 : vector<1x32x128xbf16> to vector<32x128xbf16>
    %183 = vector.shape_cast %179 : vector<32x128xbf16> to vector<1x32x128xbf16>
    tpu.vector_store %arg5[%c0_91, %180, %c0_92], %183 {strides = array<i32>} : memref<1x1024x128xbf16, #tpu.memory_space<vmem>>, vector<1x32x128xbf16>,
    %c8_i32 = arith.constant 8 : i32
    %c0_93 = arith.constant 0 : index
    %c512 = arith.constant 512 : index
    %c0_94 = arith.constant 0 : index
    %184 = vector.load %arg2[%c0_93, %c512, %c0_94] : memref<1x1024x128xbf16, #tpu.memory_space<vmem>>, vector<1x256x128xbf16>
    %185 = vector.shape_cast %184 : vector<1x256x128xbf16> to vector<256x128xbf16>
    %c0_95 = arith.constant 0 : index
    %c0_96 = arith.constant 0 : index
    %186 = vector.load %arg3[%c0_95, %c0_96] : memref<128x384xbf16, #tpu.memory_space<vmem>>, vector<128x384xbf16>
    %cst_97 = arith.constant dense<0.000000e+00> : vector<256x384xf32>
    %187 = tpu.matmul %185, %186, %cst_97 {dimension_numbers = #tpu.dot_dimension_numbers<[1], [0], [0], [1], [0, 0, 1, 1], [], []>} : vector<256x128xbf16>, vector<128x384xbf16>, vector<256x384xf32> -> vector<256x384xf32>
    %c0_98 = arith.constant 0 : index
    %c0_99 = arith.constant 0 : index
    %188 = vector.load %arg4[%c0_98, %c0_99] : memref<1x384xf32, #tpu.memory_space<vmem>>, vector<1x384xf32>
    %189 = vector.broadcast %188 : vector<1x384xf32> to vector<256x384xf32>
    %190 = arith.addf %187, %189 : vector<256x384xf32>
    %c512_100 = arith.constant 512 : index
    %c0_101 = arith.constant 0 : index
    %191 = vector.load %arg8[%c512_100, %c0_101] : memref<1024x384xf32, #tpu.memory_space<vmem>>, vector<256x384xf32>
    tpu.vector_store %arg8[%c512_100, %c0_101], %190 {strides = array<i32>} : memref<1024x384xf32, #tpu.memory_space<vmem>>, vector<256x384xf32>,
    %c512_102 = arith.constant 512 : index
    %c0_103 = arith.constant 0 : index
    %192 = vector.load %arg8[%c512_102, %c0_103] : memref<1024x384xf32, #tpu.memory_space<vmem>>, vector<256x128xf32>
    %193 = math.tanh %192 : vector<256x128xf32>
    %c512_104 = arith.constant 512 : index
    %c0_105 = arith.constant 0 : index
    %194 = vector.load %arg8[%c512_104, %c0_105] : memref<1024x384xf32, #tpu.memory_space<vmem>>, vector<256x128xf32>
    tpu.vector_store %arg8[%c512_104, %c0_105], %193 {strides = array<i32>} : memref<1024x384xf32, #tpu.memory_space<vmem>>, vector<256x128xf32>,
    %c512_106 = arith.constant 512 : index
    %c128_107 = arith.constant 128 : index
    %195 = vector.load %arg8[%c512_106, %c128_107] : memref<1024x384xf32, #tpu.memory_space<vmem>>, vector<256x256xf32>
    %196 = arith.negf %195 : vector<256x256xf32>
    %197 = math.exp %196 : vector<256x256xf32>
    %cst_108 = arith.constant 1.000000e+00 : f32
    %198 = vector.broadcast %cst_108 : f32 to vector<256x256xf32>
    %199 = arith.addf %198, %197 : vector<256x256xf32>
    %200 = arith.divf %198, %199 : vector<256x256xf32>
    %c512_109 = arith.constant 512 : index
    %c128_110 = arith.constant 128 : index
    %201 = vector.load %arg8[%c512_109, %c128_110] : memref<1024x384xf32, #tpu.memory_space<vmem>>, vector<256x256xf32>
    tpu.vector_store %arg8[%c512_109, %c128_110], %200 {strides = array<i32>} : memref<1024x384xf32, #tpu.memory_space<vmem>>, vector<256x256xf32>,
    %c0_i32_111 = arith.constant 0 : i32
    %c32_i32_112 = arith.constant 32 : i32
    %202 = arith.muli %c0_i32_111, %c32_i32_112 : i32
    %c256_i32 = arith.constant 256 : i32
    %203 = arith.addi %c256_i32, %202 : i32
    %204 = tpu.assume_multiple %203, 32 : i32
    %205 = arith.index_cast %204 : i32 to index
    %c0_113 = arith.constant 0 : index
    %206 = vector.load %arg8[%205, %c0_113] : memref<1024x384xf32, #tpu.memory_space<vmem>>, vector<32x128xf32>
    %207 = arith.index_cast %204 : i32 to index
    %c128_114 = arith.constant 128 : index
    %208 = vector.load %arg8[%207, %c128_114] : memref<1024x384xf32, #tpu.memory_space<vmem>>, vector<32x128xf32>
    %209 = arith.index_cast %204 : i32 to index
    %c256_115 = arith.constant 256 : index
    %210 = vector.load %arg8[%209, %c256_115] : memref<1024x384xf32, #tpu.memory_space<vmem>>, vector<32x128xf32>
    %211 = arith.subf %206, %177 : vector<32x128xf32>
    %212 = arith.mulf %208, %211 : vector<32x128xf32>
    %213 = arith.addf %177, %212 : vector<32x128xf32>
    %214 = arith.mulf %210, %213 : vector<32x128xf32>
    %215 = arith.truncf %214 : vector<32x128xf32> to vector<32x128xbf16>
    %c0_116 = arith.constant 0 : index
    %216 = arith.index_cast %204 : i32 to index
    %c0_117 = arith.constant 0 : index
    %217 = vector.load %arg5[%c0_116, %216, %c0_117] : memref<1x1024x128xbf16, #tpu.memory_space<vmem>>, vector<1x32x128xbf16>
    %218 = vector.shape_cast %217 : vector<1x32x128xbf16> to vector<32x128xbf16>
    %219 = vector.shape_cast %215 : vector<32x128xbf16> to vector<1x32x128xbf16>
    tpu.vector_store %arg5[%c0_116, %216, %c0_117], %219 {strides = array<i32>} : memref<1x1024x128xbf16, #tpu.memory_space<vmem>>, vector<1x32x128xbf16>,
    %c1_i32_118 = arith.constant 1 : i32
    %c32_i32_119 = arith.constant 32 : i32
    %220 = arith.muli %c1_i32_118, %c32_i32_119 : i32
    %c256_i32_120 = arith.constant 256 : i32
    %221 = arith.addi %c256_i32_120, %220 : i32
    %222 = tpu.assume_multiple %221, 32 : i32
    %223 = arith.index_cast %222 : i32 to index
    %c0_121 = arith.constant 0 : index
    %224 = vector.load %arg8[%223, %c0_121] : memref<1024x384xf32, #tpu.memory_space<vmem>>, vector<32x128xf32>
    %225 = arith.index_cast %222 : i32 to index
    %c128_122 = arith.constant 128 : index
    %226 = vector.load %arg8[%225, %c128_122] : memref<1024x384xf32, #tpu.memory_space<vmem>>, vector<32x128xf32>
    %227 = arith.index_cast %222 : i32 to index
    %c256_123 = arith.constant 256 : index
    %228 = vector.load %arg8[%227, %c256_123] : memref<1024x384xf32, #tpu.memory_space<vmem>>, vector<32x128xf32>
    %229 = arith.subf %224, %213 : vector<32x128xf32>
    %230 = arith.mulf %226, %229 : vector<32x128xf32>
    %231 = arith.addf %213, %230 : vector<32x128xf32>
    %232 = arith.mulf %228, %231 : vector<32x128xf32>
    %233 = arith.truncf %232 : vector<32x128xf32> to vector<32x128xbf16>
    %c0_124 = arith.constant 0 : index
    %234 = arith.index_cast %222 : i32 to index
    %c0_125 = arith.constant 0 : index
    %235 = vector.load %arg5[%c0_124, %234, %c0_125] : memref<1x1024x128xbf16, #tpu.memory_space<vmem>>, vector<1x32x128xbf16>
    %236 = vector.shape_cast %235 : vector<1x32x128xbf16> to vector<32x128xbf16>
    %237 = vector.shape_cast %233 : vector<32x128xbf16> to vector<1x32x128xbf16>
    tpu.vector_store %arg5[%c0_124, %234, %c0_125], %237 {strides = array<i32>} : memref<1x1024x128xbf16, #tpu.memory_space<vmem>>, vector<1x32x128xbf16>,
    %c2_i32_126 = arith.constant 2 : i32
    %c32_i32_127 = arith.constant 32 : i32
    %238 = arith.muli %c2_i32_126, %c32_i32_127 : i32
    %c256_i32_128 = arith.constant 256 : i32
    %239 = arith.addi %c256_i32_128, %238 : i32
    %240 = tpu.assume_multiple %239, 32 : i32
    %241 = arith.index_cast %240 : i32 to index
    %c0_129 = arith.constant 0 : index
    %242 = vector.load %arg8[%241, %c0_129] : memref<1024x384xf32, #tpu.memory_space<vmem>>, vector<32x128xf32>
    %243 = arith.index_cast %240 : i32 to index
    %c128_130 = arith.constant 128 : index
    %244 = vector.load %arg8[%243, %c128_130] : memref<1024x384xf32, #tpu.memory_space<vmem>>, vector<32x128xf32>
    %245 = arith.index_cast %240 : i32 to index
    %c256_131 = arith.constant 256 : index
    %246 = vector.load %arg8[%245, %c256_131] : memref<1024x384xf32, #tpu.memory_space<vmem>>, vector<32x128xf32>
    %247 = arith.subf %242, %231 : vector<32x128xf32>
    %248 = arith.mulf %244, %247 : vector<32x128xf32>
    %249 = arith.addf %231, %248 : vector<32x128xf32>
    %250 = arith.mulf %246, %249 : vector<32x128xf32>
    %251 = arith.truncf %250 : vector<32x128xf32> to vector<32x128xbf16>
    %c0_132 = arith.constant 0 : index
    %252 = arith.index_cast %240 : i32 to index
    %c0_133 = arith.constant 0 : index
    %253 = vector.load %arg5[%c0_132, %252, %c0_133] : memref<1x1024x128xbf16, #tpu.memory_space<vmem>>, vector<1x32x128xbf16>
    %254 = vector.shape_cast %253 : vector<1x32x128xbf16> to vector<32x128xbf16>
    %255 = vector.shape_cast %251 : vector<32x128xbf16> to vector<1x32x128xbf16>
    tpu.vector_store %arg5[%c0_132, %252, %c0_133], %255 {strides = array<i32>} : memref<1x1024x128xbf16, #tpu.memory_space<vmem>>, vector<1x32x128xbf16>,
    %c3_i32_134 = arith.constant 3 : i32
    %c32_i32_135 = arith.constant 32 : i32
    %256 = arith.muli %c3_i32_134, %c32_i32_135 : i32
    %c256_i32_136 = arith.constant 256 : i32
    %257 = arith.addi %c256_i32_136, %256 : i32
    %258 = tpu.assume_multiple %257, 32 : i32
    %259 = arith.index_cast %258 : i32 to index
    %c0_137 = arith.constant 0 : index
    %260 = vector.load %arg8[%259, %c0_137] : memref<1024x384xf32, #tpu.memory_space<vmem>>, vector<32x128xf32>
    %261 = arith.index_cast %258 : i32 to index
    %c128_138 = arith.constant 128 : index
    %262 = vector.load %arg8[%261, %c128_138] : memref<1024x384xf32, #tpu.memory_space<vmem>>, vector<32x128xf32>
    %263 = arith.index_cast %258 : i32 to index
    %c256_139 = arith.constant 256 : index
    %264 = vector.load %arg8[%263, %c256_139] : memref<1024x384xf32, #tpu.memory_space<vmem>>, vector<32x128xf32>
    %265 = arith.subf %260, %249 : vector<32x128xf32>
    %266 = arith.mulf %262, %265 : vector<32x128xf32>
    %267 = arith.addf %249, %266 : vector<32x128xf32>
    %268 = arith.mulf %264, %267 : vector<32x128xf32>
    %269 = arith.truncf %268 : vector<32x128xf32> to vector<32x128xbf16>
    %c0_140 = arith.constant 0 : index
    %270 = arith.index_cast %258 : i32 to index
    %c0_141 = arith.constant 0 : index
    %271 = vector.load %arg5[%c0_140, %270, %c0_141] : memref<1x1024x128xbf16, #tpu.memory_space<vmem>>, vector<1x32x128xbf16>
    %272 = vector.shape_cast %271 : vector<1x32x128xbf16> to vector<32x128xbf16>
    %273 = vector.shape_cast %269 : vector<32x128xbf16> to vector<1x32x128xbf16>
    tpu.vector_store %arg5[%c0_140, %270, %c0_141], %273 {strides = array<i32>} : memref<1x1024x128xbf16, #tpu.memory_space<vmem>>, vector<1x32x128xbf16>,
    %c4_i32_142 = arith.constant 4 : i32
    %c32_i32_143 = arith.constant 32 : i32
    %274 = arith.muli %c4_i32_142, %c32_i32_143 : i32
    %c256_i32_144 = arith.constant 256 : i32
    %275 = arith.addi %c256_i32_144, %274 : i32
    %276 = tpu.assume_multiple %275, 32 : i32
    %277 = arith.index_cast %276 : i32 to index
    %c0_145 = arith.constant 0 : index
    %278 = vector.load %arg8[%277, %c0_145] : memref<1024x384xf32, #tpu.memory_space<vmem>>, vector<32x128xf32>
    %279 = arith.index_cast %276 : i32 to index
    %c128_146 = arith.constant 128 : index
    %280 = vector.load %arg8[%279, %c128_146] : memref<1024x384xf32, #tpu.memory_space<vmem>>, vector<32x128xf32>
    %281 = arith.index_cast %276 : i32 to index
    %c256_147 = arith.constant 256 : index
    %282 = vector.load %arg8[%281, %c256_147] : memref<1024x384xf32, #tpu.memory_space<vmem>>, vector<32x128xf32>
    %283 = arith.subf %278, %267 : vector<32x128xf32>
    %284 = arith.mulf %280, %283 : vector<32x128xf32>
    %285 = arith.addf %267, %284 : vector<32x128xf32>
    %286 = arith.mulf %282, %285 : vector<32x128xf32>
    %287 = arith.truncf %286 : vector<32x128xf32> to vector<32x128xbf16>
    %c0_148 = arith.constant 0 : index
    %288 = arith.index_cast %276 : i32 to index
    %c0_149 = arith.constant 0 : index
    %289 = vector.load %arg5[%c0_148, %288, %c0_149] : memref<1x1024x128xbf16, #tpu.memory_space<vmem>>, vector<1x32x128xbf16>
    %290 = vector.shape_cast %289 : vector<1x32x128xbf16> to vector<32x128xbf16>
    %291 = vector.shape_cast %287 : vector<32x128xbf16> to vector<1x32x128xbf16>
    tpu.vector_store %arg5[%c0_148, %288, %c0_149], %291 {strides = array<i32>} : memref<1x1024x128xbf16, #tpu.memory_space<vmem>>, vector<1x32x128xbf16>,
    %c5_i32_150 = arith.constant 5 : i32
    %c32_i32_151 = arith.constant 32 : i32
    %292 = arith.muli %c5_i32_150, %c32_i32_151 : i32
    %c256_i32_152 = arith.constant 256 : i32
    %293 = arith.addi %c256_i32_152, %292 : i32
    %294 = tpu.assume_multiple %293, 32 : i32
    %295 = arith.index_cast %294 : i32 to index
    %c0_153 = arith.constant 0 : index
    %296 = vector.load %arg8[%295, %c0_153] : memref<1024x384xf32, #tpu.memory_space<vmem>>, vector<32x128xf32>
    %297 = arith.index_cast %294 : i32 to index
    %c128_154 = arith.constant 128 : index
    %298 = vector.load %arg8[%297, %c128_154] : memref<1024x384xf32, #tpu.memory_space<vmem>>, vector<32x128xf32>
    %299 = arith.index_cast %294 : i32 to index
    %c256_155 = arith.constant 256 : index
    %300 = vector.load %arg8[%299, %c256_155] : memref<1024x384xf32, #tpu.memory_space<vmem>>, vector<32x128xf32>
    %301 = arith.subf %296, %285 : vector<32x128xf32>
    %302 = arith.mulf %298, %301 : vector<32x128xf32>
    %303 = arith.addf %285, %302 : vector<32x128xf32>
    %304 = arith.mulf %300, %303 : vector<32x128xf32>
    %305 = arith.truncf %304 : vector<32x128xf32> to vector<32x128xbf16>
    %c0_156 = arith.constant 0 : index
    %306 = arith.index_cast %294 : i32 to index
    %c0_157 = arith.constant 0 : index
    %307 = vector.load %arg5[%c0_156, %306, %c0_157] : memref<1x1024x128xbf16, #tpu.memory_space<vmem>>, vector<1x32x128xbf16>
    %308 = vector.shape_cast %307 : vector<1x32x128xbf16> to vector<32x128xbf16>
    %309 = vector.shape_cast %305 : vector<32x128xbf16> to vector<1x32x128xbf16>
    tpu.vector_store %arg5[%c0_156, %306, %c0_157], %309 {strides = array<i32>} : memref<1x1024x128xbf16, #tpu.memory_space<vmem>>, vector<1x32x128xbf16>,
    %c6_i32_158 = arith.constant 6 : i32
    %c32_i32_159 = arith.constant 32 : i32
    %310 = arith.muli %c6_i32_158, %c32_i32_159 : i32
    %c256_i32_160 = arith.constant 256 : i32
    %311 = arith.addi %c256_i32_160, %310 : i32
    %312 = tpu.assume_multiple %311, 32 : i32
    %313 = arith.index_cast %312 : i32 to index
    %c0_161 = arith.constant 0 : index
    %314 = vector.load %arg8[%313, %c0_161] : memref<1024x384xf32, #tpu.memory_space<vmem>>, vector<32x128xf32>
    %315 = arith.index_cast %312 : i32 to index
    %c128_162 = arith.constant 128 : index
    %316 = vector.load %arg8[%315, %c128_162] : memref<1024x384xf32, #tpu.memory_space<vmem>>, vector<32x128xf32>
    %317 = arith.index_cast %312 : i32 to index
    %c256_163 = arith.constant 256 : index
    %318 = vector.load %arg8[%317, %c256_163] : memref<1024x384xf32, #tpu.memory_space<vmem>>, vector<32x128xf32>
    %319 = arith.subf %314, %303 : vector<32x128xf32>
    %320 = arith.mulf %316, %319 : vector<32x128xf32>
    %321 = arith.addf %303, %320 : vector<32x128xf32>
    %322 = arith.mulf %318, %321 : vector<32x128xf32>
    %323 = arith.truncf %322 : vector<32x128xf32> to vector<32x128xbf16>
    %c0_164 = arith.constant 0 : index
    %324 = arith.index_cast %312 : i32 to index
    %c0_165 = arith.constant 0 : index
    %325 = vector.load %arg5[%c0_164, %324, %c0_165] : memref<1x1024x128xbf16, #tpu.memory_space<vmem>>, vector<1x32x128xbf16>
    %326 = vector.shape_cast %325 : vector<1x32x128xbf16> to vector<32x128xbf16>
    %327 = vector.shape_cast %323 : vector<32x128xbf16> to vector<1x32x128xbf16>
    tpu.vector_store %arg5[%c0_164, %324, %c0_165], %327 {strides = array<i32>} : memref<1x1024x128xbf16, #tpu.memory_space<vmem>>, vector<1x32x128xbf16>,
    %c7_i32_166 = arith.constant 7 : i32
    %c32_i32_167 = arith.constant 32 : i32
    %328 = arith.muli %c7_i32_166, %c32_i32_167 : i32
    %c256_i32_168 = arith.constant 256 : i32
    %329 = arith.addi %c256_i32_168, %328 : i32
    %330 = tpu.assume_multiple %329, 32 : i32
    %331 = arith.index_cast %330 : i32 to index
    %c0_169 = arith.constant 0 : index
    %332 = vector.load %arg8[%331, %c0_169] : memref<1024x384xf32, #tpu.memory_space<vmem>>, vector<32x128xf32>
    %333 = arith.index_cast %330 : i32 to index
    %c128_170 = arith.constant 128 : index
    %334 = vector.load %arg8[%333, %c128_170] : memref<1024x384xf32, #tpu.memory_space<vmem>>, vector<32x128xf32>
    %335 = arith.index_cast %330 : i32 to index
    %c256_171 = arith.constant 256 : index
    %336 = vector.load %arg8[%335, %c256_171] : memref<1024x384xf32, #tpu.memory_space<vmem>>, vector<32x128xf32>
    %337 = arith.subf %332, %321 : vector<32x128xf32>
    %338 = arith.mulf %334, %337 : vector<32x128xf32>
    %339 = arith.addf %321, %338 : vector<32x128xf32>
    %340 = arith.mulf %336, %339 : vector<32x128xf32>
    %341 = arith.truncf %340 : vector<32x128xf32> to vector<32x128xbf16>
    %c0_172 = arith.constant 0 : index
    %342 = arith.index_cast %330 : i32 to index
    %c0_173 = arith.constant 0 : index
    %343 = vector.load %arg5[%c0_172, %342, %c0_173] : memref<1x1024x128xbf16, #tpu.memory_space<vmem>>, vector<1x32x128xbf16>
    %344 = vector.shape_cast %343 : vector<1x32x128xbf16> to vector<32x128xbf16>
    %345 = vector.shape_cast %341 : vector<32x128xbf16> to vector<1x32x128xbf16>
    tpu.vector_store %arg5[%c0_172, %342, %c0_173], %345 {strides = array<i32>} : memref<1x1024x128xbf16, #tpu.memory_space<vmem>>, vector<1x32x128xbf16>,
    %c8_i32_174 = arith.constant 8 : i32
    %c0_175 = arith.constant 0 : index
    %c768 = arith.constant 768 : index
    %c0_176 = arith.constant 0 : index
    %346 = vector.load %arg2[%c0_175, %c768, %c0_176] : memref<1x1024x128xbf16, #tpu.memory_space<vmem>>, vector<1x256x128xbf16>
    %347 = vector.shape_cast %346 : vector<1x256x128xbf16> to vector<256x128xbf16>
    %c0_177 = arith.constant 0 : index
    %c0_178 = arith.constant 0 : index
    %348 = vector.load %arg3[%c0_177, %c0_178] : memref<128x384xbf16, #tpu.memory_space<vmem>>, vector<128x384xbf16>
    %cst_179 = arith.constant dense<0.000000e+00> : vector<256x384xf32>
    %349 = tpu.matmul %347, %348, %cst_179 {dimension_numbers = #tpu.dot_dimension_numbers<[1], [0], [0], [1], [0, 0, 1, 1], [], []>} : vector<256x128xbf16>, vector<128x384xbf16>, vector<256x384xf32> -> vector<256x384xf32>
    %c0_180 = arith.constant 0 : index
    %c0_181 = arith.constant 0 : index
    %350 = vector.load %arg4[%c0_180, %c0_181] : memref<1x384xf32, #tpu.memory_space<vmem>>, vector<1x384xf32>
    %351 = vector.broadcast %350 : vector<1x384xf32> to vector<256x384xf32>
    %352 = arith.addf %349, %351 : vector<256x384xf32>
    %c768_182 = arith.constant 768 : index
    %c0_183 = arith.constant 0 : index
    %353 = vector.load %arg8[%c768_182, %c0_183] : memref<1024x384xf32, #tpu.memory_space<vmem>>, vector<256x384xf32>
    tpu.vector_store %arg8[%c768_182, %c0_183], %352 {strides = array<i32>} : memref<1024x384xf32, #tpu.memory_space<vmem>>, vector<256x384xf32>,
    %c768_184 = arith.constant 768 : index
    %c0_185 = arith.constant 0 : index
    %354 = vector.load %arg8[%c768_184, %c0_185] : memref<1024x384xf32, #tpu.memory_space<vmem>>, vector<256x128xf32>
    %355 = math.tanh %354 : vector<256x128xf32>
    %c768_186 = arith.constant 768 : index
    %c0_187 = arith.constant 0 : index
    %356 = vector.load %arg8[%c768_186, %c0_187] : memref<1024x384xf32, #tpu.memory_space<vmem>>, vector<256x128xf32>
    tpu.vector_store %arg8[%c768_186, %c0_187], %355 {strides = array<i32>} : memref<1024x384xf32, #tpu.memory_space<vmem>>, vector<256x128xf32>,
    %c768_188 = arith.constant 768 : index
    %c128_189 = arith.constant 128 : index
    %357 = vector.load %arg8[%c768_188, %c128_189] : memref<1024x384xf32, #tpu.memory_space<vmem>>, vector<256x256xf32>
    %358 = arith.negf %357 : vector<256x256xf32>
    %359 = math.exp %358 : vector<256x256xf32>
    %cst_190 = arith.constant 1.000000e+00 : f32
    %360 = vector.broadcast %cst_190 : f32 to vector<256x256xf32>
    %361 = arith.addf %360, %359 : vector<256x256xf32>
    %362 = arith.divf %360, %361 : vector<256x256xf32>
    %c768_191 = arith.constant 768 : index
    %c128_192 = arith.constant 128 : index
    %363 = vector.load %arg8[%c768_191, %c128_192] : memref<1024x384xf32, #tpu.memory_space<vmem>>, vector<256x256xf32>
    tpu.vector_store %arg8[%c768_191, %c128_192], %362 {strides = array<i32>} : memref<1024x384xf32, #tpu.memory_space<vmem>>, vector<256x256xf32>,
    %c0_i32_193 = arith.constant 0 : i32
    %c32_i32_194 = arith.constant 32 : i32
    %364 = arith.muli %c0_i32_193, %c32_i32_194 : i32
    %c512_i32 = arith.constant 512 : i32
    %365 = arith.addi %c512_i32, %364 : i32
    %366 = tpu.assume_multiple %365, 32 : i32
    %367 = arith.index_cast %366 : i32 to index
    %c0_195 = arith.constant 0 : index
    %368 = vector.load %arg8[%367, %c0_195] : memref<1024x384xf32, #tpu.memory_space<vmem>>, vector<32x128xf32>
    %369 = arith.index_cast %366 : i32 to index
    %c128_196 = arith.constant 128 : index
    %370 = vector.load %arg8[%369, %c128_196] : memref<1024x384xf32, #tpu.memory_space<vmem>>, vector<32x128xf32>
    %371 = arith.index_cast %366 : i32 to index
    %c256_197 = arith.constant 256 : index
    %372 = vector.load %arg8[%371, %c256_197] : memref<1024x384xf32, #tpu.memory_space<vmem>>, vector<32x128xf32>
    %373 = arith.subf %368, %339 : vector<32x128xf32>
    %374 = arith.mulf %370, %373 : vector<32x128xf32>
    %375 = arith.addf %339, %374 : vector<32x128xf32>
    %376 = arith.mulf %372, %375 : vector<32x128xf32>
    %377 = arith.truncf %376 : vector<32x128xf32> to vector<32x128xbf16>
    %c0_198 = arith.constant 0 : index
    %378 = arith.index_cast %366 : i32 to index
    %c0_199 = arith.constant 0 : index
    %379 = vector.load %arg5[%c0_198, %378, %c0_199] : memref<1x1024x128xbf16, #tpu.memory_space<vmem>>, vector<1x32x128xbf16>
    %380 = vector.shape_cast %379 : vector<1x32x128xbf16> to vector<32x128xbf16>
    %381 = vector.shape_cast %377 : vector<32x128xbf16> to vector<1x32x128xbf16>
    tpu.vector_store %arg5[%c0_198, %378, %c0_199], %381 {strides = array<i32>} : memref<1x1024x128xbf16, #tpu.memory_space<vmem>>, vector<1x32x128xbf16>,
    %c1_i32_200 = arith.constant 1 : i32
    %c32_i32_201 = arith.constant 32 : i32
    %382 = arith.muli %c1_i32_200, %c32_i32_201 : i32
    %c512_i32_202 = arith.constant 512 : i32
    %383 = arith.addi %c512_i32_202, %382 : i32
    %384 = tpu.assume_multiple %383, 32 : i32
    %385 = arith.index_cast %384 : i32 to index
    %c0_203 = arith.constant 0 : index
    %386 = vector.load %arg8[%385, %c0_203] : memref<1024x384xf32, #tpu.memory_space<vmem>>, vector<32x128xf32>
    %387 = arith.index_cast %384 : i32 to index
    %c128_204 = arith.constant 128 : index
    %388 = vector.load %arg8[%387, %c128_204] : memref<1024x384xf32, #tpu.memory_space<vmem>>, vector<32x128xf32>
    %389 = arith.index_cast %384 : i32 to index
    %c256_205 = arith.constant 256 : index
    %390 = vector.load %arg8[%389, %c256_205] : memref<1024x384xf32, #tpu.memory_space<vmem>>, vector<32x128xf32>
    %391 = arith.subf %386, %375 : vector<32x128xf32>
    %392 = arith.mulf %388, %391 : vector<32x128xf32>
    %393 = arith.addf %375, %392 : vector<32x128xf32>
    %394 = arith.mulf %390, %393 : vector<32x128xf32>
    %395 = arith.truncf %394 : vector<32x128xf32> to vector<32x128xbf16>
    %c0_206 = arith.constant 0 : index
    %396 = arith.index_cast %384 : i32 to index
    %c0_207 = arith.constant 0 : index
    %397 = vector.load %arg5[%c0_206, %396, %c0_207] : memref<1x1024x128xbf16, #tpu.memory_space<vmem>>, vector<1x32x128xbf16>
    %398 = vector.shape_cast %397 : vector<1x32x128xbf16> to vector<32x128xbf16>
    %399 = vector.shape_cast %395 : vector<32x128xbf16> to vector<1x32x128xbf16>
    tpu.vector_store %arg5[%c0_206, %396, %c0_207], %399 {strides = array<i32>} : memref<1x1024x128xbf16, #tpu.memory_space<vmem>>, vector<1x32x128xbf16>,
    %c2_i32_208 = arith.constant 2 : i32
    %c32_i32_209 = arith.constant 32 : i32
    %400 = arith.muli %c2_i32_208, %c32_i32_209 : i32
    %c512_i32_210 = arith.constant 512 : i32
    %401 = arith.addi %c512_i32_210, %400 : i32
    %402 = tpu.assume_multiple %401, 32 : i32
    %403 = arith.index_cast %402 : i32 to index
    %c0_211 = arith.constant 0 : index
    %404 = vector.load %arg8[%403, %c0_211] : memref<1024x384xf32, #tpu.memory_space<vmem>>, vector<32x128xf32>
    %405 = arith.index_cast %402 : i32 to index
    %c128_212 = arith.constant 128 : index
    %406 = vector.load %arg8[%405, %c128_212] : memref<1024x384xf32, #tpu.memory_space<vmem>>, vector<32x128xf32>
    %407 = arith.index_cast %402 : i32 to index
    %c256_213 = arith.constant 256 : index
    %408 = vector.load %arg8[%407, %c256_213] : memref<1024x384xf32, #tpu.memory_space<vmem>>, vector<32x128xf32>
    %409 = arith.subf %404, %393 : vector<32x128xf32>
    %410 = arith.mulf %406, %409 : vector<32x128xf32>
    %411 = arith.addf %393, %410 : vector<32x128xf32>
    %412 = arith.mulf %408, %411 : vector<32x128xf32>
    %413 = arith.truncf %412 : vector<32x128xf32> to vector<32x128xbf16>
    %c0_214 = arith.constant 0 : index
    %414 = arith.index_cast %402 : i32 to index
    %c0_215 = arith.constant 0 : index
    %415 = vector.load %arg5[%c0_214, %414, %c0_215] : memref<1x1024x128xbf16, #tpu.memory_space<vmem>>, vector<1x32x128xbf16>
    %416 = vector.shape_cast %415 : vector<1x32x128xbf16> to vector<32x128xbf16>
    %417 = vector.shape_cast %413 : vector<32x128xbf16> to vector<1x32x128xbf16>
    tpu.vector_store %arg5[%c0_214, %414, %c0_215], %417 {strides = array<i32>} : memref<1x1024x128xbf16, #tpu.memory_space<vmem>>, vector<1x32x128xbf16>,
    %c3_i32_216 = arith.constant 3 : i32
    %c32_i32_217 = arith.constant 32 : i32
    %418 = arith.muli %c3_i32_216, %c32_i32_217 : i32
    %c512_i32_218 = arith.constant 512 : i32
    %419 = arith.addi %c512_i32_218, %418 : i32
    %420 = tpu.assume_multiple %419, 32 : i32
    %421 = arith.index_cast %420 : i32 to index
    %c0_219 = arith.constant 0 : index
    %422 = vector.load %arg8[%421, %c0_219] : memref<1024x384xf32, #tpu.memory_space<vmem>>, vector<32x128xf32>
    %423 = arith.index_cast %420 : i32 to index
    %c128_220 = arith.constant 128 : index
    %424 = vector.load %arg8[%423, %c128_220] : memref<1024x384xf32, #tpu.memory_space<vmem>>, vector<32x128xf32>
    %425 = arith.index_cast %420 : i32 to index
    %c256_221 = arith.constant 256 : index
    %426 = vector.load %arg8[%425, %c256_221] : memref<1024x384xf32, #tpu.memory_space<vmem>>, vector<32x128xf32>
    %427 = arith.subf %422, %411 : vector<32x128xf32>
    %428 = arith.mulf %424, %427 : vector<32x128xf32>
    %429 = arith.addf %411, %428 : vector<32x128xf32>
    %430 = arith.mulf %426, %429 : vector<32x128xf32>
    %431 = arith.truncf %430 : vector<32x128xf32> to vector<32x128xbf16>
    %c0_222 = arith.constant 0 : index
    %432 = arith.index_cast %420 : i32 to index
    %c0_223 = arith.constant 0 : index
    %433 = vector.load %arg5[%c0_222, %432, %c0_223] : memref<1x1024x128xbf16, #tpu.memory_space<vmem>>, vector<1x32x128xbf16>
    %434 = vector.shape_cast %433 : vector<1x32x128xbf16> to vector<32x128xbf16>
    %435 = vector.shape_cast %431 : vector<32x128xbf16> to vector<1x32x128xbf16>
    tpu.vector_store %arg5[%c0_222, %432, %c0_223], %435 {strides = array<i32>} : memref<1x1024x128xbf16, #tpu.memory_space<vmem>>, vector<1x32x128xbf16>,
    %c4_i32_224 = arith.constant 4 : i32
    %c32_i32_225 = arith.constant 32 : i32
    %436 = arith.muli %c4_i32_224, %c32_i32_225 : i32
    %c512_i32_226 = arith.constant 512 : i32
    %437 = arith.addi %c512_i32_226, %436 : i32
    %438 = tpu.assume_multiple %437, 32 : i32
    %439 = arith.index_cast %438 : i32 to index
    %c0_227 = arith.constant 0 : index
    %440 = vector.load %arg8[%439, %c0_227] : memref<1024x384xf32, #tpu.memory_space<vmem>>, vector<32x128xf32>
    %441 = arith.index_cast %438 : i32 to index
    %c128_228 = arith.constant 128 : index
    %442 = vector.load %arg8[%441, %c128_228] : memref<1024x384xf32, #tpu.memory_space<vmem>>, vector<32x128xf32>
    %443 = arith.index_cast %438 : i32 to index
    %c256_229 = arith.constant 256 : index
    %444 = vector.load %arg8[%443, %c256_229] : memref<1024x384xf32, #tpu.memory_space<vmem>>, vector<32x128xf32>
    %445 = arith.subf %440, %429 : vector<32x128xf32>
    %446 = arith.mulf %442, %445 : vector<32x128xf32>
    %447 = arith.addf %429, %446 : vector<32x128xf32>
    %448 = arith.mulf %444, %447 : vector<32x128xf32>
    %449 = arith.truncf %448 : vector<32x128xf32> to vector<32x128xbf16>
    %c0_230 = arith.constant 0 : index
    %450 = arith.index_cast %438 : i32 to index
    %c0_231 = arith.constant 0 : index
    %451 = vector.load %arg5[%c0_230, %450, %c0_231] : memref<1x1024x128xbf16, #tpu.memory_space<vmem>>, vector<1x32x128xbf16>
    %452 = vector.shape_cast %451 : vector<1x32x128xbf16> to vector<32x128xbf16>
    %453 = vector.shape_cast %449 : vector<32x128xbf16> to vector<1x32x128xbf16>
    tpu.vector_store %arg5[%c0_230, %450, %c0_231], %453 {strides = array<i32>} : memref<1x1024x128xbf16, #tpu.memory_space<vmem>>, vector<1x32x128xbf16>,
    %c5_i32_232 = arith.constant 5 : i32
    %c32_i32_233 = arith.constant 32 : i32
    %454 = arith.muli %c5_i32_232, %c32_i32_233 : i32
    %c512_i32_234 = arith.constant 512 : i32
    %455 = arith.addi %c512_i32_234, %454 : i32
    %456 = tpu.assume_multiple %455, 32 : i32
    %457 = arith.index_cast %456 : i32 to index
    %c0_235 = arith.constant 0 : index
    %458 = vector.load %arg8[%457, %c0_235] : memref<1024x384xf32, #tpu.memory_space<vmem>>, vector<32x128xf32>
    %459 = arith.index_cast %456 : i32 to index
    %c128_236 = arith.constant 128 : index
    %460 = vector.load %arg8[%459, %c128_236] : memref<1024x384xf32, #tpu.memory_space<vmem>>, vector<32x128xf32>
    %461 = arith.index_cast %456 : i32 to index
    %c256_237 = arith.constant 256 : index
    %462 = vector.load %arg8[%461, %c256_237] : memref<1024x384xf32, #tpu.memory_space<vmem>>, vector<32x128xf32>
    %463 = arith.subf %458, %447 : vector<32x128xf32>
    %464 = arith.mulf %460, %463 : vector<32x128xf32>
    %465 = arith.addf %447, %464 : vector<32x128xf32>
    %466 = arith.mulf %462, %465 : vector<32x128xf32>
    %467 = arith.truncf %466 : vector<32x128xf32> to vector<32x128xbf16>
    %c0_238 = arith.constant 0 : index
    %468 = arith.index_cast %456 : i32 to index
    %c0_239 = arith.constant 0 : index
    %469 = vector.load %arg5[%c0_238, %468, %c0_239] : memref<1x1024x128xbf16, #tpu.memory_space<vmem>>, vector<1x32x128xbf16>
    %470 = vector.shape_cast %469 : vector<1x32x128xbf16> to vector<32x128xbf16>
    %471 = vector.shape_cast %467 : vector<32x128xbf16> to vector<1x32x128xbf16>
    tpu.vector_store %arg5[%c0_238, %468, %c0_239], %471 {strides = array<i32>} : memref<1x1024x128xbf16, #tpu.memory_space<vmem>>, vector<1x32x128xbf16>,
    %c6_i32_240 = arith.constant 6 : i32
    %c32_i32_241 = arith.constant 32 : i32
    %472 = arith.muli %c6_i32_240, %c32_i32_241 : i32
    %c512_i32_242 = arith.constant 512 : i32
    %473 = arith.addi %c512_i32_242, %472 : i32
    %474 = tpu.assume_multiple %473, 32 : i32
    %475 = arith.index_cast %474 : i32 to index
    %c0_243 = arith.constant 0 : index
    %476 = vector.load %arg8[%475, %c0_243] : memref<1024x384xf32, #tpu.memory_space<vmem>>, vector<32x128xf32>
    %477 = arith.index_cast %474 : i32 to index
    %c128_244 = arith.constant 128 : index
    %478 = vector.load %arg8[%477, %c128_244] : memref<1024x384xf32, #tpu.memory_space<vmem>>, vector<32x128xf32>
    %479 = arith.index_cast %474 : i32 to index
    %c256_245 = arith.constant 256 : index
    %480 = vector.load %arg8[%479, %c256_245] : memref<1024x384xf32, #tpu.memory_space<vmem>>, vector<32x128xf32>
    %481 = arith.subf %476, %465 : vector<32x128xf32>
    %482 = arith.mulf %478, %481 : vector<32x128xf32>
    %483 = arith.addf %465, %482 : vector<32x128xf32>
    %484 = arith.mulf %480, %483 : vector<32x128xf32>
    %485 = arith.truncf %484 : vector<32x128xf32> to vector<32x128xbf16>
    %c0_246 = arith.constant 0 : index
    %486 = arith.index_cast %474 : i32 to index
    %c0_247 = arith.constant 0 : index
    %487 = vector.load %arg5[%c0_246, %486, %c0_247] : memref<1x1024x128xbf16, #tpu.memory_space<vmem>>, vector<1x32x128xbf16>
    %488 = vector.shape_cast %487 : vector<1x32x128xbf16> to vector<32x128xbf16>
    %489 = vector.shape_cast %485 : vector<32x128xbf16> to vector<1x32x128xbf16>
    tpu.vector_store %arg5[%c0_246, %486, %c0_247], %489 {strides = array<i32>} : memref<1x1024x128xbf16, #tpu.memory_space<vmem>>, vector<1x32x128xbf16>,
    %c7_i32_248 = arith.constant 7 : i32
    %c32_i32_249 = arith.constant 32 : i32
    %490 = arith.muli %c7_i32_248, %c32_i32_249 : i32
    %c512_i32_250 = arith.constant 512 : i32
    %491 = arith.addi %c512_i32_250, %490 : i32
    %492 = tpu.assume_multiple %491, 32 : i32
    %493 = arith.index_cast %492 : i32 to index
    %c0_251 = arith.constant 0 : index
    %494 = vector.load %arg8[%493, %c0_251] : memref<1024x384xf32, #tpu.memory_space<vmem>>, vector<32x128xf32>
    %495 = arith.index_cast %492 : i32 to index
    %c128_252 = arith.constant 128 : index
    %496 = vector.load %arg8[%495, %c128_252] : memref<1024x384xf32, #tpu.memory_space<vmem>>, vector<32x128xf32>
    %497 = arith.index_cast %492 : i32 to index
    %c256_253 = arith.constant 256 : index
    %498 = vector.load %arg8[%497, %c256_253] : memref<1024x384xf32, #tpu.memory_space<vmem>>, vector<32x128xf32>
    %499 = arith.subf %494, %483 : vector<32x128xf32>
    %500 = arith.mulf %496, %499 : vector<32x128xf32>
    %501 = arith.addf %483, %500 : vector<32x128xf32>
    %502 = arith.mulf %498, %501 : vector<32x128xf32>
    %503 = arith.truncf %502 : vector<32x128xf32> to vector<32x128xbf16>
    %c0_254 = arith.constant 0 : index
    %504 = arith.index_cast %492 : i32 to index
    %c0_255 = arith.constant 0 : index
    %505 = vector.load %arg5[%c0_254, %504, %c0_255] : memref<1x1024x128xbf16, #tpu.memory_space<vmem>>, vector<1x32x128xbf16>
    %506 = vector.shape_cast %505 : vector<1x32x128xbf16> to vector<32x128xbf16>
    %507 = vector.shape_cast %503 : vector<32x128xbf16> to vector<1x32x128xbf16>
    tpu.vector_store %arg5[%c0_254, %504, %c0_255], %507 {strides = array<i32>} : memref<1x1024x128xbf16, #tpu.memory_space<vmem>>, vector<1x32x128xbf16>,
    %c8_i32_256 = arith.constant 8 : i32
    %c0_i32_257 = arith.constant 0 : i32
    %c32_i32_258 = arith.constant 32 : i32
    %508 = arith.muli %c0_i32_257, %c32_i32_258 : i32
    %c768_i32 = arith.constant 768 : i32
    %509 = arith.addi %c768_i32, %508 : i32
    %510 = tpu.assume_multiple %509, 32 : i32
    %511 = arith.index_cast %510 : i32 to index
    %c0_259 = arith.constant 0 : index
    %512 = vector.load %arg8[%511, %c0_259] : memref<1024x384xf32, #tpu.memory_space<vmem>>, vector<32x128xf32>
    %513 = arith.index_cast %510 : i32 to index
    %c128_260 = arith.constant 128 : index
    %514 = vector.load %arg8[%513, %c128_260] : memref<1024x384xf32, #tpu.memory_space<vmem>>, vector<32x128xf32>
    %515 = arith.index_cast %510 : i32 to index
    %c256_261 = arith.constant 256 : index
    %516 = vector.load %arg8[%515, %c256_261] : memref<1024x384xf32, #tpu.memory_space<vmem>>, vector<32x128xf32>
    %517 = arith.subf %512, %501 : vector<32x128xf32>
    %518 = arith.mulf %514, %517 : vector<32x128xf32>
    %519 = arith.addf %501, %518 : vector<32x128xf32>
    %520 = arith.mulf %516, %519 : vector<32x128xf32>
    %521 = arith.truncf %520 : vector<32x128xf32> to vector<32x128xbf16>
    %c0_262 = arith.constant 0 : index
    %522 = arith.index_cast %510 : i32 to index
    %c0_263 = arith.constant 0 : index
    %523 = vector.load %arg5[%c0_262, %522, %c0_263] : memref<1x1024x128xbf16, #tpu.memory_space<vmem>>, vector<1x32x128xbf16>
    %524 = vector.shape_cast %523 : vector<1x32x128xbf16> to vector<32x128xbf16>
    %525 = vector.shape_cast %521 : vector<32x128xbf16> to vector<1x32x128xbf16>
    tpu.vector_store %arg5[%c0_262, %522, %c0_263], %525 {strides = array<i32>} : memref<1x1024x128xbf16, #tpu.memory_space<vmem>>, vector<1x32x128xbf16>,
    %c1_i32_264 = arith.constant 1 : i32
    %c32_i32_265 = arith.constant 32 : i32
    %526 = arith.muli %c1_i32_264, %c32_i32_265 : i32
    %c768_i32_266 = arith.constant 768 : i32
    %527 = arith.addi %c768_i32_266, %526 : i32
    %528 = tpu.assume_multiple %527, 32 : i32
    %529 = arith.index_cast %528 : i32 to index
    %c0_267 = arith.constant 0 : index
    %530 = vector.load %arg8[%529, %c0_267] : memref<1024x384xf32, #tpu.memory_space<vmem>>, vector<32x128xf32>
    %531 = arith.index_cast %528 : i32 to index
    %c128_268 = arith.constant 128 : index
    %532 = vector.load %arg8[%531, %c128_268] : memref<1024x384xf32, #tpu.memory_space<vmem>>, vector<32x128xf32>
    %533 = arith.index_cast %528 : i32 to index
    %c256_269 = arith.constant 256 : index
    %534 = vector.load %arg8[%533, %c256_269] : memref<1024x384xf32, #tpu.memory_space<vmem>>, vector<32x128xf32>
    %535 = arith.subf %530, %519 : vector<32x128xf32>
    %536 = arith.mulf %532, %535 : vector<32x128xf32>
    %537 = arith.addf %519, %536 : vector<32x128xf32>
    %538 = arith.mulf %534, %537 : vector<32x128xf32>
    %539 = arith.truncf %538 : vector<32x128xf32> to vector<32x128xbf16>
    %c0_270 = arith.constant 0 : index
    %540 = arith.index_cast %528 : i32 to index
    %c0_271 = arith.constant 0 : index
    %541 = vector.load %arg5[%c0_270, %540, %c0_271] : memref<1x1024x128xbf16, #tpu.memory_space<vmem>>, vector<1x32x128xbf16>
    %542 = vector.shape_cast %541 : vector<1x32x128xbf16> to vector<32x128xbf16>
    %543 = vector.shape_cast %539 : vector<32x128xbf16> to vector<1x32x128xbf16>
    tpu.vector_store %arg5[%c0_270, %540, %c0_271], %543 {strides = array<i32>} : memref<1x1024x128xbf16, #tpu.memory_space<vmem>>, vector<1x32x128xbf16>,
    %c2_i32_272 = arith.constant 2 : i32
    %c32_i32_273 = arith.constant 32 : i32
    %544 = arith.muli %c2_i32_272, %c32_i32_273 : i32
    %c768_i32_274 = arith.constant 768 : i32
    %545 = arith.addi %c768_i32_274, %544 : i32
    %546 = tpu.assume_multiple %545, 32 : i32
    %547 = arith.index_cast %546 : i32 to index
    %c0_275 = arith.constant 0 : index
    %548 = vector.load %arg8[%547, %c0_275] : memref<1024x384xf32, #tpu.memory_space<vmem>>, vector<32x128xf32>
    %549 = arith.index_cast %546 : i32 to index
    %c128_276 = arith.constant 128 : index
    %550 = vector.load %arg8[%549, %c128_276] : memref<1024x384xf32, #tpu.memory_space<vmem>>, vector<32x128xf32>
    %551 = arith.index_cast %546 : i32 to index
    %c256_277 = arith.constant 256 : index
    %552 = vector.load %arg8[%551, %c256_277] : memref<1024x384xf32, #tpu.memory_space<vmem>>, vector<32x128xf32>
    %553 = arith.subf %548, %537 : vector<32x128xf32>
    %554 = arith.mulf %550, %553 : vector<32x128xf32>
    %555 = arith.addf %537, %554 : vector<32x128xf32>
    %556 = arith.mulf %552, %555 : vector<32x128xf32>
    %557 = arith.truncf %556 : vector<32x128xf32> to vector<32x128xbf16>
    %c0_278 = arith.constant 0 : index
    %558 = arith.index_cast %546 : i32 to index
    %c0_279 = arith.constant 0 : index
    %559 = vector.load %arg5[%c0_278, %558, %c0_279] : memref<1x1024x128xbf16, #tpu.memory_space<vmem>>, vector<1x32x128xbf16>
    %560 = vector.shape_cast %559 : vector<1x32x128xbf16> to vector<32x128xbf16>
    %561 = vector.shape_cast %557 : vector<32x128xbf16> to vector<1x32x128xbf16>
    tpu.vector_store %arg5[%c0_278, %558, %c0_279], %561 {strides = array<i32>} : memref<1x1024x128xbf16, #tpu.memory_space<vmem>>, vector<1x32x128xbf16>,
    %c3_i32_280 = arith.constant 3 : i32
    %c32_i32_281 = arith.constant 32 : i32
    %562 = arith.muli %c3_i32_280, %c32_i32_281 : i32
    %c768_i32_282 = arith.constant 768 : i32
    %563 = arith.addi %c768_i32_282, %562 : i32
    %564 = tpu.assume_multiple %563, 32 : i32
    %565 = arith.index_cast %564 : i32 to index
    %c0_283 = arith.constant 0 : index
    %566 = vector.load %arg8[%565, %c0_283] : memref<1024x384xf32, #tpu.memory_space<vmem>>, vector<32x128xf32>
    %567 = arith.index_cast %564 : i32 to index
    %c128_284 = arith.constant 128 : index
    %568 = vector.load %arg8[%567, %c128_284] : memref<1024x384xf32, #tpu.memory_space<vmem>>, vector<32x128xf32>
    %569 = arith.index_cast %564 : i32 to index
    %c256_285 = arith.constant 256 : index
    %570 = vector.load %arg8[%569, %c256_285] : memref<1024x384xf32, #tpu.memory_space<vmem>>, vector<32x128xf32>
    %571 = arith.subf %566, %555 : vector<32x128xf32>
    %572 = arith.mulf %568, %571 : vector<32x128xf32>
    %573 = arith.addf %555, %572 : vector<32x128xf32>
    %574 = arith.mulf %570, %573 : vector<32x128xf32>
    %575 = arith.truncf %574 : vector<32x128xf32> to vector<32x128xbf16>
    %c0_286 = arith.constant 0 : index
    %576 = arith.index_cast %564 : i32 to index
    %c0_287 = arith.constant 0 : index
    %577 = vector.load %arg5[%c0_286, %576, %c0_287] : memref<1x1024x128xbf16, #tpu.memory_space<vmem>>, vector<1x32x128xbf16>
    %578 = vector.shape_cast %577 : vector<1x32x128xbf16> to vector<32x128xbf16>
    %579 = vector.shape_cast %575 : vector<32x128xbf16> to vector<1x32x128xbf16>
    tpu.vector_store %arg5[%c0_286, %576, %c0_287], %579 {strides = array<i32>} : memref<1x1024x128xbf16, #tpu.memory_space<vmem>>, vector<1x32x128xbf16>,
    %c4_i32_288 = arith.constant 4 : i32
    %c32_i32_289 = arith.constant 32 : i32
    %580 = arith.muli %c4_i32_288, %c32_i32_289 : i32
    %c768_i32_290 = arith.constant 768 : i32
    %581 = arith.addi %c768_i32_290, %580 : i32
    %582 = tpu.assume_multiple %581, 32 : i32
    %583 = arith.index_cast %582 : i32 to index
    %c0_291 = arith.constant 0 : index
    %584 = vector.load %arg8[%583, %c0_291] : memref<1024x384xf32, #tpu.memory_space<vmem>>, vector<32x128xf32>
    %585 = arith.index_cast %582 : i32 to index
    %c128_292 = arith.constant 128 : index
    %586 = vector.load %arg8[%585, %c128_292] : memref<1024x384xf32, #tpu.memory_space<vmem>>, vector<32x128xf32>
    %587 = arith.index_cast %582 : i32 to index
    %c256_293 = arith.constant 256 : index
    %588 = vector.load %arg8[%587, %c256_293] : memref<1024x384xf32, #tpu.memory_space<vmem>>, vector<32x128xf32>
    %589 = arith.subf %584, %573 : vector<32x128xf32>
    %590 = arith.mulf %586, %589 : vector<32x128xf32>
    %591 = arith.addf %573, %590 : vector<32x128xf32>
    %592 = arith.mulf %588, %591 : vector<32x128xf32>
    %593 = arith.truncf %592 : vector<32x128xf32> to vector<32x128xbf16>
    %c0_294 = arith.constant 0 : index
    %594 = arith.index_cast %582 : i32 to index
    %c0_295 = arith.constant 0 : index
    %595 = vector.load %arg5[%c0_294, %594, %c0_295] : memref<1x1024x128xbf16, #tpu.memory_space<vmem>>, vector<1x32x128xbf16>
    %596 = vector.shape_cast %595 : vector<1x32x128xbf16> to vector<32x128xbf16>
    %597 = vector.shape_cast %593 : vector<32x128xbf16> to vector<1x32x128xbf16>
    tpu.vector_store %arg5[%c0_294, %594, %c0_295], %597 {strides = array<i32>} : memref<1x1024x128xbf16, #tpu.memory_space<vmem>>, vector<1x32x128xbf16>,
    %c5_i32_296 = arith.constant 5 : i32
    %c32_i32_297 = arith.constant 32 : i32
    %598 = arith.muli %c5_i32_296, %c32_i32_297 : i32
    %c768_i32_298 = arith.constant 768 : i32
    %599 = arith.addi %c768_i32_298, %598 : i32
    %600 = tpu.assume_multiple %599, 32 : i32
    %601 = arith.index_cast %600 : i32 to index
    %c0_299 = arith.constant 0 : index
    %602 = vector.load %arg8[%601, %c0_299] : memref<1024x384xf32, #tpu.memory_space<vmem>>, vector<32x128xf32>
    %603 = arith.index_cast %600 : i32 to index
    %c128_300 = arith.constant 128 : index
    %604 = vector.load %arg8[%603, %c128_300] : memref<1024x384xf32, #tpu.memory_space<vmem>>, vector<32x128xf32>
    %605 = arith.index_cast %600 : i32 to index
    %c256_301 = arith.constant 256 : index
    %606 = vector.load %arg8[%605, %c256_301] : memref<1024x384xf32, #tpu.memory_space<vmem>>, vector<32x128xf32>
    %607 = arith.subf %602, %591 : vector<32x128xf32>
    %608 = arith.mulf %604, %607 : vector<32x128xf32>
    %609 = arith.addf %591, %608 : vector<32x128xf32>
    %610 = arith.mulf %606, %609 : vector<32x128xf32>
    %611 = arith.truncf %610 : vector<32x128xf32> to vector<32x128xbf16>
    %c0_302 = arith.constant 0 : index
    %612 = arith.index_cast %600 : i32 to index
    %c0_303 = arith.constant 0 : index
    %613 = vector.load %arg5[%c0_302, %612, %c0_303] : memref<1x1024x128xbf16, #tpu.memory_space<vmem>>, vector<1x32x128xbf16>
    %614 = vector.shape_cast %613 : vector<1x32x128xbf16> to vector<32x128xbf16>
    %615 = vector.shape_cast %611 : vector<32x128xbf16> to vector<1x32x128xbf16>
    tpu.vector_store %arg5[%c0_302, %612, %c0_303], %615 {strides = array<i32>} : memref<1x1024x128xbf16, #tpu.memory_space<vmem>>, vector<1x32x128xbf16>,
    %c6_i32_304 = arith.constant 6 : i32
    %c32_i32_305 = arith.constant 32 : i32
    %616 = arith.muli %c6_i32_304, %c32_i32_305 : i32
    %c768_i32_306 = arith.constant 768 : i32
    %617 = arith.addi %c768_i32_306, %616 : i32
    %618 = tpu.assume_multiple %617, 32 : i32
    %619 = arith.index_cast %618 : i32 to index
    %c0_307 = arith.constant 0 : index
    %620 = vector.load %arg8[%619, %c0_307] : memref<1024x384xf32, #tpu.memory_space<vmem>>, vector<32x128xf32>
    %621 = arith.index_cast %618 : i32 to index
    %c128_308 = arith.constant 128 : index
    %622 = vector.load %arg8[%621, %c128_308] : memref<1024x384xf32, #tpu.memory_space<vmem>>, vector<32x128xf32>
    %623 = arith.index_cast %618 : i32 to index
    %c256_309 = arith.constant 256 : index
    %624 = vector.load %arg8[%623, %c256_309] : memref<1024x384xf32, #tpu.memory_space<vmem>>, vector<32x128xf32>
    %625 = arith.subf %620, %609 : vector<32x128xf32>
    %626 = arith.mulf %622, %625 : vector<32x128xf32>
    %627 = arith.addf %609, %626 : vector<32x128xf32>
    %628 = arith.mulf %624, %627 : vector<32x128xf32>
    %629 = arith.truncf %628 : vector<32x128xf32> to vector<32x128xbf16>
    %c0_310 = arith.constant 0 : index
    %630 = arith.index_cast %618 : i32 to index
    %c0_311 = arith.constant 0 : index
    %631 = vector.load %arg5[%c0_310, %630, %c0_311] : memref<1x1024x128xbf16, #tpu.memory_space<vmem>>, vector<1x32x128xbf16>
    %632 = vector.shape_cast %631 : vector<1x32x128xbf16> to vector<32x128xbf16>
    %633 = vector.shape_cast %629 : vector<32x128xbf16> to vector<1x32x128xbf16>
    tpu.vector_store %arg5[%c0_310, %630, %c0_311], %633 {strides = array<i32>} : memref<1x1024x128xbf16, #tpu.memory_space<vmem>>, vector<1x32x128xbf16>,
    %c7_i32_312 = arith.constant 7 : i32
    %c32_i32_313 = arith.constant 32 : i32
    %634 = arith.muli %c7_i32_312, %c32_i32_313 : i32
    %c768_i32_314 = arith.constant 768 : i32
    %635 = arith.addi %c768_i32_314, %634 : i32
    %636 = tpu.assume_multiple %635, 32 : i32
    %637 = arith.index_cast %636 : i32 to index
    %c0_315 = arith.constant 0 : index
    %638 = vector.load %arg8[%637, %c0_315] : memref<1024x384xf32, #tpu.memory_space<vmem>>, vector<32x128xf32>
    %639 = arith.index_cast %636 : i32 to index
    %c128_316 = arith.constant 128 : index
    %640 = vector.load %arg8[%639, %c128_316] : memref<1024x384xf32, #tpu.memory_space<vmem>>, vector<32x128xf32>
    %641 = arith.index_cast %636 : i32 to index
    %c256_317 = arith.constant 256 : index
    %642 = vector.load %arg8[%641, %c256_317] : memref<1024x384xf32, #tpu.memory_space<vmem>>, vector<32x128xf32>
    %643 = arith.subf %638, %627 : vector<32x128xf32>
    %644 = arith.mulf %640, %643 : vector<32x128xf32>
    %645 = arith.addf %627, %644 : vector<32x128xf32>
    %646 = arith.mulf %642, %645 : vector<32x128xf32>
    %647 = arith.truncf %646 : vector<32x128xf32> to vector<32x128xbf16>
    %c0_318 = arith.constant 0 : index
    %648 = arith.index_cast %636 : i32 to index
    %c0_319 = arith.constant 0 : index
    %649 = vector.load %arg5[%c0_318, %648, %c0_319] : memref<1x1024x128xbf16, #tpu.memory_space<vmem>>, vector<1x32x128xbf16>
    %650 = vector.shape_cast %649 : vector<1x32x128xbf16> to vector<32x128xbf16>
    %651 = vector.shape_cast %647 : vector<32x128xbf16> to vector<1x32x128xbf16>
    tpu.vector_store %arg5[%c0_318, %648, %c0_319], %651 {strides = array<i32>} : memref<1x1024x128xbf16, #tpu.memory_space<vmem>>, vector<1x32x128xbf16>,
    %c8_i32_320 = arith.constant 8 : i32
    %c0_321 = arith.constant 0 : index
    %c0_322 = arith.constant 0 : index
    %652 = vector.load %arg7[%c0_321, %c0_322] : memref<32x128xf32, #tpu.memory_space<vmem>>, vector<32x128xf32>
    tpu.vector_store %arg7[%c0_321, %c0_322], %645 {strides = array<i32>} : memref<32x128xf32, #tpu.memory_space<vmem>>, vector<32x128xf32>,
    %c1_i32_323 = arith.constant 1 : i32
    %653 = arith.cmpi eq, %arg1, %c1_i32_323 : i32
    %654 = arith.extui %653 : i1 to i32
    %c0_i32_324 = arith.constant 0 : i32
    %655 = arith.cmpi ne, %654, %c0_i32_324 : i32
    scf.if %655 {
      %c0_325 = arith.constant 0 : index
      %c0_326 = arith.constant 0 : index
      %656 = vector.load %arg7[%c0_325, %c0_326] : memref<32x128xf32, #tpu.memory_space<vmem>>, vector<32x128xf32>
      %c0_327 = arith.constant 0 : index
      %c0_328 = arith.constant 0 : index
      %c0_329 = arith.constant 0 : index
      %657 = vector.load %arg6[%c0_327, %c0_328, %c0_329] : memref<1x32x128xf32, #tpu.memory_space<vmem>>, vector<1x32x128xf32>
      %658 = vector.shape_cast %657 : vector<1x32x128xf32> to vector<32x128xf32>
      %659 = vector.shape_cast %656 : vector<32x128xf32> to vector<1x32x128xf32>
      tpu.vector_store %arg6[%c0_327, %c0_328, %c0_329], %659 {strides = array<i32>} : memref<1x32x128xf32, #tpu.memory_space<vmem>>, vector<1x32x128xf32>,
    } else {
    }
    return
  }
  func.func @transform_0(%arg0: i32, %arg1: i32) -> (i32, i32, i32) {
    %c0_i32 = arith.constant 0 : i32
    %c0_i32_0 = arith.constant 0 : i32
    return %arg0, %arg1, %c0_i32 : i32, i32, i32
  }
  func.func @transform_1(%arg0: i32, %arg1: i32) -> (i32, i32) {
    %c0_i32 = arith.constant 0 : i32
    %c0_i32_0 = arith.constant 0 : i32
    %c0_i32_1 = arith.constant 0 : i32
    return %c0_i32, %c0_i32_0 : i32, i32
  }
  func.func @transform_2(%arg0: i32, %arg1: i32) -> (i32, i32) {
    %c0_i32 = arith.constant 0 : i32
    %c0_i32_0 = arith.constant 0 : i32
    %c0_i32_1 = arith.constant 0 : i32
    return %c0_i32, %c0_i32_0 : i32, i32
  }
  func.func @transform_3(%arg0: i32, %arg1: i32) -> (i32, i32, i32) {
    %c0_i32 = arith.constant 0 : i32
    %c0_i32_0 = arith.constant 0 : i32
    return %arg0, %arg1, %c0_i32 : i32, i32, i32
  }
  func.func @transform_4(%arg0: i32, %arg1: i32) -> (i32, i32, i32) {
    %c0_i32 = arith.constant 0 : i32
    %c0_i32_0 = arith.constant 0 : i32
    %c0_i32_1 = arith.constant 0 : i32
    return %arg0, %c0_i32, %c0_i32_0 : i32, i32, i32
  }
}

</mosaic_0001>

<bundles_post_ra>
// kernel: tpu_custom_call.1
= control target key start
LH: loop header
LB: loop body
LE: loop exit
PB: predicated region body
PF: predicated region fallthrough
CT: control target
= control target key end

     0   :  { %s13974_s0 = inlined_call_operand.hbm [shape: bf16[1,2048,128], index: 0, kind: input, shape index: {}]   ;;  %s13975_s1 = inlined_call_operand.hbm [shape: bf16[128,384], index: 1, kind: input, shape index: {}]   ;;  %s13976_s2 = inlined_call_operand.vmem [shape: f32[1,384], index: 2, kind: input, shape index: {}]   ;;  %s13977_s3 = inlined_call_operand.hbm [shape: bf16[1,2048,128], index: 3, kind: output, shape index: {0}]   ;;  %s13978_s4 = inlined_call_operand.hbm [shape: f32[1,32,128], index: 4, kind: output, shape index: {1}]  }
   0x1   :  { %13996 = sst [smem:[#allocation63_spill]] %s13975_s1 }
   0x2   :  { %10 = vsyncpa [#allocation5], 0 }
   0x3   :  { %12 = vsyncpa [#allocation5 + $0x1], 0 }
   0x4   :  { %13 = vsyncpa [#allocation8], 0 }
   0x5   :  { %14 = vsyncpa [#allocation6], 0 }
   0x6   :  { %16 = vsyncpa [#allocation6 + $0x1], 0 }
   0x7   :  { %17 = vsyncpa [#allocation11], 0  ;;  %s10781_s15 = smov 0   ;;  %s10783_s16 = smov 0  }
   0x8   :  { %s10785_s17 = smov 0   ;;  %s10787_s18 = smov 0  }
   0x9   :  { %s10789_s19 = smov 0   ;;  %s10791_s20 = smov 0  }
   0xa LB: > { %s7572_s21 = sadd.s32 4294967295, %s10740_s20   ;;  %s7573_s22 = sadd.s32 4294967294, %s10740_s20   ;;  %s10740_s20 = sphi %s10791_s20, %s23_s20   ;;  %s10736_s19 = sphi %s10789_s19, %s14255_s19   ;;  %s10732_s18 = sphi %s10787_s18, %s14254_s18   ;;  %s10728_s17 = sphi %s10785_s17, %s14253_s17   ;;  %s10724_s16 = sphi %s10783_s16, %s14252_s16   ;;  %s10720_s15 = sphi %s10781_s15, %s14251_s15  }
   0xb   : > { %p57_p0 = scmp.ne.s32.totalorder %s10724_s16, %s10720_s15  ;;  %p10815_p1 = scmp.eq.s32.totalorder %s7572_s21, 0 }
   0xc   : > { %p10819_p2 = scmp.eq.s32.totalorder %s7572_s21, 1  ;;  %p131_p3 = scmp.eq.s32.totalorder %s7573_s22, 1 }
   0xd   : > { %p10825_p4 = por %p10815_p1, %p57_p0  ;;  %p7574_p5 = scmp.ge.s32.totalorder %s10740_s20, 1 }
   0xe   : > { %s13998_s24 = scalar_select %p10819_p2, 1, 0 }
   0xf   : > { %s13999_s25 = scalar_select %p10825_p4, 1, 0 }
  0x10   : > { %p10830_p6 = por %p131_p3, %p57_p0  ;;  %p164_p7 = scmp.lt.s32.totalorder %s10740_s20, 3 }
  0x11   : > { %s10742_s28 = smov [#allocation7]   ;;  %s32_s5 = sadd.s32 1, %s10736_s19 }
  0x12   : > { %s14000_s26 = scalar_select %p10830_p6, 1, 0 }
  0x13   : > { %p10835_p8 = pnand %p7574_p5, %p164_p7  ;;  %s176_s29 = sshll.u32 %s10742_s28, 4  ;;  %s177_s29 = int_to_ptr.vmem [resolvable:$true] %s176_s29 }
  0x14   : > { %s10585_s6 = scalar_lea.vmem %s177_s29, 3072  ;;  %p10593_p5 = scmp.lt.s32.totalorder %s177_s29, %s177_s29 }
  0x15   : > { %p9074_p9 = pneg %p10835_p8  ;;  %p10586_p13 = scmp.ne.s32.totalorder %s177_s29, %s10585_s6 }
  0x16   : > { %p10594_p7 = scmp.lt.s32.totalorder %s10585_s6, %s10585_s6 }
  0x17   : > { %p10844_p11 = pnand %p9074_p9, %p10815_p1 }
  0x18   : > { %p10595_p6 = por %p10594_p7, %p10593_p5 }
  0x19   : > { %p10576_p12 = pneg %p10844_p11 }
  0x1b   : > { %p10588_p0 = pnand %p10586_p13, %p10576_p12 }
  0x1d   : > { %p10589_p3 = pneg %p10588_p0 }
  0x1f   : > { %p10596_p4 = pnand %p10595_p6, %p10589_p3 }
  0x21   : > { %10599 = shalt.err (!%p10596_p4)
}
  0x22   : > { %s10743_s7 = smov 192   ;;  %s10744_s8 = smov 12  }
  0x23   : > { %s14003_s1 = sld [smem:[#allocation63_spill]]  ;;  %p33_p6 = scmp.ge.s32.totalorder %s32_s5, 2 }
  0x24   : > { %s44_s11 = sadd.s32 1, %s10728_s17  ;;  %p51_p4 = scmp.ne.s32.totalorder %s10728_s17, %s10724_s16 }
  0x25   : > { %p52_p9 = scmp.eq.s32.totalorder %s10740_s20, 0  ;;  %s14257_s5 = smov (%p33_p6, %s32_s5), 0 }
  0x26   : > { %14004 = sst [smem:[#allocation16_spill]] %s14257_s5  ;;  %p10868_p13 = por %p10819_p2, %p51_p4 }
  0x27   : > { %p10862_p12 = por %p52_p9, %p51_p4  ;;  %s40_s14 = ssub.s32 %s10736_s19, %s14257_s5 }
  0x28   : > { %p9087_p0 = scmp.lt.s32.totalorder %s10740_s20, 2  ;;  %s193_s21 = sand.u32 1, %s10728_s17  }
  0x29   : > { %9077 = dma.hbm_to_vmem [thread:$0]  (!%p10844_p11), %s14003_s1, 3072, %s177_s29, [#allocation8], %s10743_s7, %s10743_s7, %s10744_s8  }
  0x2a   : > { %p42_p11 = scmp.eq.s32.totalorder %s40_s14, 0  ;;  %s7577_s22 = sshll.u32 %s193_s21, 9 }
  0x2b   : > { %s8261_s29 = sshll.u32 %s10736_s19, 13  ;;  %s197_s8 = scalar_lea.vmem [#allocation4], %s7577_s22 }
  0x2c   : > { %s10877_s28 = scalar_select %p42_p11, %s10728_s17, %s44_s11  }
  0x2d   : > { %s205_s7 = scalar_lea.hbm %s13974_s0, %s8261_s29  ;;  %s206_s9 = sshll.u32 %s197_s8, 4  ;;  %s207_s9 = int_to_ptr.vmem [resolvable:$true] %s206_s9 }
  0x2e   : > { %p10885_p3 = pnand %p9087_p0, %p10862_p12  ;;  %s194_s1 = scalar_lea.sflag [#allocation5], %s193_s21 }
  0x2f   : > { %s10613_s14 = scalar_lea.vmem %s207_s9, 8192  ;;  %s10745_s11 = smov [#allocation4]  }
  0x30   : > { %p10602_p5 = pneg %p10885_p3  ;;  %p10614_p7 = scmp.ne.s32.totalorder %s207_s9, %s10613_s14 }
  0x31   : > { %s10618_s5 = sshll.u32 %s10745_s11, 4  ;;  %s10619_s5 = int_to_ptr.vmem [resolvable:$false] %s10618_s5 }
  0x32   : > { %p10616_p6 = pnand %p10614_p7, %p10602_p5  ;;  %s10620_s29 = scalar_lea.vmem %s10619_s5, 16384 }
  0x33   : > { %p10621_p9 = scmp.lt.s32.totalorder %s207_s9, %s10619_s5  ;;  %p10622_p11 = scmp.lt.s32.totalorder %s10620_s29, %s10613_s14 }
  0x34   : > { %p10617_p4 = pneg %p10616_p6 }
  0x35   : > { %p10623_p10 = por %p10622_p11, %p10621_p9 }
  0x37   : > { %p10624_p2 = pnand %p10623_p10, %p10617_p4 }
  0x39   : > { %10627 = shalt.err (!%p10624_p2)
}
  0x3a   : > { %s10746_s12 = smov 64   ;;  %s10747_s22 = smov 4  }
  0x3b   : > { %9081 = dma.hbm_to_vmem [thread:$0]  (!%p10885_p3), %s205_s7, 8192, %s207_s9, %s194_s1, %s10746_s12, %s10746_s12, %s10747_s22  }
  0x3c   : > { %218 = sbr.rel (%p10835_p8) target bundleno = 1037 (0x40d), region = 32 }
  0x41   : > { %s10896_s21 = sand.u32 1, %s10724_s16   ;;  %p14008_p10 = scmp.ne.s32.totalorder %s13999_s25, 0 }
  0x42   : > { %s7581_s30 = sshll.u32 %s10896_s21, 9  ;;  %s221_s5 = scalar_lea.sflag [#allocation5], %s10896_s21 }
  0x43   : > { %s10900_s6 = scalar_lea.vmem [#allocation4], %s7581_s30 }
  0x44   : > { %10703 = dma.done.wait (%p14008_p10), %s221_s5, 8192  }
  0x45   : > { %10705 = vsyncadd (%p14008_p10), %s221_s5, 4294959104 }
  0x46   : > { %10707 = dma.done.wait (%p10815_p1), [#allocation8], 3072  }
  0x47   : > { %10709 = vsyncadd (%p10815_p1), [#allocation8], 4294964224  ;;  %s10910_s1 = scalar_lea.vmem [#allocation9], %s7581_s30  ;;  %p7584_p2 = scmp.ne.s32.totalorder %s10732_s18, 0 }
  0x49   : > { %259 = sbr.rel (%p7584_p2) target bundleno = 81 (0x51), region = 44 }
  0x4e   : > { %v10748_v0 = vmov 0.0  }
  0x4f   : > { %260 = vst [vmem:[#allocation2 + $0x10] sm:$0xff] %v10748_v0  ;;  %261 = vst [vmem:[#allocation2] sm:$0xff] %v10748_v0 }
  0x50   : > { %262 = vst [vmem:[#allocation2 + $0x18] sm:$0xff] %v10748_v0  ;;  %263 = vst [vmem:[#allocation2 + $0x8] sm:$0xff] %v10748_v0 }
  0x51 PF: > { %v10913_v1 = vld [vmem:[#allocation7 + $0xac] ss:$12 sps:$4 sm:$0xff]   ;;  %v9154_v2 = vld [vmem:[#allocation7 + $0xb0] ss:$12 sps:$4 sm:$0xff]   ;;  %v13983_v3 = vmov 0   ;;  %v9184_v20 = vld [vmem:[%s10900_s6] sm:$0xff]  }
  0x52   : > { %601 = vmatprep.mubr.bf16.mxu0 %v13983_v3  ;;  %569 = vmatprep.subr.bf16.mxu0 %v10913_v1  ;;  %v10917_v4 = vld [vmem:[#allocation7 + $0xa8] ss:$12 sps:$4 sm:$0xff]   ;;  %v9158_v6 = vld [vmem:[#allocation7 + $0x98] ss:$12 sps:$4 sm:$0xff]   ;;  %v10922_v7 = vld [vmem:[#allocation7 + $0x90] ss:$12 sps:$4 sm:$0xff]  }
  0x53   : > { %8870 = vmatprep.subr.bf16.mxu1 %v9154_v2  ;;  %v10919_v5 = vld [vmem:[#allocation7 + $0x94] ss:$12 sps:$4 sm:$0xff]   ;;  %570 = vmatpush1.bf16.msra.mxu0 %v10917_v4  ;;  %v10925_v8 = vld [vmem:[#allocation7 + $0x7c] ss:$12 sps:$4 sm:$0xff]   ;;  %v10927_v10 = vld [vmem:[#allocation7 + $0x78] ss:$12 sps:$4 sm:$0xff]  }
  0x54   : > { %8871 = vmatpush3.bf16.msra.mxu1 %v9154_v2  ;;  %571 = vmatprep.subr.bf16.mxu0 %v10919_v5  ;;  %v9162_v9 = vld [vmem:[#allocation7 + $0x80] ss:$12 sps:$4 sm:$0xff]   ;;  %v10930_v11 = vld [vmem:[#allocation7 + $0x64] ss:$12 sps:$4 sm:$0xff]   ;;  %v9166_v12 = vld [vmem:[#allocation7 + $0x68] ss:$12 sps:$4 sm:$0xff]  }
  0x55   : > { %8872 = vmatprep.subr.bf16.mxu1 %v9158_v6  ;;  %v10934_v13 = vld [vmem:[#allocation7 + $0x60] ss:$12 sps:$4 sm:$0xff]   ;;  %v9170_v15 = vld [vmem:[#allocation7 + $0x50] ss:$12 sps:$4 sm:$0xff]   ;;  %v10939_v16 = vld [vmem:[#allocation7 + $0x48] ss:$12 sps:$4 sm:$0xff]   ;;  %8886 = vmatprep.mubr.bf16.mxu1 %v9184_v20 }
  0x56   : > { %v10937_v14 = vld [vmem:[#allocation7 + $0x4c] ss:$12 sps:$4 sm:$0xff]   ;;  %v10942_v17 = vld [vmem:[#allocation7 + $0x34] ss:$12 sps:$4 sm:$0xff]   ;;  %v10945_v19 = vld [vmem:[#allocation7 + $0x30] ss:$12 sps:$4 sm:$0xff]  }
  0x57   : > { %572 = vmatpush1.bf16.msra.mxu0 %v10922_v7  ;;  %v9174_v18 = vld [vmem:[#allocation7 + $0x38] ss:$12 sps:$4 sm:$0xff]   ;;  %v10949_v21 = vld [vmem:[#allocation7 + $0x1c] ss:$12 sps:$4 sm:$0xff]   ;;  %v9178_v22 = vld [vmem:[#allocation7 + $0x20] ss:$12 sps:$4 sm:$0xff]  }
  0x58   : > { %8873 = vmatpush3.bf16.msra.mxu1 %v9158_v6  ;;  %573 = vmatprep.subr.bf16.mxu0 %v10925_v8  ;;  %v10952_v23 = vld [vmem:[#allocation7 + $0x18] ss:$12 sps:$4 sm:$0xff]   ;;  %v9182_v25 = vld [vmem:[#allocation7 + $0x8] ss:$12 sps:$4 sm:$0xff]   ;;  %v10959_v26 = vld [vmem:[#allocation7] ss:$12 sps:$4 sm:$0xff]  }
  0x59   : > { %8874 = vmatprep.subr.bf16.mxu1 %v9162_v9  ;;  %v10955_v24 = vld [vmem:[#allocation7 + $0x4] ss:$12 sps:$4 sm:$0xff]   ;;  %v9185_v28 = vld [vmem:[%s10900_s6 + $0x8] sm:$0xff]   ;;  %v9188_v32 = vld [vmem:[%s10900_s6 + $0x18] sm:$0xff]   ;;  %p8253_p1 = scmp.ne.s32.totalorder %s10732_s18, 1 }
  0x5a   : > { %v9186_v27 = vld [vmem:[#allocation7 + $0xb0] ss:$12 sps:$4 sm:$0xff]   ;;  %v9191_v30 = vld [vmem:[#allocation7 + $0x98] ss:$12 sps:$4 sm:$0xff]   ;;  %v9196_v31 = vld [vmem:[#allocation7 + $0x80] ss:$12 sps:$4 sm:$0xff]  }
  0x5b   : > { %574 = vmatpush1.bf16.msra.mxu0 %v10927_v10  ;;  %v9187_v29 = vld [vmem:[%s10900_s6 + $0x10] sm:$0xff]   ;;  %v9189_v33 = vld [vmem:[%s10900_s6 + $0x20] sm:$0xff]   ;;  %v9190_v36 = vld [vmem:[%s10900_s6 + $0x28] sm:$0xff]  }
  0x5c   : > { %8875 = vmatpush3.bf16.msra.mxu1 %v9162_v9  ;;  %575 = vmatprep.subr.bf16.mxu0 %v10930_v11  ;;  %v9201_v34 = vld [vmem:[#allocation7 + $0x68] ss:$12 sps:$4 sm:$0xff]   ;;  %v9206_v35 = vld [vmem:[#allocation7 + $0x50] ss:$12 sps:$4 sm:$0xff]   ;;  %v9210_v38 = vld [vmem:[#allocation7 + $0x38] ss:$12 sps:$4 sm:$0xff]  }
  0x5d   : > { %8876 = vmatprep.subr.bf16.mxu1 %v9166_v12  ;;  %v9192_v37 = vld [vmem:[%s10900_s6 + $0x30] sm:$0xff]   ;;  %v9214_v39 = vld [vmem:[#allocation7 + $0x20] ss:$12 sps:$4 sm:$0xff]   ;;  %v9193_v40 = vld [vmem:[%s10900_s6 + $0x38] sm:$0xff]  }
  0x5e   : > { %v9194_v41 = vld [vmem:[%s10900_s6 + $0x40] sm:$0xff]   ;;  %v9218_v42 = vld [vmem:[#allocation7 + $0x8] ss:$12 sps:$4 sm:$0xff]   ;;  %v9205_v44 = vld [vmem:[#allocation7 + $0xb0] ss:$12 sps:$4 sm:$0xff]  }
  0x5f   : > { %576 = vmatpush1.bf16.msra.mxu0 %v10934_v13  ;;  %v9195_v43 = vld [vmem:[%s10900_s6 + $0x48] sm:$0xff]   ;;  %v9197_v45 = vld [vmem:[%s10900_s6 + $0x50] sm:$0xff]   ;;  %v9198_v46 = vld [vmem:[%s10900_s6 + $0x58] sm:$0xff]  }
  0x60   : > { %8877 = vmatpush3.bf16.msra.mxu1 %v9166_v12  ;;  %577 = vmatprep.subr.bf16.mxu0 %v10937_v14  ;;  %v9199_v47 = vld [vmem:[%s10900_s6 + $0x60] sm:$0xff]   ;;  %v9200_v48 = vld [vmem:[%s10900_s6 + $0x68] sm:$0xff]   ;;  %v11000_v49 = vld [vmem:[%s10900_s6 + $0x70] sm:$0xff]   ;;  %v330_v12 = vlaneseq }
  0x61   : > { %8878 = vmatprep.subr.bf16.mxu1 %v9170_v15  ;;  %v11005_v50 = vld [vmem:[%s10900_s6 + $0x78] sm:$0xff]   ;;  %v9204_v51 = vld [vmem:[%s10900_s6 + $0x80] sm:$0xff]   ;;  %v9207_v54 = vld [vmem:[%s10900_s6 + $0x88] sm:$0xff]  }
  0x62   : > { %v9209_v52 = vld [vmem:[#allocation7 + $0x98] ss:$12 sps:$4 sm:$0xff]   ;;  %v9213_v53 = vld [vmem:[#allocation7 + $0x80] ss:$12 sps:$4 sm:$0xff]   ;;  %v9217_v55 = vld [vmem:[#allocation7 + $0x68] ss:$12 sps:$4 sm:$0xff]  }
  0x63   : > { %578 = vmatpush1.bf16.msra.mxu0 %v10939_v16  ;;  %v9221_v56 = vld [vmem:[#allocation7 + $0x50] ss:$12 sps:$4 sm:$0xff]   ;;  %v9224_v58 = vld [vmem:[#allocation7 + $0x38] ss:$12 sps:$4 sm:$0xff]   ;;  %v9227_v59 = vld [vmem:[#allocation7 + $0x20] ss:$12 sps:$4 sm:$0xff]  }
  0x64   : > { %8879 = vmatpush3.bf16.msra.mxu1 %v9170_v15  ;;  %579 = vmatprep.subr.bf16.mxu0 %v10942_v17  ;;  %v9208_v57 = vld [vmem:[%s10900_s6 + $0x90] sm:$0xff]   ;;  %v9211_v60 = vld [vmem:[%s10900_s6 + $0x98] sm:$0xff]   ;;  %v9212_v62 = vld [vmem:[%s10900_s6 + $0xa0] sm:$0xff]   ;;  %v331_v15 = vshrl.u32 %v330_v12, 7 }
  0x65   : > { %8880 = vmatprep.subr.bf16.mxu1 %v9174_v18  ;;  %v9230_v61 = vld [vmem:[#allocation7 + $0x8] ss:$12 sps:$4 sm:$0xff]   ;;  %v9220_v2 = vld [vmem:[%s10900_s6 + $0xc0] sm:$0xff]  }
  0x66   : > { %v9215_v63 = vld [vmem:[%s10900_s6 + $0xa8] sm:$0xff]   ;;  %v9216_v0 = vld [vmem:[%s10900_s6 + $0xb0] sm:$0xff]  }
  0x67   : > { %580 = vmatpush1.bf16.msra.mxu0 %v10945_v19  ;;  %v9222_v6 = vld [vmem:[%s10900_s6 + $0xc8] sm:$0xff]   ;;  %v9223_v9 = vld [vmem:[%s10900_s6 + $0xd0] sm:$0xff]  }
  0x68   : > { %8881 = vmatpush3.bf16.msra.mxu1 %v9174_v18  ;;  %581 = vmatprep.subr.bf16.mxu0 %v10949_v21  ;;  %v11073_v18 = vsub.s32 0, %v331_v15 }
  0x69   : > { %8882 = vmatprep.subr.bf16.mxu1 %v9178_v22 }
  0x6a   : > { %14010 = vst [vmem:[#allocation18_spill] sm:$0xff] %v11073_v18 }
  0x6b   : > { %582 = vmatpush1.bf16.msra.mxu0 %v10952_v23 }
  0x6c   : > { %8883 = vmatpush3.bf16.msra.mxu1 %v9178_v22  ;;  %583 = vmatprep.subr.bf16.mxu0 %v10955_v24 }
  0x6d   : > { %8884 = vmatprep.subr.bf16.mxu1 %v9182_v25 }
  0x6f   : > { %584 = vmatpush1.bf16.msra.mxu0 %v10959_v26 }
  0x70   : > { %8885 = vmatpush3.bf16.msra.mxu1 %v9182_v25  ;;  %8918 = vmatprep.subr.bf16.mxu0 %v9186_v27  ;;  %v9239_v25 = vld [vmem:[#allocation7 + $0x94] ss:$12 sps:$4 sm:$0xff]  }
  0x71   : > { %1936 = vmatprep.subr.bf16.mxu1 %v10913_v1 }
  0x72   : > { %602 = vmatmul.mubr.bf16.vlgmr.msra.gmra.mxu0 %v9184_v20  ;;  %v9233_v20 = vld [vmem:[%s10900_s6 + $0x108] sm:$0xff]  }
  0x73   : > { %8887 = vmatmul.mubr.bf16.vlgmr.msra.gmra.mxu1 %v9185_v28  ;;  %8919 = vmatpush3.bf16.msra.mxu0 %v9186_v27 }
  0x74   : > { %1937 = vmatpush1.bf16.msra.mxu1 %v10917_v4  ;;  %611 = vmatprep.mubr.bf16.mxu0 %v13983_v3 }
  0x75   : > { %8890 = vmatprep.mubr.bf16.mxu1 %v9187_v29  ;;  %1938 = vmatprep.subr.bf16.mxu1 %v10919_v5 }
  0x76   : > { %8920 = vmatprep.subr.bf16.mxu0 %v9191_v30 }
  0x77   : > { %8921 = vmatpush3.bf16.msra.mxu0 %v9191_v30  ;;  %v9237_v30 = vld [vmem:[#allocation7 + $0x90] ss:$12 sps:$4 sm:$0xff]  }
  0x78   : > { %1939 = vmatpush1.bf16.msra.mxu1 %v10922_v7  ;;  %8922 = vmatprep.subr.bf16.mxu0 %v9196_v31 }
  0x79   : > { %1940 = vmatprep.subr.bf16.mxu1 %v10925_v8 }
  0x7a   : > { %612 = vmatmul.mubr.bf16.gmra.mxu0 %v9185_v28 }
  0x7b   : > { %8891 = vmatmul.mubr.bf16.gmra.mxu1 %v9188_v32  ;;  %621 = vmatprep.mubr.bf16.mxu0 %v13983_v3 }
  0x7c   : > { %8894 = vmatprep.mubr.bf16.mxu1 %v9189_v33  ;;  %1941 = vmatpush1.bf16.msra.mxu1 %v10927_v10 }
  0x7d   : > { %8923 = vmatpush3.bf16.msra.mxu0 %v9196_v31  ;;  %1942 = vmatprep.subr.bf16.mxu1 %v10930_v11 }
  0x7e   : > { %8924 = vmatprep.subr.bf16.mxu0 %v9201_v34 }
  0x80   : > { %1943 = vmatpush1.bf16.msra.mxu1 %v10934_v13 }
  0x81   : > { %8925 = vmatpush3.bf16.msra.mxu0 %v9201_v34  ;;  %1944 = vmatprep.subr.bf16.mxu1 %v10937_v14  ;;  %v9244_v34 = vld [vmem:[#allocation7 + $0x7c] ss:$12 sps:$4 sm:$0xff]  }
  0x82   : > { %8926 = vmatprep.subr.bf16.mxu0 %v9206_v35  ;;  %622 = vmatmul.mubr.bf16.gmra.mxu0 %v9187_v29 }
  0x83   : > { %8895 = vmatmul.mubr.bf16.gmra.mxu1 %v9190_v36  ;;  %631 = vmatprep.mubr.bf16.mxu0 %v13983_v3 }
  0x84   : > { %8898 = vmatprep.mubr.bf16.mxu1 %v9192_v37  ;;  %1945 = vmatpush1.bf16.msra.mxu1 %v10939_v16 }
  0x85   : > { %8927 = vmatpush3.bf16.msra.mxu0 %v9206_v35  ;;  %1946 = vmatprep.subr.bf16.mxu1 %v10942_v17  ;;  %v9256_v35 = vld [vmem:[#allocation7 + $0x80] ss:$12 sps:$4 sm:$0xff]  }
  0x86   : > { %8928 = vmatprep.subr.bf16.mxu0 %v9210_v38 }
  0x88   : > { %1947 = vmatpush1.bf16.msra.mxu1 %v10945_v19 }
  0x89   : > { %8929 = vmatpush3.bf16.msra.mxu0 %v9210_v38  ;;  %1948 = vmatprep.subr.bf16.mxu1 %v10949_v21 }
  0x8a   : > { %8930 = vmatprep.subr.bf16.mxu0 %v9214_v39  ;;  %632 = vmatmul.mubr.bf16.gmra.mxu0 %v9188_v32 }
  0x8b   : > { %8899 = vmatmul.mubr.bf16.gmra.mxu1 %v9193_v40  ;;  %641 = vmatprep.mubr.bf16.mxu0 %v13983_v3 }
  0x8c   : > { %8902 = vmatprep.mubr.bf16.mxu1 %v9194_v41  ;;  %1949 = vmatpush1.bf16.msra.mxu1 %v10952_v23 }
  0x8d   : > { %8931 = vmatpush3.bf16.msra.mxu0 %v9214_v39  ;;  %1950 = vmatprep.subr.bf16.mxu1 %v10955_v24 }
  0x8e   : > { %8932 = vmatprep.subr.bf16.mxu0 %v9218_v42 }
  0x90   : > { %1951 = vmatpush1.bf16.msra.mxu1 %v10959_v26 }
  0x91   : > { %8933 = vmatpush3.bf16.msra.mxu0 %v9218_v42  ;;  %8966 = vmatprep.subr.bf16.mxu1 %v9205_v44 }
  0x92   : > { %3714 = vmatprep.subr.bf16.mxu0 %v10913_v1  ;;  %642 = vmatmul.mubr.bf16.gmra.mxu0 %v9189_v33 }
  0x93   : > { %8903 = vmatmul.mubr.bf16.gmra.mxu1 %v9195_v43  ;;  %651 = vmatprep.mubr.bf16.mxu0 %v13983_v3 }
  0x94   : > { %8906 = vmatprep.mubr.bf16.mxu1 %v9197_v45 }
  0x9a   : > { %652 = vmatmul.mubr.bf16.gmra.mxu0 %v9190_v36 }
  0x9b   : > { %8907 = vmatmul.mubr.bf16.gmra.mxu1 %v9198_v46  ;;  %661 = vmatprep.mubr.bf16.mxu0 %v13983_v3 }
  0x9c   : > { %8910 = vmatprep.mubr.bf16.mxu1 %v9199_v47 }
  0xa2   : > { %662 = vmatmul.mubr.bf16.gmra.mxu0 %v9192_v37 }
  0xa3   : > { %8911 = vmatmul.mubr.bf16.gmra.mxu1 %v9200_v48  ;;  %671 = vmatprep.mubr.bf16.mxu0 %v13983_v3 }
  0xa4   : > { %8914 = vmatprep.mubr.bf16.mxu1 %v11000_v49 }
  0xaa   : > { %672 = vmatmul.mubr.bf16.gmra.mxu0 %v9193_v40  ;;  %v11098_v40 = vld [vmem:[%s10900_s6 + $0x118] sm:$0xff]  }
  0xab   : > { %8915 = vmatmul.mubr.bf16.gmra.mxu1 %v11005_v50  ;;  %681 = vmatprep.mubr.bf16.mxu0 %v13983_v3 }
  0xac   : > { %1968 = vmatprep.mubr.bf16.mxu1 %v13983_v3 }
  0xb2   : > { %682 = vmatmul.mubr.bf16.gmra.mxu0 %v9194_v41 }
  0xb3   : > { %1969 = vmatmul.mubr.bf16.vlgmr.msra.gmra.mxu1 %v9204_v51  ;;  %691 = vmatprep.mubr.bf16.mxu0 %v13983_v3 }
  0xb4   : > { %8967 = vmatpush3.bf16.msra.mxu1 %v9205_v44  ;;  %1978 = vmatprep.mubr.bf16.mxu1 %v13983_v3  ;;  %v11102_v44 = vld [vmem:[%s10900_s6 + $0x120] sm:$0xff]  }
  0xb5   : > { %8968 = vmatprep.subr.bf16.mxu1 %v9209_v52 }
  0xb8   : > { %8969 = vmatpush3.bf16.msra.mxu1 %v9209_v52  ;;  %v9267_v52 = vld [vmem:[#allocation7 + $0x68] ss:$12 sps:$4 sm:$0xff]  }
  0xb9   : > { %8970 = vmatprep.subr.bf16.mxu1 %v9213_v53 }
  0xba   : > { %692 = vmatmul.mubr.bf16.gmra.mxu0 %v9195_v43 }
  0xbb   : > { %1979 = vmatmul.mubr.bf16.gmra.mxu1 %v9207_v54  ;;  %701 = vmatprep.mubr.bf16.mxu0 %v13983_v3 }
  0xbc   : > { %1988 = vmatprep.mubr.bf16.mxu1 %v13983_v3  ;;  %8971 = vmatpush3.bf16.msra.mxu1 %v9213_v53 }
  0xbd   : > { %8972 = vmatprep.subr.bf16.mxu1 %v9217_v55 }
  0xc0   : > { %8973 = vmatpush3.bf16.msra.mxu1 %v9217_v55 }
  0xc1   : > { %8974 = vmatprep.subr.bf16.mxu1 %v9221_v56 }
  0xc2   : > { %702 = vmatmul.mubr.bf16.gmra.mxu0 %v9197_v45 }
  0xc3   : > { %1989 = vmatmul.mubr.bf16.gmra.mxu1 %v9208_v57  ;;  %711 = vmatprep.mubr.bf16.mxu0 %v13983_v3 }
  0xc4   : > { %1998 = vmatprep.mubr.bf16.mxu1 %v13983_v3  ;;  %8975 = vmatpush3.bf16.msra.mxu1 %v9221_v56 }
  0xc5   : > { %8976 = vmatprep.subr.bf16.mxu1 %v9224_v58 }
  0xc8   : > { %8977 = vmatpush3.bf16.msra.mxu1 %v9224_v58 }
  0xc9   : > { %8978 = vmatprep.subr.bf16.mxu1 %v9227_v59 }
  0xca   : > { %712 = vmatmul.mubr.bf16.gmra.mxu0 %v9198_v46 }
  0xcb   : > { %1999 = vmatmul.mubr.bf16.gmra.mxu1 %v9211_v60  ;;  %721 = vmatprep.mubr.bf16.mxu0 %v13983_v3 }
  0xcc   : > { %2008 = vmatprep.mubr.bf16.mxu1 %v13983_v3  ;;  %8979 = vmatpush3.bf16.msra.mxu1 %v9227_v59 }
  0xcd   : > { %8980 = vmatprep.subr.bf16.mxu1 %v9230_v61 }
  0xd0   : > { %8981 = vmatpush3.bf16.msra.mxu1 %v9230_v61 }
  0xd1   : > { %5493 = vmatprep.subr.bf16.mxu1 %v10913_v1  ;;  %v9219_v1 = vld [vmem:[%s10900_s6 + $0xb8] sm:$0xff]  }
  0xd2   : > { %722 = vmatmul.mubr.bf16.gmra.mxu0 %v9199_v47 }
  0xd3   : > { %2009 = vmatmul.mubr.bf16.gmra.mxu1 %v9212_v62  ;;  %731 = vmatprep.mubr.bf16.mxu0 %v13983_v3 }
  0xd4   : > { %2018 = vmatprep.mubr.bf16.mxu1 %v13983_v3 }
  0xda   : > { %732 = vmatmul.mubr.bf16.gmra.mxu0 %v9200_v48  ;;  %v9242_v48 = vld [vmem:[#allocation7 + $0x78] ss:$12 sps:$4 sm:$0xff]  }
  0xdb   : > { %2019 = vmatmul.mubr.bf16.gmra.mxu1 %v9215_v63  ;;  %741 = vmatprep.mubr.bf16.mxu0 %v13983_v3 }
  0xdc   : > { %2028 = vmatprep.mubr.bf16.mxu1 %v13983_v3 }
  0xe2   : > { %742 = vmatmul.mubr.bf16.gmra.mxu0 %v11000_v49 }
  0xe3   : > { %2029 = vmatmul.mubr.bf16.gmra.mxu1 %v9216_v0  ;;  %751 = vmatprep.mubr.bf16.mxu0 %v13983_v3 }
  0xe4   : > { %2038 = vmatprep.mubr.bf16.mxu1 %v13983_v3 }
  0xea   : > { %752 = vmatmul.mubr.bf16.gmra.mxu0 %v11005_v50 }
  0xeb   : > { %2039 = vmatmul.mubr.bf16.gmra.mxu1 %v9219_v1  ;;  %8934 = vmatprep.mubr.bf16.mxu0 %v9204_v51  ;;  %v9250_v51 = vld [vmem:[#allocation7 + $0x64] ss:$12 sps:$4 sm:$0xff]  }
  0xec   : > { %2048 = vmatprep.mubr.bf16.mxu1 %v13983_v3 }
  0xf2   : > { %8935 = vmatmul.mubr.bf16.vlgmr.msra.gmra.mxu0 %v9207_v54 }
  0xf3   : > { %2049 = vmatmul.mubr.bf16.gmra.mxu1 %v9220_v2  ;;  %3715 = vmatpush1.bf16.msra.mxu0 %v10917_v4 }
  0xf4   : > { %2058 = vmatprep.mubr.bf16.mxu1 %v13983_v3  ;;  %8938 = vmatprep.mubr.bf16.mxu0 %v9208_v57 }
  0xf5   : > { %3716 = vmatprep.subr.bf16.mxu0 %v10919_v5  ;;  %v9225_v5 = vld [vmem:[%s10900_s6 + $0xd8] sm:$0xff]  }
  0xf7   : > { %3717 = vmatpush1.bf16.msra.mxu0 %v10922_v7  ;;  %v9234_v7 = vld [vmem:[#allocation7 + $0xb0] ss:$12 sps:$4 sm:$0xff]  }
  0xf8   : > { %3718 = vmatprep.subr.bf16.mxu0 %v10925_v8  ;;  %v9226_v8 = vld [vmem:[%s10900_s6 + $0xe0] sm:$0xff]  }
  0xfa   : > { %8939 = vmatmul.mubr.bf16.gmra.mxu0 %v9211_v60 }
  0xfb   : > { %2059 = vmatmul.mubr.bf16.gmra.mxu1 %v9222_v6  ;;  %8942 = vmatprep.mubr.bf16.mxu0 %v9212_v62  ;;  %v9248_v62 = vld [vmem:[#allocation7 + $0x60] ss:$12 sps:$4 sm:$0xff]  }
  0xfc   : > { %2068 = vmatprep.mubr.bf16.mxu1 %v13983_v3  ;;  %3719 = vmatpush1.bf16.msra.mxu0 %v10927_v10  ;;  %v9228_v10 = vld [vmem:[%s10900_s6 + $0xe8] sm:$0xff]  }
  0xfd   : > { %3720 = vmatprep.subr.bf16.mxu0 %v10930_v11  ;;  %v9229_v11 = vld [vmem:[%s10900_s6 + $0xf0] sm:$0xff]  }
 0x100   : > { %3721 = vmatpush1.bf16.msra.mxu0 %v10934_v13  ;;  %v9231_v13 = vld [vmem:[%s10900_s6 + $0xf8] sm:$0xff]  }
 0x101   : > { %3722 = vmatprep.subr.bf16.mxu0 %v10937_v14  ;;  %v9232_v14 = vld [vmem:[%s10900_s6 + $0x100] sm:$0xff]  }
 0x102   : > { %8943 = vmatmul.mubr.bf16.gmra.mxu0 %v9215_v63 }
 0x103   : > { %2069 = vmatmul.mubr.bf16.gmra.mxu1 %v9223_v9  ;;  %8946 = vmatprep.mubr.bf16.mxu0 %v9216_v0 }
 0x104   : > { %2078 = vmatprep.mubr.bf16.mxu1 %v13983_v3  ;;  %3723 = vmatpush1.bf16.msra.mxu0 %v10939_v16  ;;  %v11068_v16 = vsub.s32 2, %v331_v15 }
 0x105   : > { %3724 = vmatprep.subr.bf16.mxu0 %v10942_v17  ;;  %v328_v17 = vld [vmem:[%s13976_s2] sm:$0x7] }
 0x106   : > { %14009 = vst [vmem:[#allocation17_spill] sm:$0xff] %v11068_v16  ;;  %v11082_v22 = vrot.slane %v328_v17, %v11073_v18 }
 0x108   : > { %3725 = vmatpush1.bf16.msra.mxu0 %v10945_v19  ;;  %v11075_v19 = vsub.s32 1, %v331_v15  ;;  %v9253_v15 = vld [vmem:[#allocation7 + $0x48] ss:$12 sps:$4 sm:$0xff]  }
 0x109   : > { %3726 = vmatprep.subr.bf16.mxu0 %v10949_v21  ;;  %v11079_v21 = vrot.slane %v328_v17, %v11068_v16 }
 0x10a   : > { %8947 = vmatmul.mubr.bf16.gmra.mxu0 %v9219_v1  ;;  %14011 = vst [vmem:[#allocation19_spill] sm:$0xff] %v11075_v19  ;;  %v9255_v1 = vld [vmem:[#allocation7 + $0x4c] ss:$12 sps:$4 sm:$0xff]  }
 0x10b   : > { %2079 = vmatmul.mubr.bf16.gmra.mxu1 %v9225_v5  ;;  %8950 = vmatprep.mubr.bf16.mxu0 %v9220_v2 }
 0x10c   : > { %2088 = vmatprep.mubr.bf16.mxu1 %v13983_v3  ;;  %3727 = vmatpush1.bf16.msra.mxu0 %v10952_v23  ;;  %v11085_v23 = vld [vmem:[%s10900_s6 + $0x110] sm:$0xff]  }
 0x10d   : > { %3728 = vmatprep.subr.bf16.mxu0 %v10955_v24  ;;  %v11088_v24 = vrot.slane %v328_v17, %v11075_v19 }
 0x110   : > { %3729 = vmatpush1.bf16.msra.mxu0 %v10959_v26  ;;  %v9245_v26 = vld [vmem:[#allocation7 + $0x98] ss:$12 sps:$4 sm:$0xff]  }
 0x111   : > { %9014 = vmatprep.subr.bf16.mxu0 %v9234_v7 }
 0x112   : > { %8951 = vmatmul.mubr.bf16.gmra.mxu0 %v9222_v6 }
 0x113   : > { %2089 = vmatmul.mubr.bf16.gmra.mxu1 %v9226_v8  ;;  %8954 = vmatprep.mubr.bf16.mxu0 %v9223_v9 }
 0x114   : > { %2098 = vmatprep.mubr.bf16.mxu1 %v13983_v3 }
 0x11a   : > { %8955 = vmatmul.mubr.bf16.gmra.mxu0 %v9225_v5  ;;  %v11115_v5 = vld [vmem:[%s10900_s6 + $0x128] sm:$0xff]  }
 0x11b   : > { %2099 = vmatmul.mubr.bf16.gmra.mxu1 %v9228_v10  ;;  %8958 = vmatprep.mubr.bf16.mxu0 %v9226_v8 }
 0x11c   : > { %2108 = vmatprep.mubr.bf16.mxu1 %v13983_v3 }
 0x122   : > { %8959 = vmatmul.mubr.bf16.gmra.mxu0 %v9228_v10 }
 0x123   : > { %2109 = vmatmul.mubr.bf16.gmra.mxu1 %v9229_v11  ;;  %8962 = vmatprep.mubr.bf16.mxu0 %v9229_v11  ;;  %v11119_v11 = vld [vmem:[%s10900_s6 + $0x130] sm:$0xff]  }
 0x124   : > { %2118 = vmatprep.mubr.bf16.mxu1 %v13983_v3 }
 0x12a   : > { %8963 = vmatmul.mubr.bf16.gmra.mxu0 %v9231_v13 }
 0x12b   : > { %2119 = vmatmul.mubr.bf16.gmra.mxu1 %v9231_v13  ;;  %3746 = vmatprep.mubr.bf16.mxu0 %v13983_v3 }
 0x12c   : > { %8982 = vmatprep.mubr.bf16.mxu1 %v9232_v14 }
 0x132   : > { %v603_v27 = vpop.f32.mrf.mxu0  ;;  %3747 = vmatmul.mubr.bf16.vlgmr.msra.gmra.mxu0 %v9232_v14 }
 0x133   : > { %v8888_v28 = vpop.f32.mrf.mxu1  ;;  %8983 = vmatmul.mubr.bf16.vlgmr.msra.gmra.mxu1 %v9233_v20  ;;  %9015 = vmatpush3.bf16.msra.mxu0 %v9234_v7  ;;  %v604_v31 = vadd.f32 %v603_v27, %v11082_v22 }
 0x134   : > { %v805_v29 = vadd.f32 %v8888_v28, %v11079_v21  ;;  %5494 = vmatpush1.bf16.msra.mxu1 %v10917_v4  ;;  %v605_v32 = vpop.f32.mrf.mxu0  ;;  %3756 = vmatprep.mubr.bf16.mxu0 %v13983_v3 }
 0x135   : > { %v796_v33 = vpop.f32.mrf.mxu1  ;;  %8986 = vmatprep.mubr.bf16.mxu1 %v11085_v23  ;;  %v606_v37 = vadd.f32 %v605_v32, %v11088_v24  ;;  %5495 = vmatprep.subr.bf16.mxu1 %v9239_v25  ;;  %v9261_v25 = vld [vmem:[#allocation7 + $0x34] ss:$12 sps:$4 sm:$0xff]  }
 0x136   : > { %v7630_v36 = vmul.f32 -1.442695, %v805_v29  ;;  %v797_v38 = vadd.f32 %v796_v33, %v11079_v21  ;;  %9016 = vmatprep.subr.bf16.mxu0 %v9245_v26  ;;  %v607_v4 = vpop.f32.mrf.mxu0 }
 0x137   : > { %v8889_v39 = vpop.f32.mrf.mxu1  ;;  %v7625_v41 = vmul.f32 -1.442695, %v606_v37  ;;  %v608_v43 = vadd.f32 %v607_v4, %v11082_v22  ;;  %9017 = vmatpush3.bf16.msra.mxu0 %v9245_v26  ;;  %v9274_v4 = vld [vmem:[#allocation7 + $0x50] ss:$12 sps:$4 sm:$0xff]  }
 0x138   : > { %9293 = vpow2.f32 %v7630_v36  ;;  %v7626_v42 = vmul.f32 -1.442695, %v797_v38  ;;  %5496 = vmatpush1.bf16.msra.mxu1 %v9237_v30  ;;  %v808_v45 = vadd.f32 %v8889_v39, %v11079_v21  ;;  %v609_v46 = vpop.f32.mrf.mxu0  ;;  %9018 = vmatprep.subr.bf16.mxu0 %v9256_v35  ;;  %v9266_v38 = vld [vmem:[#allocation7 + $0x1c] ss:$12 sps:$4 sm:$0xff]  }
 0x139   : > { %9295 = vtanh.f32 %v604_v31  ;;  %v799_v47 = vpop.f32.mrf.mxu1  ;;  %5497 = vmatprep.subr.bf16.mxu1 %v9244_v34  ;;  %v610_v49 = vadd.f32 %v609_v46, %v11088_v24 }
 0x13a   : > { %9297 = vpow2.f32 %v7625_v41  ;;  %v800_v50 = vadd.f32 %v799_v47, %v11079_v21  ;;  %v7632_v53 = vmul.f32 -1.442695, %v808_v45  ;;  %v613_v54 = vpop.f32.mrf.mxu0  ;;  %3757 = vmatmul.mubr.bf16.gmra.mxu0 %v9233_v20 }
 0x13b   : > { %9299 = vpow2.f32 %v7626_v42  ;;  %v8892_v55 = vpop.f32.mrf.mxu1  ;;  %8987 = vmatmul.mubr.bf16.gmra.mxu1 %v11098_v40  ;;  %v7627_v56 = vmul.f32 -1.442695, %v610_v49  ;;  %v614_v58 = vadd.f32 %v613_v54, %v11082_v22  ;;  %3766 = vmatprep.mubr.bf16.mxu0 %v13983_v3  ;;  %v11139_v49 = vld [vmem:[%s10900_s6 + $0x140] sm:$0xff]  }
 0x13c   : > { %9301 = vtanh.f32 %v608_v43  ;;  %v7628_v57 = vmul.f32 -1.442695, %v800_v50  ;;  %8990 = vmatprep.mubr.bf16.mxu1 %v11102_v44  ;;  %v821_v59 = vadd.f32 %v8892_v55, %v11079_v21  ;;  %v615_v60 = vpop.f32.mrf.mxu0  ;;  %5498 = vmatpush1.bf16.msra.mxu1 %v9242_v48  ;;  %v11135_v43 = vld [vmem:[%s10900_s6 + $0x138] sm:$0xff]  }
 0x13d   : > { %9303 = vpow2.f32 %v7632_v53  ;;  %v812_v61 = vpop.f32.mrf.mxu1  ;;  %9019 = vmatpush3.bf16.msra.mxu0 %v9256_v35  ;;  %v616_v63 = vadd.f32 %v615_v60, %v11088_v24  ;;  %5499 = vmatprep.subr.bf16.mxu1 %v9250_v51  ;;  %v9264_v54 = vld [vmem:[#allocation7 + $0x18] ss:$12 sps:$4 sm:$0xff]  }
 0x13e   : > { %9305 = vpow2.f32 %v7627_v56  ;;  %v813_v0 = vadd.f32 %v812_v61, %v11079_v21  ;;  %9020 = vmatprep.subr.bf16.mxu0 %v9267_v52  ;;  %v7638_v2 = vmul.f32 -1.442695, %v821_v59  ;;  %v617_v6 = vpop.f32.mrf.mxu0  ;;  %v9272_v56 = vld [vmem:[#allocation7 + $0x4] ss:$12 sps:$4 sm:$0xff]  }
 0x13f   : > { %9307 = vpow2.f32 %v7628_v57  ;;  %v8893_v9 = vpop.f32.mrf.mxu1  ;;  %v7629_v7 = vmul.f32 -1.442695, %v616_v63  ;;  %v618_v10 = vadd.f32 %v617_v6, %v11082_v22 }
 0x140   : > { %9309 = vtanh.f32 %v614_v58  ;;  %v7634_v8 = vmul.f32 -1.442695, %v813_v0  ;;  %v824_v12 = vadd.f32 %v8893_v9, %v11079_v21  ;;  %v619_v13 = vpop.f32.mrf.mxu0  ;;  %5500 = vmatpush1.bf16.msra.mxu1 %v9248_v62 }
 0x141   : > { %9311 = vpow2.f32 %v7638_v2  ;;  %v815_v14 = vpop.f32.mrf.mxu1  ;;  %9021 = vmatpush3.bf16.msra.mxu0 %v9267_v52  ;;  %v620_v17 = vadd.f32 %v619_v13, %v11088_v24  ;;  %5501 = vmatprep.subr.bf16.mxu1 %v9255_v1 }
 0x142   : > { %9313 = vpow2.f32 %v7629_v7  ;;  %v816_v20 = vadd.f32 %v815_v14, %v11079_v21  ;;  %v7640_v26 = vmul.f32 -1.442695, %v824_v12  ;;  %v623_v27 = vpop.f32.mrf.mxu0  ;;  %3767 = vmatmul.mubr.bf16.gmra.mxu0 %v11085_v23  ;;  %v9259_v23 = vld [vmem:[#allocation7 + $0x30] ss:$12 sps:$4 sm:$0xff]   ;;  %9022 = vmatprep.subr.bf16.mxu0 %v9274_v4  ;;  %v11161_v14 = vld [vmem:[%s10900_s6 + $0x148] sm:$0xff]  }
 0x143   : > { %9315 = vpow2.f32 %v7634_v8  ;;  %v8896_v28 = vpop.f32.mrf.mxu1  ;;  %8991 = vmatmul.mubr.bf16.gmra.mxu1 %v11115_v5  ;;  %v7631_v29 = vmul.f32 -1.442695, %v620_v17  ;;  %3776 = vmatprep.mubr.bf16.mxu0 %v13983_v3  ;;  %v624_v32 = vadd.f32 %v623_v27, %v11082_v22 }
 0x144   : > { %9317 = vtanh.f32 %v618_v10  ;;  %v7636_v30 = vmul.f32 -1.442695, %v816_v20  ;;  %8994 = vmatprep.mubr.bf16.mxu1 %v11119_v11  ;;  %v837_v33 = vadd.f32 %v8896_v28, %v11079_v21  ;;  %v625_v34 = vpop.f32.mrf.mxu0  ;;  %5502 = vmatpush1.bf16.msra.mxu1 %v9253_v15 }
 0x145   : > { %v9294_v31 = vpop.eup %9293  ;;  %9319 = vpow2.f32 %v7640_v26  ;;  %v828_v35 = vpop.f32.mrf.mxu1  ;;  %5503 = vmatprep.subr.bf16.mxu1 %v9261_v25  ;;  %v626_v48 = vadd.f32 %v625_v34, %v11088_v24  ;;  %9023 = vmatpush3.bf16.msra.mxu0 %v9274_v4  ;;  %v11164_v25 = vld [vmem:[%s10900_s6 + $0x150] sm:$0xff]  }
 0x146   : > { %v11130_v36 = vpop.eup %9295  ;;  %v1376_v37 = vadd.f32 1.0, %v9294_v31  ;;  %9321 = vpow2.f32 %v7631_v29  ;;  %v11132_v41 = vpop.f32.mrf.mxu0  ;;  %v7646_v47 = vmul.f32 -1.442695, %v837_v33  ;;  %v829_v0 = vadd.f32 %v828_v35, %v11079_v21  ;;  %v1627_v34 = vld [vmem:[#allocation2 + $0x10] sm:$0xff] }
 0x147   : > { %v9298_v39 = vpop.eup %9297  ;;  %9323 = vpow2.f32 %v7636_v30  ;;  %v8897_v42 = vpop.f32.mrf.mxu1  ;;  %v7633_v63 = vmul.f32 -1.442695, %v626_v48 }
 0x148   : > { %v9300_v45 = vpop.eup %9299  ;;  %9325 = vrcp.f32 %v1376_v37  ;;  %v1371_v46 = vadd.f32 1.0, %v9298_v39  ;;  %v629_v52 = vpop.f32.mrf.mxu0  ;;  %5504 = vmatpush1.bf16.msra.mxu1 %v9259_v23  ;;  %v7642_v20 = vmul.f32 -1.442695, %v829_v0  ;;  %v840_v28 = vadd.f32 %v8897_v42, %v11079_v21 }
 0x149   : > { %v11141_v50 = vpop.eup %9301  ;;  %v1372_v51 = vadd.f32 1.0, %v9300_v45  ;;  %9327 = vtanh.f32 %v624_v32  ;;  %v831_v53 = vpop.f32.mrf.mxu1  ;;  %5505 = vmatprep.subr.bf16.mxu1 %v9266_v38  ;;  %v630_v32 = vadd.f32 %v629_v52, %v11088_v24  ;;  %v628_v42 = vadd.f32 %v11132_v41, %v11082_v22 }
 0x14a   : > { %v9304_v55 = vpop.eup %9303  ;;  %9329 = vrcp.f32 %v1371_v46  ;;  %v11143_v59 = vpop.f32.mrf.mxu0  ;;  %3777 = vmatmul.mubr.bf16.gmra.mxu0 %v11098_v40  ;;  %v9270_v40 = vld [vmem:[#allocation7] ss:$12 sps:$4 sm:$0xff]   ;;  %v832_v23 = vadd.f32 %v831_v53, %v11079_v21  ;;  %v3009_v41 = vsub.f32 %v11130_v36, %v1627_v34  ;;  %v11203_v36 = vld [vmem:[#allocation2 + $0x18] sm:$0xff] }
 0x14b   : > { %v9306_v57 = vpop.eup %9305  ;;  %9331 = vrcp.f32 %v1372_v51  ;;  %v1378_v58 = vadd.f32 1.0, %v9304_v55  ;;  %v11145_v60 = vpop.f32.mrf.mxu1  ;;  %8995 = vmatmul.mubr.bf16.gmra.mxu1 %v11135_v43  ;;  %3786 = vmatprep.mubr.bf16.mxu0 %v13983_v3  ;;  %v7635_v53 = vmul.f32 -1.442695, %v630_v32 }
 0x14c   : > { %v9308_v61 = vpop.eup %9307  ;;  %v1373_v62 = vadd.f32 1.0, %v9306_v57  ;;  %9333 = vpow2.f32 %v7646_v47  ;;  %8998 = vmatprep.mubr.bf16.mxu1 %v11139_v49  ;;  %v635_v6 = vpop.f32.mrf.mxu0  ;;  %5506 = vmatpush1.bf16.msra.mxu1 %v9264_v54  ;;  %v7648_v47 = vmul.f32 -1.442695, %v840_v28  ;;  %v853_v54 = vadd.f32 %v11145_v60, %v11079_v21  ;;  %v11208_v60 = vld [vmem:[%s10900_s6 + $0x160] sm:$0xff]  }
 0x14d   : > { %v11152_v1 = vpop.eup %9309  ;;  %9335 = vrcp.f32 %v1378_v58  ;;  %v1374_v2 = vadd.f32 1.0, %v9308_v61  ;;  %v11154_v9 = vpop.f32.mrf.mxu1  ;;  %5507 = vmatprep.subr.bf16.mxu1 %v9272_v56  ;;  %v1628_v56 = vld [vmem:[#allocation2] sm:$0xff]  ;;  %v7644_v57 = vmul.f32 -1.442695, %v832_v23  ;;  %v636_v58 = vadd.f32 %v635_v6, %v11088_v24 }
 0x14e   : > { %v9312_v7 = vpop.eup %9311  ;;  %9337 = vrcp.f32 %v1373_v62  ;;  %v11156_v12 = vpop.f32.mrf.mxu0  ;;  %v634_v6 = vadd.f32 %v11143_v59, %v11082_v22 }
 0x14f   : > { %v9314_v8 = vpop.eup %9313  ;;  %9339 = vrcp.f32 %v1374_v2  ;;  %v1384_v10 = vadd.f32 1.0, %v9312_v7  ;;  %v11158_v13 = vpop.f32.mrf.mxu1  ;;  %v7637_v59 = vmul.f32 -1.442695, %v636_v58 }
 0x150   : > { %v9316_v15 = vpop.eup %9315  ;;  %v1375_v17 = vadd.f32 1.0, %v9314_v8  ;;  %9341 = vpow2.f32 %v7633_v63  ;;  %v11169_v29 = vpop.f32.mrf.mxu0  ;;  %5508 = vmatpush1.bf16.msra.mxu1 %v9270_v40  ;;  %v11201_v63 = vld [vmem:[%s10900_s6 + $0x158] sm:$0xff]   ;;  %v845_v40 = vadd.f32 %v11154_v9, %v11079_v21  ;;  %v7654_v9 = vmul.f32 -1.442695, %v853_v54 }
 0x151   : > { %v11166_v26 = vpop.eup %9317  ;;  %9343 = vrcp.f32 %v1384_v10  ;;  %v1380_v27 = vadd.f32 1.0, %v9316_v15  ;;  %v11171_v30 = vpop.f32.mrf.mxu1  ;;  %v856_v32 = vadd.f32 %v11158_v13, %v11079_v21  ;;  %v638_v13 = vadd.f32 %v11156_v12, %v11082_v22 }
 0x152   : > { %v9320_v31 = vpop.eup %9319  ;;  %9345 = vrcp.f32 %v1375_v17  ;;  %v11175_v37 = vpop.f32.mrf.mxu0  ;;  %3787 = vmatmul.mubr.bf16.gmra.mxu0 %v11102_v44 }
 0x153   : > { %v9322_v33 = vpop.eup %9321  ;;  %9347 = vrcp.f32 %v1380_v27  ;;  %v1386_v35 = vadd.f32 1.0, %v9320_v31  ;;  %v8904_v38 = vpop.f32.mrf.mxu1  ;;  %8999 = vmatmul.mubr.bf16.gmra.mxu1 %v11161_v14  ;;  %3796 = vmatprep.mubr.bf16.mxu0 %v13983_v3  ;;  %v3011_v31 = vsub.f32 %v11152_v1, %v11203_v36  ;;  %v9277_v1 = vld [vmem:[#allocation7 + $0x38] ss:$12 sps:$4 sm:$0xff]  }
 0x154   : > { %v9324_v4 = vpop.eup %9323  ;;  %v1377_v39 = vadd.f32 1.0, %v9322_v33  ;;  %9349 = vpow2.f32 %v7642_v20  ;;  %9002 = vmatprep.mubr.bf16.mxu1 %v11164_v25  ;;  %v11186_v44 = vadd.f32 %v8904_v38, %v11079_v21  ;;  %v11188_v48 = vpop.f32.mrf.mxu0  ;;  %v3010_v20 = vsub.f32 %v11141_v50, %v1628_v56  ;;  %9024 = vmatprep.subr.bf16.mxu0 %v9277_v1 }
 0x155   : > { %v11183_v45 = vpop.eup %9325  ;;  %9351 = vrcp.f32 %v1386_v35  ;;  %v1382_v46 = vadd.f32 1.0, %v9324_v4  ;;  %v11190_v51 = vpop.f32.mrf.mxu1  ;;  %v7650_v4 = vmul.f32 -1.442695, %v845_v40  ;;  %9025 = vmatpush3.bf16.msra.mxu0 %v9277_v1 }
 0x156   : > { %v11192_v52 = vpop.eup %9327  ;;  %9353 = vrcp.f32 %v1377_v39  ;;  %v11198_v61 = vpop.f32.mrf.mxu0 }
 0x157   : > { %v9330_v55 = vpop.eup %9329  ;;  %9355 = vrcp.f32 %v1382_v46  ;;  %v8905_v62 = vpop.f32.mrf.mxu1 }
 0x158   : > { %v9332_v0 = vpop.eup %9331  ;;  %v3013_v2 = vmul.f32 %v9330_v55, %v3009_v41  ;;  %9357 = vtanh.f32 %v628_v42  ;;  %v11213_v8 = vadd.f32 %v8905_v62, %v11079_v21  ;;  %v11215_v10 = vpop.f32.mrf.mxu0  ;;  %v7656_v55 = vmul.f32 -1.442695, %v856_v32  ;;  %v11255_v62 = vld [vmem:[%s10900_s6 + $0x168] sm:$0xff]  }
 0x159   : > { %v9334_v7 = vpop.eup %9333  ;;  %9359 = vpow2.f32 %v7648_v47  ;;  %v11217_v15 = vpop.f32.mrf.mxu1 }
 0x15a   : > { %v11219_v17 = vpop.eup %9335  ;;  %v1392_v27 = vadd.f32 1.0, %v9334_v7  ;;  %9361 = vpow2.f32 %v7635_v53  ;;  %v11226_v33 = vpop.f32.mrf.mxu0  ;;  %3797 = vmatmul.mubr.bf16.gmra.mxu0 %v11115_v5  ;;  %v11230_v23 = vadd.f32 %v3013_v2, %v1627_v34  ;;  %v640_v5 = vadd.f32 %v11169_v29, %v11088_v24  ;;  %v1630_v53 = vld [vmem:[#allocation2 + $0x8] sm:$0xff] }
 0x15b   : > { %v9338_v28 = vpop.eup %9337  ;;  %9363 = vpow2.f32 %v7644_v57  ;;  %v8908_v35 = vpop.f32.mrf.mxu1  ;;  %9003 = vmatmul.mubr.bf16.gmra.mxu1 %v11201_v63  ;;  %3806 = vmatprep.mubr.bf16.mxu0 %v13983_v3  ;;  %v848_v34 = vadd.f32 %v11171_v30, %v11079_v21 }
 0x15c   : > { %v9340_v50 = vpop.eup %9339  ;;  %v3014_v38 = vmul.f32 %v9338_v28, %v3010_v20  ;;  %9365 = vrcp.f32 %v1392_v27  ;;  %9006 = vmatprep.mubr.bf16.mxu1 %v11208_v60  ;;  %v11240_v42 = vpop.f32.mrf.mxu0  ;;  %v11247_v12 = vadd.f32 %v8908_v35, %v11079_v21  ;;  %v3021_v2 = vmul.f32 %v9332_v0, %v11230_v23 }
 0x15d   : > { %v9342_v39 = vpop.eup %9341  ;;  %9367 = vtanh.f32 %v634_v6  ;;  %v876_v46 = vpop.f32.mrf.mxu1  ;;  %v11262_v6 = vld [vmem:[%s10900_s6 + $0x170] sm:$0xff]   ;;  %v3012_v27 = vsub.f32 %v11166_v26, %v1630_v53  ;;  %v7652_v28 = vmul.f32 -1.442695, %v848_v34  ;;  %v646_v26 = vadd.f32 %v11188_v48, %v11088_v24 }
 0x15e   : > { %v11242_v47 = vpop.eup %9343  ;;  %v11244_v41 = vadd.f32 %v3014_v38, %v1628_v56  ;;  %v1379_v54 = vadd.f32 1.0, %v9342_v39  ;;  %9369 = vpow2.f32 %v7654_v9  ;;  %v11250_v30 = vadd.f32 %v876_v46, %v11079_v21  ;;  %v11252_v57 = vpop.f32.mrf.mxu0  ;;  %14012 = vst [vmem:[#allocation20_spill] sm:$0xff] %v11262_v6 }
 0x15f   : > { %v9346_v29 = vpop.eup %9345  ;;  %9371 = vpow2.f32 %v7637_v59  ;;  %v8909_v58 = vpop.f32.mrf.mxu1  ;;  %v7639_v9 = vmul.f32 -1.442695, %v640_v5  ;;  %v7662_v34 = vmul.f32 -1.442695, %v11186_v44 }
 0x160   : > { %v11257_v56 = vpop.eup %9347  ;;  %v3022_v40 = vmul.f32 %v9340_v50, %v11244_v41  ;;  %v3015_v7 = vmul.f32 %v9346_v29, %v3011_v31  ;;  %9373 = vrcp.f32 %v1379_v54  ;;  %v11265_v59 = vpop.f32.mrf.mxu0  ;;  %v644_v31 = vadd.f32 %v11175_v37, %v11082_v22 }
 0x161   : > { %v9350_v20 = vpop.eup %9349  ;;  %9375 = vpow2.f32 %v7650_v4  ;;  %v879_v32 = vpop.f32.mrf.mxu1  ;;  %v11274_v4 = vadd.f32 %v8909_v58, %v11079_v21 }
 0x162   : > { %v11267_v35 = vpop.eup %9351  ;;  %v8394_v38 = vpack.c.bf16 %v3022_v40, %v3021_v2  ;;  %v1388_v0 = vadd.f32 1.0, %v9350_v20  ;;  %9377 = vtanh.f32 %v638_v13  ;;  %v11277_v1 = vadd.f32 %v879_v32, %v11079_v21  ;;  %v11279_v39 = vpop.f32.mrf.mxu0  ;;  %3807 = vmatmul.mubr.bf16.gmra.mxu0 %v11119_v11 }
 0x163   : > { %v9354_v50 = vpop.eup %9353  ;;  %9379 = vpow2.f32 %v7656_v55  ;;  %v8912_v5 = vpop.f32.mrf.mxu1  ;;  %9007 = vmatmul.mubr.bf16.gmra.mxu1 %v11255_v62  ;;  %v11287_v37 = vadd.f32 %v3015_v7, %v11203_v36  ;;  %3816 = vmatprep.mubr.bf16.mxu0 %v13983_v3  ;;  %v861_v11 = vadd.f32 %v11190_v51, %v11079_v21  ;;  %v7641_v40 = vmul.f32 -1.442695, %v646_v26 }
 0x164   : > { %v11283_v13 = vpop.eup %9355  ;;  %8395 = vst [vmem:[%s10910_s1] sm:$0xff] %v8394_v38   ;;  %v3016_v48 = vmul.f32 %v9354_v50, %v3012_v27  ;;  %9381 = vrcp.f32 %v1388_v0  ;;  %9010 = vmatprep.mubr.bf16.mxu1 %v11262_v6  ;;  %v11296_v54 = vpop.f32.mrf.mxu0  ;;  %v11301_v44 = vadd.f32 %v8912_v5, %v11079_v21  ;;  %v11309_v27 = vld [vmem:[%s10900_s6 + $0x178] sm:$0xff]   ;;  %v9280_v38 = vld [vmem:[#allocation7 + $0x20] ss:$12 sps:$4 sm:$0xff]  }
 0x165   : > { %v11292_v46 = vpop.eup %9357  ;;  %9383 = vpow2.f32 %v7639_v9  ;;  %v892_v29 = vpop.f32.mrf.mxu1  ;;  %14013 = vst [vmem:[#allocation21_spill] sm:$0xff] %v11309_v27  ;;  %v7658_v50 = vmul.f32 -1.442695, %v861_v11  ;;  %9026 = vmatprep.subr.bf16.mxu0 %v9280_v38 }
 0x166   : > { %v9360_v36 = vpop.eup %9359  ;;  %v11298_v55 = vadd.f32 %v3016_v48, %v1630_v53  ;;  %9385 = vpow2.f32 %v7652_v28  ;;  %v11304_v7 = vadd.f32 %v892_v29, %v11079_v21  ;;  %v11306_v20 = vpop.f32.mrf.mxu0  ;;  %v3023_v53 = vmul.f32 %v11183_v45, %v11287_v37  ;;  %9027 = vmatpush3.bf16.msra.mxu0 %v9280_v38 }
 0x167   : > { %v9362_v58 = vpop.eup %9361  ;;  %v1394_v2 = vadd.f32 1.0, %v9360_v36  ;;  %9387 = vtanh.f32 %v644_v31  ;;  %v8913_v51 = vpop.f32.mrf.mxu1 }
 0x168   : > { %v9364_v9 = vpop.eup %9363  ;;  %v3024_v28 = vmul.f32 %v11219_v17, %v11298_v55  ;;  %v1381_v32 = vadd.f32 1.0, %v9362_v58  ;;  %9389 = vpow2.f32 %v7662_v34  ;;  %v11317_v26 = vpop.f32.mrf.mxu0  ;;  %v11322_v45 = vadd.f32 %v8913_v51, %v11079_v21 }
 0x169   : > { %v11315_v0 = vpop.eup %9365  ;;  %9391 = vrcp.f32 %v1394_v2  ;;  %v1390_v31 = vadd.f32 1.0, %v9364_v9  ;;  %v895_v5 = vpop.f32.mrf.mxu1  ;;  %v648_v51 = vadd.f32 %v11198_v61, %v11082_v22  ;;  %v650_v9 = vadd.f32 %v11215_v10, %v11088_v24 }
 0x16a   : > { %14014 = vst [vmem:[#allocation22_spill] sm:$0xff] %v11315_v0  ;;  %v11319_v48 = vpop.eup %9367  ;;  %v8399_v29 = vpack.c.bf16 %v3024_v28, %v3023_v53  ;;  %9393 = vrcp.f32 %v1381_v32  ;;  %v11325_v34 = vadd.f32 %v895_v5, %v11079_v21  ;;  %v11327_v36 = vpop.f32.mrf.mxu0  ;;  %3817 = vmatmul.mubr.bf16.gmra.mxu0 %v11135_v43  ;;  %v864_v61 = vadd.f32 %v11217_v15, %v11079_v21 }
 0x16b   : > { %v9370_v17 = vpop.eup %9369  ;;  %9395 = vrcp.f32 %v1390_v31  ;;  %v8916_v11 = vpop.f32.mrf.mxu1  ;;  %9011 = vmatmul.mubr.bf16.gmra.mxu1 %v11309_v27  ;;  %3826 = vmatprep.mubr.bf16.mxu0 %v13983_v3 }
 0x16c   : > { %v9372_v58 = vpop.eup %9371  ;;  %8711 = vst [vmem:[%s10910_s1 + $0x8] sm:$0xff] %v8399_v29   ;;  %v1400_v2 = vadd.f32 1.0, %v9370_v17  ;;  %9397 = vpow2.f32 %v7641_v40  ;;  %5525 = vmatprep.mubr.bf16.mxu1 %v13983_v3  ;;  %v11338_v43 = vpop.f32.mrf.mxu0  ;;  %v7664_v40 = vmul.f32 -1.442695, %v11213_v8  ;;  %v11344_v10 = vadd.f32 %v8916_v11, %v11079_v21 }
 0x16d   : > { %v9374_v53 = vpop.eup %9373  ;;  %v1383_v28 = vadd.f32 1.0, %v9372_v58  ;;  %9399 = vpow2.f32 %v7658_v50  ;;  %v908_v32 = vpop.f32.mrf.mxu1  ;;  %v11354_v58 = vld [vmem:[%s10900_s6 + $0x180] sm:$0xff]   ;;  %v7643_v8 = vmul.f32 -1.442695, %v650_v9  ;;  %v656_v9 = vadd.f32 %v11240_v42, %v11088_v24  ;;  %v9283_v42 = vld [vmem:[#allocation7 + $0x8] ss:$12 sps:$4 sm:$0xff]  }
 0x16e   : > { %v9376_v31 = vpop.eup %9375  ;;  %9401 = vrcp.f32 %v1400_v2  ;;  %v11349_v50 = vadd.f32 %v908_v32, %v11079_v21  ;;  %v11351_v17 = vpop.f32.mrf.mxu0  ;;  %14015 = vst [vmem:[#allocation23_spill] sm:$0xff] %v11354_v58  ;;  %v3060_v32 = vsub.f32 %v11192_v52, %v11230_v23  ;;  %9028 = vmatprep.subr.bf16.mxu0 %v9283_v42 }
 0x16f   : > { %v11346_v5 = vpop.eup %9377  ;;  %9403 = vrcp.f32 %v1383_v28  ;;  %v1396_v29 = vadd.f32 1.0, %v9376_v31  ;;  %v8917_v38 = vpop.f32.mrf.mxu1  ;;  %v7660_v31 = vmul.f32 -1.442695, %v864_v61  ;;  %9029 = vmatpush3.bf16.msra.mxu0 %v9283_v42 }
 0x170   : > { %v9380_v2 = vpop.eup %9379  ;;  %9405 = vtanh.f32 %v648_v51  ;;  %v11358_v11 = vpop.f32.mrf.mxu0  ;;  %v11363_v27 = vadd.f32 %v8917_v38, %v11079_v21  ;;  %v14017_v38 = vmov 0  }
 0x171   : > { %v11356_v3 = vpop.eup %9381  ;;  %9407 = vrcp.f32 %v1396_v29  ;;  %v1402_v15 = vadd.f32 1.0, %v9380_v2  ;;  %v911_v16 = vpop.f32.mrf.mxu1 }
 0x172   : > { %v9384_v28 = vpop.eup %9383  ;;  %9409 = vpow2.f32 %v7664_v40  ;;  %v11368_v29 = vadd.f32 %v911_v16, %v11079_v21  ;;  %v11370_v2 = vpop.f32.mrf.mxu0  ;;  %3827 = vmatmul.mubr.bf16.gmra.mxu0 %v11139_v49  ;;  %v3064_v40 = vmul.f32 %v9374_v53, %v3060_v32  ;;  %v654_v21 = vadd.f32 %v11226_v33, %v11082_v22 }
 0x173   : > { %v9386_v6 = vpop.eup %9385  ;;  %9411 = vrcp.f32 %v1402_v15  ;;  %v1385_v51 = vadd.f32 1.0, %v9384_v28  ;;  %v11372_v0 = vpop.f32.mrf.mxu1  ;;  %5526 = vmatmul.mubr.bf16.vlgmr.msra.gmra.mxu1 %v11354_v58  ;;  %3836 = vmatprep.mubr.bf16.mxu0 %v14017_v38 }
 0x174   : > { %14016 = vst [vmem:[#allocation24_spill] sm:$0xff] %v11372_v0  ;;  %v11376_v52 = vpop.eup %9387  ;;  %v1398_v61 = vadd.f32 1.0, %v9386_v6  ;;  %9413 = vpow2.f32 %v7643_v8  ;;  %5535 = vmatprep.mubr.bf16.mxu1 %v14017_v38  ;;  %v11382_v15 = vpop.f32.mrf.mxu0  ;;  %v3061_v6 = vsub.f32 %v11292_v46, %v11244_v41  ;;  %v7670_v8 = vmul.f32 -1.442695, %v11247_v12  ;;  %v11396_v0 = vld [vmem:[%s10900_s6 + $0x188] sm:$0xff]  }
 0x175   : > { %v9390_v16 = vpop.eup %9389  ;;  %9415 = vrcp.f32 %v1385_v51  ;;  %v11384_v49 = vpop.f32.mrf.mxu1  ;;  %v7645_v51 = vmul.f32 -1.442695, %v656_v9  ;;  %14021 = vst [vmem:[#allocation28_spill] sm:$0xff] %v11396_v0  ;;  %v660_v12 = vadd.f32 %v11265_v59, %v11088_v24 }
 0x176   : > { %14018 = vst [vmem:[#allocation25_spill] sm:$0xff] %v11384_v49  ;;  %v11386_v28 = vpop.eup %9391  ;;  %9417 = vrcp.f32 %v1398_v61  ;;  %v1408_v53 = vadd.f32 1.0, %v9390_v16  ;;  %v11391_v58 = vpop.f32.mrf.mxu0 }
 0x177   : > { %14019 = vst [vmem:[#allocation26_spill] sm:$0xff] %v11386_v28  ;;  %v9394_v32 = vpop.eup %9393  ;;  %9419 = vpow2.f32 %v7660_v31  ;;  %v11393_v33 = vpop.f32.mrf.mxu1  ;;  %v11401_v28 = vadd.f32 %v3064_v40, %v11230_v23  ;;  %v7666_v23 = vmul.f32 -1.442695, %v11250_v30 }
 0x178   : > { %14020 = vst [vmem:[#allocation27_spill] sm:$0xff] %v11393_v33  ;;  %v11398_v49 = vpop.eup %9395  ;;  %v3065_v46 = vmul.f32 %v9394_v32, %v3061_v6  ;;  %9421 = vrcp.f32 %v1408_v53  ;;  %v11405_v31 = vpop.f32.mrf.mxu0  ;;  %v7672_v32 = vmul.f32 -1.442695, %v11274_v4 }
 0x179   : > { %v9398_v61 = vpop.eup %9397  ;;  %9423 = vtanh.f32 %v654_v21  ;;  %v11407_v9 = vpop.f32.mrf.mxu1  ;;  %v658_v21 = vadd.f32 %v11252_v57, %v11082_v22 }
 0x17a   : > { %v9400_v16 = vpop.eup %9399  ;;  %v11410_v33 = vadd.f32 %v3065_v46, %v11244_v41  ;;  %v1387_v42 = vadd.f32 1.0, %v9398_v61  ;;  %9425 = vpow2.f32 %v7670_v8  ;;  %v11417_v59 = vpop.f32.mrf.mxu0  ;;  %3837 = vmatmul.mubr.bf16.gmra.mxu0 %v11161_v14  ;;  %v3072_v8 = vmul.f32 %v11257_v56, %v11401_v28 }
 0x17b   : > { %v11413_v40 = vpop.eup %9401  ;;  %v1404_v6 = vadd.f32 1.0, %v9400_v16  ;;  %9427 = vpow2.f32 %v7645_v51  ;;  %v11419_v53 = vpop.f32.mrf.mxu1  ;;  %5536 = vmatmul.mubr.bf16.gmra.mxu1 %v11396_v0  ;;  %3846 = vmatprep.mubr.bf16.mxu0 %v14017_v38  ;;  %v3062_v14 = vsub.f32 %v11319_v48, %v11287_v37  ;;  %v7647_v51 = vmul.f32 -1.442695, %v660_v12  ;;  %v11446_v48 = vld [vmem:[%s10900_s6 + $0x190] sm:$0xff]  }
 0x17c   : > { %14022 = vst [vmem:[#allocation29_spill] sm:$0xff] %v11413_v40  ;;  %v9404_v41 = vpop.eup %9403  ;;  %v3073_v30 = vmul.f32 %v11283_v13, %v11410_v33  ;;  %9429 = vrcp.f32 %v1387_v42  ;;  %5545 = vmatprep.mubr.bf16.mxu1 %v14017_v38  ;;  %v11434_v56 = vpop.f32.mrf.mxu0  ;;  %v7668_v42 = vmul.f32 -1.442695, %v11277_v1  ;;  %v664_v1 = vadd.f32 %v11279_v39, %v11082_v22 }
 0x17d   : > { %v11430_v57 = vpop.eup %9405  ;;  %9431 = vrcp.f32 %v1404_v6  ;;  %v11436_v46 = vpop.f32.mrf.mxu1  ;;  %v3066_v16 = vmul.f32 %v9404_v41, %v3062_v14 }
 0x17e   : > { %v11438_v13 = vpop.eup %9407  ;;  %v8404_v4 = vpack.c.bf16 %v3073_v30, %v3072_v8  ;;  %9433 = vpow2.f32 %v7666_v23  ;;  %v11441_v40 = vpop.f32.mrf.mxu0  ;;  %v666_v8 = vadd.f32 %v11296_v54, %v11088_v24 }
 0x17f   : > { %v9410_v61 = vpop.eup %9409  ;;  %9435 = vtanh.f32 %v658_v21  ;;  %v11443_v0 = vpop.f32.mrf.mxu1  ;;  %v3063_v21 = vsub.f32 %v11346_v5, %v11298_v55  ;;  %v11465_v54 = vadd.f32 %v3066_v16, %v11287_v37 }
 0x180   : > { %v11448_v12 = vpop.eup %9411  ;;  %8712 = vst [vmem:[%s10910_s1 + $0x10] sm:$0xff] %v8404_v4   ;;  %v1410_v6 = vadd.f32 1.0, %v9410_v61  ;;  %9437 = vpow2.f32 %v7672_v32  ;;  %v11457_v41 = vpop.f32.mrf.mxu0  ;;  %v7678_v32 = vmul.f32 -1.442695, %v11301_v44 }
 0x181   : > { %14023 = vst [vmem:[#allocation30_spill] sm:$0xff] %v11448_v12  ;;  %v9414_v23 = vpop.eup %9413  ;;  %9439 = vpow2.f32 %v7647_v51  ;;  %v11459_v30 = vpop.f32.mrf.mxu1 }
 0x182   : > { %v9416_v14 = vpop.eup %9415  ;;  %9441 = vrcp.f32 %v1410_v6  ;;  %v1389_v4 = vadd.f32 1.0, %v9414_v23  ;;  %v11467_v5 = vpop.f32.mrf.mxu0  ;;  %3847 = vmatmul.mubr.bf16.gmra.mxu0 %v11164_v25  ;;  %v7649_v6 = vmul.f32 -1.442695, %v666_v8 }
 0x183   : > { %v11462_v61 = vpop.eup %9417  ;;  %v3067_v12 = vmul.f32 %v9416_v14, %v3063_v21  ;;  %9443 = vpow2.f32 %v7668_v42  ;;  %v11469_v51 = vpop.f32.mrf.mxu1  ;;  %5546 = vmatmul.mubr.bf16.gmra.mxu1 %v11446_v48  ;;  %3856 = vmatprep.mubr.bf16.mxu0 %v14017_v38  ;;  %v7674_v42 = vmul.f32 -1.442695, %v11304_v7  ;;  %v3074_v14 = vmul.f32 %v11242_v47, %v11465_v54 }
 0x184   : > { %14024 = vst [vmem:[#allocation31_spill] sm:$0xff] %v11469_v51  ;;  %v9420_v39 = vpop.eup %9419  ;;  %9445 = vrcp.f32 %v1389_v4  ;;  %5555 = vmatprep.mubr.bf16.mxu1 %v14017_v38  ;;  %v11481_v25 = vpop.f32.mrf.mxu0  ;;  %v668_v47 = vadd.f32 %v11306_v20, %v11082_v22 }
 0x185   : > { %v11475_v44 = vpop.eup %9421  ;;  %v11478_v37 = vadd.f32 %v3067_v12, %v11298_v55  ;;  %v1406_v16 = vadd.f32 1.0, %v9420_v39  ;;  %9447 = vtanh.f32 %v664_v1  ;;  %v11483_v23 = vpop.f32.mrf.mxu1  ;;  %v670_v55 = vadd.f32 %v11317_v26, %v11088_v24  ;;  %v11498_v1 = vld [vmem:[%s10900_s6 + $0x198] sm:$0xff]  }
 0x186   : > { %14025 = vst [vmem:[#allocation32_spill] sm:$0xff] %v11475_v44  ;;  %14026 = vst [vmem:[#allocation33_spill] sm:$0xff] %v11483_v23  ;;  %v11485_v21 = vpop.eup %9423  ;;  %9449 = vpow2.f32 %v7678_v32  ;;  %v11493_v12 = vpop.f32.mrf.mxu0 }
 0x187   : > { %v9426_v8 = vpop.eup %9425  ;;  %v3075_v4 = vmul.f32 %v11267_v35, %v11478_v37  ;;  %9451 = vrcp.f32 %v1406_v16  ;;  %14027 = vst [vmem:[#allocation34_spill] sm:$0xff] %v11493_v12  ;;  %v11495_v7 = vpop.f32.mrf.mxu1  ;;  %v7680_v16 = vmul.f32 -1.442695, %v11322_v45 }
 0x188   : > { %14028 = vst [vmem:[#allocation35_spill] sm:$0xff] %v11495_v7  ;;  %v9428_v39 = vpop.eup %9427  ;;  %v1416_v32 = vadd.f32 1.0, %v9426_v8  ;;  %9453 = vpow2.f32 %v7649_v6  ;;  %v11503_v26 = vpop.f32.mrf.mxu0  ;;  %v7651_v6 = vmul.f32 -1.442695, %v670_v55 }
 0x189   : > { %v9430_v44 = vpop.eup %9429  ;;  %v8409_v51 = vpack.c.bf16 %v3075_v4, %v3074_v14  ;;  %v1391_v35 = vadd.f32 1.0, %v9428_v39  ;;  %9455 = vpow2.f32 %v7674_v42  ;;  %v11505_v12 = vpop.f32.mrf.mxu1  ;;  %v3112_v42 = vsub.f32 %v11376_v52, %v11401_v28 }
 0x18a   : > { %v11507_v7 = vpop.eup %9431  ;;  %9457 = vrcp.f32 %v1416_v32  ;;  %v11510_v8 = vpop.f32.mrf.mxu0  ;;  %3857 = vmatmul.mubr.bf16.gmra.mxu0 %v11201_v63 }
 0x18b   : > { %14029 = vst [vmem:[#allocation36_spill] sm:$0xff] %v11507_v7  ;;  %v9434_v23 = vpop.eup %9433  ;;  %8713 = vst [vmem:[%s10910_s1 + $0x18] sm:$0xff] %v8409_v51   ;;  %9459 = vrcp.f32 %v1391_v35  ;;  %v11512_v20 = vpop.f32.mrf.mxu1  ;;  %5556 = vmatmul.mubr.bf16.gmra.mxu1 %v11498_v1  ;;  %3866 = vmatprep.mubr.bf16.mxu0 %v14017_v38  ;;  %v3116_v39 = vmul.f32 %v9430_v44, %v3112_v42  ;;  %v7676_v35 = vmul.f32 -1.442695, %v11325_v34 }
 0x18c   : > { %14030 = vst [vmem:[#allocation37_spill] sm:$0xff] %v11512_v20  ;;  %v11516_v45 = vpop.eup %9435  ;;  %v1412_v14 = vadd.f32 1.0, %v9434_v23  ;;  %9461 = vtanh.f32 %v668_v47  ;;  %5565 = vmatprep.mubr.bf16.mxu1 %v14017_v38  ;;  %v11522_v4 = vpop.f32.mrf.mxu0  ;;  %v676_v47 = vadd.f32 %v11338_v43, %v11088_v24  ;;  %v11536_v20 = vld [vmem:[%s10900_s6 + $0x1a0] sm:$0xff]   ;;  %v3113_v44 = vsub.f32 %v11430_v57, %v11410_v33 }
 0x18d   : > { %v9438_v51 = vpop.eup %9437  ;;  %9463 = vpow2.f32 %v7680_v16  ;;  %v11524_v55 = vpop.f32.mrf.mxu1  ;;  %v674_v34 = vadd.f32 %v11327_v36, %v11082_v22 }
 0x18e   : > { %14031 = vst [vmem:[#allocation38_spill] sm:$0xff] %v11524_v55  ;;  %v9440_v63 = vpop.eup %9439  ;;  %9465 = vrcp.f32 %v1412_v14  ;;  %v1418_v32 = vadd.f32 1.0, %v9438_v51  ;;  %v11531_v7 = vpop.f32.mrf.mxu0  ;;  %v7686_v14 = vmul.f32 -1.442695, %v11344_v10 }
 0x18f   : > { %v11527_v52 = vpop.eup %9441  ;;  %v1393_v23 = vadd.f32 1.0, %v9440_v63  ;;  %9467 = vpow2.f32 %v7651_v6  ;;  %v11533_v16 = vpop.f32.mrf.mxu1 }
 0x190   : > { %14032 = vst [vmem:[#allocation39_spill] sm:$0xff] %v11527_v52  ;;  %14033 = vst [vmem:[#allocation40_spill] sm:$0xff] %v11533_v16  ;;  %v9444_v55 = vpop.eup %9443  ;;  %9469 = vrcp.f32 %v1418_v32  ;;  %v11543_v43 = vpop.f32.mrf.mxu0  ;;  %v11550_v52 = vadd.f32 %v3116_v39, %v11401_v28  ;;  %v7653_v32 = vmul.f32 -1.442695, %v676_v47 }
 0x191   : > { %v9446_v42 = vpop.eup %9445  ;;  %9471 = vrcp.f32 %v1393_v23  ;;  %v1414_v6 = vadd.f32 1.0, %v9444_v55  ;;  %v11545_v51 = vpop.f32.mrf.mxu1 }
 0x192   : > { %v11547_v63 = vpop.eup %9447  ;;  %v3117_v16 = vmul.f32 %v9446_v42, %v3113_v44  ;;  %9473 = vpow2.f32 %v7676_v35  ;;  %v11552_v36 = vpop.f32.mrf.mxu0  ;;  %3867 = vmatmul.mubr.bf16.gmra.mxu0 %v11208_v60  ;;  %v7682_v35 = vmul.f32 -1.442695, %v11349_v50  ;;  %v680_v60 = vadd.f32 %v11358_v11, %v11088_v24 }
 0x193   : > { %v9450_v57 = vpop.eup %9449  ;;  %9475 = vrcp.f32 %v1414_v6  ;;  %v11554_v23 = vpop.f32.mrf.mxu1  ;;  %5566 = vmatmul.mubr.bf16.gmra.mxu1 %v11536_v20  ;;  %3876 = vmatprep.mubr.bf16.mxu0 %v14017_v38  ;;  %v678_v50 = vadd.f32 %v11351_v17, %v11082_v22  ;;  %v3114_v17 = vsub.f32 %v11485_v21, %v11465_v54 }
 0x194   : > { %14034 = vst [vmem:[#allocation41_spill] sm:$0xff] %v11554_v23  ;;  %v11558_v10 = vpop.eup %9451  ;;  %v11561_v55 = vadd.f32 %v3117_v16, %v11410_v33  ;;  %v1424_v28 = vadd.f32 1.0, %v9450_v57  ;;  %9477 = vtanh.f32 %v674_v34  ;;  %5575 = vmatprep.mubr.bf16.mxu1 %v14017_v38  ;;  %v11568_v47 = vpop.f32.mrf.mxu0  ;;  %v3124_v16 = vmul.f32 %v11356_v3, %v11550_v52 }
 0x195   : > { %v9454_v39 = vpop.eup %9453  ;;  %9479 = vpow2.f32 %v7686_v14  ;;  %v11570_v44 = vpop.f32.mrf.mxu1 }
 0x196   : > { %14035 = vst [vmem:[#allocation42_spill] sm:$0xff] %v11570_v44  ;;  %v9456_v33 = vpop.eup %9455  ;;  %v3125_v34 = vmul.f32 %v11398_v49, %v11561_v55  ;;  %9481 = vrcp.f32 %v1424_v28  ;;  %v1395_v42 = vadd.f32 1.0, %v9454_v39  ;;  %v11580_v11 = vpop.f32.mrf.mxu0  ;;  %v11585_v44 = vld [vmem:[%s10900_s6 + $0x1a8] sm:$0xff]   ;;  %v7688_v49 = vmul.f32 -1.442695, %v11363_v27 }
 0x197   : > { %v11576_v6 = vpop.eup %9457  ;;  %v1420_v14 = vadd.f32 1.0, %v9456_v33  ;;  %9483 = vpow2.f32 %v7653_v32  ;;  %14037 = vst [vmem:[#allocation44_spill] sm:$0xff] %v11580_v11  ;;  %v11582_v57 = vpop.f32.mrf.mxu1  ;;  %v1695_v28 = vld [vmem:[%s13976_s2] sm:$0x7] }
 0x198   : > { %14036 = vst [vmem:[#allocation43_spill] sm:$0xff] %v11576_v6  ;;  %14038 = vst [vmem:[#allocation45_spill] sm:$0xff] %v11582_v57  ;;  %v9460_v3 = vpop.eup %9459  ;;  %v8414_v23 = vpack.c.bf16 %v3125_v34, %v3124_v16  ;;  %9485 = vrcp.f32 %v1395_v42  ;;  %v11595_v39 = vpop.f32.mrf.mxu0  ;;  %v7655_v16 = vmul.f32 -1.442695, %v680_v60  ;;  %v11601_v27 = vrot.slane %v1695_v28, %v11075_v19 }
 0x199   : > { %v11591_v32 = vpop.eup %9461  ;;  %9487 = vrcp.f32 %v1420_v14  ;;  %v11597_v33 = vpop.f32.mrf.mxu1  ;;  %v3118_v42 = vmul.f32 %v9460_v3, %v3114_v17  ;;  %v11606_v11 = vrot.slane %v1695_v28, %v11073_v18  ;;  %v686_v60 = vadd.f32 %v11382_v15, %v11088_v24  ;;  %v14043_v28 = vld [vmem:[#allocation25_spill] sm:$0xff] }
 0x19a   : > { %v9464_v6 = vpop.eup %9463  ;;  %8714 = vst [vmem:[%s10910_s1 + $0x20] sm:$0xff] %v8414_v23   ;;  %9489 = vpow2.f32 %v7682_v35  ;;  %v11608_v21 = vpop.f32.mrf.mxu0  ;;  %3877 = vmatmul.mubr.bf16.gmra.mxu0 %v11255_v62  ;;  %v7684_v35 = vmul.f32 -1.442695, %v11368_v29  ;;  %v684_v3 = vadd.f32 %v11370_v2, %v11082_v22  ;;  %v1973_v17 = vadd.f32 %v14043_v28, %v11601_v27 }
 0x19b   : > { %v11603_v34 = vpop.eup %9465  ;;  %v1426_v57 = vadd.f32 1.0, %v9464_v6  ;;  %9491 = vtanh.f32 %v678_v50  ;;  %v11610_v14 = vpop.f32.mrf.mxu1  ;;  %5576 = vmatmul.mubr.bf16.gmra.mxu1 %v11585_v44  ;;  %3886 = vmatprep.mubr.bf16.mxu0 %v14017_v38  ;;  %v3115_v50 = vsub.f32 %v11516_v45, %v11478_v37  ;;  %v11632_v19 = vadd.f32 %v3118_v42, %v11465_v54 }
 0x19c   : > { %14039 = vst [vmem:[#allocation46_spill] sm:$0xff] %v11603_v34  ;;  %14040 = vst [vmem:[#allocation47_spill] sm:$0xff] %v11610_v14  ;;  %v9468_v23 = vpop.eup %9467  ;;  %9493 = vpow2.f32 %v7688_v49  ;;  %5585 = vmatprep.mubr.bf16.mxu1 %v14017_v38  ;;  %v11625_v49 = vpop.f32.mrf.mxu0  ;;  %v11641_v34 = vld [vmem:[%s10900_s6 + $0x1b0] sm:$0xff]   ;;  %v7657_v28 = vmul.f32 -1.442695, %v686_v60  ;;  %v14050_v60 = vld [vmem:[#allocation26_spill] sm:$0xff] }
 0x19d   : > { %v11619_v6 = vpop.eup %9469  ;;  %9495 = vrcp.f32 %v1426_v57  ;;  %v1397_v62 = vadd.f32 1.0, %v9468_v23  ;;  %v11627_v29 = vpop.f32.mrf.mxu1  ;;  %v14044_v57 = vld [vmem:[#allocation24_spill] sm:$0xff] }
 0x19e   : > { %14041 = vst [vmem:[#allocation48_spill] sm:$0xff] %v11619_v6  ;;  %14042 = vst [vmem:[#allocation49_spill] sm:$0xff] %v11627_v29  ;;  %v9472_v15 = vpop.eup %9471  ;;  %9497 = vpow2.f32 %v7655_v16  ;;  %v1971_v23 = vadd.f32 %v14044_v57, %v11606_v11  ;;  %v11636_v6 = vpop.f32.mrf.mxu0  ;;  %v690_v57 = vadd.f32 %v11405_v31, %v11088_v24  ;;  %v688_v31 = vadd.f32 %v11391_v58, %v11082_v22 }
 0x19f   : > { %v9474_v18 = vpop.eup %9473  ;;  %v3119_v45 = vmul.f32 %v9472_v15, %v3115_v50  ;;  %9499 = vrcp.f32 %v1397_v62  ;;  %v11638_v2 = vpop.f32.mrf.mxu1  ;;  %v7729_v15 = vmul.f32 -1.442695, %v1973_v17 }
 0x1a0   : > { %14045 = vst [vmem:[#allocation25_spill] sm:$0xff] %v11638_v2  ;;  %v11643_v29 = vpop.eup %9475  ;;  %v1422_v16 = vadd.f32 1.0, %v9474_v18  ;;  %9501 = vpow2.f32 %v7684_v35  ;;  %v11650_v42 = vpop.f32.mrf.mxu0  ;;  %v14049_v18 = vld [vmem:[#allocation22_spill] sm:$0xff] }
 0x1a1   : > { %14046 = vst [vmem:[#allocation24_spill] sm:$0xff] %v11643_v29  ;;  %v11645_v14 = vpop.eup %9477  ;;  %v11648_v54 = vadd.f32 %v3119_v45, %v11478_v37  ;;  %9503 = vtanh.f32 %v684_v3  ;;  %v11652_v50 = vpop.f32.mrf.mxu1  ;;  %v3126_v35 = vmul.f32 %v14049_v18, %v11632_v19 }
 0x1a2   : > { %14047 = vst [vmem:[#allocation50_spill] sm:$0xff] %v11652_v50  ;;  %v9480_v62 = vpop.eup %9479  ;;  %9505 = vrcp.f32 %v1422_v16  ;;  %v11662_v3 = vpop.f32.mrf.mxu0  ;;  %v14053_v50 = vld [vmem:[#allocation20_spill] sm:$0xff]  ;;  %v14054_v16 = vld [vmem:[#allocation27_spill] sm:$0xff] }
 0x1a3   : > { %v11656_v29 = vpop.eup %9481  ;;  %v3127_v37 = vmul.f32 %v14050_v60, %v11648_v54  ;;  %v1432_v45 = vadd.f32 1.0, %v9480_v62  ;;  %9507 = vtanh.f32 %v1971_v23  ;;  %14051 = vst [vmem:[#allocation22_spill] sm:$0xff] %v11662_v3  ;;  %v11664_v2 = vpop.f32.mrf.mxu1  ;;  %3887 = vmatmul.mubr.bf16.gmra.mxu0 %v14053_v50  ;;  %5586 = vmatmul.mubr.bf16.gmra.mxu1 %v11641_v34  ;;  %v1975_v18 = vadd.f32 %v14054_v16, %v11606_v11 }
 0x1a4   : > { %14048 = vst [vmem:[#allocation51_spill] sm:$0xff] %v11656_v29  ;;  %14052 = vst [vmem:[#allocation26_spill] sm:$0xff] %v11664_v2  ;;  %v9484_v17 = vpop.eup %9483  ;;  %9509 = vpow2.f32 %v7657_v28  ;;  %3896 = vmatprep.mubr.bf16.mxu0 %v14017_v38  ;;  %5595 = vmatprep.mubr.bf16.mxu1 %v14017_v38  ;;  %v1977_v60 = vadd.f32 %v11407_v9, %v11601_v27  ;;  %v11676_v29 = vpop.f32.mrf.mxu0  ;;  %v3164_v2 = vsub.f32 %v11547_v63, %v11550_v52 }
 0x1a5   : > { %v9486_v23 = vpop.eup %9485  ;;  %v8419_v62 = vpack.c.bf16 %v3127_v37, %v3126_v35  ;;  %9511 = vrcp.f32 %v1432_v45  ;;  %v1399_v50 = vadd.f32 1.0, %v9484_v17  ;;  %14055 = vst [vmem:[#allocation20_spill] sm:$0xff] %v11676_v29  ;;  %v11678_v28 = vpop.f32.mrf.mxu1  ;;  %v7659_v3 = vmul.f32 -1.442695, %v690_v57  ;;  %v11690_v45 = vld [vmem:[%s10900_s6 + $0x1b8] sm:$0xff]  }
 0x1a6   : > { %14056 = vst [vmem:[#allocation27_spill] sm:$0xff] %v11678_v28  ;;  %v11680_v58 = vpop.eup %9487  ;;  %9513 = vpow2.f32 %v7729_v15  ;;  %v11685_v35 = vpop.f32.mrf.mxu0  ;;  %v7731_v15 = vmul.f32 -1.442695, %v1977_v60  ;;  %v14061_v60 = vld [vmem:[#allocation21_spill] sm:$0xff] }
 0x1a7   : > { %14057 = vst [vmem:[#allocation52_spill] sm:$0xff] %v11680_v58  ;;  %v9490_v16 = vpop.eup %9489  ;;  %8715 = vst [vmem:[%s10910_s1 + $0x28] sm:$0xff] %v8419_v62   ;;  %9515 = vrcp.f32 %v1399_v50  ;;  %v11687_v37 = vpop.f32.mrf.mxu1  ;;  %v3168_v58 = vmul.f32 %v9486_v23, %v3164_v2  ;;  %v696_v50 = vadd.f32 %v11434_v56, %v11088_v24  ;;  %v694_v2 = vadd.f32 %v11417_v59, %v11082_v22 }
 0x1a8   : > { %14058 = vst [vmem:[#allocation53_spill] sm:$0xff] %v11687_v37  ;;  %v11692_v9 = vpop.eup %9491  ;;  %v1428_v17 = vadd.f32 1.0, %v9490_v16  ;;  %9517 = vtanh.f32 %v688_v31  ;;  %v11694_v62 = vpop.f32.mrf.mxu0  ;;  %v3165_v16 = vsub.f32 %v11591_v32, %v11561_v55  ;;  %v1983_v31 = vadd.f32 %v11436_v46, %v11601_v27  ;;  %v14062_v32 = vld [vmem:[#allocation23_spill] sm:$0xff] }
 0x1a9   : > { %v9494_v28 = vpop.eup %9493  ;;  %9519 = vtanh.f32 %v1975_v18  ;;  %v11696_v29 = vpop.f32.mrf.mxu1  ;;  %v11717_v59 = vadd.f32 %v3168_v58, %v11550_v52 }
 0x1aa   : > { %v11698_v63 = vpop.eup %9495  ;;  %9521 = vrcp.f32 %v1428_v17  ;;  %v1434_v57 = vadd.f32 1.0, %v9494_v28  ;;  %v11708_v18 = vpop.f32.mrf.mxu0  ;;  %v1981_v17 = vadd.f32 %v11419_v53, %v11606_v11  ;;  %v7733_v58 = vmul.f32 -1.442695, %v1983_v31  ;;  %v11737_v53 = vld [vmem:[%s10900_s6 + $0x1c0] sm:$0xff]  }
 0x1ab   : > { %14059 = vst [vmem:[#allocation54_spill] sm:$0xff] %v11698_v63  ;;  %v9498_v37 = vpop.eup %9497  ;;  %9523 = vpow2.f32 %v7659_v3  ;;  %v11710_v23 = vpop.f32.mrf.mxu1  ;;  %3897 = vmatmul.mubr.bf16.gmra.mxu0 %v14061_v60  ;;  %5596 = vmatmul.mubr.bf16.gmra.mxu1 %v11690_v45  ;;  %v1987_v31 = vadd.f32 %v11459_v30, %v11601_v27  ;;  %v14068_v30 = vld [vmem:[#allocation28_spill] sm:$0xff] }
 0x1ac   : > { %14060 = vst [vmem:[#allocation55_spill] sm:$0xff] %v11710_v23  ;;  %v9500_v56 = vpop.eup %9499  ;;  %9525 = vrcp.f32 %v1434_v57  ;;  %v1401_v28 = vadd.f32 1.0, %v9498_v37  ;;  %5605 = vmatprep.mubr.bf16.mxu1 %v14017_v38  ;;  %9030 = vmatprep.mubr.bf16.mxu0 %v14062_v32  ;;  %v11721_v60 = vpop.f32.mrf.mxu0  ;;  %v7661_v23 = vmul.f32 -1.442695, %v696_v50  ;;  %v700_v50 = vadd.f32 %v11457_v41, %v11088_v24 }
 0x1ad   : > { %v9502_v3 = vpop.eup %9501  ;;  %v3169_v46 = vmul.f32 %v9500_v56, %v3165_v16  ;;  %9527 = vpow2.f32 %v7731_v15  ;;  %v11723_v63 = vpop.f32.mrf.mxu1 }
 0x1ae   : > { %v11725_v57 = vpop.eup %9503  ;;  %9529 = vrcp.f32 %v1401_v28  ;;  %v1430_v37 = vadd.f32 1.0, %v9502_v3  ;;  %v11732_v15 = vpop.f32.mrf.mxu0  ;;  %v698_v28 = vadd.f32 %v11441_v40, %v11082_v22 }
 0x1af   : > { %v11727_v32 = vpop.eup %9505  ;;  %v11730_v52 = vadd.f32 %v3169_v46, %v11561_v55  ;;  %9531 = vtanh.f32 %v694_v2  ;;  %v11734_v16 = vpop.f32.mrf.mxu1  ;;  %v3176_v55 = vmul.f32 %v11438_v13, %v11717_v59  ;;  %v1985_v13 = vadd.f32 %v11443_v0, %v11606_v11 }
 0x1b0   : > { %14063 = vst [vmem:[#allocation21_spill] sm:$0xff] %v11727_v32  ;;  %v11739_v56 = vpop.eup %9507  ;;  %9533 = vrcp.f32 %v1430_v37  ;;  %v11751_v46 = vpop.f32.mrf.mxu0  ;;  %v7735_v0 = vmul.f32 -1.442695, %v1987_v31 }
 0x1b1   : > { %14064 = vst [vmem:[#allocation23_spill] sm:$0xff] %v11739_v56  ;;  %v9510_v3 = vpop.eup %9509  ;;  %v3177_v2 = vmul.f32 %v11462_v61, %v11730_v52  ;;  %9535 = vtanh.f32 %v1981_v17  ;;  %v11753_v37 = vpop.f32.mrf.mxu1 }
 0x1b2   : > { %14065 = vst [vmem:[#allocation56_spill] sm:$0xff] %v11753_v37  ;;  %v11755_v56 = vpop.eup %9511  ;;  %v1403_v40 = vadd.f32 1.0, %v9510_v3  ;;  %9537 = vpow2.f32 %v7661_v23  ;;  %v11761_v17 = vpop.f32.mrf.mxu0  ;;  %v7663_v3 = vmul.f32 -1.442695, %v700_v50  ;;  %v704_v50 = vadd.f32 %v11467_v5, %v11082_v22  ;;  %v14076_v5 = vld [vmem:[#allocation31_spill] sm:$0xff] }
 0x1b3   : > { %14066 = vst [vmem:[#allocation57_spill] sm:$0xff] %v11755_v56  ;;  %v9514_v41 = vpop.eup %9513  ;;  %v8424_v32 = vpack.c.bf16 %v3177_v2, %v3176_v55  ;;  %9539 = vpow2.f32 %v7733_v58  ;;  %v11759_v61 = vpop.f32.mrf.mxu1  ;;  %5606 = vmatmul.mubr.bf16.gmra.mxu1 %v11737_v53  ;;  %9031 = vmatmul.mubr.bf16.vlgmr.msra.gmra.mxu0 %v14068_v30 }
 0x1b4   : > { %14067 = vst [vmem:[#allocation58_spill] sm:$0xff] %v11759_v61  ;;  %v9516_v37 = vpop.eup %9515  ;;  %9541 = vrcp.f32 %v1403_v40  ;;  %v2738_v56 = vadd.f32 1.0, %v9514_v41  ;;  %5615 = vmatprep.mubr.bf16.mxu1 %v14017_v38  ;;  %9034 = vmatprep.mubr.bf16.mxu0 %v11446_v48  ;;  %v11772_v55 = vpop.f32.mrf.mxu0  ;;  %v3166_v40 = vsub.f32 %v11645_v14, %v11632_v19  ;;  %v706_v48 = vadd.f32 %v11481_v25, %v11088_v24 }
 0x1b5   : > { %v11767_v23 = vpop.eup %9517  ;;  %8716 = vst [vmem:[%s10910_s1 + $0x30] sm:$0xff] %v8424_v32   ;;  %9543 = vtanh.f32 %v698_v28  ;;  %v11770_v58 = vpop.f32.mrf.mxu1  ;;  %14070 = vst [vmem:[#allocation59_spill] sm:$0xff] %v11772_v55  ;;  %v14073_v32 = vld [vmem:[#allocation33_spill] sm:$0xff]  ;;  %v1991_v55 = vadd.f32 %v14076_v5, %v11606_v11 }
 0x1b6   : > { %14069 = vst [vmem:[#allocation28_spill] sm:$0xff] %v11770_v58  ;;  %v11774_v2 = vpop.eup %9519  ;;  %9545 = vrcp.f32 %v2738_v56  ;;  %v1993_v28 = vadd.f32 %v14073_v32, %v11601_v27  ;;  %v11788_v30 = vpop.f32.mrf.mxu0  ;;  %v3170_v56 = vmul.f32 %v9516_v37, %v3166_v40  ;;  %v3167_v32 = vsub.f32 %v11692_v9, %v11648_v54 }
 0x1b7   : > { %14071 = vst [vmem:[#allocation60_spill] sm:$0xff] %v11774_v2  ;;  %v11782_v41 = vpop.eup %9521  ;;  %9547 = vtanh.f32 %v1985_v13  ;;  %v11786_v31 = vpop.f32.mrf.mxu1  ;;  %14075 = vst [vmem:[#allocation62_spill] sm:$0xff] %v11788_v30  ;;  %v11791_v2 = vld [vmem:[%s10900_s6 + $0x1c8] sm:$0xff]   ;;  %v710_v37 = vadd.f32 %v11503_v26, %v11088_v24 }
 0x1b8   : > { %14072 = vst [vmem:[#allocation61_spill] sm:$0xff] %v11782_v41  ;;  %14074 = vst [vmem:[#allocation33_spill] sm:$0xff] %v11786_v31  ;;  %v9524_v14 = vpop.eup %9523  ;;  %9549 = vpow2.f32 %v7663_v3  ;;  %v7665_v41 = vmul.f32 -1.442695, %v706_v48  ;;  %v7737_v61 = vmul.f32 -1.442695, %v1993_v28  ;;  %v11803_v40 = vpop.f32.mrf.mxu0  ;;  %v11810_v9 = vadd.f32 %v3170_v56, %v11632_v19 }
 0x1b9   : > { %v11795_v58 = vpop.eup %9525  ;;  %v1405_v25 = vadd.f32 1.0, %v9524_v14  ;;  %9551 = vpow2.f32 %v7735_v0  ;;  %v11801_v3 = vpop.f32.mrf.mxu1  ;;  %v14078_v48 = vld [vmem:[#allocation34_spill] sm:$0xff]  ;;  %v1997_v19 = vadd.f32 %v11505_v12, %v11601_v27  ;;  %v7667_v5 = vmul.f32 -1.442695, %v710_v37 }
 0x1ba   : > { %14077 = vst [vmem:[#allocation31_spill] sm:$0xff] %v11795_v58  ;;  %v9528_v13 = vpop.eup %9527  ;;  %9553 = vtanh.f32 %v704_v50  ;;  %v708_v28 = vadd.f32 %v14078_v48, %v11082_v22  ;;  %v14083_v12 = vld [vmem:[#allocation30_spill] sm:$0xff] }
 0x1bb   : > { %v9530_v31 = vpop.eup %9529  ;;  %9555 = vrcp.f32 %v1405_v25  ;;  %v2740_v30 = vadd.f32 1.0, %v9528_v13  ;;  %5616 = vmatmul.mubr.bf16.gmra.mxu1 %v11791_v2  ;;  %9035 = vmatmul.mubr.bf16.gmra.mxu0 %v11498_v1  ;;  %v14080_v1 = vld [vmem:[#allocation35_spill] sm:$0xff]  ;;  %v11827_v25 = vpop.f32.mrf.mxu1 }
 0x1bc   : > { %v11807_v0 = vpop.eup %9531  ;;  %v3171_v50 = vmul.f32 %v9530_v31, %v3167_v32  ;;  %9557 = vtanh.f32 %v1991_v55  ;;  %5625 = vmatprep.mubr.bf16.mxu1 %v14017_v38  ;;  %9038 = vmatprep.mubr.bf16.mxu0 %v11536_v20  ;;  %v1995_v14 = vadd.f32 %v14080_v1, %v11606_v11  ;;  %v11829_v20 = vpop.f32.mrf.mxu0  ;;  %v14082_v32 = vld [vmem:[#allocation29_spill] sm:$0xff] }
 0x1bd   : > { %v11816_v26 = vpop.eup %9533  ;;  %9559 = vrcp.f32 %v2740_v30  ;;  %v11832_v30 = vld [vmem:[%s10900_s6 + $0x1d0] sm:$0xff]   ;;  %v3178_v48 = vmul.f32 %v14082_v32, %v11810_v9  ;;  %v716_v32 = vadd.f32 %v11522_v4, %v11088_v24 }
 0x1be   : > { %14079 = vst [vmem:[#allocation34_spill] sm:$0xff] %v11816_v26  ;;  %v11822_v56 = vpop.eup %9535  ;;  %v11825_v55 = vadd.f32 %v3171_v50, %v11648_v54  ;;  %9561 = vpow2.f32 %v7665_v41 }
 0x1bf   : > { %14081 = vst [vmem:[#allocation35_spill] sm:$0xff] %v11822_v56  ;;  %v9538_v31 = vpop.eup %9537  ;;  %9563 = vpow2.f32 %v7737_v61  ;;  %v7739_v61 = vmul.f32 -1.442695, %v1997_v19  ;;  %v714_v56 = vadd.f32 %v11510_v8, %v11082_v22 }
 0x1c0   : > { %v9540_v13 = vpop.eup %9539  ;;  %v3179_v1 = vmul.f32 %v14083_v12, %v11825_v55  ;;  %v1407_v58 = vadd.f32 1.0, %v9538_v31  ;;  %9565 = vtanh.f32 %v708_v28  ;;  %v3216_v28 = vsub.f32 %v11725_v57, %v11717_v59  ;;  %v14085_v31 = vld [vmem:[#allocation38_spill] sm:$0xff] }
 0x1c1   : > { %v9542_v54 = vpop.eup %9541  ;;  %v2742_v41 = vadd.f32 1.0, %v9540_v13  ;;  %9567 = vtanh.f32 %v1995_v14  ;;  %v14084_v14 = vld [vmem:[#allocation37_spill] sm:$0xff]  ;;  %v2003_v13 = vadd.f32 %v14085_v31, %v11601_v27 }
 0x1c2   : > { %v11838_v37 = vpop.eup %9543  ;;  %v8429_v50 = vpack.c.bf16 %v3179_v1, %v3178_v48  ;;  %9569 = vrcp.f32 %v1407_v58  ;;  %v2001_v19 = vadd.f32 %v14084_v14, %v11606_v11  ;;  %v11852_v48 = vpop.f32.mrf.mxu1  ;;  %v3220_v57 = vmul.f32 %v9542_v54, %v3216_v28 }
 0x1c3   : > { %v11844_v26 = vpop.eup %9545  ;;  %9571 = vrcp.f32 %v2742_v41  ;;  %v11854_v58 = vpop.f32.mrf.mxu0  ;;  %5626 = vmatmul.mubr.bf16.gmra.mxu1 %v11832_v30  ;;  %9039 = vmatmul.mubr.bf16.gmra.mxu0 %v11585_v44  ;;  %v7669_v41 = vmul.f32 -1.442695, %v716_v32  ;;  %v3217_v44 = vsub.f32 %v11767_v23, %v11730_v52  ;;  %v2007_v23 = vadd.f32 %v11545_v51, %v11601_v27 }
 0x1c4   : > { %v11858_v8 = vpop.eup %9547  ;;  %8717 = vst [vmem:[%s10910_s1 + $0x38] sm:$0xff] %v8429_v50   ;;  %9573 = vpow2.f32 %v7667_v5  ;;  %5635 = vmatprep.mubr.bf16.mxu1 %v14017_v38  ;;  %9042 = vmatprep.mubr.bf16.mxu0 %v11641_v34  ;;  %v7741_v5 = vmul.f32 -1.442695, %v2003_v13  ;;  %v11867_v50 = vpop.f32.mrf.mxu1  ;;  %v11872_v34 = vld [vmem:[%s10900_s6 + $0x1d8] sm:$0xff]   ;;  %v11883_v28 = vadd.f32 %v3220_v57, %v11717_v59 }
 0x1c5   : > { %14086 = vst [vmem:[#allocation29_spill] sm:$0xff] %v11858_v8  ;;  %v9550_v4 = vpop.eup %9549  ;;  %9575 = vpow2.f32 %v7739_v61  ;;  %v11869_v8 = vpop.f32.mrf.mxu0  ;;  %v720_v61 = vadd.f32 %v11543_v43, %v11088_v24  ;;  %v14088_v13 = vld [vmem:[#allocation40_spill] sm:$0xff] }
 0x1c6   : > { %v9552_v12 = vpop.eup %9551  ;;  %v1409_v1 = vadd.f32 1.0, %v9550_v4  ;;  %9577 = vtanh.f32 %v714_v56  ;;  %v718_v56 = vadd.f32 %v11531_v7, %v11082_v22  ;;  %v2005_v4 = vadd.f32 %v14088_v13, %v11606_v11  ;;  %v11892_v43 = vpop.f32.mrf.mxu1  ;;  %v14092_v13 = vld [vmem:[#allocation41_spill] sm:$0xff] }
 0x1c7   : > { %v11863_v14 = vpop.eup %9553  ;;  %v2744_v31 = vadd.f32 1.0, %v9552_v12  ;;  %9579 = vtanh.f32 %v2001_v19  ;;  %v11894_v51 = vpop.f32.mrf.mxu0 }
 0x1c8   : > { %v9556_v54 = vpop.eup %9555  ;;  %9581 = vrcp.f32 %v1409_v1 }
 0x1c9   : > { %v11880_v32 = vpop.eup %9557  ;;  %v3221_v19 = vmul.f32 %v9556_v54, %v3217_v44  ;;  %9583 = vrcp.f32 %v2744_v31  ;;  %v7671_v44 = vmul.f32 -1.442695, %v720_v61  ;;  %v7743_v31 = vmul.f32 -1.442695, %v2007_v23 }
 0x1ca   : > { %14087 = vst [vmem:[#allocation30_spill] sm:$0xff] %v11880_v32  ;;  %v11887_v12 = vpop.eup %9559  ;;  %9585 = vpow2.f32 %v7669_v41  ;;  %v14090_v41 = vld [vmem:[#allocation36_spill] sm:$0xff] }
 0x1cb   : > { %14089 = vst [vmem:[#allocation37_spill] sm:$0xff] %v11887_v12  ;;  %v9562_v7 = vpop.eup %9561  ;;  %v11890_v1 = vadd.f32 %v3221_v19, %v11730_v52  ;;  %9587 = vpow2.f32 %v7741_v5  ;;  %5636 = vmatmul.mubr.bf16.gmra.mxu1 %v11872_v34  ;;  %9043 = vmatmul.mubr.bf16.gmra.mxu0 %v11690_v45  ;;  %v3228_v5 = vmul.f32 %v14090_v41, %v11883_v28  ;;  %v11918_v41 = vpop.f32.mrf.mxu0 }
 0x1cc   : > { %v9564_v59 = vpop.eup %9563  ;;  %v1411_v57 = vadd.f32 1.0, %v9562_v7  ;;  %9589 = vtanh.f32 %v718_v56  ;;  %5645 = vmatprep.mubr.bf16.mxu1 %v14017_v38  ;;  %9046 = vmatprep.mubr.bf16.mxu0 %v11737_v53  ;;  %v724_v56 = vadd.f32 %v11552_v36, %v11082_v22  ;;  %v726_v53 = vadd.f32 %v11568_v47, %v11088_v24  ;;  %14094 = vst [vmem:[#allocation40_spill] sm:$0xff] %v11918_v41 }
 0x1cd   : > { %v11900_v52 = vpop.eup %9565  ;;  %v3229_v54 = vmul.f32 %v11558_v10, %v11890_v1  ;;  %v2746_v19 = vadd.f32 1.0, %v9564_v59  ;;  %9591 = vtanh.f32 %v2005_v4  ;;  %v2011_v7 = vadd.f32 %v14092_v13, %v11606_v11  ;;  %v14093_v10 = vld [vmem:[#allocation42_spill] sm:$0xff]  ;;  %v11916_v4 = vpop.f32.mrf.mxu1 }
 0x1ce   : > { %v11906_v45 = vpop.eup %9567  ;;  %9593 = vrcp.f32 %v1411_v57  ;;  %v2013_v59 = vadd.f32 %v14093_v10, %v11601_v27  ;;  %v11921_v57 = vld [vmem:[%s10900_s6 + $0x1e0] sm:$0xff]   ;;  %v3218_v36 = vsub.f32 %v11807_v0, %v11810_v9  ;;  %v7673_v13 = vmul.f32 -1.442695, %v726_v53 }
 0x1cf   : > { %14091 = vst [vmem:[#allocation38_spill] sm:$0xff] %v11906_v45  ;;  %v9570_v61 = vpop.eup %9569  ;;  %v8434_v23 = vpack.c.bf16 %v3229_v54, %v3228_v5  ;;  %9595 = vrcp.f32 %v2746_v19  ;;  %v11930_v41 = vpop.f32.mrf.mxu1  ;;  %v730_v53 = vadd.f32 %v11595_v39, %v11088_v24 }
 0x1d0   : > { %v11923_v45 = vpop.eup %9571  ;;  %9597 = vpow2.f32 %v7671_v44  ;;  %v3222_v54 = vmul.f32 %v9570_v61, %v3218_v36  ;;  %v7745_v32 = vmul.f32 -1.442695, %v2013_v59  ;;  %v3219_v44 = vsub.f32 %v11838_v37, %v11825_v55 }
 0x1d1   : > { %14095 = vst [vmem:[#allocation36_spill] sm:$0xff] %v11923_v45  ;;  %v9574_v47 = vpop.eup %9573  ;;  %8718 = vst [vmem:[%s10910_s1 + $0x40] sm:$0xff] %v8434_v23   ;;  %9599 = vpow2.f32 %v7743_v31  ;;  %v11932_v45 = vpop.f32.mrf.mxu0  ;;  %v14097_v31 = vld [vmem:[#allocation44_spill] sm:$0xff]  ;;  %v2017_v37 = vadd.f32 %v11597_v33, %v11601_v27  ;;  %v7675_v33 = vmul.f32 -1.442695, %v730_v53 }
 0x1d2   : > { %v9576_v5 = vpop.eup %9575  ;;  %v1413_v19 = vadd.f32 1.0, %v9574_v47  ;;  %9601 = vtanh.f32 %v724_v56  ;;  %v728_v56 = vadd.f32 %v14097_v31, %v11082_v22  ;;  %v11953_v59 = vadd.f32 %v3222_v54, %v11810_v9  ;;  %v11955_v47 = vpop.f32.mrf.mxu1 }
 0x1d3   : > { %v11928_v10 = vpop.eup %9577  ;;  %v2748_v12 = vadd.f32 1.0, %v9576_v5  ;;  %9603 = vtanh.f32 %v2011_v7  ;;  %5646 = vmatmul.mubr.bf16.gmra.mxu1 %v11921_v57  ;;  %9047 = vmatmul.mubr.bf16.gmra.mxu0 %v11791_v2  ;;  %v14098_v2 = vld [vmem:[#allocation45_spill] sm:$0xff]  ;;  %v7747_v54 = vmul.f32 -1.442695, %v2017_v37 }
 0x1d4   : > { %v11936_v0 = vpop.eup %9579  ;;  %9605 = vrcp.f32 %v1413_v19  ;;  %5655 = vmatprep.mubr.bf16.mxu1 %v14017_v38  ;;  %9050 = vmatprep.mubr.bf16.mxu0 %v11832_v30  ;;  %v2015_v23 = vadd.f32 %v14098_v2, %v11606_v11  ;;  %v11957_v30 = vpop.f32.mrf.mxu0 }
 0x1d5   : > { %14096 = vst [vmem:[#allocation41_spill] sm:$0xff] %v11936_v0  ;;  %v9582_v61 = vpop.eup %9581  ;;  %9607 = vrcp.f32 %v2748_v12  ;;  %v9290_v12 = vld [vmem:[%s10900_s6 + $0x1e8] sm:$0xff]   ;;  %v9291_v0 = vld [vmem:[%s10900_s6 + $0x1f0] sm:$0xff]  }
 0x1d6   : > { %v11950_v7 = vpop.eup %9583  ;;  %v3223_v36 = vmul.f32 %v9582_v61, %v3219_v44  ;;  %9609 = vpow2.f32 %v7673_v13  ;;  %v14101_v44 = vld [vmem:[#allocation32_spill] sm:$0xff] }
 0x1d7   : > { %14099 = vst [vmem:[#allocation42_spill] sm:$0xff] %v11950_v7  ;;  %v9586_v39 = vpop.eup %9585  ;;  %9611 = vpow2.f32 %v7745_v32  ;;  %v734_v32 = vadd.f32 %v11608_v21, %v11082_v22  ;;  %v3230_v61 = vmul.f32 %v14101_v44, %v11953_v59  ;;  %v14102_v7 = vld [vmem:[#allocation39_spill] sm:$0xff]  ;;  %v14104_v21 = vld [vmem:[#allocation49_spill] sm:$0xff] }
 0x1d8   : > { %v9588_v5 = vpop.eup %9587  ;;  %v11961_v19 = vadd.f32 %v3223_v36, %v11825_v55  ;;  %v1415_v31 = vadd.f32 1.0, %v9586_v39  ;;  %9613 = vtanh.f32 %v728_v56  ;;  %v736_v56 = vadd.f32 %v11625_v49, %v11088_v24  ;;  %v11979_v39 = vpop.f32.mrf.mxu1 }
 0x1d9   : > { %v11963_v2 = vpop.eup %9589  ;;  %v2750_v9 = vadd.f32 1.0, %v9588_v5  ;;  %9615 = vtanh.f32 %v2015_v23  ;;  %v14103_v23 = vld [vmem:[#allocation47_spill] sm:$0xff]  ;;  %v2023_v36 = vadd.f32 %v14104_v21, %v11601_v27  ;;  %v11981_v5 = vpop.f32.mrf.mxu0  ;;  %v3268_v49 = vsub.f32 %v11863_v14, %v11883_v28 }
 0x1da   : > { %v11967_v13 = vpop.eup %9591  ;;  %v3231_v55 = vmul.f32 %v14102_v7, %v11961_v19  ;;  %9617 = vrcp.f32 %v1415_v31  ;;  %v2021_v37 = vadd.f32 %v14103_v23, %v11606_v11  ;;  %14105 = vst [vmem:[#allocation45_spill] sm:$0xff] %v11981_v5  ;;  %v11993_v14 = vpop.f32.mrf.mxu1 }
 0x1db   : > { %14100 = vst [vmem:[#allocation44_spill] sm:$0xff] %v11967_v13  ;;  %v9594_v53 = vpop.eup %9593  ;;  %9619 = vrcp.f32 %v2750_v9  ;;  %5656 = vmatmul.mubr.bf16.gmra.mxu1 %v9290_v12  ;;  %9051 = vmatmul.mubr.bf16.gmra.mxu0 %v11872_v34  ;;  %v7677_v34 = vmul.f32 -1.442695, %v736_v56  ;;  %14106 = vst [vmem:[#allocation32_spill] sm:$0xff] %v11993_v14 }
 0x1dc   : > { %v11984_v7 = vpop.eup %9595  ;;  %v8439_v31 = vpack.c.bf16 %v3231_v55, %v3230_v61  ;;  %9621 = vpow2.f32 %v7675_v33  ;;  %5665 = vmatprep.mubr.bf16.mxu1 %v14017_v38  ;;  %9054 = vmatprep.mubr.bf16.mxu0 %v11921_v57  ;;  %v3272_v23 = vmul.f32 %v9594_v53, %v3268_v49  ;;  %v7749_v55 = vmul.f32 -1.442695, %v2023_v36  ;;  %v11995_v33 = vpop.f32.mrf.mxu0  ;;  %v14108_v53 = vld [vmem:[#allocation25_spill] sm:$0xff]  ;;  %v14109_v36 = vld [vmem:[#allocation50_spill] sm:$0xff] }
 0x1dd   : > { %v9598_v9 = vpop.eup %9597  ;;  %9623 = vpow2.f32 %v7747_v54  ;;  %14107 = vst [vmem:[#allocation39_spill] sm:$0xff] %v11995_v33  ;;  %v3269_v57 = vsub.f32 %v11900_v52, %v11890_v1  ;;  %v738_v54 = vadd.f32 %v11636_v6, %v11082_v22  ;;  %v12015_v6 = vpop.f32.mrf.mxu1 }
 0x1de   : > { %v9600_v44 = vpop.eup %9599  ;;  %8719 = vst [vmem:[%s10910_s1 + $0x48] sm:$0xff] %v8439_v31   ;;  %v1417_v21 = vadd.f32 1.0, %v9598_v9  ;;  %9625 = vtanh.f32 %v734_v32  ;;  %v740_v32 = vadd.f32 %v11650_v42, %v11088_v24  ;;  %v2027_v31 = vadd.f32 %v14109_v36, %v11601_v27  ;;  %14110 = vst [vmem:[#allocation47_spill] sm:$0xff] %v12015_v6  ;;  %v12017_v42 = vpop.f32.mrf.mxu0 }
 0x1df   : > { %v11991_v13 = vpop.eup %9601  ;;  %v2752_v61 = vadd.f32 1.0, %v9600_v44  ;;  %9627 = vtanh.f32 %v2021_v37  ;;  %v2025_v37 = vadd.f32 %v14108_v53, %v11606_v11  ;;  %v12013_v9 = vadd.f32 %v3272_v23, %v11883_v28  ;;  %14111 = vst [vmem:[#allocation49_spill] sm:$0xff] %v12017_v42 }
 0x1e0   : > { %v11998_v5 = vpop.eup %9603  ;;  %9629 = vrcp.f32 %v1417_v21  ;;  %v7679_v36 = vmul.f32 -1.442695, %v740_v32  ;;  %v12041_v42 = vpop.f32.mrf.mxu0 }
 0x1e1   : > { %v9606_v56 = vpop.eup %9605  ;;  %9631 = vrcp.f32 %v2752_v61 }
 0x1e2   : > { %v12010_v49 = vpop.eup %9607  ;;  %v3273_v52 = vmul.f32 %v9606_v56, %v3269_v57  ;;  %9633 = vpow2.f32 %v7677_v34  ;;  %v7751_v34 = vmul.f32 -1.442695, %v2027_v31 }
 0x1e3   : > { %v9610_v44 = vpop.eup %9609  ;;  %9635 = vpow2.f32 %v7749_v55  ;;  %5666 = vmatmul.mubr.bf16.gmra.mxu1 %v9291_v0  ;;  %9055 = vmatmul.mubr.bf16.gmra.mxu0 %v9290_v12  ;;  %v14112_v55 = vld [vmem:[#allocation22_spill] sm:$0xff] }
 0x1e4   : > { %v9612_v21 = vpop.eup %9611  ;;  %v12020_v61 = vadd.f32 %v3273_v52, %v11890_v1  ;;  %v1419_v53 = vadd.f32 1.0, %v9610_v44  ;;  %9637 = vtanh.f32 %v738_v54  ;;  %5675 = vmatprep.mubr.bf16.mxu1 %v14017_v38  ;;  %9058 = vmatprep.mubr.bf16.mxu0 %v9291_v0  ;;  %v744_v57 = vadd.f32 %v14112_v55, %v11082_v22  ;;  %v14114_v1 = vld [vmem:[#allocation46_spill] sm:$0xff]  ;;  %v14115_v54 = vld [vmem:[#allocation24_spill] sm:$0xff]  ;;  %v14118_v44 = vld [vmem:[#allocation27_spill] sm:$0xff]  ;;  %v12039_v55 = vpop.f32.mrf.mxu1  ;;  %14120 = vst [vmem:[#allocation22_spill] sm:$0xff] %v12041_v42 }
 0x1e5   : > { %v12023_v28 = vpop.eup %9613  ;;  %v2754_v23 = vadd.f32 1.0, %v9612_v21  ;;  %9639 = vtanh.f32 %v2025_v37  ;;  %v3280_v56 = vmul.f32 %v14114_v1, %v12013_v9  ;;  %v14116_v38 = vld [vmem:[#allocation20_spill] sm:$0xff]  ;;  %v14117_v37 = vld [vmem:[#allocation26_spill] sm:$0xff]  ;;  %v2033_v21 = vadd.f32 %v14118_v44, %v11601_v27  ;;  %14119 = vst [vmem:[#allocation50_spill] sm:$0xff] %v12039_v55 }
 0x1e6   : > { %v12027_v12 = vpop.eup %9615  ;;  %v3281_v32 = vmul.f32 %v14115_v54, %v12020_v61  ;;  %9641 = vrcp.f32 %v1419_v53  ;;  %v746_v0 = vadd.f32 %v14116_v38, %v11088_v24  ;;  %v2031_v31 = vadd.f32 %v14117_v37, %v11606_v11  ;;  %v9292_v1 = vld [vmem:[%s10900_s6 + $0x1f8] sm:$0xff]   ;;  %v12051_v14 = vpop.f32.mrf.mxu1 }
 0x1e7   : > { %14113 = vst [vmem:[#allocation25_spill] sm:$0xff] %v12027_v12  ;;  %v9618_v52 = vpop.eup %9617  ;;  %9643 = vrcp.f32 %v2754_v23  ;;  %v3270_v54 = vsub.f32 %v11928_v10, %v11953_v59  ;;  %v7753_v42 = vmul.f32 -1.442695, %v2033_v21 }
 0x1e8   : > { %v12044_v6 = vpop.eup %9619  ;;  %v8444_v53 = vpack.c.bf16 %v3281_v32, %v3280_v56  ;;  %9645 = vpow2.f32 %v7679_v36  ;;  %v7681_v44 = vmul.f32 -1.442695, %v746_v0  ;;  %v12053_v56 = vpop.f32.mrf.mxu0  ;;  %v3271_v36 = vsub.f32 %v11963_v2, %v11961_v19  ;;  %v14121_v0 = vld [vmem:[#allocation53_spill] sm:$0xff] }
 0x1e9   : > { %v9622_v38 = vpop.eup %9621  ;;  %9647 = vpow2.f32 %v7751_v34  ;;  %v3274_v37 = vmul.f32 %v9618_v52, %v3270_v54  ;;  %v748_v34 = vadd.f32 %v11685_v35, %v11082_v22  ;;  %v2035_v52 = vadd.f32 %v14121_v0, %v11606_v11 }
 0x1ea   : > { %v9624_v23 = vpop.eup %9623  ;;  %8720 = vst [vmem:[%s10910_s1 + $0x50] sm:$0xff] %v8444_v53   ;;  %v1421_v33 = vadd.f32 1.0, %v9622_v38  ;;  %9649 = vtanh.f32 %v744_v57  ;;  %v750_v57 = vadd.f32 %v11694_v62, %v11088_v24 }
 0x1eb   : > { %v12049_v12 = vpop.eup %9625  ;;  %v2756_v55 = vadd.f32 1.0, %v9624_v23  ;;  %9651 = vtanh.f32 %v2031_v31  ;;  %5676 = vmatmul.mubr.bf16.gmra.mxu1 %v9292_v1  ;;  %9059 = vmatmul.mubr.bf16.gmra.mxu0 %v9292_v1  ;;  %v2037_v31 = vadd.f32 %v11696_v29, %v11601_v27  ;;  %v12070_v1 = vadd.f32 %v3274_v37, %v11953_v59  ;;  %v14122_v37 = vld [vmem:[#allocation43_spill] sm:$0xff] }
 0x1ec   : > { %v12055_v10 = vpop.eup %9627  ;;  %9653 = vrcp.f32 %v1421_v33  ;;  %v7683_v53 = vmul.f32 -1.442695, %v750_v57  ;;  %v754_v59 = vadd.f32 %v11708_v18, %v11082_v22  ;;  %v12089_v57 = vpop.f32.mrf.mxu0  ;;  %v14126_v18 = vld [vmem:[#allocation55_spill] sm:$0xff] }
 0x1ed   : > { %v9630_v32 = vpop.eup %9629  ;;  %9655 = vrcp.f32 %v2756_v55  ;;  %v7755_v29 = vmul.f32 -1.442695, %v2037_v31  ;;  %14125 = vst [vmem:[#allocation24_spill] sm:$0xff] %v12089_v57  ;;  %v2041_v0 = vadd.f32 %v14126_v18, %v11606_v11 }
 0x1ee   : > { %v12067_v21 = vpop.eup %9631  ;;  %v3275_v2 = vmul.f32 %v9630_v32, %v3271_v36  ;;  %9657 = vpow2.f32 %v7681_v44  ;;  %v14123_v44 = vld [vmem:[#allocation48_spill] sm:$0xff]  ;;  %v756_v36 = vadd.f32 %v11721_v60, %v11088_v24  ;;  %v12102_v18 = vpop.f32.mrf.mxu0 }
 0x1ef   : > { %v9634_v33 = vpop.eup %9633  ;;  %9659 = vpow2.f32 %v7753_v42  ;;  %v3282_v42 = vmul.f32 %v14122_v37, %v12070_v1  ;;  %14128 = vst [vmem:[#allocation26_spill] sm:$0xff] %v12102_v18 }
 0x1f0   : > { %v9636_v35 = vpop.eup %9635  ;;  %v12073_v62 = vadd.f32 %v3275_v2, %v11961_v19  ;;  %v1423_v55 = vadd.f32 1.0, %v9634_v33  ;;  %9661 = vtanh.f32 %v748_v34  ;;  %v12087_v34 = vpop.f32.mrf.mxu1  ;;  %v3320_v33 = vsub.f32 %v11991_v13, %v12013_v9 }
 0x1f1   : > { %v12075_v54 = vpop.eup %9637  ;;  %v2758_v38 = vadd.f32 1.0, %v9636_v35  ;;  %9663 = vtanh.f32 %v2035_v52  ;;  %14124 = vst [vmem:[#allocation46_spill] sm:$0xff] %v12087_v34  ;;  %v2043_v52 = vadd.f32 %v11723_v63, %v11601_v27  ;;  %v3321_v13 = vsub.f32 %v12023_v28, %v12020_v61  ;;  %v14130_v28 = vld [vmem:[#allocation17_spill] sm:$0xff] }
 0x1f2   : > { %v12079_v23 = vpop.eup %9639  ;;  %v3283_v19 = vmul.f32 %v14123_v44, %v12073_v62  ;;  %9665 = vrcp.f32 %v1423_v55  ;;  %v12100_v44 = vpop.f32.mrf.mxu1 }
 0x1f3   : > { %v9642_v32 = vpop.eup %9641  ;;  %9667 = vrcp.f32 %v2758_v38  ;;  %v7685_v38 = vmul.f32 -1.442695, %v756_v36  ;;  %14127 = vst [vmem:[#allocation20_spill] sm:$0xff] %v12100_v44  ;;  %v2045_v36 = vadd.f32 %v11734_v16, %v11606_v11  ;;  %v12131_v16 = vpop.f32.mrf.mxu0 }
 0x1f4   : > { %v12095_v31 = vpop.eup %9643  ;;  %v8449_v2 = vpack.c.bf16 %v3283_v19, %v3282_v42  ;;  %9669 = vpow2.f32 %v7683_v53  ;;  %v3324_v55 = vmul.f32 %v9642_v32, %v3320_v33  ;;  %v7757_v42 = vmul.f32 -1.442695, %v2043_v52  ;;  %v14129_v32 = vld [vmem:[#allocation56_spill] sm:$0xff]  ;;  %v10573_v52 = vld [vmem:[%s13976_s2] sm:$0x7]  ;;  %14132 = vst [vmem:[#allocation53_spill] sm:$0xff] %v12131_v16 }
 0x1f5   : > { %v9646_v60 = vpop.eup %9645  ;;  %9671 = vpow2.f32 %v7755_v29  ;;  %v758_v53 = vadd.f32 %v11732_v15, %v11082_v22  ;;  %v760_v29 = vadd.f32 %v11751_v46, %v11088_v24  ;;  %v12129_v15 = vpop.f32.mrf.mxu1 }
 0x1f6   : > { %v9648_v35 = vpop.eup %9647  ;;  %8721 = vst [vmem:[%s10910_s1 + $0x58] sm:$0xff] %v8449_v2   ;;  %v1425_v37 = vadd.f32 1.0, %v9646_v60  ;;  %9673 = vtanh.f32 %v754_v59  ;;  %v12122_v2 = vrot.slane %v10573_v52, %v14130_v28  ;;  %v12127_v22 = vadd.f32 %v3324_v55, %v12013_v9  ;;  %14131 = vst [vmem:[#allocation27_spill] sm:$0xff] %v12129_v15  ;;  %v14135_v28 = vld [vmem:[#allocation21_spill] sm:$0xff] }
 0x1f7   : > { %v12104_v63 = vpop.eup %9649  ;;  %v2760_v34 = vadd.f32 1.0, %v9648_v35  ;;  %9675 = vtanh.f32 %v2041_v0  ;;  %v2047_v0 = vadd.f32 %v14129_v32, %v11601_v27  ;;  %v7687_v32 = vmul.f32 -1.442695, %v760_v29 }
 0x1f8   : > { %v12106_v19 = vpop.eup %9651  ;;  %9677 = vrcp.f32 %v1425_v37 }
 0x1f9   : > { %v9654_v59 = vpop.eup %9653  ;;  %9679 = vrcp.f32 %v2760_v34  ;;  %v2172_v34 = vadd.f32 %v11761_v17, %v12122_v2 }
 0x1fa   : > { %v12124_v33 = vpop.eup %9655  ;;  %v3325_v24 = vmul.f32 %v9654_v59, %v3321_v13  ;;  %9681 = vpow2.f32 %v7685_v38  ;;  %v7759_v38 = vmul.f32 -1.442695, %v2047_v0  ;;  %v14133_v13 = vld [vmem:[#allocation58_spill] sm:$0xff] }
 0x1fb   : > { %v9658_v46 = vpop.eup %9657  ;;  %9683 = vpow2.f32 %v7757_v42  ;;  %v2051_v59 = vadd.f32 %v14133_v13, %v11606_v11  ;;  %v14134_v42 = vld [vmem:[#allocation52_spill] sm:$0xff] }
 0x1fc   : > { %v9660_v60 = vpop.eup %9659  ;;  %v12136_v35 = vadd.f32 %v3325_v24, %v12020_v61  ;;  %v1427_v37 = vadd.f32 1.0, %v9658_v46  ;;  %9685 = vtanh.f32 %v758_v53  ;;  %v3332_v17 = vmul.f32 %v14134_v42, %v12127_v22  ;;  %v14136_v53 = vld [vmem:[#allocation28_spill] sm:$0xff]  ;;  %v12150_v24 = vpop.f32.mrf.mxu1 }
 0x1fd   : > { %v12138_v9 = vpop.eup %9661  ;;  %v2762_v55 = vadd.f32 1.0, %v9660_v60  ;;  %9687 = vtanh.f32 %v2045_v36  ;;  %v2053_v29 = vadd.f32 %v14136_v53, %v11601_v27  ;;  %14137 = vst [vmem:[#allocation43_spill] sm:$0xff] %v12150_v24  ;;  %v12152_v36 = vpop.f32.mrf.mxu0  ;;  %v7734_v46 = vmul.f32 -1.442695, %v2172_v34  ;;  %v14139_v60 = vld [vmem:[#allocation59_spill] sm:$0xff]  ;;  %v14140_v53 = vld [vmem:[#allocation62_spill] sm:$0xff] }
 0x1fe   : > { %v12142_v52 = vpop.eup %9663  ;;  %v3333_v61 = vmul.f32 %v14135_v28, %v12136_v35  ;;  %9689 = vrcp.f32 %v1427_v37  ;;  %14138 = vst [vmem:[#allocation48_spill] sm:$0xff] %v12152_v36  ;;  %v2164_v13 = vadd.f32 %v14139_v60, %v12122_v2  ;;  %v3322_v28 = vsub.f32 %v12049_v12, %v12070_v1  ;;  %v12163_v16 = vpop.f32.mrf.mxu1 }
 0x1ff   : > { %v9666_v0 = vpop.eup %9665  ;;  %9691 = vrcp.f32 %v2762_v55  ;;  %v2175_v24 = vadd.f32 %v14140_v53, %v12122_v2  ;;  %v7761_v34 = vmul.f32 -1.442695, %v2053_v29  ;;  %14141 = vst [vmem:[#allocation55_spill] sm:$0xff] %v12163_v16  ;;  %v12165_v60 = vpop.f32.mrf.mxu0 }
 0x200   : > { %v12156_v15 = vpop.eup %9667  ;;  %v8454_v42 = vpack.c.bf16 %v3333_v61, %v3332_v17  ;;  %9693 = vpow2.f32 %v7687_v32  ;;  %v3326_v36 = vmul.f32 %v9666_v0, %v3322_v28  ;;  %14142 = vst [vmem:[#allocation56_spill] sm:$0xff] %v12165_v60  ;;  %v7730_v12 = vmul.f32 -1.442695, %v2164_v13 }
 0x201   : > { %v9670_v37 = vpop.eup %9669  ;;  %9695 = vpow2.f32 %v7759_v38  ;;  %v2057_v32 = vadd.f32 %v11801_v3, %v11601_v27  ;;  %v3323_v0 = vsub.f32 %v12075_v54, %v12073_v62  ;;  %v12186_v54 = vpop.f32.mrf.mxu0 }
 0x202   : > { %v9672_v44 = vpop.eup %9671  ;;  %8722 = vst [vmem:[%s10910_s1 + $0x60] sm:$0xff] %v8454_v42   ;;  %v1429_v55 = vadd.f32 1.0, %v9670_v37  ;;  %9697 = vtanh.f32 %v2051_v59  ;;  %v14143_v59 = vld [vmem:[#allocation33_spill] sm:$0xff]  ;;  %v2167_v42 = vadd.f32 %v11803_v40, %v12122_v2  ;;  %v12182_v13 = vadd.f32 %v3326_v36, %v12070_v1  ;;  %v12184_v37 = vpop.f32.mrf.mxu1  ;;  %14145 = vst [vmem:[#allocation52_spill] sm:$0xff] %v12186_v54 }
 0x203   : > { %v12167_v17 = vpop.eup %9673  ;;  %v2764_v61 = vadd.f32 1.0, %v9672_v44  ;;  %9699 = vpow2.f32 %v7734_v46  ;;  %v2055_v29 = vadd.f32 %v14143_v59, %v11606_v11  ;;  %v7736_v44 = vmul.f32 -1.442695, %v2175_v24  ;;  %14144 = vst [vmem:[#allocation58_spill] sm:$0xff] %v12184_v37 }
 0x204   : > { %v12171_v38 = vpop.eup %9675  ;;  %9701 = vrcp.f32 %v1429_v55  ;;  %v7763_v55 = vmul.f32 -1.442695, %v2057_v32  ;;  %v2188_v40 = vadd.f32 %v11829_v20, %v12122_v2  ;;  %v7732_v1 = vmul.f32 -1.442695, %v2167_v42  ;;  %v14146_v20 = vld [vmem:[#allocation51_spill] sm:$0xff]  ;;  %v12207_v42 = vpop.f32.mrf.mxu1 }
 0x205   : > { %v9678_v28 = vpop.eup %9677  ;;  %9703 = vrcp.f32 %v2764_v61  ;;  %14148 = vst [vmem:[#allocation21_spill] sm:$0xff] %v12207_v42 }
 0x206   : > { %v12179_v46 = vpop.eup %9679  ;;  %v3327_v3 = vmul.f32 %v9678_v28, %v3323_v0  ;;  %9705 = vpow2.f32 %v7761_v34  ;;  %v2061_v0 = vadd.f32 %v11827_v25, %v11606_v11  ;;  %v3334_v28 = vmul.f32 %v14146_v20, %v12182_v13 }
 0x207   : > { %v9682_v53 = vpop.eup %9681  ;;  %9707 = vpow2.f32 %v7730_v12  ;;  %v2063_v12 = vadd.f32 %v11852_v48, %v11601_v27  ;;  %v7742_v48 = vmul.f32 -1.442695, %v2188_v40  ;;  %v2191_v40 = vadd.f32 %v11869_v8, %v12122_v2 }
 0x208   : > { %v9684_v59 = vpop.eup %9683  ;;  %v12191_v24 = vadd.f32 %v3327_v3, %v12073_v62  ;;  %v1431_v61 = vadd.f32 1.0, %v9682_v53  ;;  %9709 = vtanh.f32 %v2055_v29  ;;  %v14147_v62 = vld [vmem:[#allocation54_spill] sm:$0xff]  ;;  %v3372_v29 = vsub.f32 %v12104_v63, %v12127_v22 }
 0x209   : > { %v12193_v36 = vpop.eup %9685  ;;  %v2766_v34 = vadd.f32 1.0, %v9684_v59  ;;  %9711 = vpow2.f32 %v7736_v44  ;;  %v12209_v44 = vpop.f32.mrf.mxu0  ;;  %v2180_v53 = vadd.f32 %v11854_v58, %v12122_v2  ;;  %v7765_v63 = vmul.f32 -1.442695, %v2063_v12 }
 0x20a   : > { %v12199_v32 = vpop.eup %9687  ;;  %v3335_v3 = vmul.f32 %v14147_v62, %v12191_v24  ;;  %9713 = vrcp.f32 %v1431_v61  ;;  %14149 = vst [vmem:[#allocation28_spill] sm:$0xff] %v12209_v44  ;;  %v3373_v8 = vsub.f32 %v12138_v9, %v12136_v35 }
 0x20b   : > { %v9690_v25 = vpop.eup %9689  ;;  %9715 = vrcp.f32 %v2766_v34  ;;  %v12219_v34 = vpop.f32.mrf.mxu1 }
 0x20c   : > { %v12213_v59 = vpop.eup %9691  ;;  %v8459_v20 = vpack.c.bf16 %v3335_v3, %v3334_v28  ;;  %v3376_v16 = vmul.f32 %v9690_v25, %v3372_v29  ;;  %9717 = vpow2.f32 %v7763_v55  ;;  %14150 = vst [vmem:[#allocation59_spill] sm:$0xff] %v12219_v34  ;;  %v12221_v58 = vpop.f32.mrf.mxu0  ;;  %v7738_v55 = vmul.f32 -1.442695, %v2180_v53  ;;  %v14152_v3 = vld [vmem:[#allocation61_spill] sm:$0xff] }
 0x20d   : > { %v9694_v62 = vpop.eup %9693  ;;  %9719 = vpow2.f32 %v7732_v1  ;;  %14151 = vst [vmem:[#allocation62_spill] sm:$0xff] %v12221_v58  ;;  %v2067_v1 = vadd.f32 %v11892_v43, %v11601_v27 }
 0x20e   : > { %v9696_v54 = vpop.eup %9695  ;;  %8723 = vst [vmem:[%s10910_s1 + $0x68] sm:$0xff] %v8459_v20   ;;  %v3380_v61 = vadd.f32 %v3376_v16, %v12127_v22  ;;  %v1433_v42 = vadd.f32 1.0, %v9694_v62  ;;  %9721 = vtanh.f32 %v2061_v0  ;;  %v14153_v16 = vld [vmem:[#allocation23_spill] sm:$0xff]  ;;  %v7744_v62 = vmul.f32 -1.442695, %v2191_v40  ;;  %v12240_v9 = vpop.f32.mrf.mxu0 }
 0x20f   : > { %v12223_v44 = vpop.eup %9697  ;;  %v2768_v28 = vadd.f32 1.0, %v9696_v54  ;;  %9723 = vpow2.f32 %v7742_v48  ;;  %v2065_v54 = vadd.f32 %v11867_v50, %v11606_v11  ;;  %v2183_v48 = vadd.f32 %v11894_v51, %v12122_v2  ;;  %14155 = vst [vmem:[#allocation51_spill] sm:$0xff] %v12240_v9  ;;  %v14156_v51 = vld [vmem:[#allocation40_spill] sm:$0xff]  ;;  %v14162_v9 = vld [vmem:[#allocation37_spill] sm:$0xff] }
 0x210   : > { %v9700_v12 = vpop.eup %9699  ;;  %v3384_v22 = vmul.f32 %v14152_v3, %v3380_v61  ;;  %v4787_v0 = vsub.f32 %v14153_v16, %v3380_v61  ;;  %9725 = vrcp.f32 %v1433_v42  ;;  %v12238_v3 = vpop.f32.mrf.mxu1  ;;  %v12246_v50 = vadd.f32 %v11916_v4, %v11606_v11 }
 0x211   : > { %v9702_v29 = vpop.eup %9701  ;;  %9727 = vrcp.f32 %v2768_v28  ;;  %v2743_v25 = vadd.f32 1.0, %v9700_v12  ;;  %14154 = vst [vmem:[#allocation33_spill] sm:$0xff] %v12238_v3  ;;  %v12242_v28 = vmul.f32 -1.442695, %v2067_v1  ;;  %v2204_v12 = vadd.f32 %v14156_v51, %v12122_v2  ;;  %v14159_v3 = vld [vmem:[#allocation60_spill] sm:$0xff] }
 0x212   : > { %v12235_v53 = vpop.eup %9703  ;;  %v4791_v43 = vmul.f32 %v11844_v26, %v4787_v0  ;;  %v3377_v20 = vmul.f32 %v9702_v29, %v3373_v8  ;;  %9729 = vpow2.f32 %v7765_v63  ;;  %v3374_v1 = vsub.f32 %v12167_v17, %v12182_v13 }
 0x213   : > { %v9706_v42 = vpop.eup %9705  ;;  %9731 = vrcp.f32 %v2743_v25  ;;  %v2073_v4 = vadd.f32 %v11930_v41, %v11601_v27  ;;  %v14157_v25 = vld [vmem:[#allocation30_spill] sm:$0xff]  ;;  %v12269_v41 = vmul.f32 -1.442695, %v2204_v12 }
 0x214   : > { %v9708_v16 = vpop.eup %9707  ;;  %v12250_v26 = vadd.f32 %v4791_v43, %v3380_v61  ;;  %v3381_v63 = vadd.f32 %v3377_v20, %v12136_v35  ;;  %v2770_v40 = vadd.f32 1.0, %v9706_v42  ;;  %9733 = vpow2.f32 %v7738_v55  ;;  %v14158_v61 = vld [vmem:[#allocation34_spill] sm:$0xff]  ;;  %v12263_v55 = vpop.f32.mrf.mxu1 }
 0x215   : > { %v12253_v0 = vpop.eup %9709  ;;  %v2739_v8 = vadd.f32 1.0, %v9708_v16  ;;  %9735 = vtanh.f32 %v2065_v54  ;;  %14160 = vst [vmem:[#allocation54_spill] sm:$0xff] %v12263_v55  ;;  %v12265_v20 = vpop.f32.mrf.mxu0  ;;  %v12267_v54 = vmul.f32 -1.442695, %v2183_v48  ;;  %v12275_v55 = vmul.f32 -1.442695, %v2073_v4 }
 0x216   : > { %v9712_v29 = vpop.eup %9711  ;;  %v4839_v51 = vsub.f32 %v14157_v25, %v12250_v26  ;;  %v3385_v43 = vmul.f32 %v14158_v61, %v3381_v63  ;;  %v4788_v35 = vsub.f32 %v14159_v3, %v3381_v63  ;;  %9737 = vrcp.f32 %v2770_v40  ;;  %14161 = vst [vmem:[#allocation61_spill] sm:$0xff] %v12265_v20 }
 0x217   : > { %v9714_v42 = vpop.eup %9713  ;;  %9739 = vrcp.f32 %v2739_v8  ;;  %v2745_v17 = vadd.f32 1.0, %v9712_v29  ;;  %v2196_v8 = vadd.f32 %v11932_v45, %v12122_v2  ;;  %v2207_v48 = vadd.f32 %v11957_v30, %v12122_v2  ;;  %v12290_v4 = vpop.f32.mrf.mxu0 }
 0x218   : > { %v12271_v16 = vpop.eup %9715  ;;  %v4843_v25 = vmul.f32 %v11984_v7, %v4839_v51  ;;  %v8464_v61 = vpack.c.bf16 %v3385_v43, %v3384_v22  ;;  %v4792_v3 = vmul.f32 %v14162_v9, %v4788_v35  ;;  %v3378_v40 = vmul.f32 %v9714_v42, %v3374_v1  ;;  %v12288_v1 = vpop.f32.mrf.mxu1  ;;  %14164 = vst [vmem:[#allocation40_spill] sm:$0xff] %v12290_v4  ;;  %v14166_v42 = vld [vmem:[#allocation57_spill] sm:$0xff] }
 0x219   : > { %v9718_v58 = vpop.eup %9717  ;;  %9741 = vrcp.f32 %v2745_v17  ;;  %14163 = vst [vmem:[#allocation23_spill] sm:$0xff] %v12288_v1  ;;  %v3375_v45 = vsub.f32 %v12193_v36, %v12191_v24  ;;  %v2077_v43 = vadd.f32 %v11979_v39, %v11601_v27  ;;  %v12306_v36 = vadd.f32 %v11955_v47, %v11606_v11  ;;  %v14168_v39 = vld [vmem:[#allocation45_spill] sm:$0xff]  ;;  %v14169_v1 = vld [vmem:[#allocation36_spill] sm:$0xff] }
 0x21a   : > { %v9720_v12 = vpop.eup %9719  ;;  %v12282_v29 = vadd.f32 %v4843_v25, %v12250_v26  ;;  %8724 = vst [vmem:[%s10910_s1 + $0x70] sm:$0xff] %v8464_v61   ;;  %v12285_v7 = vadd.f32 %v4792_v3, %v3381_v63  ;;  %v3382_v22 = vadd.f32 %v3378_v40, %v12182_v13  ;;  %v2772_v9 = vadd.f32 1.0, %v9718_v58  ;;  %v14165_v13 = vld [vmem:[#allocation38_spill] sm:$0xff]  ;;  %v14167_v25 = vld [vmem:[#allocation35_spill] sm:$0xff] }
 0x21b   : > { %v12292_v51 = vpop.eup %9721  ;;  %v2741_v30 = vadd.f32 1.0, %v9720_v12  ;;  %9743 = vpow2.f32 %v7744_v62  ;;  %v2199_v62 = vadd.f32 %v14168_v39, %v12122_v2  ;;  %v12319_v47 = vmul.f32 -1.442695, %v2196_v8  ;;  %v14172_v8 = vld [vmem:[#allocation32_spill] sm:$0xff] }
 0x21c   : > { %v9724_v35 = vpop.eup %9723  ;;  %v4891_v63 = vsub.f32 %v11998_v5, %v12282_v29  ;;  %v4840_v58 = vsub.f32 %v14165_v13, %v12285_v7  ;;  %v3386_v17 = vmul.f32 %v14166_v42, %v3382_v22  ;;  %v4789_v61 = vsub.f32 %v14167_v25, %v3382_v22  ;;  %v12315_v25 = vpop.f32.mrf.mxu1 }
 0x21d   : > { %v9726_v3 = vpop.eup %9725  ;;  %9745 = vrcp.f32 %v2772_v9  ;;  %v2751_v40 = vadd.f32 1.0, %v9724_v35  ;;  %14170 = vst [vmem:[#allocation30_spill] sm:$0xff] %v12315_v25  ;;  %v12317_v9 = vpop.f32.mrf.mxu0  ;;  %v12321_v20 = vmul.f32 -1.442695, %v2207_v48  ;;  %v12323_v39 = vmul.f32 -1.442695, %v2077_v43 }
 0x21e   : > { %v12310_v12 = vpop.eup %9727  ;;  %v4895_v5 = vmul.f32 %v12095_v31, %v4891_v63  ;;  %v4844_v13 = vmul.f32 %v12010_v49, %v4840_v58  ;;  %v4793_v42 = vmul.f32 %v14169_v1, %v4789_v61  ;;  %v3379_v4 = vmul.f32 %v9726_v3, %v3375_v45  ;;  %14171 = vst [vmem:[#allocation34_spill] sm:$0xff] %v12317_v9  ;;  %v14174_v3 = vld [vmem:[#allocation25_spill] sm:$0xff]  ;;  %v14180_v25 = vld [vmem:[#allocation39_spill] sm:$0xff] }
 0x21f   : > { %v9730_v35 = vpop.eup %9729  ;;  %9747 = vrcp.f32 %v2741_v30  ;;  %v12332_v30 = vmul.f32 -1.442695, %v2199_v62  ;;  %v12336_v48 = vadd.f32 %v14172_v8, %v11606_v11  ;;  %v12348_v62 = vpop.f32.mrf.mxu0 }
 0x220   : > { %v9732_v34 = vpop.eup %9731  ;;  %v12326_v31 = vadd.f32 %v4895_v5, %v12282_v29  ;;  %v12329_v49 = vadd.f32 %v4844_v13, %v12285_v7  ;;  %v4797_v1 = vadd.f32 %v4793_v42, %v3382_v22  ;;  %v3383_v45 = vadd.f32 %v3379_v4, %v12191_v24  ;;  %v14175_v22 = vld [vmem:[#allocation41_spill] sm:$0xff]  ;;  %v14176_v24 = vld [vmem:[#allocation31_spill] sm:$0xff]  ;;  %14178 = vst [vmem:[#allocation38_spill] sm:$0xff] %v12348_v62 }
 0x221   : > { %v9734_v63 = vpop.eup %9733  ;;  %9749 = vrcp.f32 %v2751_v40  ;;  %v2774_v58 = vadd.f32 1.0, %v9730_v35  ;;  %v12346_v40 = vpop.f32.mrf.mxu1  ;;  %v14179_v35 = vld [vmem:[#allocation29_spill] sm:$0xff]  ;;  %v14182_v62 = vld [vmem:[#allocation47_spill] sm:$0xff] }
 0x222   : > { %v12338_v43 = vpop.eup %9735  ;;  %v4943_v61 = vsub.f32 %v12106_v19, %v12326_v31  ;;  %v4892_v5 = vsub.f32 %v14174_v3, %v12329_v49  ;;  %v4841_v13 = vsub.f32 %v14175_v22, %v4797_v1  ;;  %v3387_v4 = vmul.f32 %v14176_v24, %v3383_v45  ;;  %14177 = vst [vmem:[#allocation37_spill] sm:$0xff] %v12346_v40  ;;  %v14181_v40 = vld [vmem:[#allocation42_spill] sm:$0xff] }
 0x223   : > { %14173 = vst [vmem:[#allocation60_spill] sm:$0xff] %v12338_v43  ;;  %v9738_v42 = vpop.eup %9737  ;;  %v4790_v8 = vsub.f32 %v14179_v35, %v3383_v45  ;;  %9751 = vrcp.f32 %v2774_v58  ;;  %v2747_v9 = vadd.f32 1.0, %v9734_v63  ;;  %v2220_v19 = vadd.f32 %v14180_v25, %v12122_v2  ;;  %v14183_v58 = vld [vmem:[#allocation49_spill] sm:$0xff] }
 0x224   : > { %v9740_v37 = vpop.eup %9739  ;;  %v4947_v3 = vmul.f32 %v12213_v59, %v4943_v61  ;;  %v4896_v22 = vmul.f32 %v12124_v33, %v4892_v5  ;;  %v4845_v24 = vmul.f32 %v12044_v6, %v4841_v13  ;;  %v8469_v60 = vpack.c.bf16 %v3387_v4, %v3386_v17  ;;  %v12369_v6 = vpop.f32.mrf.mxu1 }
 0x225   : > { %v4794_v18 = vmul.f32 %v14181_v40, %v4790_v8  ;;  %9753 = vrcp.f32 %v2747_v9  ;;  %v2083_v35 = vadd.f32 %v14182_v62, %v11601_v27  ;;  %v2212_v63 = vadd.f32 %v14183_v58, %v12122_v2  ;;  %v12371_v59 = vpop.f32.mrf.mxu0 }
 0x226   : > { %v9742_v57 = vpop.eup %9741  ;;  %v12362_v25 = vadd.f32 %v4896_v22, %v12329_v49  ;;  %v4849_v43 = vadd.f32 %v4845_v24, %v4797_v1  ;;  %8725 = vst [vmem:[%s10910_s1 + $0x78] sm:$0xff] %v8469_v60   ;;  %v12366_v33 = vadd.f32 %v4947_v3, %v12326_v31  ;;  %9755 = vpow2.f32 %v12242_v28  ;;  %v14184_v28 = vld [vmem:[#allocation44_spill] sm:$0xff] }
 0x227   : > { %v4798_v17 = vadd.f32 %v4794_v18, %v3383_v45  ;;  %v4801_v9 = vmul.f32 %v9732_v34, %v4797_v1  ;;  %9757 = vpow2.f32 %v12267_v54  ;;  %v7758_v61 = vmul.f32 -1.442695, %v2220_v19 }
 0x228   : > { %v9744_v5 = vpop.eup %9743  ;;  %v4944_v13 = vsub.f32 %v12142_v52, %v12362_v25  ;;  %v4893_v60 = vsub.f32 %v12055_v10, %v4849_v43  ;;  %v4995_v4 = vsub.f32 %v12223_v44, %v12366_v33  ;;  %9759 = vtanh.f32 %v12246_v50  ;;  %v12385_v10 = vpop.f32.mrf.mxu1 }
 0x229   : > { %v4842_v40 = vsub.f32 %v14184_v28, %v4798_v17  ;;  %v4802_v62 = vmul.f32 %v9742_v57, %v4798_v17  ;;  %v2753_v8 = vadd.f32 1.0, %v9744_v5  ;;  %9761 = vpow2.f32 %v12269_v41  ;;  %v12387_v44 = vpop.f32.mrf.mxu0 }
 0x22a   : > { %v9746_v18 = vpop.eup %9745  ;;  %v4948_v34 = vmul.f32 %v12235_v53, %v4944_v13  ;;  %v4897_v54 = vmul.f32 %v12156_v15, %v4893_v60  ;;  %v4999_v52 = vmul.f32 %v9738_v42, %v4995_v4  ;;  %9763 = vpow2.f32 %v12275_v55  ;;  %v12410_v24 = vpop.f32.mrf.mxu1 }
 0x22b   : > { %v4846_v50 = vmul.f32 %v12067_v21, %v4842_v40  ;;  %v8479_v1 = vpack.c.bf16 %v4802_v62, %v4801_v9  ;;  %9765 = vrcp.f32 %v2753_v8  ;;  %v7773_v57 = vmul.f32 -1.442695, %v2083_v35  ;;  %v12412_v35 = vpop.f32.mrf.mxu0 }
 0x22c   : > { %v9748_v45 = vpop.eup %9747  ;;  %v12390_v41 = vadd.f32 %v4897_v54, %v4849_v43  ;;  %v12393_v53 = vadd.f32 %v4948_v34, %v12362_v25  ;;  %v12396_v15 = vadd.f32 %v4999_v52, %v12366_v33  ;;  %9767 = vpow2.f32 %v12319_v47  ;;  %v12436_v9 = vpop.f32.mrf.mxu1 }
 0x22d   : > { %v12399_v55 = vadd.f32 %v4846_v50, %v4798_v17  ;;  %v4799_v42 = vmul.f32 %v9740_v37, %v12250_v26  ;;  %8727 = vst [vmem:[%s10910_s1 + $0x88] sm:$0xff] %v8479_v1   ;;  %v4800_v21 = vmul.f32 %v9748_v45, %v12285_v7  ;;  %9769 = vtanh.f32 %v12306_v36 }
 0x22e   : > { %v9750_v19 = vpop.eup %9749  ;;  %v4945_v3 = vsub.f32 %v12171_v38, %v12390_v41  ;;  %v4996_v22 = vsub.f32 %v12253_v0, %v12393_v53  ;;  %9771 = vpow2.f32 %v12321_v20  ;;  %v7754_v47 = vmul.f32 -1.442695, %v2212_v63  ;;  %v14185_v0 = vld [vmem:[#allocation22_spill] sm:$0xff]  ;;  %v12458_v54 = vpop.f32.mrf.mxu1 }
 0x22f   : > { %v4894_v37 = vsub.f32 %v12079_v23, %v12399_v55  ;;  %v8474_v26 = vpack.c.bf16 %v4800_v21, %v4799_v42  ;;  %v12416_v7 = vmul.f32 %v9750_v19, %v4849_v43  ;;  %9773 = vpow2.f32 %v12323_v39  ;;  %v14186_v23 = vld [vmem:[#allocation50_spill] sm:$0xff] }
 0x230   : > { %v9752_v38 = vpop.eup %9751  ;;  %v4949_v36 = vmul.f32 %v12271_v16, %v4945_v3  ;;  %v5000_v58 = vmul.f32 %v9746_v18, %v4996_v22  ;;  %9775 = vpow2.f32 %v12332_v30  ;;  %v2223_v20 = vadd.f32 %v14185_v0, %v12122_v2  ;;  %v12434_v30 = vpop.f32.mrf.mxu0 }
 0x231   : > { %v4898_v63 = vmul.f32 %v12179_v46, %v4894_v37  ;;  %8726 = vst [vmem:[%s10910_s1 + $0x80] sm:$0xff] %v8474_v26   ;;  %9777 = vtanh.f32 %v12336_v48  ;;  %v2085_v43 = vadd.f32 %v14186_v23, %v11606_v11  ;;  %v2087_v13 = vadd.f32 %v12051_v14, %v11601_v27  ;;  %v12472_v37 = vpop.f32.mrf.mxu1 }
 0x232   : > { %v9754_v17 = vpop.eup %9753  ;;  %v12429_v39 = vadd.f32 %v4949_v36, %v12390_v41  ;;  %v12432_v16 = vadd.f32 %v5000_v58, %v12393_v53  ;;  %9779 = vpow2.f32 %v7758_v61  ;;  %v7760_v28 = vmul.f32 -1.442695, %v2223_v20 }
 0x233   : > { %v9756_v5 = vpop.eup %9755  ;;  %v12439_v46 = vadd.f32 %v4898_v63, %v12399_v55  ;;  %v12442_v48 = vmul.f32 %v9754_v17, %v12282_v29  ;;  %9781 = vpow2.f32 %v7773_v57  ;;  %v2215_v29 = vadd.f32 %v12053_v56, %v12122_v2 }
 0x234   : > { %v9758_v60 = vpop.eup %9757  ;;  %v4997_v4 = vsub.f32 %v12292_v51, %v12429_v39  ;;  %v2776_v61 = vadd.f32 1.0, %v9756_v5  ;;  %9783 = vpow2.f32 %v7754_v47  ;;  %v12456_v51 = vpop.f32.mrf.mxu0  ;;  %v7775_v1 = vmul.f32 -1.442695, %v2087_v13 }
 0x235   : > { %v12448_v40 = vpop.eup %9759  ;;  %v4946_v62 = vsub.f32 %v12199_v32, %v12439_v46  ;;  %v2749_v8 = vadd.f32 1.0, %v9758_v60  ;;  %9785 = vtanh.f32 %v2085_v43  ;;  %v7756_v3 = vmul.f32 -1.442695, %v2215_v29  ;;  %v14188_v43 = vld [vmem:[#allocation24_spill] sm:$0xff] }
 0x236   : > { %v9762_v18 = vpop.eup %9761  ;;  %v5001_v34 = vmul.f32 %v9752_v38, %v4997_v4  ;;  %9787 = vrcp.f32 %v2776_v61  ;;  %v5047_v14 = vsub.f32 %v12448_v40, %v12396_v15  ;;  %v12470_v47 = vpop.f32.mrf.mxu0  ;;  %v14187_v38 = vld [vmem:[#allocation60_spill] sm:$0xff]  ;;  %v2236_v17 = vadd.f32 %v14188_v43, %v12122_v2 }
 0x237   : > { %v9764_v52 = vpop.eup %9763  ;;  %v4950_v50 = vmul.f32 %v12310_v12, %v4946_v62  ;;  %9789 = vrcp.f32 %v2749_v8  ;;  %v2759_v32 = vadd.f32 1.0, %v9762_v18 }
 0x238   : > { %v9766_v57 = vpop.eup %9765  ;;  %v2778_v45 = vadd.f32 1.0, %v9764_v52  ;;  %v12462_v56 = vadd.f32 %v5001_v34, %v12429_v39  ;;  %9791 = vpow2.f32 %v7760_v28  ;;  %v12484_v60 = vpop.f32.mrf.mxu0  ;;  %v14189_v28 = vld [vmem:[#allocation26_spill] sm:$0xff]  ;;  %v7766_v52 = vmul.f32 -1.442695, %v2236_v17 }
 0x239   : > { %v9768_v42 = vpop.eup %9767  ;;  %v12465_v21 = vadd.f32 %v4950_v50, %v12439_v46  ;;  %v4854_v19 = vmul.f32 %v9766_v57, %v12399_v55  ;;  %9793 = vrcp.f32 %v2759_v32  ;;  %v2228_v62 = vadd.f32 %v14189_v28, %v12122_v2 }
 0x23a   : > { %v12468_v22 = vpop.eup %9769  ;;  %9795 = vrcp.f32 %v2778_v45  ;;  %v2755_v12 = vadd.f32 1.0, %v9768_v42  ;;  %v12496_v45 = vpop.f32.mrf.mxu0 }
 0x23b   : > { %v9772_v26 = vpop.eup %9771  ;;  %v4998_v36 = vsub.f32 %v14187_v38, %v12465_v21  ;;  %v8489_v58 = vpack.c.bf16 %v4854_v19, %v12416_v7  ;;  %v5048_v55 = vsub.f32 %v12468_v22, %v12432_v16  ;;  %9797 = vpow2.f32 %v7775_v1  ;;  %v12486_v7 = vpop.f32.mrf.mxu1  ;;  %v14190_v1 = vld [vmem:[#allocation53_spill] sm:$0xff]  ;;  %v14197_v22 = vld [vmem:[#allocation59_spill] sm:$0xff] }
 0x23c   : > { %v9774_v0 = vpop.eup %9773  ;;  %9799 = vrcp.f32 %v2755_v12  ;;  %v2761_v20 = vadd.f32 1.0, %v9772_v26  ;;  %v2239_v57 = vadd.f32 %v14190_v1, %v12122_v2 }
 0x23d   : > { %v9776_v63 = vpop.eup %9775  ;;  %8729 = vst [vmem:[%s10910_s1 + $0x98] sm:$0xff] %v8489_v58   ;;  %v2780_v23 = vadd.f32 1.0, %v9774_v0  ;;  %9801 = vpow2.f32 %v7756_v3  ;;  %v12498_v42 = vpop.f32.mrf.mxu1  ;;  %v7762_v3 = vmul.f32 -1.442695, %v2228_v62  ;;  %v14191_v0 = vld [vmem:[#allocation48_spill] sm:$0xff] }
 0x23e   : > { %v12482_v5 = vpop.eup %9777  ;;  %9803 = vrcp.f32 %v2761_v20  ;;  %v2757_v13 = vadd.f32 1.0, %v9776_v63  ;;  %v2231_v20 = vadd.f32 %v14191_v0, %v12122_v2  ;;  %v7768_v17 = vmul.f32 -1.442695, %v2239_v57  ;;  %v14195_v0 = vld [vmem:[#allocation20_spill] sm:$0xff] }
 0x23f   : > { %v9780_v4 = vpop.eup %9779  ;;  %9805 = vrcp.f32 %v2780_v23  ;;  %v5049_v61 = vsub.f32 %v12482_v5, %v12462_v56  ;;  %v14200_v5 = vld [vmem:[#allocation43_spill] sm:$0xff] }
 0x240   : > { %v9782_v8 = vpop.eup %9781  ;;  %9807 = vrcp.f32 %v2757_v13  ;;  %v2767_v29 = vadd.f32 1.0, %v9780_v4  ;;  %v12506_v13 = vpop.f32.mrf.mxu0  ;;  %v7764_v1 = vmul.f32 -1.442695, %v2231_v20  ;;  %v2093_v20 = vadd.f32 %v14195_v0, %v11601_v27 }
 0x241   : > { %v9784_v18 = vpop.eup %9783  ;;  %v2782_v34 = vadd.f32 1.0, %v9782_v8  ;;  %v12508_v4 = vpop.f32.mrf.mxu1 }
 0x242   : > { %v12492_v50 = vpop.eup %9785  ;;  %9809 = vrcp.f32 %v2767_v29  ;;  %v2763_v32 = vadd.f32 1.0, %v9784_v18  ;;  %v14192_v18 = vld [vmem:[#allocation56_spill] sm:$0xff] }
 0x243   : > { %v9788_v19 = vpop.eup %9787  ;;  %9811 = vrcp.f32 %v2782_v34  ;;  %v2252_v34 = vadd.f32 %v14192_v18, %v12122_v2 }
 0x244   : > { %v9790_v12 = vpop.eup %9789  ;;  %v5002_v26 = vmul.f32 %v9788_v19, %v4998_v36  ;;  %9813 = vrcp.f32 %v2763_v32 }
 0x245   : > { %v9792_v38 = vpop.eup %9791  ;;  %v4852_v58 = vmul.f32 %v9790_v12, %v12329_v49  ;;  %9815 = vpow2.f32 %v7766_v52  ;;  %v12528_v12 = vpop.f32.mrf.mxu0 }
 0x246   : > { %v9794_v63 = vpop.eup %9793  ;;  %v12504_v23 = vadd.f32 %v5002_v26, %v12465_v21  ;;  %v2769_v43 = vadd.f32 1.0, %v9792_v38  ;;  %9817 = vpow2.f32 %v7762_v3  ;;  %v12530_v26 = vpop.f32.mrf.mxu1 }
 0x247   : > { %v9796_v36 = vpop.eup %9795  ;;  %v8484_v28 = vpack.c.bf16 %v4852_v58, %v12442_v48  ;;  %v4905_v49 = vmul.f32 %v9794_v63, %v12390_v41  ;;  %v14193_v48 = vld [vmem:[#allocation58_spill] sm:$0xff] }
 0x248   : > { %v9798_v62 = vpop.eup %9797  ;;  %v5051_v8 = vmul.f32 %v9796_v36, %v5047_v14  ;;  %v5050_v29 = vsub.f32 %v12492_v50, %v12504_v23  ;;  %9819 = vrcp.f32 %v2769_v43  ;;  %v2103_v41 = vadd.f32 %v14193_v48, %v11601_v27  ;;  %v14194_v14 = vld [vmem:[#allocation52_spill] sm:$0xff]  ;;  %v12541_v48 = vpop.f32.mrf.mxu0 }
 0x249   : > { %v9800_v52 = vpop.eup %9799  ;;  %8728 = vst [vmem:[%s10910_s1 + $0x90] sm:$0xff] %v8484_v28   ;;  %v2784_v32 = vadd.f32 1.0, %v9798_v62  ;;  %9821 = vpow2.f32 %v7768_v17  ;;  %v2244_v3 = vadd.f32 %v14194_v14, %v12122_v2  ;;  %v7774_v43 = vmul.f32 -1.442695, %v2252_v34  ;;  %v14196_v36 = vld [vmem:[#allocation28_spill] sm:$0xff] }
 0x24a   : > { %v9802_v57 = vpop.eup %9801  ;;  %v4903_v19 = vmul.f32 %v9800_v52, %v12326_v31  ;;  %v12524_v40 = vadd.f32 %v5051_v8, %v12396_v15  ;;  %v2255_v17 = vadd.f32 %v14196_v36, %v12122_v2  ;;  %v7781_v8 = vmul.f32 -1.442695, %v2103_v41 }
 0x24b   : > { %v9804_v38 = vpop.eup %9803  ;;  %9823 = vrcp.f32 %v2784_v32  ;;  %v2765_v58 = vadd.f32 1.0, %v9802_v57  ;;  %v7770_v32 = vmul.f32 -1.442695, %v2244_v3  ;;  %v7777_v57 = vmul.f32 -1.442695, %v2093_v20 }
 0x24c   : > { %v9806_v63 = vpop.eup %9805  ;;  %v4906_v31 = vmul.f32 %v9804_v38, %v12439_v46  ;;  %v12543_v46 = vpop.f32.mrf.mxu1 }
 0x24d   : > { %v9808_v28 = vpop.eup %9807  ;;  %v5052_v62 = vmul.f32 %v9806_v63, %v5048_v55  ;;  %9825 = vrcp.f32 %v2765_v58  ;;  %v2107_v55 = vadd.f32 %v14197_v22, %v11601_v27  ;;  %v14198_v58 = vld [vmem:[#allocation62_spill] sm:$0xff] }
 0x24e   : > { %v8499_v18 = vpack.c.bf16 %v4906_v31, %v4905_v49  ;;  %v4904_v52 = vmul.f32 %v9808_v28, %v12362_v25  ;;  %9827 = vpow2.f32 %v7764_v1  ;;  %v7776_v1 = vmul.f32 -1.442695, %v2255_v17  ;;  %v14199_v31 = vld [vmem:[#allocation46_spill] sm:$0xff] }
 0x24f   : > { %v9810_v34 = vpop.eup %9809  ;;  %v12546_v14 = vadd.f32 %v5052_v62, %v12432_v16  ;;  %9829 = vpow2.f32 %v7774_v43  ;;  %v2247_v0 = vadd.f32 %v14198_v58, %v12122_v2  ;;  %v12563_v43 = vpop.f32.mrf.mxu1  ;;  %v7783_v62 = vmul.f32 -1.442695, %v2107_v55 }
 0x250   : > { %v9812_v38 = vpop.eup %9811  ;;  %8731 = vst [vmem:[%s10910_s1 + $0xa8] sm:$0xff] %v8499_v18   ;;  %v8494_v49 = vpack.c.bf16 %v4904_v52, %v4903_v19  ;;  %v4957_v25 = vmul.f32 %v9810_v34, %v12429_v39  ;;  %9831 = vpow2.f32 %v7781_v8  ;;  %v2091_v19 = vadd.f32 %v14199_v31, %v11606_v11  ;;  %v12561_v39 = vpop.f32.mrf.mxu0  ;;  %v14201_v52 = vld [vmem:[#allocation51_spill] sm:$0xff] }
 0x251   : > { %v9814_v41 = vpop.eup %9813  ;;  %v5053_v3 = vmul.f32 %v9812_v38, %v5049_v61  ;;  %9833 = vpow2.f32 %v7770_v32  ;;  %v2097_v61 = vadd.f32 %v14200_v5, %v11601_v27  ;;  %v7772_v18 = vmul.f32 -1.442695, %v2247_v0  ;;  %v12575_v22 = vpop.f32.mrf.mxu1 }
 0x252   : > { %v9816_v20 = vpop.eup %9815  ;;  %8730 = vst [vmem:[%s10910_s1 + $0xa0] sm:$0xff] %v8494_v49   ;;  %v4955_v63 = vmul.f32 %v9814_v41, %v12366_v33  ;;  %9835 = vpow2.f32 %v7777_v57  ;;  %v2268_v32 = vadd.f32 %v14201_v52, %v12122_v2  ;;  %v12573_v57 = vpop.f32.mrf.mxu0 }
 0x253   : > { %v2775_v36 = vadd.f32 1.0, %v9816_v20  ;;  %v12568_v17 = vadd.f32 %v5053_v3, %v12462_v56  ;;  %v9818_v28 = vpop.eup %9817  ;;  %9837 = vpow2.f32 %v7776_v1  ;;  %v7779_v49 = vmul.f32 -1.442695, %v2097_v61  ;;  %v14202_v3 = vld [vmem:[#allocation55_spill] sm:$0xff]  ;;  %v14203_v20 = vld [vmem:[#allocation54_spill] sm:$0xff]  ;;  %v12589_v61 = vpop.f32.mrf.mxu1 }
 0x254   : > { %v2771_v8 = vadd.f32 1.0, %v9818_v28  ;;  %v2101_v58 = vadd.f32 %v14202_v3, %v11606_v11  ;;  %v7782_v0 = vmul.f32 -1.442695, %v2268_v32  ;;  %v2113_v31 = vadd.f32 %v14203_v20, %v11601_v27  ;;  %v12587_v5 = vpop.f32.mrf.mxu0 }
 0x255   : > { %v9820_v33 = vpop.eup %9819  ;;  %9839 = vrcp.f32 %v2775_v36  ;;  %v14204_v36 = vld [vmem:[#allocation21_spill] sm:$0xff] }
 0x256   : > { %v4958_v34 = vmul.f32 %v9820_v33, %v12465_v21  ;;  %9841 = vtanh.f32 %v2091_v19  ;;  %v9822_v38 = vpop.eup %9821  ;;  %v7785_v32 = vmul.f32 -1.442695, %v2113_v31 }
 0x257   : > { %9843 = vrcp.f32 %v2771_v8  ;;  %v2777_v41 = vadd.f32 1.0, %v9822_v38 }
 0x258   : > { %v9824_v1 = vpop.eup %9823  ;;  %v8509_v55 = vpack.c.bf16 %v4958_v34, %v4957_v25  ;;  %9845 = vpow2.f32 %v7783_v62  ;;  %v2105_v25 = vadd.f32 %v14204_v36, %v11606_v11 }
 0x259   : > { %v5054_v21 = vmul.f32 %v9824_v1, %v5050_v29  ;;  %9847 = vpow2.f32 %v7772_v18  ;;  %v14205_v29 = vld [vmem:[#allocation61_spill] sm:$0xff]  ;;  %v14206_v1 = vld [vmem:[#allocation40_spill] sm:$0xff] }
 0x25a   : > { %v9826_v19 = vpop.eup %9825  ;;  %8733 = vst [vmem:[%s10910_s1 + $0xb8] sm:$0xff] %v8509_v55   ;;  %9849 = vrcp.f32 %v2777_v41  ;;  %v2260_v33 = vadd.f32 %v14205_v29, %v12122_v2  ;;  %v12601_v55 = vpop.f32.mrf.mxu1 }
 0x25b   : > { %v9828_v28 = vpop.eup %9827  ;;  %v4956_v62 = vmul.f32 %v9826_v19, %v12393_v53  ;;  %9851 = vpow2.f32 %v7779_v49  ;;  %v12593_v50 = vadd.f32 %v5054_v21, %v12504_v23  ;;  %v2271_v53 = vadd.f32 %v14206_v1, %v12122_v2  ;;  %v12599_v49 = vpop.f32.mrf.mxu0 }
 0x25c   : > { %v2773_v8 = vadd.f32 1.0, %v9828_v28  ;;  %9853 = vtanh.f32 %v2101_v58  ;;  %v9830_v18 = vpop.eup %9829  ;;  %v7778_v3 = vmul.f32 -1.442695, %v2260_v33 }
 0x25d   : > { %v8504_v52 = vpack.c.bf16 %v4956_v62, %v4955_v63  ;;  %9855 = vpow2.f32 %v7782_v0  ;;  %v9832_v34 = vpop.eup %9831  ;;  %v2783_v38 = vadd.f32 1.0, %v9830_v18  ;;  %v14207_v63 = vld [vmem:[#allocation30_spill] sm:$0xff]  ;;  %v7784_v28 = vmul.f32 -1.442695, %v2271_v53 }
 0x25e   : > { %9857 = vrcp.f32 %v2773_v8  ;;  %v9834_v41 = vpop.eup %9833  ;;  %v2117_v0 = vadd.f32 %v14207_v63, %v11601_v27  ;;  %v2790_v31 = vadd.f32 1.0, %v9832_v34  ;;  %v14208_v62 = vld [vmem:[#allocation34_spill] sm:$0xff]  ;;  %v12608_v8 = vpop.f32.mrf.mxu0 }
 0x25f   : > { %8732 = vst [vmem:[%s10910_s1 + $0xb0] sm:$0xff] %v8504_v52   ;;  %9859 = vtanh.f32 %v2105_v25  ;;  %v9836_v21 = vpop.eup %9835  ;;  %v2779_v58 = vadd.f32 1.0, %v9834_v41  ;;  %v2263_v29 = vadd.f32 %v14208_v62, %v12122_v2  ;;  %v12610_v25 = vpop.f32.mrf.mxu1  ;;  %v14209_v34 = vld [vmem:[#allocation38_spill] sm:$0xff] }
 0x260   : > { %9861 = vrcp.f32 %v2783_v38  ;;  %v9838_v20 = vpop.eup %9837  ;;  %v2786_v52 = vadd.f32 1.0, %v9836_v21  ;;  %v2284_v1 = vadd.f32 %v14209_v34, %v12122_v2  ;;  %v12620_v62 = vpop.f32.mrf.mxu0 }
 0x261   : > { %9863 = vpow2.f32 %v7785_v32  ;;  %v2785_v36 = vadd.f32 1.0, %v9838_v20  ;;  %v7787_v32 = vmul.f32 -1.442695, %v2117_v0  ;;  %v7780_v63 = vmul.f32 -1.442695, %v2263_v29 }
 0x262   : > { %v9840_v19 = vpop.eup %9839  ;;  %9865 = vrcp.f32 %v2779_v58  ;;  %v2123_v20 = vadd.f32 %v12369_v6, %v11601_v27  ;;  %v12629_v34 = vpop.f32.mrf.mxu0 }
 0x263   : > { %v12612_v33 = vpop.eup %9841  ;;  %v5009_v18 = vmul.f32 %v9840_v19, %v12462_v56  ;;  %9867 = vpow2.f32 %v7778_v3  ;;  %v12622_v56 = vpop.f32.mrf.mxu1  ;;  %14210 = vst [vmem:[#allocation57_spill] sm:$0xff] %v12629_v34 }
 0x264   : > { %v9844_v38 = vpop.eup %9843  ;;  %9869 = vrcp.f32 %v2785_v36 }
 0x265   : > { %v9846_v53 = vpop.eup %9845  ;;  %v5007_v41 = vmul.f32 %v9844_v38, %v12396_v15  ;;  %9871 = vrcp.f32 %v2790_v31  ;;  %v7790_v15 = vmul.f32 -1.442695, %v2284_v1  ;;  %v2276_v31 = vadd.f32 %v12371_v59, %v12122_v2 }
 0x266   : > { %v9848_v58 = vpop.eup %9847  ;;  %9873 = vpow2.f32 %v7784_v28  ;;  %v2792_v21 = vadd.f32 1.0, %v9846_v53  ;;  %v7789_v38 = vmul.f32 -1.442695, %v2123_v20  ;;  %v12631_v53 = vpop.f32.mrf.mxu1 }
 0x267   : > { %v9850_v3 = vpop.eup %9849  ;;  %9875 = vrcp.f32 %v2786_v52  ;;  %v2781_v0 = vadd.f32 1.0, %v9848_v58  ;;  %v2287_v52 = vadd.f32 %v12387_v44, %v12122_v2  ;;  %v2127_v44 = vadd.f32 %v12410_v24, %v11601_v27 }
 0x268   : > { %v9852_v19 = vpop.eup %9851  ;;  %v5010_v36 = vmul.f32 %v9850_v3, %v12504_v23  ;;  %9877 = vpow2.f32 %v7787_v32  ;;  %v14211_v32 = vld [vmem:[#allocation27_spill] sm:$0xff]  ;;  %v12651_v27 = vpop.f32.mrf.mxu1 }
 0x269   : > { %v9854_v28 = vpop.eup %9853  ;;  %9879 = vrcp.f32 %v2781_v0  ;;  %v2095_v1 = vadd.f32 %v14211_v32, %v11606_v11  ;;  %v2788_v3 = vadd.f32 1.0, %v9852_v19  ;;  %v2279_v0 = vadd.f32 %v12412_v35, %v12122_v2  ;;  %v14212_v19 = vld [vmem:[#allocation19_spill] sm:$0xff] }
 0x26a   : > { %v9856_v6 = vpop.eup %9855  ;;  %v8519_v29 = vpack.c.bf16 %v5010_v36, %v5009_v18  ;;  %9881 = vpow2.f32 %v7780_v63  ;;  %v7786_v63 = vmul.f32 -1.442695, %v2276_v31  ;;  %v7791_v31 = vmul.f32 -1.442695, %v2127_v44 }
 0x26b   : > { %v9858_v23 = vpop.eup %9857  ;;  %9883 = vrcp.f32 %v2792_v21  ;;  %v2791_v58 = vadd.f32 1.0, %v9856_v6 }
 0x26c   : > { %v12635_v59 = vpop.eup %9859  ;;  %8735 = vst [vmem:[%s10910_s1 + $0xc8] sm:$0xff] %v8519_v29   ;;  %v5008_v18 = vmul.f32 %v9858_v23, %v12432_v16  ;;  %9885 = vpow2.f32 %v7790_v15  ;;  %v7792_v29 = vmul.f32 -1.442695, %v2287_v52  ;;  %v12647_v16 = vld [vmem:[%s13976_s2] sm:$0x7]  ;;  %v12649_v15 = vpop.f32.mrf.mxu0 }
 0x26d   : > { %v9862_v20 = vpop.eup %9861  ;;  %9887 = vrcp.f32 %v2791_v58  ;;  %v12655_v2 = vrot.slane %v12647_v16, %v14212_v19  ;;  %v7788_v23 = vmul.f32 -1.442695, %v2279_v0 }
 0x26e   : > { %v9864_v36 = vpop.eup %9863  ;;  %v8514_v21 = vpack.c.bf16 %v5008_v18, %v5007_v41  ;;  %v5061_v6 = vmul.f32 %v9862_v20, %v12568_v17  ;;  %9889 = vpow2.f32 %v7789_v38  ;;  %v12660_v18 = vpop.f32.mrf.mxu0 }
 0x26f   : > { %v9866_v24 = vpop.eup %9865  ;;  %9891 = vtanh.f32 %v2095_v1  ;;  %14213 = vst [vmem:[#allocation35_spill] sm:$0xff] %v12660_v18  ;;  %v12662_v1 = vpop.f32.mrf.mxu1  ;;  %v3751_v44 = vadd.f32 %v12456_v51, %v12655_v2  ;;  %v14216_v18 = vld [vmem:[#allocation23_spill] sm:$0xff] }
 0x270   : > { %v9868_v35 = vpop.eup %9867  ;;  %8734 = vst [vmem:[%s10910_s1 + $0xc0] sm:$0xff] %v8514_v21   ;;  %v5059_v41 = vmul.f32 %v9866_v24, %v12524_v40  ;;  %9893 = vpow2.f32 %v7786_v63  ;;  %14214 = vst [vmem:[#allocation45_spill] sm:$0xff] %v12662_v1  ;;  %v5101_v21 = vsub.f32 %v9854_v28, %v12568_v17  ;;  %v14215_v24 = vld [vmem:[#allocation33_spill] sm:$0xff]  ;;  %v2115_v1 = vadd.f32 %v14216_v18, %v11606_v11 }
 0x271   : > { %v9870_v38 = vpop.eup %9869  ;;  %9895 = vrcp.f32 %v2788_v3  ;;  %v2787_v52 = vadd.f32 1.0, %v9868_v35  ;;  %v2111_v63 = vadd.f32 %v14215_v24, %v11606_v11  ;;  %v2794_v35 = vadd.f32 1.0, %v9864_v36  ;;  %v14217_v28 = vld [vmem:[#allocation17_spill] sm:$0xff]  ;;  %v12676_v24 = vpop.f32.mrf.mxu0 }
 0x272   : > { %v9872_v32 = vpop.eup %9871  ;;  %v5062_v58 = vmul.f32 %v9870_v38, %v12593_v50  ;;  %9897 = vpow2.f32 %v7792_v29  ;;  %v12678_v51 = vpop.f32.mrf.mxu1  ;;  %v5099_v18 = vsub.f32 %v12612_v33, %v12524_v40 }
 0x273   : > { %v9874_v20 = vpop.eup %9873  ;;  %9899 = vrcp.f32 %v2787_v52  ;;  %v5105_v19 = vmul.f32 %v9872_v32, %v5101_v21  ;;  %v12674_v52 = vrot.slane %v12647_v16, %v14217_v28 }
 0x274   : > { %v9876_v3 = vpop.eup %9875  ;;  %v8529_v0 = vpack.c.bf16 %v5062_v58, %v5061_v6  ;;  %v2793_v38 = vadd.f32 1.0, %v9874_v20  ;;  %9901 = vpow2.f32 %v7791_v31  ;;  %v14218_v31 = vld [vmem:[#allocation37_spill] sm:$0xff]  ;;  %v7893_v58 = vmul.f32 -1.442695, %v3751_v44  ;;  %v12694_v33 = vpop.f32.mrf.mxu1 }
 0x275   : > { %v9878_v29 = vpop.eup %9877  ;;  %9903 = vpow2.f32 %v7788_v23  ;;  %v2121_v32 = vadd.f32 %v14218_v31, %v11606_v11  ;;  %v3942_v21 = vadd.f32 %v12458_v54, %v12674_v52  ;;  %v2125_v44 = vadd.f32 %v12385_v10, %v11606_v11  ;;  %v12692_v31 = vpop.f32.mrf.mxu0 }
 0x276   : > { %v9880_v34 = vpop.eup %9879  ;;  %8737 = vst [vmem:[%s10910_s1 + $0xd8] sm:$0xff] %v8529_v0   ;;  %9905 = vrcp.f32 %v2793_v38  ;;  %v12688_v38 = vadd.f32 %v5105_v19, %v12568_v17  ;;  %v3755_v17 = vadd.f32 %v12484_v60, %v12655_v2  ;;  %v12706_v60 = vpop.f32.mrf.mxu1 }
 0x277   : > { %v9882_v36 = vpop.eup %9881  ;;  %v5060_v6 = vmul.f32 %v9880_v34, %v12546_v14  ;;  %9907 = vtanh.f32 %v2111_v63  ;;  %v2796_v63 = vadd.f32 1.0, %v9878_v29  ;;  %v7894_v10 = vmul.f32 -1.442695, %v3942_v21 }
 0x278   : > { %v9884_v23 = vpop.eup %9883  ;;  %9909 = vrcp.f32 %v2794_v35  ;;  %v2789_v20 = vadd.f32 1.0, %v9882_v36  ;;  %v5103_v36 = vmul.f32 %v9876_v3, %v5099_v18  ;;  %v3945_v29 = vadd.f32 %v12486_v7, %v12674_v52 }
 0x279   : > { %v9886_v0 = vpop.eup %9885  ;;  %v8524_v34 = vpack.c.bf16 %v5060_v6, %v5059_v41  ;;  %9911 = vtanh.f32 %v2115_v1  ;;  %v5102_v41 = vsub.f32 %v12635_v59, %v12593_v50 }
 0x27a   : > { %v9888_v28 = vpop.eup %9887  ;;  %9913 = vrcp.f32 %v2789_v20  ;;  %v2799_v18 = vadd.f32 1.0, %v9886_v0  ;;  %v12709_v59 = vadd.f32 %v5103_v36, %v12524_v40  ;;  %v7896_v0 = vmul.f32 -1.442695, %v3945_v29  ;;  %v12720_v36 = vpop.f32.mrf.mxu1 }
 0x27b   : > { %v9890_v35 = vpop.eup %9889  ;;  %8736 = vst [vmem:[%s10910_s1 + $0xd0] sm:$0xff] %v8524_v34   ;;  %v5113_v54 = vmul.f32 %v9888_v28, %v12688_v38  ;;  %9915 = vpow2.f32 %v7893_v58  ;;  %v5106_v6 = vmul.f32 %v9884_v23, %v5102_v41  ;;  %v12704_v58 = vpop.f32.mrf.mxu0 }
 0x27c   : > { %v9892_v19 = vpop.eup %9891  ;;  %9917 = vtanh.f32 %v2121_v32  ;;  %v2798_v1 = vadd.f32 1.0, %v9890_v35  ;;  %v7895_v32 = vmul.f32 -1.442695, %v3755_v17 }
 0x27d   : > { %v9894_v11 = vpop.eup %9893  ;;  %9919 = vrcp.f32 %v2796_v63  ;;  %v5100_v21 = vsub.f32 %v9892_v19, %v12546_v14  ;;  %v3761_v63 = vadd.f32 %v12506_v13, %v12655_v2  ;;  %v3950_v13 = vadd.f32 %v12436_v9, %v12674_v52  ;;  %v12733_v9 = vpop.f32.mrf.mxu1 }
 0x27e   : > { %v9896_v3 = vpop.eup %9895  ;;  %9921 = vrcp.f32 %v2798_v1  ;;  %v2795_v28 = vadd.f32 1.0, %v9894_v11  ;;  %v12716_v1 = vadd.f32 %v5106_v6, %v12593_v50  ;;  %v14219_v11 = vld [vmem:[#allocation18_spill] sm:$0xff] }
 0x27f   : > { %v9898_v20 = vpop.eup %9897  ;;  %9923 = vtanh.f32 %v2125_v44  ;;  %v5104_v41 = vmul.f32 %v9896_v3, %v5100_v21  ;;  %v12718_v44 = vpop.f32.mrf.mxu0 }
 0x280   : > { %v9900_v34 = vpop.eup %9899  ;;  %9925 = vrcp.f32 %v2795_v28  ;;  %v2801_v3 = vadd.f32 1.0, %v9898_v20 }
 0x281   : > { %v9902_v7 = vpop.eup %9901  ;;  %v5111_v23 = vmul.f32 %v9900_v34, %v12709_v59  ;;  %9927 = vpow2.f32 %v7894_v10  ;;  %v12724_v10 = vrot.slane %v12647_v16, %v14219_v11  ;;  %v5108_v21 = vadd.f32 %v5104_v41, %v12546_v14 }
 0x282   : > { %v9904_v35 = vpop.eup %9903  ;;  %9929 = vrcp.f32 %v2799_v18  ;;  %v2800_v40 = vadd.f32 1.0, %v9902_v7  ;;  %v7897_v18 = vmul.f32 -1.442695, %v3761_v63  ;;  %v12731_v7 = vpop.f32.mrf.mxu0  ;;  %v3765_v14 = vadd.f32 %v12541_v48, %v12655_v2 }
 0x283   : > { %v9906_v17 = vpop.eup %9905  ;;  %v2797_v19 = vadd.f32 1.0, %v9904_v35  ;;  %9931 = vpow2.f32 %v7895_v32  ;;  %v3749_v20 = vadd.f32 %v12434_v30, %v12724_v10  ;;  %v7898_v35 = vmul.f32 -1.442695, %v3950_v13 }
 0x284   : > { %v9908_v29 = vpop.eup %9907  ;;  %v5114_v50 = vmul.f32 %v9906_v17, %v12716_v1  ;;  %9933 = vrcp.f32 %v2800_v40  ;;  %v3953_v40 = vadd.f32 %v12472_v37, %v12674_v52  ;;  %v3966_v41 = vadd.f32 %v12498_v42, %v12674_v52 }
 0x285   : > { %v9910_v6 = vpop.eup %9909  ;;  %9935 = vrcp.f32 %v2797_v19  ;;  %v5151_v34 = vsub.f32 %v9908_v29, %v12709_v59  ;;  %v3753_v37 = vadd.f32 %v12470_v47, %v12724_v10  ;;  %v7899_v47 = vmul.f32 -1.442695, %v3765_v14 }
 0x286   : > { %v9912_v28 = vpop.eup %9911  ;;  %v8539_v16 = vpack.c.bf16 %v5114_v50, %v5113_v54  ;;  %9937 = vpow2.f32 %v7896_v0  ;;  %v12747_v50 = vpop.f32.mrf.mxu0 }
 0x287   : > { %v9914_v32 = vpop.eup %9913  ;;  %v5155_v17 = vmul.f32 %v9910_v6, %v5151_v34  ;;  %9939 = vrcp.f32 %v2801_v3  ;;  %v12749_v3 = vpop.f32.mrf.mxu1  ;;  %v5152_v48 = vsub.f32 %v9912_v28, %v5108_v21  ;;  %v7900_v34 = vmul.f32 -1.442695, %v3953_v40 }
 0x288   : > { %v9916_v63 = vpop.eup %9915  ;;  %8739 = vst [vmem:[%s10910_s1 + $0xe8] sm:$0xff] %v8539_v16   ;;  %v5112_v19 = vmul.f32 %v9914_v32, %v5108_v21  ;;  %9941 = vpow2.f32 %v7897_v18  ;;  %v3958_v16 = vadd.f32 %v12508_v4, %v12674_v52  ;;  %v12761_v4 = vpop.f32.mrf.mxu0 }
 0x289   : > { %v9918_v54 = vpop.eup %9917  ;;  %v4516_v0 = vadd.f32 1.0, %v9916_v63  ;;  %9943 = vtanh.f32 %v3749_v20  ;;  %v12763_v40 = vpop.f32.mrf.mxu1 }
 0x28a   : > { %v9920_v29 = vpop.eup %9919  ;;  %v8534_v30 = vpack.c.bf16 %v5112_v19, %v5111_v23  ;;  %v5153_v13 = vsub.f32 %v9918_v54, %v12688_v38  ;;  %v12754_v23 = vadd.f32 %v5155_v17, %v12709_v59  ;;  %9945 = vpow2.f32 %v7898_v35 }
 0x28b   : > { %v9922_v6 = vpop.eup %9921  ;;  %v5156_v63 = vmul.f32 %v9920_v29, %v5152_v48  ;;  %9947 = vrcp.f32 %v4516_v0  ;;  %v7906_v19 = vmul.f32 -1.442695, %v3966_v41  ;;  %v3771_v35 = vadd.f32 %v12573_v57, %v12655_v2  ;;  %v12771_v48 = vpop.f32.mrf.mxu0 }
 0x28c   : > { %v9924_v42 = vpop.eup %9923  ;;  %8738 = vst [vmem:[%s10910_s1 + $0xe0] sm:$0xff] %v8534_v30   ;;  %v5157_v32 = vmul.f32 %v9922_v6, %v5153_v13  ;;  %9949 = vtanh.f32 %v3753_v37  ;;  %v7902_v41 = vmul.f32 -1.442695, %v3958_v16 }
 0x28d   : > { %v9926_v18 = vpop.eup %9925  ;;  %9951 = vpow2.f32 %v7900_v34  ;;  %v5154_v14 = vsub.f32 %v9924_v42, %v12716_v1  ;;  %v12769_v30 = vadd.f32 %v5156_v63, %v5108_v21  ;;  %v12773_v34 = vpop.f32.mrf.mxu1  ;;  %v7901_v42 = vmul.f32 -1.442695, %v3771_v35 }
 0x28e   : > { %v9928_v54 = vpop.eup %9927  ;;  %v5163_v28 = vmul.f32 %v9926_v18, %v12754_v23  ;;  %v12759_v20 = vadd.f32 %v5157_v32, %v12688_v38  ;;  %9953 = vpow2.f32 %v7899_v47  ;;  %v3969_v47 = vadd.f32 %v12530_v26, %v12674_v52 }
 0x28f   : > { %v9930_v59 = vpop.eup %9929  ;;  %v4517_v38 = vadd.f32 1.0, %v9928_v54  ;;  %9955 = vpow2.f32 %v7906_v19  ;;  %v3759_v19 = vadd.f32 %v12496_v45, %v12724_v10  ;;  %v3961_v54 = vadd.f32 %v12543_v46, %v12674_v52 }
 0x290   : > { %v9932_v17 = vpop.eup %9931  ;;  %v5165_v0 = vmul.f32 %v9930_v59, %v12759_v20  ;;  %v3775_v35 = vadd.f32 %v12599_v49, %v12655_v2  ;;  %v3982_v49 = vadd.f32 %v12563_v43, %v12674_v52 }
 0x291   : > { %v9934_v29 = vpop.eup %9933  ;;  %v4518_v13 = vadd.f32 1.0, %v9932_v17  ;;  %v12790_v17 = vpop.f32.mrf.mxu1 }
 0x292   : > { %v9936_v37 = vpop.eup %9935  ;;  %v5158_v6 = vmul.f32 %v9934_v29, %v5154_v14 }
 0x293   : > { %v9938_v57 = vpop.eup %9937  ;;  %v5164_v32 = vmul.f32 %v9936_v37, %v12769_v30  ;;  %9957 = vrcp.f32 %v4518_v13  ;;  %v7903_v37 = vmul.f32 -1.442695, %v3775_v35 }
 0x294   : > { %v4519_v16 = vadd.f32 1.0, %v9938_v57  ;;  %9959 = vpow2.f32 %v7902_v41  ;;  %v12777_v21 = vadd.f32 %v5158_v6, %v12716_v1  ;;  %v9940_v18 = vpop.eup %9939  ;;  %v12788_v1 = vpop.f32.mrf.mxu0  ;;  %v7908_v41 = vmul.f32 -1.442695, %v3969_v47 }
 0x295   : > { %v8544_v63 = vpack.c.bf16 %v5164_v32, %v5163_v28  ;;  %9961 = vrcp.f32 %v4517_v38  ;;  %v9942_v26 = vpop.eup %9941  ;;  %v3763_v28 = vadd.f32 %v12528_v12, %v12724_v10  ;;  %v7904_v38 = vmul.f32 -1.442695, %v3961_v54  ;;  %v12800_v57 = vpop.f32.mrf.mxu1 }
 0x296   : > { %9963 = vrcp.f32 %v4519_v16  ;;  %v5166_v59 = vmul.f32 %v9940_v18, %v12777_v21  ;;  %v9944_v45 = vpop.eup %9943  ;;  %v4520_v14 = vadd.f32 1.0, %v9942_v26  ;;  %v12798_v6 = vpop.f32.mrf.mxu0  ;;  %v7914_v47 = vmul.f32 -1.442695, %v3982_v49 }
 0x297   : > { %8740 = vst [vmem:[%s10910_s1 + $0xf0] sm:$0xff] %v8544_v63   ;;  %9965 = vpow2.f32 %v7901_v42  ;;  %v9946_v29 = vpop.eup %9945  ;;  %v6566_v32 = vsub.f32 %v9944_v45, %v12754_v23  ;;  %v3985_v49 = vadd.f32 %v12589_v61, %v12674_v52  ;;  %v3785_v61 = vadd.f32 %v12649_v15, %v12655_v2 }
 0x298   : > { %v8549_v46 = vpack.c.bf16 %v5166_v59, %v5165_v0  ;;  %9967 = vtanh.f32 %v3759_v19  ;;  %v9948_v13 = vpop.eup %9947  ;;  %v4521_v43 = vadd.f32 1.0, %v9946_v29  ;;  %v3781_v19 = vadd.f32 %v12620_v62, %v12655_v2  ;;  %v12805_v54 = vpop.f32.mrf.mxu0 }
 0x299   : > { %9969 = vrcp.f32 %v4520_v14  ;;  %v9950_v12 = vpop.eup %9949  ;;  %v6570_v16 = vmul.f32 %v9948_v13, %v6566_v32  ;;  %v12807_v59 = vpop.f32.mrf.mxu1  ;;  %v3769_v14 = vadd.f32 %v12561_v39, %v12724_v10  ;;  %v3998_v15 = vadd.f32 %v12610_v25, %v12674_v52 }
 0x29a   : > { %8741 = vst [vmem:[%s10910_s1 + $0xf8] sm:$0xff] %v8549_v46   ;;  %9971 = vtanh.f32 %v3763_v28  ;;  %v9952_v0 = vpop.eup %9951  ;;  %v6567_v35 = vsub.f32 %v9950_v12, %v12769_v30  ;;  %v3974_v28 = vadd.f32 %v12575_v22, %v12674_v52  ;;  %v7905_v13 = vmul.f32 -1.442695, %v3781_v19 }
 0x29b   : > { %9973 = vpow2.f32 %v7908_v41  ;;  %v9954_v42 = vpop.eup %9953  ;;  %v4523_v26 = vadd.f32 1.0, %v9952_v0  ;;  %v12815_v41 = vadd.f32 %v6570_v16, %v12754_v23  ;;  %v12821_v22 = vpop.f32.mrf.mxu1  ;;  %v3773_v0 = vadd.f32 %v12587_v5, %v12724_v10 }
 0x29c   : > { %9975 = vpow2.f32 %v7904_v38  ;;  %v9956_v18 = vpop.eup %9955  ;;  %v4522_v63 = vadd.f32 1.0, %v9954_v42  ;;  %v7910_v23 = vmul.f32 -1.442695, %v3974_v28  ;;  %v3977_v42 = vadd.f32 %v12601_v55, %v12674_v52 }
 0x29d   : > { %9977 = vpow2.f32 %v7903_v37  ;;  %v4529_v29 = vadd.f32 1.0, %v9956_v18  ;;  %v12819_v37 = vpop.f32.mrf.mxu0  ;;  %v12836_v19 = vpop.f32.mrf.mxu1 }
 0x29e   : > { %9979 = vrcp.f32 %v4522_v63 }
 0x29f   : > { %9981 = vpow2.f32 %v7914_v47  ;;  %v12834_v63 = vpop.f32.mrf.mxu0 }
 0x2a0   : > { %v9958_v45 = vpop.eup %9957  ;;  %9983 = vrcp.f32 %v4521_v43  ;;  %v7916_v43 = vmul.f32 -1.442695, %v3985_v49  ;;  %v3990_v49 = vadd.f32 %v12622_v56, %v12674_v52 }
 0x2a1   : > { %v9960_v46 = vpop.eup %9959  ;;  %v6571_v62 = vmul.f32 %v9958_v45, %v6567_v35  ;;  %9985 = vrcp.f32 %v4523_v26  ;;  %v7907_v45 = vmul.f32 -1.442695, %v3785_v61 }
 0x2a2   : > { %v9962_v38 = vpop.eup %9961  ;;  %9987 = vtanh.f32 %v3769_v14  ;;  %v4525_v55 = vadd.f32 1.0, %v9960_v46  ;;  %v12844_v46 = vpop.f32.mrf.mxu0 }
 0x2a3   : > { %v9964_v12 = vpop.eup %9963  ;;  %v12824_v39 = vadd.f32 %v6571_v62, %v12769_v30  ;;  %v6578_v16 = vmul.f32 %v9962_v38, %v12815_v41  ;;  %9989 = vrcp.f32 %v4529_v29  ;;  %v7912_v62 = vmul.f32 -1.442695, %v3977_v42 }
 0x2a4   : > { %v9966_v32 = vpop.eup %9965  ;;  %9991 = vpow2.f32 %v7905_v13  ;;  %v12846_v13 = vpop.f32.mrf.mxu1 }
 0x2a5   : > { %v6579_v47 = vmul.f32 %v9964_v12, %v12824_v39  ;;  %v4524_v18 = vadd.f32 1.0, %v9966_v32  ;;  %v9968_v30 = vpop.eup %9967  ;;  %9993 = vpow2.f32 %v7910_v23  ;;  %v7922_v12 = vmul.f32 -1.442695, %v3998_v15 }
 0x2a6   : > { %v9970_v5 = vpop.eup %9969  ;;  %v6568_v28 = vsub.f32 %v9968_v30, %v12759_v20  ;;  %v3791_v23 = vadd.f32 %v12676_v24, %v12655_v2  ;;  %v7918_v30 = vmul.f32 -1.442695, %v3990_v49  ;;  %v3779_v15 = vadd.f32 %v12608_v8, %v12724_v10 }
 0x2a7   : > { %v8554_v35 = vpack.c.bf16 %v6579_v47, %v6578_v16  ;;  %v9972_v26 = vpop.eup %9971  ;;  %9995 = vrcp.f32 %v4524_v18  ;;  %v3795_v8 = vadd.f32 %v12704_v58, %v12655_v2 }
 0x2a8   : > { %v9974_v14 = vpop.eup %9973  ;;  %9997 = vtanh.f32 %v3773_v0  ;;  %v6572_v38 = vmul.f32 %v9970_v5, %v6568_v28  ;;  %v6569_v32 = vsub.f32 %v9972_v26, %v12777_v21  ;;  %v12856_v5 = vpop.f32.mrf.mxu1 }
 0x2a9   : > { %8742 = vst [vmem:[%s10910_s1 + $0x100] sm:$0xff] %v8554_v35   ;;  %v9976_v29 = vpop.eup %9975  ;;  %9999 = vpow2.f32 %v7916_v43  ;;  %v4531_v0 = vadd.f32 1.0, %v9974_v14  ;;  %v12854_v43 = vpop.f32.mrf.mxu0  ;;  %v7909_v35 = vmul.f32 -1.442695, %v3791_v23  ;;  %v3993_v14 = vadd.f32 %v12651_v27, %v12674_v52  ;;  %v14221_v27 = vld [vmem:[#allocation45_spill] sm:$0xff] }
 0x2aa   : > { %v9978_v25 = vpop.eup %9977  ;;  %10001 = vrcp.f32 %v4525_v55  ;;  %v4527_v16 = vadd.f32 1.0, %v9976_v29  ;;  %v12852_v18 = vadd.f32 %v6572_v38, %v12759_v20  ;;  %v4001_v20 = vadd.f32 %v12631_v53, %v12674_v52  ;;  %v12875_v49 = vpop.f32.mrf.mxu1 }
 0x2ab   : > { %v4526_v42 = vadd.f32 1.0, %v9978_v25  ;;  %10003 = vpow2.f32 %v7907_v45  ;;  %v9980_v61 = vpop.eup %9979  ;;  %v14220_v25 = vld [vmem:[#allocation57_spill] sm:$0xff]  ;;  %v4014_v23 = vadd.f32 %v14221_v27, %v12674_v52  ;;  %v7920_v58 = vmul.f32 -1.442695, %v3993_v14 }
 0x2ac   : > { %10005 = vpow2.f32 %v7912_v62  ;;  %v9982_v47 = vpop.eup %9981  ;;  %v6573_v56 = vmul.f32 %v9980_v61, %v6569_v32  ;;  %v7924_v61 = vmul.f32 -1.442695, %v4001_v20 }
 0x2ad   : > { %10007 = vrcp.f32 %v4526_v42  ;;  %v9984_v24 = vpop.eup %9983  ;;  %v4537_v45 = vadd.f32 1.0, %v9982_v47 }
 0x2ae   : > { %10009 = vpow2.f32 %v7922_v12  ;;  %v9986_v55 = vpop.eup %9985  ;;  %v12861_v26 = vadd.f32 %v6573_v56, %v12777_v21  ;;  %v6580_v29 = vmul.f32 %v9984_v24, %v12852_v18  ;;  %v12873_v21 = vpop.f32.mrf.mxu0  ;;  %v3783_v12 = vadd.f32 %v14220_v25, %v12724_v10 }
 0x2af   : > { %10011 = vrcp.f32 %v4531_v0  ;;  %v9988_v28 = vpop.eup %9987 }
 0x2b0   : > { %10013 = vrcp.f32 %v4527_v16  ;;  %v12867_v62 = vpop.eup %9989  ;;  %v6581_v38 = vmul.f32 %v9986_v55, %v12861_v26  ;;  %v6618_v56 = vsub.f32 %v9988_v28, %v12815_v41  ;;  %v12883_v24 = vpop.f32.mrf.mxu0  ;;  %v3801_v28 = vadd.f32 %v12731_v7, %v12655_v2 }
 0x2b1   : > { %10015 = vpow2.f32 %v7918_v30  ;;  %v9992_v53 = vpop.eup %9991  ;;  %v7911_v30 = vmul.f32 -1.442695, %v3795_v8  ;;  %v12885_v55 = vpop.f32.mrf.mxu1 }
 0x2b2   : > { %10017 = vpow2.f32 %v7909_v35  ;;  %v9994_v32 = vpop.eup %9993  ;;  %v4528_v0 = vadd.f32 1.0, %v9992_v53  ;;  %v8559_v42 = vpack.c.bf16 %v6581_v38, %v6580_v29  ;;  %v7930_v35 = vmul.f32 -1.442695, %v4014_v23 }
 0x2b3   : > { %10019 = vtanh.f32 %v3779_v15  ;;  %v4006_v15 = vadd.f32 %v12678_v51, %v12674_v52  ;;  %v4533_v14 = vadd.f32 1.0, %v9994_v32  ;;  %v12894_v23 = vpop.f32.mrf.mxu1  ;;  %v14222_v32 = vld [vmem:[#allocation35_spill] sm:$0xff] }
 0x2b4   : > { %v9996_v16 = vpop.eup %9995  ;;  %10021 = vrcp.f32 %v4537_v45  ;;  %8743 = vst [vmem:[%s10910_s1 + $0x108] sm:$0xff] %v8559_v42  }
 0x2b5   : > { %v9998_v47 = vpop.eup %9997  ;;  %10023 = vrcp.f32 %v4528_v0  ;;  %v6622_v29 = vmul.f32 %v9996_v16, %v6618_v56  ;;  %v7926_v0 = vmul.f32 -1.442695, %v4006_v15  ;;  %v3789_v16 = vadd.f32 %v14222_v32, %v12724_v10 }
 0x2b6   : > { %v10000_v25 = vpop.eup %9999  ;;  %10025 = vtanh.f32 %v3783_v12  ;;  %v6619_v8 = vsub.f32 %v9998_v47, %v12824_v39  ;;  %v12892_v12 = vpop.f32.mrf.mxu0  ;;  %v7913_v47 = vmul.f32 -1.442695, %v3801_v28 }
 0x2b7   : > { %v10002_v20 = vpop.eup %10001  ;;  %10027 = vpow2.f32 %v7924_v61  ;;  %v4539_v53 = vadd.f32 1.0, %v10000_v25  ;;  %v12899_v7 = vadd.f32 %v6622_v29, %v12815_v41 }
 0x2b8   : > { %v10004_v45 = vpop.eup %10003  ;;  %10029 = vpow2.f32 %v7920_v58  ;;  %v12908_v15 = vpop.f32.mrf.mxu0 }
 0x2b9   : > { %v10006_v38 = vpop.eup %10005  ;;  %v4530_v27 = vadd.f32 1.0, %v10004_v45  ;;  %10031 = vpow2.f32 %v7911_v30  ;;  %v12910_v45 = vpop.f32.mrf.mxu1 }
 0x2ba   : > { %v10008_v51 = vpop.eup %10007  ;;  %10033 = vpow2.f32 %v7930_v35  ;;  %v4535_v30 = vadd.f32 1.0, %v10006_v38  ;;  %v4017_v35 = vadd.f32 %v12694_v33, %v12674_v52  ;;  %v3793_v33 = vadd.f32 %v12692_v31, %v12724_v10 }
 0x2bb   : > { %v10010_v42 = vpop.eup %10009  ;;  %v6623_v61 = vmul.f32 %v10008_v51, %v6619_v8  ;;  %10035 = vrcp.f32 %v4530_v27  ;;  %v4009_v27 = vadd.f32 %v12706_v60, %v12674_v52  ;;  %v4030_v31 = vadd.f32 %v12720_v36, %v12674_v52 }
 0x2bc   : > { %v12901_v58 = vpop.eup %10011  ;;  %10037 = vrcp.f32 %v4533_v14  ;;  %v4545_v41 = vadd.f32 1.0, %v10010_v42  ;;  %v6630_v14 = vmul.f32 %v10002_v20, %v12899_v7  ;;  %v7932_v20 = vmul.f32 -1.442695, %v4017_v35  ;;  %v12922_v42 = vpop.f32.mrf.mxu0 }
 0x2bd   : > { %v10014_v56 = vpop.eup %10013  ;;  %10039 = vrcp.f32 %v4539_v53  ;;  %v12904_v25 = vadd.f32 %v6623_v61, %v12824_v39  ;;  %v3805_v39 = vadd.f32 %v12761_v4, %v12655_v2  ;;  %v12924_v61 = vpop.f32.mrf.mxu1  ;;  %v3811_v36 = vadd.f32 %v12788_v1, %v12655_v2 }
 0x2be   : > { %v10016_v8 = vpop.eup %10015  ;;  %10041 = vpow2.f32 %v7926_v0 }
 0x2bf   : > { %v10018_v29 = vpop.eup %10017  ;;  %10043 = vtanh.f32 %v3789_v16  ;;  %v6631_v28 = vmul.f32 %v10014_v56, %v12904_v25  ;;  %v4541_v32 = vadd.f32 1.0, %v10016_v8  ;;  %v7915_v60 = vmul.f32 -1.442695, %v3805_v39 }
 0x2c0   : > { %v10020_v38 = vpop.eup %10019  ;;  %v4532_v53 = vadd.f32 1.0, %v10018_v29  ;;  %10045 = vpow2.f32 %v7913_v47 }
 0x2c1   : > { %v12920_v51 = vpop.eup %10021  ;;  %10047 = vrcp.f32 %v4535_v30  ;;  %v8564_v0 = vpack.c.bf16 %v6631_v28, %v6630_v14  ;;  %v6620_v56 = vsub.f32 %v10020_v38, %v12852_v18  ;;  %v7928_v30 = vmul.f32 -1.442695, %v4009_v27  ;;  %v12930_v14 = vpop.f32.mrf.mxu0 }
 0x2c2   : > { %v10024_v4 = vpop.eup %10023  ;;  %10049 = vrcp.f32 %v4545_v41  ;;  %v12932_v28 = vpop.f32.mrf.mxu1  ;;  %v7938_v41 = vmul.f32 -1.442695, %v4030_v31  ;;  %v3799_v27 = vadd.f32 %v12718_v44, %v12724_v10 }
 0x2c3   : > { %v10026_v16 = vpop.eup %10025  ;;  %10051 = vrcp.f32 %v4532_v53  ;;  %8744 = vst [vmem:[%s10910_s1 + $0x110] sm:$0xff] %v8564_v0   ;;  %v6624_v29 = vmul.f32 %v10024_v4, %v6620_v56 }
 0x2c4   : > { %v10028_v47 = vpop.eup %10027  ;;  %10053 = vtanh.f32 %v3793_v33  ;;  %v6621_v53 = vsub.f32 %v10026_v16, %v12861_v26  ;;  %v12946_v16 = vpop.f32.mrf.mxu0 }
 0x2c5   : > { %v10030_v35 = vpop.eup %10029  ;;  %10055 = vpow2.f32 %v7932_v20  ;;  %v4547_v39 = vadd.f32 1.0, %v10028_v47  ;;  %v4022_v20 = vadd.f32 %v12733_v9, %v12674_v52  ;;  %v12944_v1 = vadd.f32 %v6624_v29, %v12852_v18  ;;  %v12948_v56 = vpop.f32.mrf.mxu1 }
 0x2c6   : > { %v10032_v8 = vpop.eup %10031  ;;  %10057 = vrcp.f32 %v4541_v32  ;;  %v4543_v31 = vadd.f32 1.0, %v10030_v35  ;;  %v7917_v47 = vmul.f32 -1.442695, %v3811_v36  ;;  %v4033_v35 = vadd.f32 %v12749_v3, %v12674_v52 }
 0x2c7   : > { %v10034_v38 = vpop.eup %10033  ;;  %v4534_v0 = vadd.f32 1.0, %v10032_v8  ;;  %10059 = vpow2.f32 %v7915_v60  ;;  %v7934_v18 = vmul.f32 -1.442695, %v4022_v20  ;;  %v3815_v36 = vadd.f32 %v12805_v54, %v12655_v2 }
 0x2c8   : > { %v10036_v33 = vpop.eup %10035  ;;  %10061 = vpow2.f32 %v7928_v30  ;;  %v4553_v30 = vadd.f32 1.0, %v10034_v38  ;;  %v12963_v38 = vpop.f32.mrf.mxu0  ;;  %v3803_v54 = vadd.f32 %v12747_v50, %v12724_v10  ;;  %v4038_v50 = vadd.f32 %v12790_v17, %v12674_v52 }
 0x2c9   : > { %v12941_v4 = vpop.eup %10037  ;;  %v6625_v32 = vmul.f32 %v10036_v33, %v6621_v53  ;;  %10063 = vrcp.f32 %v4534_v0  ;;  %v6632_v53 = vmul.f32 %v12867_v62, %v12944_v1  ;;  %v4025_v33 = vadd.f32 %v12763_v40, %v12674_v52 }
 0x2ca   : > { %v12950_v60 = vpop.eup %10039  ;;  %10065 = vpow2.f32 %v7938_v41  ;;  %v7919_v40 = vmul.f32 -1.442695, %v3815_v36  ;;  %v3809_v17 = vadd.f32 %v12771_v48, %v12724_v10 }
 0x2cb   : > { %v10042_v44 = vpop.eup %10041  ;;  %10067 = vrcp.f32 %v4547_v39  ;;  %v12953_v9 = vadd.f32 %v6625_v32, %v12861_v26  ;;  %v12965_v26 = vpop.f32.mrf.mxu1  ;;  %v4046_v32 = vadd.f32 %v12773_v34, %v12674_v52 }
 0x2cc   : > { %v10044_v8 = vpop.eup %10043  ;;  %10069 = vtanh.f32 %v3799_v27  ;;  %v4549_v3 = vadd.f32 1.0, %v10042_v44  ;;  %v7940_v27 = vmul.f32 -1.442695, %v4033_v35  ;;  %v7936_v35 = vmul.f32 -1.442695, %v4025_v33 }
 0x2cd   : > { %v10046_v29 = vpop.eup %10045  ;;  %10071 = vrcp.f32 %v4543_v31  ;;  %v6633_v41 = vmul.f32 %v12901_v58, %v12953_v9  ;;  %v6670_v44 = vsub.f32 %v10044_v8, %v12899_v7  ;;  %v7946_v8 = vmul.f32 -1.442695, %v4046_v32 }
 0x2ce   : > { %v12967_v39 = vpop.eup %10047  ;;  %v4536_v0 = vadd.f32 1.0, %v10046_v29  ;;  %10073 = vpow2.f32 %v7917_v47  ;;  %v12979_v47 = vpop.f32.mrf.mxu0  ;;  %v7942_v32 = vmul.f32 -1.442695, %v4038_v50  ;;  %v4041_v50 = vadd.f32 %v12807_v59, %v12674_v52 }
 0x2cf   : > { %v12971_v62 = vpop.eup %10049  ;;  %10075 = vrcp.f32 %v4553_v30  ;;  %v8569_v58 = vpack.c.bf16 %v6633_v41, %v6632_v53  ;;  %v12981_v29 = vpop.f32.mrf.mxu1  ;;  %v3821_v41 = vadd.f32 %v12834_v63, %v12655_v2  ;;  %v3813_v59 = vadd.f32 %v12798_v6, %v12724_v10 }
 0x2d0   : > { %v10052_v20 = vpop.eup %10051  ;;  %10077 = vpow2.f32 %v7934_v18  ;;  %14223 = vst [vmem:[#allocation36_spill] sm:$0xff] %v12981_v29 }
 0x2d1   : > { %v10054_v31 = vpop.eup %10053  ;;  %10079 = vrcp.f32 %v4536_v0  ;;  %8745 = vst [vmem:[%s10910_s1 + $0x118] sm:$0xff] %v8569_v58   ;;  %v6674_v53 = vmul.f32 %v10052_v20, %v6670_v44  ;;  %v12992_v33 = vpop.f32.mrf.mxu1  ;;  %v4049_v44 = vadd.f32 %v12800_v57, %v12674_v52 }
 0x2d2   : > { %v10056_v30 = vpop.eup %10055  ;;  %10081 = vrcp.f32 %v4549_v3  ;;  %v6671_v0 = vsub.f32 %v10054_v31, %v12904_v25  ;;  %v12990_v3 = vpop.f32.mrf.mxu0 }
 0x2d3   : > { %v12983_v18 = vpop.eup %10057  ;;  %10083 = vpow2.f32 %v7940_v27  ;;  %v4555_v58 = vadd.f32 1.0, %v10056_v30  ;;  %v12997_v63 = vadd.f32 %v6674_v53, %v12899_v7 }
 0x2d4   : > { %v10060_v34 = vpop.eup %10059  ;;  %10085 = vtanh.f32 %v3803_v54  ;;  %v13006_v48 = vpop.f32.mrf.mxu0 }
 0x2d5   : > { %v10062_v36 = vpop.eup %10061  ;;  %v4538_v29 = vadd.f32 1.0, %v10060_v34  ;;  %10087 = vpow2.f32 %v7919_v40  ;;  %v7921_v40 = vmul.f32 -1.442695, %v3821_v41  ;;  %v6682_v57 = vmul.f32 %v12941_v4, %v12997_v63 }
 0x2d6   : > { %v10064_v27 = vpop.eup %10063  ;;  %10089 = vpow2.f32 %v7936_v35  ;;  %v4551_v35 = vadd.f32 1.0, %v10062_v36  ;;  %v3825_v41 = vadd.f32 %v12854_v43, %v12655_v2  ;;  %v13024_v4 = vpop.f32.mrf.mxu0  ;;  %v4062_v43 = vadd.f32 %v12821_v22, %v12674_v52 }
 0x2d7   : > { %v10066_v20 = vpop.eup %10065  ;;  %v6675_v54 = vmul.f32 %v10064_v27, %v6671_v0  ;;  %10091 = vrcp.f32 %v4538_v29  ;;  %v13008_v29 = vpop.f32.mrf.mxu1 }
 0x2d8   : > { %v12999_v31 = vpop.eup %10067  ;;  %10093 = vpow2.f32 %v7946_v8  ;;  %v4561_v53 = vadd.f32 1.0, %v10066_v20 }
 0x2d9   : > { %v10070_v30 = vpop.eup %10069  ;;  %10095 = vrcp.f32 %v4555_v58  ;;  %v13004_v34 = vadd.f32 %v6675_v54, %v12904_v25  ;;  %v7948_v58 = vmul.f32 -1.442695, %v4049_v44  ;;  %v13026_v20 = vpop.f32.mrf.mxu1  ;;  %v7944_v54 = vmul.f32 -1.442695, %v4041_v50 }
 0x2da   : > { %v13010_v7 = vpop.eup %10071  ;;  %10097 = vtanh.f32 %v3809_v17  ;;  %v6672_v44 = vsub.f32 %v10070_v30, %v12944_v1  ;;  %v13036_v50 = vpop.f32.mrf.mxu0  ;;  %v3831_v30 = vadd.f32 %v12883_v24, %v12655_v2 }
 0x2db   : > { %v10074_v8 = vpop.eup %10073  ;;  %10099 = vpow2.f32 %v7942_v32  ;;  %v6683_v25 = vmul.f32 %v12967_v39, %v13004_v34 }
 0x2dc   : > { %v13020_v36 = vpop.eup %10075  ;;  %v4540_v0 = vadd.f32 1.0, %v10074_v8  ;;  %10101 = vpow2.f32 %v7921_v40  ;;  %v7923_v40 = vmul.f32 -1.442695, %v3825_v41 }
 0x2dd   : > { %14224 = vst [vmem:[#allocation32_spill] sm:$0xff] %v13020_v36  ;;  %v10078_v27 = vpop.eup %10077  ;;  %10103 = vrcp.f32 %v4551_v35  ;;  %v8574_v17 = vpack.c.bf16 %v6683_v25, %v6682_v57  ;;  %v13038_v25 = vpop.f32.mrf.mxu1  ;;  %v7954_v36 = vmul.f32 -1.442695, %v4062_v43 }
 0x2de   : > { %v10080_v39 = vpop.eup %10079  ;;  %10105 = vrcp.f32 %v4561_v53  ;;  %v4557_v6 = vadd.f32 1.0, %v10078_v27  ;;  %v4054_v53 = vadd.f32 %v12836_v19, %v12674_v52  ;;  %v3819_v19 = vadd.f32 %v12819_v37, %v12724_v10 }
 0x2df   : > { %v13030_v32 = vpop.eup %10081  ;;  %10107 = vrcp.f32 %v4540_v0  ;;  %8746 = vst [vmem:[%s10910_s1 + $0x120] sm:$0xff] %v8574_v17   ;;  %v6676_v57 = vmul.f32 %v10080_v39, %v6672_v44  ;;  %v13048_v44 = vpop.f32.mrf.mxu0 }
 0x2e0   : > { %v10084_v35 = vpop.eup %10083  ;;  %10109 = vpow2.f32 %v7948_v58  ;;  %v7950_v43 = vmul.f32 -1.442695, %v4054_v53  ;;  %v13050_v24 = vpop.f32.mrf.mxu1 }
 0x2e1   : > { %v10086_v8 = vpop.eup %10085  ;;  %10111 = vtanh.f32 %v3813_v59  ;;  %v4563_v58 = vadd.f32 1.0, %v10084_v35  ;;  %v7925_v35 = vmul.f32 -1.442695, %v3831_v30  ;;  %v13065_v30 = vpop.f32.mrf.mxu0 }
 0x2e2   : > { %v10088_v22 = vpop.eup %10087  ;;  %10113 = vpow2.f32 %v7944_v54  ;;  %v6673_v0 = vsub.f32 %v10086_v8, %v12953_v9  ;;  %v13046_v54 = vadd.f32 %v6676_v57, %v12944_v1 }
 0x2e3   : > { %v10090_v41 = vpop.eup %10089  ;;  %v4542_v27 = vadd.f32 1.0, %v10088_v22  ;;  %10115 = vpow2.f32 %v7923_v40  ;;  %v4065_v40 = vadd.f32 %v12846_v13, %v12674_v52  ;;  %v3835_v13 = vadd.f32 %v12908_v15, %v12655_v2 }
 0x2e4   : > { %v10092_v59 = vpop.eup %10091  ;;  %10117 = vrcp.f32 %v4557_v6  ;;  %v4559_v37 = vadd.f32 1.0, %v10090_v41  ;;  %v13067_v41 = vpop.f32.mrf.mxu1 }
 0x2e5   : > { %v10094_v17 = vpop.eup %10093  ;;  %v6677_v39 = vmul.f32 %v10092_v59, %v6673_v0  ;;  %10119 = vrcp.f32 %v4542_v27  ;;  %v6684_v0 = vmul.f32 %v12920_v51, %v13046_v54  ;;  %v7956_v27 = vmul.f32 -1.442695, %v4065_v40 }
 0x2e6   : > { %v13052_v8 = vpop.eup %10095  ;;  %10121 = vpow2.f32 %v7954_v36  ;;  %v4569_v57 = vadd.f32 1.0, %v10094_v17  ;;  %v4057_v59 = vadd.f32 %v12856_v5, %v12674_v52  ;;  %v14227_v52 = vld [vmem:[#allocation19_spill] sm:$0xff] }
 0x2e7   : > { %v10098_v6 = vpop.eup %10097  ;;  %10123 = vrcp.f32 %v4563_v58  ;;  %v13057_v22 = vadd.f32 %v6677_v39, %v12953_v9  ;;  %v13080_v39 = vld [vmem:[%s13976_s2] sm:$0x7] }
 0x2e8   : > { %v10100_v1 = vpop.eup %10099  ;;  %10125 = vtanh.f32 %v3819_v19  ;;  %14226 = vst [vmem:[#allocation41_spill] sm:$0xff] %v13080_v39  ;;  %v6722_v40 = vsub.f32 %v10098_v6, %v12997_v63  ;;  %v13086_v5 = vrot.slane %v13080_v39, %v14227_v52  ;;  %v13094_v6 = vrot.slane %v13080_v39, %v14219_v11 }
 0x2e9   : > { %v10102_v53 = vpop.eup %10101  ;;  %10127 = vpow2.f32 %v7950_v43  ;;  %v6685_v36 = vmul.f32 %v12950_v60, %v13057_v22  ;;  %v3823_v60 = vadd.f32 %v12844_v46, %v12724_v10  ;;  %v4565_v17 = vadd.f32 1.0, %v10100_v1  ;;  %v13088_v46 = vpop.f32.mrf.mxu0 }
 0x2ea   : > { %v13069_v9 = vpop.eup %10103  ;;  %v4544_v58 = vadd.f32 1.0, %v10102_v53  ;;  %10129 = vpow2.f32 %v7925_v35  ;;  %v7927_v35 = vmul.f32 -1.442695, %v3835_v13  ;;  %v3829_v13 = vadd.f32 %v12873_v21, %v12724_v10 }
 0x2eb   : > { %v13073_v51 = vpop.eup %10105  ;;  %10131 = vrcp.f32 %v4559_v37  ;;  %v8579_v15 = vpack.c.bf16 %v6685_v36, %v6684_v0  ;;  %v13090_v37 = vpop.f32.mrf.mxu1 }
 0x2ec   : > { %14225 = vst [vmem:[#allocation25_spill] sm:$0xff] %v13073_v51  ;;  %v10108_v19 = vpop.eup %10107  ;;  %10133 = vrcp.f32 %v4569_v57  ;;  %v7952_v57 = vmul.f32 -1.442695, %v4057_v59  ;;  %v13105_v11 = vpop.f32.mrf.mxu0 }
 0x2ed   : > { %v10110_v43 = vpop.eup %10109  ;;  %10135 = vrcp.f32 %v4544_v58  ;;  %8747 = vst [vmem:[%s10910_s1 + $0x128] sm:$0xff] %v8579_v15   ;;  %v6726_v0 = vmul.f32 %v10108_v19, %v6722_v40  ;;  %v3841_v15 = vadd.f32 %v12930_v14, %v12655_v2  ;;  %v13107_v19 = vpop.f32.mrf.mxu1 }
 0x2ee   : > { %v10112_v1 = vpop.eup %10111  ;;  %10137 = vpow2.f32 %v7956_v27  ;;  %v4571_v58 = vadd.f32 1.0, %v10110_v43 }
 0x2ef   : > { %v10114_v53 = vpop.eup %10113  ;;  %10139 = vtanh.f32 %v3823_v60  ;;  %v6723_v27 = vsub.f32 %v10112_v1, %v13004_v34  ;;  %v5530_v60 = vadd.f32 %v12885_v55, %v13086_v5  ;;  %v13110_v14 = vadd.f32 %v6726_v0, %v12997_v63 }
 0x2f0   : > { %v10116_v36 = vpop.eup %10115  ;;  %10141 = vrcp.f32 %v4565_v17  ;;  %v4567_v43 = vadd.f32 1.0, %v10114_v53  ;;  %v5528_v1 = vadd.f32 %v12875_v49, %v13094_v6  ;;  %v7929_v55 = vmul.f32 -1.442695, %v3841_v15  ;;  %v13121_v53 = vpop.f32.mrf.mxu1 }
 0x2f1   : > { %v13100_v52 = vpop.eup %10117  ;;  %v4546_v59 = vadd.f32 1.0, %v10116_v36  ;;  %10143 = vpow2.f32 %v7927_v35  ;;  %v8061_v39 = vmul.f32 -1.442695, %v5530_v60  ;;  %v3845_v49 = vadd.f32 %v12963_v38, %v12655_v2 }
 0x2f2   : > { %v10120_v17 = vpop.eup %10119  ;;  %10145 = vpow2.f32 %v7952_v57  ;;  %v13119_v57 = vpop.f32.mrf.mxu0  ;;  %v3833_v60 = vadd.f32 %v12892_v12, %v12724_v10  ;;  %v3851_v12 = vadd.f32 %v12990_v3, %v12655_v2 }
 0x2f3   : > { %v10122_v21 = vpop.eup %10121  ;;  %v6727_v40 = vmul.f32 %v10120_v17, %v6723_v27  ;;  %10147 = vrcp.f32 %v4546_v59 }
 0x2f4   : > { %v13114_v36 = vpop.eup %10123  ;;  %10149 = vrcp.f32 %v4571_v58  ;;  %v4577_v63 = vadd.f32 1.0, %v10122_v21  ;;  %v6734_v58 = vmul.f32 %v12983_v18, %v13110_v14  ;;  %v13139_v21 = vpop.f32.mrf.mxu1 }
 0x2f5   : > { %v10126_v35 = vpop.eup %10125  ;;  %10151 = vtanh.f32 %v3829_v13  ;;  %v13117_v51 = vadd.f32 %v6727_v40, %v13004_v34  ;;  %v5534_v34 = vadd.f32 %v12910_v45, %v13086_v5  ;;  %v7931_v45 = vmul.f32 -1.442695, %v3845_v49 }
 0x2f6   : > { %v10128_v27 = vpop.eup %10127  ;;  %10153 = vrcp.f32 %v4567_v43  ;;  %v13137_v43 = vpop.f32.mrf.mxu0 }
 0x2f7   : > { %v10130_v0 = vpop.eup %10129  ;;  %10155 = vtanh.f32 %v5528_v1  ;;  %v6735_v13 = vmul.f32 %v13010_v7, %v13117_v51  ;;  %v4573_v17 = vadd.f32 1.0, %v10128_v27  ;;  %v6724_v1 = vsub.f32 %v10126_v35, %v13046_v54  ;;  %v13153_v35 = vpop.f32.mrf.mxu1 }
 0x2f8   : > { %v13131_v15 = vpop.eup %10131  ;;  %v4548_v59 = vadd.f32 1.0, %v10130_v0  ;;  %10157 = vpow2.f32 %v7929_v55  ;;  %v8063_v0 = vmul.f32 -1.442695, %v5534_v34  ;;  %v13151_v49 = vpop.f32.mrf.mxu0 }
 0x2f9   : > { %v13135_v38 = vpop.eup %10133  ;;  %10159 = vpow2.f32 %v8061_v39  ;;  %v8584_v18 = vpack.c.bf16 %v6735_v13, %v6734_v58  ;;  %v5532_v39 = vadd.f32 %v12894_v23, %v13094_v6  ;;  %v7933_v23 = vmul.f32 -1.442695, %v3851_v12 }
 0x2fa   : > { %14228 = vst [vmem:[#allocation31_spill] sm:$0xff] %v13135_v38  ;;  %v10136_v7 = vpop.eup %10135  ;;  %10161 = vrcp.f32 %v4577_v63  ;;  %v5540_v63 = vadd.f32 %v12932_v28, %v13086_v5  ;;  %v13165_v38 = vpop.f32.mrf.mxu1  ;;  %v3855_v12 = vadd.f32 %v13024_v4, %v12655_v2  ;;  %v3843_v4 = vadd.f32 %v12946_v16, %v12724_v10 }
 0x2fb   : > { %v10138_v40 = vpop.eup %10137  ;;  %10163 = vrcp.f32 %v4548_v59  ;;  %8748 = vst [vmem:[%s10910_s1 + $0x130] sm:$0xff] %v8584_v18   ;;  %v6728_v58 = vmul.f32 %v10136_v7, %v6724_v1  ;;  %v5542_v16 = vadd.f32 %v12948_v56, %v13094_v6 }
 0x2fc   : > { %v10140_v55 = vpop.eup %10139  ;;  %10165 = vtanh.f32 %v3833_v60  ;;  %v4579_v34 = vadd.f32 1.0, %v10138_v40  ;;  %v8065_v40 = vmul.f32 -1.442695, %v5540_v63 }
 0x2fd   : > { %v13147_v27 = vpop.eup %10141  ;;  %10167 = vrcp.f32 %v4573_v17  ;;  %v6725_v59 = vsub.f32 %v10140_v55, %v13057_v22  ;;  %v3839_v17 = vadd.f32 %v12922_v42, %v12724_v10  ;;  %v13161_v1 = vadd.f32 %v6728_v58, %v13046_v54 }
 0x2fe   : > { %v10144_v13 = vpop.eup %10143  ;;  %10169 = vpow2.f32 %v7931_v45  ;;  %v13163_v45 = vpop.f32.mrf.mxu0  ;;  %v5538_v42 = vadd.f32 %v12924_v61, %v13094_v6  ;;  %v5544_v54 = vadd.f32 %v12965_v26, %v13086_v5 }
 0x2ff   : > { %v10146_v3 = vpop.eup %10145  ;;  %v4550_v60 = vadd.f32 1.0, %v10144_v13  ;;  %10171 = vpow2.f32 %v8063_v0 }
 0x300   : > { %v10148_v18 = vpop.eup %10147  ;;  %10173 = vtanh.f32 %v5532_v39  ;;  %v4575_v0 = vadd.f32 1.0, %v10146_v3  ;;  %v13188_v3 = vpop.f32.mrf.mxu1 }
 0x301   : > { %v13158_v7 = vpop.eup %10149  ;;  %v6729_v28 = vmul.f32 %v10148_v18, %v6725_v59  ;;  %10175 = vrcp.f32 %v4550_v60  ;;  %v7935_v60 = vmul.f32 -1.442695, %v3855_v12  ;;  %v8067_v18 = vmul.f32 -1.442695, %v5544_v54 }
 0x302   : > { %v10152_v55 = vpop.eup %10151  ;;  %10177 = vrcp.f32 %v4579_v34  ;;  %v6736_v34 = vmul.f32 %v12971_v62, %v13161_v1 }
 0x303   : > { %v13169_v39 = vpop.eup %10153  ;;  %v13174_v13 = vadd.f32 %v6729_v28, %v13057_v22  ;;  %10179 = vpow2.f32 %v7933_v23  ;;  %v13186_v22 = vpop.f32.mrf.mxu0 }
 0x304   : > { %v13178_v58 = vpop.eup %10155  ;;  %10181 = vtanh.f32 %v3839_v17 }
 0x305   : > { %14229 = vst [vmem:[#allocation29_spill] sm:$0xff] %v13178_v58  ;;  %v10158_v63 = vpop.eup %10157  ;;  %10183 = vpow2.f32 %v8065_v40  ;;  %v6737_v61 = vmul.f32 %v12999_v31, %v13174_v13  ;;  %v3861_v31 = vadd.f32 %v13048_v44, %v12655_v2  ;;  %v6774_v40 = vsub.f32 %v10152_v55, %v13110_v14  ;;  %v13200_v12 = vpop.f32.mrf.mxu0 }
 0x306   : > { %v10160_v26 = vpop.eup %10159  ;;  %10185 = vrcp.f32 %v4575_v0  ;;  %v4552_v59 = vadd.f32 1.0, %v10158_v63  ;;  %v5550_v0 = vadd.f32 %v12992_v33, %v13086_v5  ;;  %v3849_v44 = vadd.f32 %v12979_v47, %v12724_v10 }
 0x307   : > { %v13190_v23 = vpop.eup %10161  ;;  %10187 = vtanh.f32 %v5538_v42  ;;  %v8589_v62 = vpack.c.bf16 %v6737_v61, %v6736_v34  ;;  %v6295_v58 = vadd.f32 1.0, %v10160_v26  ;;  %v13202_v42 = vpop.f32.mrf.mxu1  ;;  %v5554_v47 = vadd.f32 %v13026_v20, %v13086_v5 }
 0x308   : > { %v10164_v17 = vpop.eup %10163  ;;  %10189 = vrcp.f32 %v4552_v59  ;;  %v8069_v26 = vmul.f32 -1.442695, %v5550_v0  ;;  %v13211_v59 = vpop.f32.mrf.mxu0 }
 0x309   : > { %v10166_v28 = vpop.eup %10165  ;;  %10191 = vtanh.f32 %v3843_v4  ;;  %8749 = vst [vmem:[%s10910_s1 + $0x138] sm:$0xff] %v8589_v62   ;;  %v6778_v63 = vmul.f32 %v10164_v17, %v6774_v40  ;;  %v7937_v4 = vmul.f32 -1.442695, %v3861_v31  ;;  %v13213_v62 = vpop.f32.mrf.mxu1 }
 0x30a   : > { %v13204_v54 = vpop.eup %10167  ;;  %10193 = vpow2.f32 %v7935_v60  ;;  %v6775_v33 = vsub.f32 %v10166_v28, %v13117_v51 }
 0x30b   : > { %v10170_v56 = vpop.eup %10169  ;;  %10195 = vpow2.f32 %v8067_v18  ;;  %v14231_v18 = vld [vmem:[#allocation36_spill] sm:$0xff]  ;;  %v13224_v40 = vadd.f32 %v6778_v63, %v13110_v14 }
 0x30c   : > { %v10172_v55 = vpop.eup %10171  ;;  %10197 = vtanh.f32 %v5542_v16  ;;  %v4554_v34 = vadd.f32 1.0, %v10170_v56  ;;  %v5548_v17 = vadd.f32 %v14231_v18, %v13094_v6  ;;  %v3865_v16 = vadd.f32 %v13088_v46, %v12655_v2  ;;  %v13231_v46 = vpop.f32.mrf.mxu0 }
 0x30d   : > { %v13208_v61 = vpop.eup %10173  ;;  %10199 = vrcp.f32 %v6295_v58  ;;  %v6297_v28 = vadd.f32 1.0, %v10172_v55  ;;  %v3853_v18 = vadd.f32 %v13006_v48, %v12724_v10  ;;  %v6786_v63 = vmul.f32 %v13030_v32, %v13224_v40 }
 0x30e   : > { %14230 = vst [vmem:[#allocation39_spill] sm:$0xff] %v13208_v61  ;;  %v10176_v60 = vpop.eup %10175  ;;  %10201 = vrcp.f32 %v4554_v34  ;;  %v13233_v61 = vpop.f32.mrf.mxu1  ;;  %v8071_v48 = vmul.f32 -1.442695, %v5554_v47  ;;  %v5560_v32 = vadd.f32 %v13050_v24, %v13086_v5 }
 0x30f   : > { %v13221_v31 = vpop.eup %10177  ;;  %v6779_v58 = vmul.f32 %v10176_v60, %v6775_v33  ;;  %10203 = vtanh.f32 %v3849_v44  ;;  %v7939_v44 = vmul.f32 -1.442695, %v3865_v16  ;;  %v5552_v33 = vadd.f32 %v13008_v29, %v13094_v6 }
 0x310   : > { %14232 = vst [vmem:[#allocation42_spill] sm:$0xff] %v13221_v31  ;;  %v10180_v0 = vpop.eup %10179  ;;  %10205 = vpow2.f32 %v7937_v4  ;;  %v3859_v29 = vadd.f32 %v13036_v50, %v12724_v10  ;;  %v5558_v50 = vadd.f32 %v13038_v25, %v13094_v6  ;;  %v3863_v25 = vadd.f32 %v13065_v30, %v12724_v10 }
 0x311   : > { %v10182_v56 = vpop.eup %10181  ;;  %v4556_v34 = vadd.f32 1.0, %v10180_v0  ;;  %10207 = vpow2.f32 %v8069_v26  ;;  %v13229_v20 = vadd.f32 %v6779_v58, %v13117_v51  ;;  %v3871_v26 = vadd.f32 %v13119_v57, %v12655_v2  ;;  %v13249_v58 = vpop.f32.mrf.mxu0 }
 0x312   : > { %v10184_v55 = vpop.eup %10183  ;;  %10209 = vtanh.f32 %v5548_v17  ;;  %v5570_v30 = vadd.f32 %v13121_v53, %v13086_v5 }
 0x313   : > { %v13235_v14 = vpop.eup %10185  ;;  %10211 = vrcp.f32 %v6297_v28  ;;  %v6787_v4 = vmul.f32 %v13069_v9, %v13229_v20  ;;  %v6299_v17 = vadd.f32 1.0, %v10184_v55  ;;  %v13251_v9 = vpop.f32.mrf.mxu1  ;;  %v6776_v28 = vsub.f32 %v10182_v56, %v13161_v1 }
 0x314   : > { %v13241_v51 = vpop.eup %10187  ;;  %10213 = vrcp.f32 %v4556_v34  ;;  %v7941_v55 = vmul.f32 -1.442695, %v3871_v26 }
 0x315   : > { %v10190_v60 = vpop.eup %10189  ;;  %10215 = vtanh.f32 %v3853_v18  ;;  %v8594_v16 = vpack.c.bf16 %v6787_v4, %v6786_v63  ;;  %v8073_v63 = vmul.f32 -1.442695, %v5560_v32  ;;  %v13259_v4 = vpop.f32.mrf.mxu0 }
 0x316   : > { %v10192_v47 = vpop.eup %10191  ;;  %10217 = vpow2.f32 %v7939_v44  ;;  %v6780_v34 = vmul.f32 %v10190_v60, %v6776_v28  ;;  %v13261_v31 = vpop.f32.mrf.mxu1  ;;  %v5564_v60 = vadd.f32 %v13090_v37, %v13086_v5 }
 0x317   : > { %v10194_v0 = vpop.eup %10193  ;;  %8750 = vst [vmem:[%s10910_s1 + $0x140] sm:$0xff] %v8594_v16   ;;  %10219 = vpow2.f32 %v8071_v48  ;;  %v6777_v44 = vsub.f32 %v10192_v47, %v13174_v13  ;;  %v3875_v48 = vadd.f32 %v13151_v49, %v12655_v2  ;;  %v13277_v28 = vpop.f32.mrf.mxu0 }
 0x318   : > { %v10196_v57 = vpop.eup %10195  ;;  %10221 = vtanh.f32 %v5552_v33  ;;  %v4558_v18 = vadd.f32 1.0, %v10194_v0  ;;  %v13273_v32 = vadd.f32 %v6780_v34, %v13161_v1  ;;  %v13279_v49 = vpop.f32.mrf.mxu1  ;;  %v5562_v1 = vadd.f32 %v13067_v41, %v13094_v6 }
 0x319   : > { %v13257_v24 = vpop.eup %10197  ;;  %10223 = vrcp.f32 %v6299_v17  ;;  %v6301_v26 = vadd.f32 1.0, %v10196_v57  ;;  %v7943_v57 = vmul.f32 -1.442695, %v3875_v48  ;;  %v8075_v34 = vmul.f32 -1.442695, %v5564_v60  ;;  %v13298_v41 = vpop.f32.mrf.mxu0 }
 0x31a   : > { %v13263_v56 = vpop.eup %10199  ;;  %10225 = vrcp.f32 %v4558_v18 }
 0x31b   : > { %v10202_v33 = vpop.eup %10201  ;;  %10227 = vtanh.f32 %v3859_v29 }
 0x31c   : > { %v10204_v17 = vpop.eup %10203  ;;  %v6781_v16 = vmul.f32 %v10202_v33, %v6777_v44  ;;  %10229 = vpow2.f32 %v7941_v55 }
 0x31d   : > { %v10206_v47 = vpop.eup %10205  ;;  %10231 = vpow2.f32 %v8073_v63  ;;  %v14234_v63 = vld [vmem:[#allocation32_spill] sm:$0xff]  ;;  %v6826_v60 = vsub.f32 %v10204_v17, %v13224_v40  ;;  %v5574_v17 = vadd.f32 %v13153_v35, %v13086_v5 }
 0x31e   : > { %v10208_v0 = vpop.eup %10207  ;;  %10233 = vtanh.f32 %v5558_v50  ;;  %v4560_v29 = vadd.f32 1.0, %v10206_v47  ;;  %v13282_v37 = vadd.f32 %v6781_v16, %v13174_v13  ;;  %v6788_v44 = vmul.f32 %v14234_v63, %v13273_v32 }
 0x31f   : > { %v13284_v18 = vpop.eup %10209  ;;  %10235 = vrcp.f32 %v6301_v26  ;;  %v3881_v50 = vadd.f32 %v13186_v22, %v12655_v2  ;;  %v6303_v33 = vadd.f32 1.0, %v10208_v0  ;;  %v13300_v26 = vpop.f32.mrf.mxu1 }
 0x320   : > { %14233 = vst [vmem:[#allocation47_spill] sm:$0xff] %v13284_v18  ;;  %v13290_v55 = vpop.eup %10211  ;;  %10237 = vrcp.f32 %v4560_v29  ;;  %v6789_v13 = vmul.f32 %v13052_v8, %v13282_v37  ;;  %v8077_v29 = vmul.f32 -1.442695, %v5570_v30 }
 0x321   : > { %v10214_v48 = vpop.eup %10213  ;;  %10239 = vtanh.f32 %v3863_v25  ;;  %v7945_v18 = vmul.f32 -1.442695, %v3881_v50  ;;  %v3869_v25 = vadd.f32 %v13105_v11, %v12724_v10 }
 0x322   : > { %v10216_v53 = vpop.eup %10215  ;;  %v8599_v16 = vpack.c.bf16 %v6789_v13, %v6788_v44  ;;  %10241 = vpow2.f32 %v7943_v57  ;;  %v6830_v63 = vmul.f32 %v10214_v48, %v6826_v60  ;;  %v13310_v44 = vpop.f32.mrf.mxu0  ;;  %v3885_v13 = vadd.f32 %v13211_v59, %v12655_v2 }
 0x323   : > { %v10218_v47 = vpop.eup %10217  ;;  %10243 = vpow2.f32 %v8075_v34  ;;  %v13312_v57 = vpop.f32.mrf.mxu1  ;;  %v6827_v30 = vsub.f32 %v10216_v53, %v13229_v20 }
 0x324   : > { %v10220_v8 = vpop.eup %10219  ;;  %8751 = vst [vmem:[%s10910_s1 + $0x148] sm:$0xff] %v8599_v16   ;;  %10245 = vtanh.f32 %v5562_v1  ;;  %v4562_v22 = vadd.f32 1.0, %v10218_v47  ;;  %v5568_v1 = vadd.f32 %v13107_v19, %v13094_v6  ;;  %v8079_v16 = vmul.f32 -1.442695, %v5574_v17  ;;  %v13324_v53 = vpop.f32.mrf.mxu0 }
 0x325   : > { %v13304_v0 = vpop.eup %10221  ;;  %10247 = vrcp.f32 %v6303_v33  ;;  %v6305_v11 = vadd.f32 1.0, %v10220_v8  ;;  %v13322_v33 = vadd.f32 %v6830_v63, %v13224_v40  ;;  %v13326_v47 = vpop.f32.mrf.mxu1  ;;  %v3873_v40 = vadd.f32 %v13137_v43, %v12724_v10 }
 0x326   : > { %14235 = vst [vmem:[#allocation49_spill] sm:$0xff] %v13304_v0  ;;  %v13314_v34 = vpop.eup %10223  ;;  %10249 = vrcp.f32 %v4562_v22  ;;  %v5580_v63 = vadd.f32 %v13188_v3, %v13086_v5 }
 0x327   : > { %v10226_v50 = vpop.eup %10225  ;;  %10251 = vpow2.f32 %v8077_v29  ;;  %v7947_v29 = vmul.f32 -1.442695, %v3885_v13  ;;  %v6838_v17 = vmul.f32 %v13100_v52, %v13322_v33  ;;  %v13349_v13 = vpop.f32.mrf.mxu1 }
 0x328   : > { %v10228_v48 = vpop.eup %10227  ;;  %v6831_v35 = vmul.f32 %v10226_v50, %v6827_v30  ;;  %10253 = vpow2.f32 %v7945_v18  ;;  %v5572_v18 = vadd.f32 %v13139_v21, %v13094_v6  ;;  %v3891_v30 = vadd.f32 %v13249_v58, %v12655_v2  ;;  %v13347_v21 = vpop.f32.mrf.mxu0 }
 0x329   : > { %v10230_v60 = vpop.eup %10229  ;;  %10255 = vtanh.f32 %v3869_v25  ;;  %v6828_v50 = vsub.f32 %v10228_v48, %v13273_v32  ;;  %v13357_v0 = vpop.f32.mrf.mxu1 }
 0x32a   : > { %v10232_v19 = vpop.eup %10231  ;;  %10257 = vtanh.f32 %v5568_v1  ;;  %v4564_v22 = vadd.f32 1.0, %v10230_v60  ;;  %v13329_v59 = vadd.f32 %v6831_v35, %v13229_v20  ;;  %v8081_v35 = vmul.f32 -1.442695, %v5580_v63  ;;  %v13359_v48 = vpop.f32.mrf.mxu0 }
 0x32b   : > { %v13331_v8 = vpop.eup %10233  ;;  %10259 = vrcp.f32 %v6305_v11  ;;  %v6307_v1 = vadd.f32 1.0, %v10232_v19  ;;  %v3895_v63 = vadd.f32 %v13277_v28, %v12655_v2 }
 0x32c   : > { %v13339_v25 = vpop.eup %10235  ;;  %10261 = vrcp.f32 %v4564_v22  ;;  %v6839_v20 = vmul.f32 %v13131_v15, %v13329_v59  ;;  %v7949_v22 = vmul.f32 -1.442695, %v3891_v30  ;;  %v13377_v28 = vpop.f32.mrf.mxu0 }
 0x32d   : > { %v10238_v43 = vpop.eup %10237  ;;  %10263 = vpow2.f32 %v8079_v16  ;;  %v3879_v16 = vadd.f32 %v13163_v45, %v12724_v10 }
 0x32e   : > { %v10240_v3 = vpop.eup %10239  ;;  %v8604_v11 = vpack.c.bf16 %v6839_v20, %v6838_v17  ;;  %10265 = vpow2.f32 %v7947_v29  ;;  %v6832_v60 = vmul.f32 %v10238_v43, %v6828_v50  ;;  %v13375_v50 = vpop.f32.mrf.mxu1 }
 0x32f   : > { %v10242_v52 = vpop.eup %10241  ;;  %10267 = vtanh.f32 %v3873_v40  ;;  %v6829_v40 = vsub.f32 %v10240_v3, %v13282_v37  ;;  %v3883_v3 = vadd.f32 %v13200_v12, %v12724_v10  ;;  %v5582_v12 = vadd.f32 %v13202_v42, %v13094_v6  ;;  %v13396_v42 = vpop.f32.mrf.mxu0 }
 0x330   : > { %v10244_v15 = vpop.eup %10243  ;;  %8752 = vst [vmem:[%s10910_s1 + $0x150] sm:$0xff] %v8604_v11   ;;  %10269 = vtanh.f32 %v5572_v18  ;;  %v4566_v58 = vadd.f32 1.0, %v10242_v52  ;;  %v5578_v18 = vadd.f32 %v13165_v38, %v13094_v6  ;;  %v13369_v43 = vadd.f32 %v6832_v60, %v13273_v32 }
 0x331   : > { %v13353_v19 = vpop.eup %10245  ;;  %10271 = vrcp.f32 %v6307_v1  ;;  %v6309_v20 = vadd.f32 1.0, %v10244_v15  ;;  %v5584_v38 = vadd.f32 %v13213_v62, %v13086_v5  ;;  %v7951_v32 = vmul.f32 -1.442695, %v3895_v63  ;;  %v13394_v63 = vpop.f32.mrf.mxu1 }
 0x332   : > { %v13361_v29 = vpop.eup %10247  ;;  %10273 = vrcp.f32 %v4566_v58  ;;  %v3901_v62 = vadd.f32 %v13310_v44, %v12655_v2 }
 0x333   : > { %v10250_v17 = vpop.eup %10249  ;;  %10275 = vpow2.f32 %v8081_v35 }
 0x334   : > { %v10252_v30 = vpop.eup %10251  ;;  %v6833_v45 = vmul.f32 %v10250_v17, %v6829_v40  ;;  %10277 = vpow2.f32 %v7949_v22  ;;  %v14236_v22 = vld [vmem:[#allocation25_spill] sm:$0xff] }
 0x335   : > { %v10254_v1 = vpop.eup %10253  ;;  %10279 = vtanh.f32 %v3879_v16  ;;  %v6311_v58 = vadd.f32 1.0, %v10252_v30  ;;  %v6840_v16 = vmul.f32 %v14236_v22, %v13369_v43 }
 0x336   : > { %v10256_v11 = vpop.eup %10255  ;;  %10281 = vtanh.f32 %v5578_v18  ;;  %v4568_v52 = vadd.f32 1.0, %v10254_v1  ;;  %v13380_v35 = vadd.f32 %v6833_v45, %v13282_v37  ;;  %v8083_v18 = vmul.f32 -1.442695, %v5584_v38 }
 0x337   : > { %v13382_v15 = vpop.eup %10257  ;;  %10283 = vrcp.f32 %v6309_v20  ;;  %v6878_v44 = vsub.f32 %v10256_v11, %v13322_v33  ;;  %v3889_v45 = vadd.f32 %v13231_v46, %v12724_v10  ;;  %v5588_v11 = vadd.f32 %v13233_v61, %v13094_v6 }
 0x338   : > { %v13388_v60 = vpop.eup %10259  ;;  %10285 = vrcp.f32 %v4568_v52  ;;  %v6841_v37 = vmul.f32 %v13114_v36, %v13380_v35  ;;  %v5590_v36 = vadd.f32 %v13251_v9, %v13086_v5  ;;  %v7953_v52 = vmul.f32 -1.442695, %v3901_v62 }
 0x339   : > { %v10262_v40 = vpop.eup %10261  ;;  %10287 = vtanh.f32 %v3883_v3 }
 0x33a   : > { %v10264_v17 = vpop.eup %10263  ;;  %v8609_v20 = vpack.c.bf16 %v6841_v37, %v6840_v16  ;;  %10289 = vpow2.f32 %v7951_v32  ;;  %v6882_v3 = vmul.f32 %v10262_v40, %v6878_v44  ;;  %v13408_v32 = vpop.f32.mrf.mxu1  ;;  %v8085_v37 = vmul.f32 -1.442695, %v5590_v36 }
 0x33b   : > { %v10266_v30 = vpop.eup %10265  ;;  %10291 = vtanh.f32 %v5582_v12  ;;  %v13410_v12 = vpop.f32.mrf.mxu0  ;;  %v6313_v16 = vadd.f32 1.0, %v10264_v17  ;;  %v5594_v17 = vadd.f32 %v13279_v49, %v13086_v5 }
 0x33c   : > { %v10268_v1 = vpop.eup %10267  ;;  %10293 = vrcp.f32 %v6311_v58  ;;  %8753 = vst [vmem:[%s10910_s1 + $0x158] sm:$0xff] %v8609_v20   ;;  %v4570_v38 = vadd.f32 1.0, %v10266_v30  ;;  %v3905_v58 = vadd.f32 %v13347_v21, %v12655_v2  ;;  %v13418_v61 = vadd.f32 %v6882_v3, %v13322_v33  ;;  %v14237_v30 = vld [vmem:[#allocation17_spill] sm:$0xff]  ;;  %v13428_v21 = vpop.f32.mrf.mxu1 }
 0x33d   : > { %v13404_v22 = vpop.eup %10269  ;;  %10295 = vpow2.f32 %v8083_v18  ;;  %v6879_v9 = vsub.f32 %v10268_v1, %v13329_v59  ;;  %v3893_v20 = vadd.f32 %v13259_v4, %v12724_v10  ;;  %v14238_v1 = vld [vmem:[#allocation41_spill] sm:$0xff]  ;;  %v5592_v4 = vadd.f32 %v13261_v31, %v13094_v6 }
 0x33e   : > { %v13412_v46 = vpop.eup %10271  ;;  %10297 = vrcp.f32 %v4570_v38  ;;  %v13426_v2 = vrot.slane %v14238_v1, %v14237_v30  ;;  %v7955_v38 = vmul.f32 -1.442695, %v3905_v58 }
 0x33f   : > { %v10274_v62 = vpop.eup %10273  ;;  %10299 = vtanh.f32 %v3889_v45  ;;  %v13430_v45 = vpop.f32.mrf.mxu0 }
 0x340   : > { %v10276_v40 = vpop.eup %10275  ;;  %v6883_v18 = vmul.f32 %v10274_v62, %v6879_v9  ;;  %10301 = vpow2.f32 %v7953_v52  ;;  %v5729_v49 = vadd.f32 %v13359_v48, %v13426_v2  ;;  %v8087_v62 = vmul.f32 -1.442695, %v5594_v17 }
 0x341   : > { %v10278_v44 = vpop.eup %10277  ;;  %10303 = vtanh.f32 %v5588_v11  ;;  %v6315_v9 = vadd.f32 1.0, %v10276_v40  ;;  %v13449_v31 = vpop.f32.mrf.mxu0 }
 0x342   : > { %v10280_v36 = vpop.eup %10279  ;;  %10305 = vrcp.f32 %v6313_v16  ;;  %v4572_v33 = vadd.f32 1.0, %v10278_v44  ;;  %v13433_v3 = vadd.f32 %v6883_v18, %v13329_v59  ;;  %v6890_v16 = vmul.f32 %v13147_v27, %v13418_v61 }
 0x343   : > { %v13435_v52 = vpop.eup %10281  ;;  %10307 = vpow2.f32 %v8085_v37  ;;  %v13447_v37 = vpop.f32.mrf.mxu1  ;;  %v6880_v48 = vsub.f32 %v10280_v36, %v13369_v43  ;;  %v5721_v27 = vadd.f32 %v13377_v28, %v13426_v2  ;;  %v8066_v30 = vmul.f32 -1.442695, %v5729_v49 }
 0x344   : > { %v13441_v11 = vpop.eup %10283  ;;  %10309 = vrcp.f32 %v4572_v33  ;;  %v6891_v59 = vmul.f32 %v13169_v39, %v13433_v3  ;;  %v5732_v39 = vadd.f32 %v13396_v42, %v13426_v2  ;;  %v3899_v36 = vadd.f32 %v13298_v41, %v12724_v10  ;;  %v13469_v42 = vpop.f32.mrf.mxu0 }
 0x345   : > { %v10286_v58 = vpop.eup %10285  ;;  %10311 = vtanh.f32 %v3893_v20  ;;  %v5598_v28 = vadd.f32 %v13300_v26, %v13094_v6  ;;  %v5604_v41 = vadd.f32 %v13349_v13, %v13086_v5  ;;  %v5724_v26 = vadd.f32 %v13410_v12, %v13426_v2 }
 0x346   : > { %v10288_v18 = vpop.eup %10287  ;;  %v8614_v44 = vpack.c.bf16 %v6891_v59, %v6890_v16  ;;  %10313 = vpow2.f32 %v7955_v38  ;;  %v6884_v17 = vmul.f32 %v10286_v58, %v6880_v48  ;;  %v5600_v38 = vadd.f32 %v13312_v57, %v13086_v5  ;;  %v13483_v13 = vpop.f32.mrf.mxu0 }
 0x347   : > { %v10290_v40 = vpop.eup %10289  ;;  %10315 = vtanh.f32 %v5592_v4  ;;  %v13467_v4 = vpop.f32.mrf.mxu1  ;;  %v8062_v16 = vmul.f32 -1.442695, %v5721_v27  ;;  %v8068_v58 = vmul.f32 -1.442695, %v5732_v39  ;;  %v5610_v27 = vadd.f32 %v13375_v50, %v13086_v5 }
 0x348   : > { %v13456_v20 = vpop.eup %10291  ;;  %10317 = vrcp.f32 %v6315_v9  ;;  %8754 = vst [vmem:[%s10910_s1 + $0x160] sm:$0xff] %v8614_v44   ;;  %v4574_v1 = vadd.f32 1.0, %v10290_v40  ;;  %v6881_v9 = vsub.f32 %v10288_v18, %v13380_v35  ;;  %v13477_v48 = vadd.f32 %v6884_v17, %v13369_v43 }
 0x349   : > { %v13461_v33 = vpop.eup %10293  ;;  %10319 = vpow2.f32 %v8087_v62  ;;  %v8089_v18 = vmul.f32 -1.442695, %v5600_v38  ;;  %v13481_v40 = vpop.f32.mrf.mxu1  ;;  %v3903_v12 = vadd.f32 %v13324_v53, %v12724_v10  ;;  %v8091_v17 = vmul.f32 -1.442695, %v5604_v41  ;;  %v14240_v38 = vld [vmem:[#allocation31_spill] sm:$0xff] }
 0x34a   : > { %v10296_v49 = vpop.eup %10295  ;;  %10321 = vrcp.f32 %v4574_v1  ;;  %v5614_v50 = vadd.f32 %v13408_v32, %v13086_v5  ;;  %v5745_v53 = vadd.f32 %v13430_v45, %v13426_v2  ;;  %v13504_v41 = vpop.f32.mrf.mxu0 }
 0x34b   : > { %v10298_v59 = vpop.eup %10297  ;;  %10323 = vpow2.f32 %v8066_v30 }
 0x34c   : > { %v10300_v62 = vpop.eup %10299  ;;  %v6885_v57 = vmul.f32 %v10298_v59, %v6881_v9  ;;  %10325 = vtanh.f32 %v3899_v36  ;;  %v8064_v36 = vmul.f32 -1.442695, %v5724_v26  ;;  %v6892_v9 = vmul.f32 %v14240_v38, %v13477_v48  ;;  %v13502_v59 = vpop.f32.mrf.mxu1 }
 0x34d   : > { %v10302_v44 = vpop.eup %10301  ;;  %10327 = vtanh.f32 %v5598_v28 }
 0x34e   : > { %v13485_v30 = vpop.eup %10303  ;;  %v4576_v39 = vadd.f32 1.0, %v10302_v44  ;;  %v13490_v1 = vadd.f32 %v6885_v57, %v13380_v35  ;;  %10329 = vpow2.f32 %v8062_v16  ;;  %v8093_v16 = vmul.f32 -1.442695, %v5610_v27 }
 0x34f   : > { %14239 = vst [vmem:[#allocation44_spill] sm:$0xff] %v13485_v30  ;;  %v13492_v43 = vpop.eup %10305  ;;  %10331 = vpow2.f32 %v8068_v58  ;;  %v6930_v58 = vsub.f32 %v10300_v62, %v13418_v61  ;;  %v5620_v57 = vadd.f32 %v13447_v37, %v13086_v5  ;;  %v8095_v44 = vmul.f32 -1.442695, %v5614_v50  ;;  %v13514_v62 = vpop.f32.mrf.mxu1 }
 0x350   : > { %v10308_v28 = vpop.eup %10307  ;;  %10333 = vrcp.f32 %v4576_v39  ;;  %v6893_v10 = vmul.f32 %v13158_v7, %v13490_v1  ;;  %v8074_v27 = vmul.f32 -1.442695, %v5745_v53  ;;  %v6317_v30 = vadd.f32 1.0, %v10296_v49 }
 0x351   : > { %v10310_v35 = vpop.eup %10309  ;;  %10335 = vpow2.f32 %v8089_v18  ;;  %v8097_v50 = vmul.f32 -1.442695, %v5620_v57  ;;  %v6319_v49 = vadd.f32 1.0, %v10308_v28 }
 0x352   : > { %v10312_v32 = vpop.eup %10311  ;;  %10337 = vtanh.f32 %v3903_v12  ;;  %v8619_v26 = vpack.c.bf16 %v6893_v10, %v6892_v9  ;;  %v6934_v39 = vmul.f32 %v10310_v35, %v6930_v58  ;;  %v13516_v12 = vpop.f32.mrf.mxu0  ;;  %v5602_v10 = vadd.f32 %v13326_v47, %v13094_v6 }
 0x353   : > { %v10314_v7 = vpop.eup %10313  ;;  %10339 = vpow2.f32 %v8064_v36  ;;  %v6931_v37 = vsub.f32 %v10312_v32, %v13433_v3  ;;  %v5608_v58 = vadd.f32 %v13357_v0, %v13094_v6  ;;  %v5748_v32 = vadd.f32 %v13469_v42, %v13426_v2 }
 0x354   : > { %v13509_v45 = vpop.eup %10315  ;;  %8755 = vst [vmem:[%s10910_s1 + $0x168] sm:$0xff] %v8619_v26   ;;  %v4578_v18 = vadd.f32 1.0, %v10314_v7  ;;  %10341 = vpow2.f32 %v8091_v17  ;;  %v13522_v53 = vadd.f32 %v6934_v39, %v13418_v61  ;;  %v13528_v26 = vpop.f32.mrf.mxu1 }
 0x355   : > { %v13512_v38 = vpop.eup %10317  ;;  %10343 = vpow2.f32 %v8093_v16  ;;  %v13530_v57 = vpop.f32.mrf.mxu0 }
 0x356   : > { %v10320_v9 = vpop.eup %10319  ;;  %10345 = vrcp.f32 %v4578_v18  ;;  %v6942_v42 = vmul.f32 %v13204_v54, %v13522_v53 }
 0x357   : > { %v10322_v36 = vpop.eup %10321  ;;  %10347 = vpow2.f32 %v8095_v44  ;;  %v6321_v28 = vadd.f32 1.0, %v10320_v9  ;;  %v8076_v9 = vmul.f32 -1.442695, %v5748_v32 }
 0x358   : > { %v10324_v17 = vpop.eup %10323  ;;  %v6935_v35 = vmul.f32 %v10322_v36, %v6931_v37  ;;  %10349 = vpow2.f32 %v8074_v27  ;;  %v13544_v37 = vpop.f32.mrf.mxu1 }
 0x359   : > { %v10326_v16 = vpop.eup %10325  ;;  %10351 = vrcp.f32 %v6317_v30  ;;  %v5737_v30 = vadd.f32 %v13449_v31, %v13426_v2  ;;  %v6300_v0 = vadd.f32 1.0, %v10324_v17  ;;  %v13546_v31 = vpop.f32.mrf.mxu0 }
 0x35a   : > { %v13532_v47 = vpop.eup %10327  ;;  %v13535_v61 = vadd.f32 %v6935_v35, %v13433_v3  ;;  %10353 = vpow2.f32 %v8097_v50  ;;  %v6932_v18 = vsub.f32 %v10326_v16, %v13477_v48  ;;  %v5612_v16 = vadd.f32 %v13394_v63, %v13094_v6 }
 0x35b   : > { %v10330_v7 = vpop.eup %10329  ;;  %10355 = vtanh.f32 %v5602_v10  ;;  %v8070_v54 = vmul.f32 -1.442695, %v5737_v30  ;;  %v13556_v30 = vpop.f32.mrf.mxu0  ;;  %v5618_v63 = vadd.f32 %v13428_v21, %v13094_v6 }
 0x35c   : > { %v10332_v44 = vpop.eup %10331  ;;  %10357 = vrcp.f32 %v6319_v49  ;;  %v6943_v39 = vmul.f32 %v13235_v14, %v13535_v61  ;;  %v6296_v49 = vadd.f32 1.0, %v10330_v7 }
 0x35d   : > { %v10334_v3 = vpop.eup %10333  ;;  %10359 = vtanh.f32 %v5608_v58  ;;  %v6302_v27 = vadd.f32 1.0, %v10332_v44  ;;  %v5740_v44 = vadd.f32 %v13483_v13, %v13426_v2  ;;  %v5622_v13 = vadd.f32 %v13467_v4, %v13094_v6 }
 0x35e   : > { %v10336_v50 = vpop.eup %10335  ;;  %v8624_v36 = vpack.c.bf16 %v6943_v39, %v6942_v42  ;;  %10361 = vrcp.f32 %v6321_v28  ;;  %v6936_v10 = vmul.f32 %v10334_v3, %v6932_v18  ;;  %v13554_v28 = vpop.f32.mrf.mxu1  ;;  %v5630_v4 = vadd.f32 %v13514_v62, %v13086_v5  ;;  %v14242_v62 = vld [vmem:[#allocation29_spill] sm:$0xff] }
 0x35f   : > { %v10338_v17 = vpop.eup %10337  ;;  %10363 = vrcp.f32 %v6300_v0  ;;  %v6323_v7 = vadd.f32 1.0, %v10336_v50  ;;  %v5624_v50 = vadd.f32 %v13481_v40, %v13086_v5 }
 0x360   : > { %v10340_v14 = vpop.eup %10339  ;;  %8756 = vst [vmem:[%s10910_s1 + $0x170] sm:$0xff] %v8624_v36   ;;  %v6940_v35 = vadd.f32 %v6936_v10, %v13477_v48  ;;  %10365 = vrcp.f32 %v6302_v27  ;;  %v6933_v42 = vsub.f32 %v10338_v17, %v13490_v1  ;;  %v8072_v36 = vmul.f32 -1.442695, %v5740_v44  ;;  %v13568_v10 = vpop.f32.mrf.mxu1  ;;  %v14241_v44 = vld [vmem:[#allocation42_spill] sm:$0xff] }
 0x361   : > { %v10342_v58 = vpop.eup %10341  ;;  %v6298_v32 = vadd.f32 1.0, %v10340_v14  ;;  %10367 = vpow2.f32 %v8076_v9 }
 0x362   : > { %v10344_v0 = vpop.eup %10343  ;;  %10369 = vpow2.f32 %v8070_v54  ;;  %v6984_v39 = vsub.f32 %v13241_v51, %v6940_v35  ;;  %v6325_v27 = vadd.f32 1.0, %v10342_v58  ;;  %v5761_v51 = vadd.f32 %v13504_v41, %v13426_v2  ;;  %v13570_v54 = vpop.f32.mrf.mxu0 }
 0x363   : > { %v10346_v48 = vpop.eup %10345  ;;  %10371 = vrcp.f32 %v6296_v49  ;;  %v6327_v49 = vadd.f32 1.0, %v10344_v0  ;;  %v5753_v41 = vadd.f32 %v13516_v12, %v13426_v2  ;;  %v13591_v12 = vpop.f32.mrf.mxu1 }
 0x364   : > { %v10348_v18 = vpop.eup %10347  ;;  %v6937_v3 = vmul.f32 %v10346_v48, %v6933_v42  ;;  %10373 = vtanh.f32 %v5612_v16  ;;  %v6988_v40 = vmul.f32 %v13314_v34, %v6984_v39  ;;  %v6982_v42 = vsub.f32 %v14242_v62, %v13522_v53  ;;  %v14243_v34 = vld [vmem:[#allocation39_spill] sm:$0xff] }
 0x365   : > { %v10350_v9 = vpop.eup %10349  ;;  %10375 = vrcp.f32 %v6298_v32  ;;  %v6329_v16 = vadd.f32 1.0, %v10348_v18  ;;  %v6944_v32 = vmul.f32 %v13190_v23, %v6940_v35  ;;  %v6983_v48 = vsub.f32 %v14243_v34, %v13535_v61 }
 0x366   : > { %v13572_v21 = vpop.eup %10351  ;;  %10377 = vrcp.f32 %v6323_v7  ;;  %v6941_v17 = vadd.f32 %v6937_v3, %v13490_v1  ;;  %v6308_v1 = vadd.f32 1.0, %v10350_v9  ;;  %v8099_v34 = vmul.f32 -1.442695, %v5624_v50 }
 0x367   : > { %v10354_v14 = vpop.eup %10353  ;;  %10379 = vtanh.f32 %v5618_v63  ;;  %v13593_v63 = vpop.f32.mrf.mxu0  ;;  %v8101_v50 = vmul.f32 -1.442695, %v5630_v4 }
 0x368   : > { %v13580_v58 = vpop.eup %10355  ;;  %v6945_v7 = vmul.f32 %v14241_v44, %v6941_v17  ;;  %10381 = vrcp.f32 %v6325_v27  ;;  %v6985_v39 = vsub.f32 %v13257_v24, %v6941_v17  ;;  %v6331_v3 = vadd.f32 1.0, %v10354_v14 }
 0x369   : > { %v13584_v0 = vpop.eup %10357  ;;  %10383 = vtanh.f32 %v5622_v13  ;;  %v5764_v27 = vadd.f32 %v13530_v57, %v13426_v2  ;;  %v13601_v44 = vadd.f32 %v6988_v40, %v6940_v35  ;;  %v8082_v24 = vmul.f32 -1.442695, %v5761_v51  ;;  %v13613_v51 = vpop.f32.mrf.mxu0 }
 0x36a   : > { %v13595_v23 = vpop.eup %10359  ;;  %v8629_v18 = vpack.c.bf16 %v6945_v7, %v6944_v32  ;;  %10385 = vrcp.f32 %v6327_v49  ;;  %v6989_v62 = vmul.f32 %v13339_v25, %v6985_v39  ;;  %v5634_v32 = vadd.f32 %v13544_v37, %v13086_v5  ;;  %v5643_v25 = vpop.f32.mrf.mxu1 }
 0x36b   : > { %v13599_v9 = vpop.eup %10361  ;;  %10387 = vrcp.f32 %v6329_v16  ;;  %v5756_v49 = vadd.f32 %v13546_v31, %v13426_v2  ;;  %v6986_v57 = vmul.f32 %v13263_v56, %v6982_v42  ;;  %v6987_v35 = vmul.f32 %v13290_v55, %v6983_v48 }
 0x36c   : > { %v10364_v13 = vpop.eup %10363  ;;  %8757 = vst [vmem:[%s10910_s1 + $0x178] sm:$0xff] %v8629_v18   ;;  %10389 = vrcp.f32 %v6308_v1  ;;  %v13611_v40 = vadd.f32 %v6989_v62, %v6941_v17  ;;  %v8078_v7 = vmul.f32 -1.442695, %v5753_v41  ;;  %v8084_v1 = vmul.f32 -1.442695, %v5764_v27  ;;  %v13629_v27 = vpop.f32.mrf.mxu0 }
 0x36d   : > { %v10366_v14 = vpop.eup %10365  ;;  %10391 = vpow2.f32 %v8072_v36  ;;  %v6996_v39 = vmul.f32 %v10364_v13, %v13601_v44  ;;  %v8103_v55 = vmul.f32 -1.442695, %v5634_v32  ;;  %v8080_v17 = vmul.f32 -1.442695, %v5756_v49 }
 0x36e   : > { %v10368_v16 = vpop.eup %10367  ;;  %10393 = vrcp.f32 %v6331_v3  ;;  %v6997_v31 = vmul.f32 %v10366_v14, %v13611_v40  ;;  %v5777_v36 = vadd.f32 %v13556_v30, %v13426_v2  ;;  %v13622_v4 = vadd.f32 %v6986_v57, %v13522_v53  ;;  %v13627_v3 = vpop.f32.mrf.mxu1 }
 0x36f   : > { %v10370_v37 = vpop.eup %10369  ;;  %v6310_v18 = vadd.f32 1.0, %v10368_v16  ;;  %10395 = vpow2.f32 %v8082_v24  ;;  %v13625_v41 = vadd.f32 %v6987_v35, %v13535_v61  ;;  %v7036_v24 = vsub.f32 %v13331_v8, %v13601_v44  ;;  %v13652_v16 = vpop.f32.mrf.mxu0 }
 0x370   : > { %v10372_v56 = vpop.eup %10371  ;;  %10397 = vpow2.f32 %v8099_v34  ;;  %v8639_v48 = vpack.c.bf16 %v6997_v31, %v6996_v39  ;;  %v6304_v30 = vadd.f32 1.0, %v10370_v37  ;;  %v5640_v13 = vadd.f32 %v13568_v10, %v13086_v5  ;;  %v13650_v35 = vpop.f32.mrf.mxu1 }
 0x371   : > { %v13619_v42 = vpop.eup %10373  ;;  %10399 = vrcp.f32 %v6310_v18  ;;  %v7037_v61 = vsub.f32 %v13353_v19, %v13611_v40  ;;  %v6994_v34 = vmul.f32 %v10372_v56, %v13622_v4  ;;  %v8090_v8 = vmul.f32 -1.442695, %v5777_v36 }
 0x372   : > { %v10376_v62 = vpop.eup %10375  ;;  %10401 = vpow2.f32 %v8078_v7  ;;  %8759 = vst [vmem:[%s10910_s1 + $0x188] sm:$0xff] %v8639_v48   ;;  %v5769_v14 = vadd.f32 %v13570_v54, %v13426_v2  ;;  %v5628_v19 = vadd.f32 %v13502_v59, %v13094_v6  ;;  %v5632_v7 = vadd.f32 %v13528_v26, %v13094_v6 }
 0x373   : > { %v13635_v53 = vpop.eup %10377  ;;  %v6995_v32 = vmul.f32 %v10376_v62, %v13625_v41  ;;  %10403 = vpow2.f32 %v8101_v50  ;;  %v5780_v54 = vadd.f32 %v13593_v63, %v13426_v2  ;;  %v7040_v37 = vmul.f32 %v13412_v46, %v7036_v24 }
 0x374   : > { %v13642_v49 = vpop.eup %10379  ;;  %10405 = vpow2.f32 %v8084_v1  ;;  %v7041_v59 = vmul.f32 %v13441_v11, %v7037_v61  ;;  %v8105_v39 = vmul.f32 -1.442695, %v5640_v13  ;;  %v8086_v18 = vmul.f32 -1.442695, %v5769_v14  ;;  %v14244_v11 = vld [vmem:[#allocation47_spill] sm:$0xff]  ;;  %v14245_v61 = vld [vmem:[#allocation49_spill] sm:$0xff] }
 0x375   : > { %v13646_v10 = vpop.eup %10381  ;;  %v8634_v57 = vpack.c.bf16 %v6995_v32, %v6994_v34  ;;  %10407 = vpow2.f32 %v8103_v55  ;;  %v5638_v26 = vadd.f32 %v13554_v28, %v13094_v6  ;;  %v5644_v63 = vadd.f32 %v5643_v25, %v13086_v5  ;;  %v13670_v55 = vpop.f32.mrf.mxu1 }
 0x376   : > { %v13654_v50 = vpop.eup %10383  ;;  %10409 = vpow2.f32 %v8080_v17  ;;  %v9049_v17 = vpop.f32.mrf.mxu0  ;;  %v7034_v36 = vsub.f32 %v14244_v11, %v13622_v4  ;;  %v8092_v48 = vmul.f32 -1.442695, %v5780_v54  ;;  %v5772_v62 = vadd.f32 %v13613_v51, %v13426_v2 }
 0x377   : > { %v13660_v1 = vpop.eup %10385  ;;  %8758 = vst [vmem:[%s10910_s1 + $0x180] sm:$0xff] %v8634_v57   ;;  %10411 = vrcp.f32 %v6304_v30  ;;  %v13679_v30 = vadd.f32 %v7040_v37, %v13601_v44  ;;  %v13682_v28 = vadd.f32 %v7041_v59, %v13611_v40  ;;  %v7035_v34 = vsub.f32 %v14245_v61, %v13625_v41  ;;  %v5653_v51 = vpop.f32.mrf.mxu1 }
 0x378   : > { %v13665_v31 = vpop.eup %10387  ;;  %10413 = vpow2.f32 %v8090_v8  ;;  %v8107_v14 = vmul.f32 -1.442695, %v5644_v63  ;;  %v13686_v57 = vpop.f32.mrf.mxu0  ;;  %v7038_v44 = vmul.f32 %v13361_v29, %v7034_v36  ;;  %v8088_v37 = vmul.f32 -1.442695, %v5772_v62 }
 0x379   : > { %v10390_v56 = vpop.eup %10389  ;;  %10415 = vtanh.f32 %v5628_v19  ;;  %v5642_v11 = vadd.f32 %v13591_v12, %v13094_v6  ;;  %v13694_v29 = vpop.f32.mrf.mxu1  ;;  %v5650_v12 = vadd.f32 %v13650_v35, %v13086_v5 }
 0x37a   : > { %v10392_v46 = vpop.eup %10391  ;;  %10417 = vtanh.f32 %v5632_v7  ;;  %v7048_v7 = vmul.f32 %v10390_v56, %v13679_v30  ;;  %v9052_v36 = vpop.f32.mrf.mxu0 }
 0x37b   : > { %v13676_v24 = vpop.eup %10393  ;;  %v6306_v25 = vadd.f32 1.0, %v10392_v46  ;;  %10419 = vpow2.f32 %v8105_v39  ;;  %v7039_v39 = vmul.f32 %v13388_v60, %v7035_v34  ;;  %v5793_v60 = vadd.f32 %v13629_v27, %v13426_v2 }
 0x37c   : > { %v10396_v13 = vpop.eup %10395  ;;  %10421 = vpow2.f32 %v8086_v18  ;;  %v7088_v27 = vsub.f32 %v13435_v52, %v13679_v30  ;;  %v5800_v35 = vpop.f32.mrf.mxu0 }
 0x37d   : > { %v10398_v32 = vpop.eup %10397  ;;  %10423 = vrcp.f32 %v6306_v25  ;;  %v6316_v8 = vadd.f32 1.0, %v10396_v13  ;;  %v5785_v13 = vadd.f32 %v13652_v16, %v13426_v2  ;;  %v13707_v34 = vadd.f32 %v7039_v39, %v13625_v41 }
 0x37e   : > { %v10400_v19 = vpop.eup %10399  ;;  %10425 = vpow2.f32 %v8092_v48  ;;  %v13697_v48 = vadd.f32 %v7038_v44, %v13622_v4  ;;  %v6333_v25 = vadd.f32 1.0, %v10398_v32  ;;  %v5796_v32 = vadd.f32 %v9049_v17, %v13426_v2  ;;  %v5659_v44 = vpop.f32.mrf.mxu1 }
 0x37f   : > { %v10402_v40 = vpop.eup %10401  ;;  %v7049_v54 = vmul.f32 %v10400_v19, %v13682_v28  ;;  %10427 = vtanh.f32 %v5638_v26  ;;  %v7089_v41 = vsub.f32 %v13456_v20, %v13682_v28  ;;  %v8098_v52 = vmul.f32 -1.442695, %v5793_v60 }
 0x380   : > { %v10404_v59 = vpop.eup %10403  ;;  %10429 = vrcp.f32 %v6316_v8  ;;  %v6312_v18 = vadd.f32 1.0, %v10402_v40  ;;  %v7086_v16 = vsub.f32 %v13382_v15, %v13697_v48  ;;  %v8100_v20 = vmul.f32 -1.442695, %v5796_v32 }
 0x381   : > { %v10406_v63 = vpop.eup %10405  ;;  %v8649_v46 = vpack.c.bf16 %v7049_v54, %v7048_v7  ;;  %10431 = vpow2.f32 %v8107_v14  ;;  %v6335_v4 = vadd.f32 1.0, %v10404_v59  ;;  %v5648_v7 = vadd.f32 %v13627_v3, %v13094_v6  ;;  %v13726_v3 = vpop.f32.mrf.mxu1 }
 0x382   : > { %v10408_v56 = vpop.eup %10407  ;;  %10433 = vrcp.f32 %v6312_v18  ;;  %v6318_v26 = vadd.f32 1.0, %v10406_v63  ;;  %v7087_v59 = vsub.f32 %v13404_v22, %v13707_v34  ;;  %v8094_v18 = vmul.f32 -1.442695, %v5785_v13 }
 0x383   : > { %v10410_v62 = vpop.eup %10409  ;;  %8761 = vst [vmem:[%s10910_s1 + $0x198] sm:$0xff] %v8649_v46   ;;  %10435 = vpow2.f32 %v8088_v37  ;;  %v6337_v19 = vadd.f32 1.0, %v10408_v56  ;;  %v8109_v37 = vmul.f32 -1.442695, %v5650_v12  ;;  %v7092_v63 = vmul.f32 %v13512_v38, %v7088_v27 }
 0x384   : > { %v10412_v61 = vpop.eup %10411  ;;  %10437 = vrcp.f32 %v6318_v26  ;;  %v6314_v8 = vadd.f32 1.0, %v10410_v62  ;;  %v5654_v46 = vadd.f32 %v5653_v51, %v13086_v5  ;;  %v7090_v26 = vmul.f32 %v13461_v33, %v7086_v16 }
 0x385   : > { %v10414_v14 = vpop.eup %10413  ;;  %10439 = vtanh.f32 %v5642_v11  ;;  %v9053_v11 = vpop.f32.mrf.mxu0  ;;  %v7093_v60 = vmul.f32 %v13572_v21, %v7089_v41  ;;  %v5788_v22 = vadd.f32 %v13686_v57, %v13426_v2  ;;  %v7091_v13 = vmul.f32 %v13492_v43, %v7087_v59 }
 0x386   : > { %v13712_v40 = vpop.eup %10415  ;;  %10441 = vrcp.f32 %v6314_v8  ;;  %v6324_v39 = vadd.f32 1.0, %v10414_v14  ;;  %v5809_v33 = vadd.f32 %v9052_v36, %v13426_v2  ;;  %v13739_v8 = vadd.f32 %v7092_v63, %v13679_v30 }
 0x387   : > { %v13720_v54 = vpop.eup %10417  ;;  %10443 = vrcp.f32 %v6333_v25  ;;  %v7046_v25 = vmul.f32 %v10412_v61, %v13697_v48  ;;  %v5663_v61 = vpop.f32.mrf.mxu1  ;;  %v13742_v32 = vadd.f32 %v7093_v60, %v13682_v28  ;;  %v5652_v43 = vadd.f32 %v13670_v55, %v13094_v6 }
 0x388   : > { %v10420_v17 = vpop.eup %10419  ;;  %10445 = vrcp.f32 %v6335_v4  ;;  %v5803_v27 = vpop.f32.mrf.mxu0  ;;  %v8111_v16 = vmul.f32 -1.442695, %v5654_v46  ;;  %v13747_v36 = vadd.f32 %v7090_v26, %v13697_v48  ;;  %v8096_v30 = vmul.f32 -1.442695, %v5788_v22 }
 0x389   : > { %v10422_v15 = vpop.eup %10421  ;;  %10447 = vrcp.f32 %v6337_v19  ;;  %v6339_v12 = vadd.f32 1.0, %v10420_v17  ;;  %v8106_v17 = vmul.f32 -1.442695, %v5809_v33  ;;  %v5660_v28 = vadd.f32 %v5659_v44, %v13086_v5 }
 0x38a   : > { %v10424_v56 = vpop.eup %10423  ;;  %10449 = vtanh.f32 %v5648_v7  ;;  %v6320_v14 = vadd.f32 1.0, %v10422_v15  ;;  %v5801_v7 = vadd.f32 %v5800_v35, %v13426_v2  ;;  %v5812_v59 = vadd.f32 %v9053_v11, %v13426_v2  ;;  %v13758_v15 = vpop.f32.mrf.mxu1  ;;  %v14246_v11 = vld [vmem:[#allocation44_spill] sm:$0xff] }
 0x38b   : > { %v10426_v62 = vpop.eup %10425  ;;  %v7047_v38 = vmul.f32 %v10424_v56, %v13707_v34  ;;  %10451 = vpow2.f32 %v8098_v52  ;;  %v13754_v55 = vadd.f32 %v7091_v13, %v13707_v34  ;;  %v7140_v48 = vsub.f32 %v13532_v47, %v13739_v8  ;;  %v9056_v63 = vpop.f32.mrf.mxu0 }
 0x38c   : > { %v13734_v51 = vpop.eup %10427  ;;  %10453 = vrcp.f32 %v6324_v39  ;;  %v6326_v4 = vadd.f32 1.0, %v10426_v62  ;;  %v7138_v56 = vsub.f32 %v14246_v11, %v13747_v36  ;;  %v8102_v26 = vmul.f32 -1.442695, %v5801_v7  ;;  %v5669_v13 = vpop.f32.mrf.mxu1 }
 0x38d   : > { %v10430_v21 = vpop.eup %10429  ;;  %v8644_v57 = vpack.c.bf16 %v7047_v38, %v7046_v25  ;;  %10455 = vpow2.f32 %v8094_v18  ;;  %v5664_v38 = vadd.f32 %v5663_v61, %v13086_v5  ;;  %v7139_v61 = vsub.f32 %v13509_v45, %v13754_v55 }
 0x38e   : > { %v10432_v19 = vpop.eup %10431  ;;  %10457 = vrcp.f32 %v6326_v4  ;;  %v7100_v44 = vmul.f32 %v10430_v21, %v13739_v8  ;;  %v5816_v4 = vpop.f32.mrf.mxu0  ;;  %v7144_v21 = vmul.f32 %v13635_v53, %v7140_v48 }
 0x38f   : > { %v10434_v41 = vpop.eup %10433  ;;  %8760 = vst [vmem:[%s10910_s1 + $0x190] sm:$0xff] %v8644_v57   ;;  %10459 = vrcp.f32 %v6339_v12  ;;  %v6341_v47 = vadd.f32 1.0, %v10432_v19  ;;  %v5804_v12 = vadd.f32 %v5803_v27, %v13426_v2  ;;  %v5658_v27 = vadd.f32 %v13694_v29, %v13094_v6 }
 0x390   : > { %v10436_v52 = vpop.eup %10435  ;;  %10461 = vpow2.f32 %v8100_v20  ;;  %v7141_v20 = vsub.f32 %v13580_v58, %v13742_v32  ;;  %v7098_v22 = vmul.f32 %v10434_v41, %v13747_v36  ;;  %v8115_v7 = vmul.f32 -1.442695, %v5664_v38 }
 0x391   : > { %v10438_v39 = vpop.eup %10437  ;;  %10463 = vrcp.f32 %v6320_v14  ;;  %v6322_v18 = vadd.f32 1.0, %v10436_v52  ;;  %v13789_v52 = vpop.f32.mrf.mxu1  ;;  %v8104_v29 = vmul.f32 -1.442695, %v5804_v12 }
 0x392   : > { %v13760_v35 = vpop.eup %10439  ;;  %v7101_v46 = vmul.f32 %v10438_v39, %v13742_v32  ;;  %10465 = vpow2.f32 %v8109_v37  ;;  %v8108_v37 = vmul.f32 -1.442695, %v5812_v59  ;;  %v7145_v57 = vmul.f32 %v13646_v10, %v7141_v20 }
 0x393   : > { %v10442_v34 = vpop.eup %10441  ;;  %10467 = vrcp.f32 %v6322_v18 }
 0x394   : > { %v13768_v60 = vpop.eup %10443  ;;  %v8659_v62 = vpack.c.bf16 %v7101_v46, %v7100_v44  ;;  %v7099_v58 = vmul.f32 %v10442_v34, %v13754_v55  ;;  %10469 = vpow2.f32 %v8096_v30  ;;  %v8113_v30 = vmul.f32 -1.442695, %v5660_v28 }
 0x395   : > { %v13772_v25 = vpop.eup %10445  ;;  %10471 = vtanh.f32 %v5652_v43  ;;  %v7142_v43 = vmul.f32 %v13584_v0, %v7138_v56  ;;  %v13792_v0 = vadd.f32 %v7144_v21, %v13739_v8  ;;  %v13795_v45 = vadd.f32 %v7145_v57, %v13742_v32 }
 0x396   : > { %v13776_v33 = vpop.eup %10447  ;;  %8763 = vst [vmem:[%s10910_s1 + $0x1a8] sm:$0xff] %v8659_v62   ;;  %v8654_v14 = vpack.c.bf16 %v7099_v58, %v7098_v22  ;;  %10473 = vpow2.f32 %v8106_v17  ;;  %v9057_v17 = vpop.f32.mrf.mxu0  ;;  %v7143_v28 = vmul.f32 %v13599_v9, %v7139_v61  ;;  %v5670_v32 = vadd.f32 %v5669_v13, %v13086_v5 }
 0x397   : > { %v13781_v19 = vpop.eup %10449  ;;  %10475 = vrcp.f32 %v6341_v47  ;;  %v13799_v48 = vadd.f32 %v7142_v43, %v13747_v36  ;;  %v5662_v9 = vadd.f32 %v13726_v3, %v13094_v6  ;;  %v5673_v36 = vpop.f32.mrf.mxu1  ;;  %v5828_v38 = vadd.f32 %v9057_v17, %v13426_v2 }
 0x398   : > { %v10452_v41 = vpop.eup %10451  ;;  %8762 = vst [vmem:[%s10910_s1 + $0x1a0] sm:$0xff] %v8654_v14   ;;  %10477 = vpow2.f32 %v8102_v26  ;;  %v5819_v46 = vpop.f32.mrf.mxu0  ;;  %v13812_v22 = vadd.f32 %v7143_v28, %v13754_v55  ;;  %v8117_v3 = vmul.f32 -1.442695, %v5670_v32  ;;  %v7192_v13 = vsub.f32 %v13642_v49, %v13792_v0 }
 0x399   : > { %v10454_v53 = vpop.eup %10453  ;;  %v6332_v10 = vadd.f32 1.0, %v10452_v41  ;;  %10479 = vpow2.f32 %v8111_v16  ;;  %v5825_v16 = vadd.f32 %v9056_v63, %v13426_v2  ;;  %v7190_v26 = vsub.f32 %v13595_v23, %v13799_v48  ;;  %v13821_v55 = vpop.f32.mrf.mxu1 }
 0x39a   : > { %v10456_v59 = vpop.eup %10455  ;;  %10481 = vpow2.f32 %v8108_v37  ;;  %v7152_v20 = vmul.f32 %v10454_v53, %v13792_v0  ;;  %v5817_v37 = vadd.f32 %v5816_v4, %v13426_v2  ;;  %v9060_v57 = vpop.f32.mrf.mxu0  ;;  %v7193_v4 = vsub.f32 %v13654_v50, %v13795_v45 }
 0x39b   : > { %v10458_v39 = vpop.eup %10457  ;;  %10483 = vtanh.f32 %v5658_v27  ;;  %v6328_v63 = vadd.f32 1.0, %v10456_v59  ;;  %v8114_v62 = vmul.f32 -1.442695, %v5825_v16  ;;  %v7194_v49 = vmul.f32 %v13660_v1, %v7190_v26 }
 0x39c   : > { %v13802_v18 = vpop.eup %10459  ;;  %v7153_v8 = vmul.f32 %v10458_v39, %v13795_v45  ;;  %10485 = vpow2.f32 %v8113_v30  ;;  %v5668_v30 = vadd.f32 %v13758_v15, %v13094_v6  ;;  %v7196_v17 = vmul.f32 %v13676_v24, %v7192_v13  ;;  %v5832_v39 = vpop.f32.mrf.mxu0 }
 0x39d   : > { %v10462_v44 = vpop.eup %10461  ;;  %10487 = vrcp.f32 %v6332_v10  ;;  %v8110_v50 = vmul.f32 -1.442695, %v5817_v37  ;;  %v5674_v59 = vadd.f32 %v5673_v36, %v13086_v5  ;;  %v7197_v28 = vmul.f32 %v13768_v60, %v7193_v4 }
 0x39e   : > { %v10464_v34 = vpop.eup %10463  ;;  %v8669_v11 = vpack.c.bf16 %v7153_v8, %v7152_v20  ;;  %v6334_v56 = vadd.f32 1.0, %v10462_v44  ;;  %10489 = vpow2.f32 %v8115_v7  ;;  %v8116_v15 = vmul.f32 -1.442695, %v5828_v38  ;;  %v9061_v26 = vpop.f32.mrf.mxu0 }
 0x39f   : > { %v10466_v47 = vpop.eup %10465  ;;  %10491 = vpow2.f32 %v8104_v29  ;;  %v7150_v21 = vmul.f32 %v10464_v34, %v13799_v48  ;;  %v5679_v29 = vpop.f32.mrf.mxu1  ;;  %v5820_v16 = vadd.f32 %v5819_v46, %v13426_v2  ;;  %v7191_v8 = vsub.f32 %v13619_v42, %v13812_v22 }
 0x3a0   : > { %v10468_v58 = vpop.eup %10467  ;;  %8765 = vst [vmem:[%s10910_s1 + $0x1b8] sm:$0xff] %v8669_v11   ;;  %10493 = vrcp.f32 %v6334_v56  ;;  %v6343_v43 = vadd.f32 1.0, %v10466_v47  ;;  %v13840_v24 = vadd.f32 %v7194_v49, %v13799_v48  ;;  %v5680_v36 = vadd.f32 %v5679_v29, %v13086_v5 }
 0x3a1   : > { %v10470_v12 = vpop.eup %10469  ;;  %v7151_v23 = vmul.f32 %v10468_v58, %v13812_v22  ;;  %10495 = vtanh.f32 %v5662_v9  ;;  %v5833_v60 = vadd.f32 %v5832_v39, %v13426_v2  ;;  %v13847_v46 = vadd.f32 %v7196_v17, %v13792_v0  ;;  %v13854_v47 = vpop.f32.mrf.mxu1 }
 0x3a2   : > { %v13823_v14 = vpop.eup %10471  ;;  %10497 = vrcp.f32 %v6328_v63  ;;  %v6330_v61 = vadd.f32 1.0, %v10470_v12  ;;  %v8119_v11 = vmul.f32 -1.442695, %v5674_v59  ;;  %v13850_v48 = vadd.f32 %v7197_v28, %v13795_v45 }
 0x3a3   : > { %v10474_v27 = vpop.eup %10473  ;;  %v8664_v41 = vpack.c.bf16 %v7151_v23, %v7150_v21  ;;  %10499 = vpow2.f32 %v8114_v62  ;;  %v5672_v56 = vadd.f32 %v13789_v52, %v13094_v6  ;;  %v7195_v58 = vmul.f32 %v13665_v31, %v7191_v8 }
 0x3a4   : > { %v13830_v53 = vpop.eup %10475  ;;  %10501 = vrcp.f32 %v6330_v61  ;;  %v6340_v10 = vadd.f32 1.0, %v10474_v27  ;;  %v7242_v0 = vsub.f32 %v13712_v40, %v13840_v24  ;;  %v5841_v45 = vadd.f32 %v9060_v57, %v13426_v2  ;;  %v5683_v57 = vpop.f32.mrf.mxu1 }
 0x3a5   : > { %v10478_v7 = vpop.eup %10477  ;;  %8764 = vst [vmem:[%s10910_s1 + $0x1b0] sm:$0xff] %v8664_v41   ;;  %10503 = vpow2.f32 %v8117_v3  ;;  %v8112_v3 = vmul.f32 -1.442695, %v5820_v16  ;;  %v8121_v38 = vmul.f32 -1.442695, %v5680_v36  ;;  %v7244_v52 = vsub.f32 %v13734_v51, %v13847_v46  ;;  %v5835_v61 = vpop.f32.mrf.mxu0 }
 0x3a6   : > { %v10480_v1 = vpop.eup %10479  ;;  %10505 = vrcp.f32 %v6343_v43  ;;  %v6336_v32 = vadd.f32 1.0, %v10478_v7  ;;  %v8118_v12 = vmul.f32 -1.442695, %v5833_v60  ;;  %v7245_v31 = vsub.f32 %v13760_v35, %v13850_v48 }
 0x3a7   : > { %v10482_v20 = vpop.eup %10481  ;;  %10507 = vtanh.f32 %v5668_v30  ;;  %v6345_v63 = vadd.f32 1.0, %v10480_v1  ;;  %v7246_v49 = vmul.f32 %v13772_v25, %v7242_v0  ;;  %v7199_v51 = vadd.f32 %v7195_v58, %v13812_v22 }
 0x3a8   : > { %v13842_v44 = vpop.eup %10483  ;;  %10509 = vrcp.f32 %v6340_v10  ;;  %v6342_v9 = vadd.f32 1.0, %v10482_v20  ;;  %v8122_v7 = vmul.f32 -1.442695, %v5841_v45  ;;  %v5844_v35 = vadd.f32 %v9061_v26, %v13426_v2 }
 0x3a9   : > { %v10486_v34 = vpop.eup %10485  ;;  %10511 = vpow2.f32 %v8110_v50  ;;  %v7248_v50 = vmul.f32 %v13802_v18, %v7244_v52  ;;  %v5684_v59 = vadd.f32 %v5683_v57, %v13086_v5  ;;  %v5836_v29 = vadd.f32 %v5835_v61, %v13426_v2 }
 0x3aa   : > { %v10488_v42 = vpop.eup %10487  ;;  %10513 = vrcp.f32 %v6342_v9  ;;  %v6347_v21 = vadd.f32 1.0, %v10486_v34  ;;  %v7249_v22 = vmul.f32 %v13830_v53, %v7245_v31  ;;  %v7250_v16 = vadd.f32 %v7246_v49, %v13840_v24 }
 0x3ab   : > { %v10490_v62 = vpop.eup %10489  ;;  %10515 = vrcp.f32 %v6336_v32  ;;  %v7204_v40 = vmul.f32 %v10488_v42, %v13847_v46  ;;  %v8124_v53 = vmul.f32 -1.442695, %v5844_v35  ;;  %v13881_v9 = vadd.f32 %v7248_v50, %v13847_v46 }
 0x3ac   : > { %v10492_v37 = vpop.eup %10491  ;;  %10517 = vpow2.f32 %v8116_v15  ;;  %v6349_v41 = vadd.f32 1.0, %v10490_v62  ;;  %v7243_v15 = vsub.f32 %v13720_v54, %v7199_v51  ;;  %v13884_v36 = vadd.f32 %v7249_v22, %v13850_v48 }
 0x3ad   : > { %v10494_v13 = vpop.eup %10493  ;;  %v6338_v23 = vadd.f32 1.0, %v10492_v37  ;;  %10519 = vpow2.f32 %v8119_v11  ;;  %v8123_v54 = vmul.f32 -1.442695, %v5684_v59  ;;  %v7294_v34 = vsub.f32 %v13781_v19, %v7250_v16 }
 0x3ae   : > { %v13862_v4 = vpop.eup %10495  ;;  %v7205_v43 = vmul.f32 %v10494_v13, %v13850_v48  ;;  %10521 = vrcp.f32 %v6345_v63  ;;  %v7247_v60 = vmul.f32 %v13776_v33, %v7243_v15  ;;  %v8120_v11 = vmul.f32 -1.442695, %v5836_v29 }
 0x3af   : > { %v10498_v27 = vpop.eup %10497  ;;  %10523 = vrcp.f32 %v6338_v23  ;;  %v5678_v23 = vadd.f32 %v13821_v55, %v13094_v6  ;;  %v5682_v50 = vadd.f32 %v13854_v47, %v13094_v6 }
 0x3b0   : > { %v10500_v30 = vpop.eup %10499  ;;  %v8679_v10 = vpack.c.bf16 %v7205_v43, %v7204_v40  ;;  %10525 = vpow2.f32 %v8112_v3  ;;  %v7202_v39 = vmul.f32 %v10498_v27, %v13840_v24  ;;  %v7251_v3 = vadd.f32 %v7247_v60, %v7199_v51 }
 0x3b1   : > { %v10502_v17 = vpop.eup %10501  ;;  %10527 = vrcp.f32 %v6347_v21  ;;  %v6348_v8 = vadd.f32 1.0, %v10500_v30  ;;  %v7297_v30 = vsub.f32 %v13862_v4, %v13884_v36 }
 0x3b2   : > { %v10504_v25 = vpop.eup %10503  ;;  %8767 = vst [vmem:[%s10910_s1 + $0x1c8] sm:$0xff] %v8679_v10   ;;  %v7203_v1 = vmul.f32 %v10502_v17, %v7199_v51  ;;  %10529 = vtanh.f32 %v5672_v56  ;;  %v7295_v40 = vsub.f32 %v13823_v14, %v7251_v3 }
 0x3b3   : > { %v10506_v28 = vpop.eup %10505  ;;  %10531 = vrcp.f32 %v6349_v41  ;;  %v6351_v18 = vadd.f32 1.0, %v10504_v25  ;;  %v7296_v41 = vsub.f32 %v13842_v44, %v13881_v9 }
 0x3b4   : > { %v10508_v20 = vpop.eup %10507  ;;  %v8674_v5 = vpack.c.bf16 %v7203_v1, %v7202_v39  ;;  %10533 = vpow2.f32 %v8121_v38  ;;  %v7298_v26 = vmul.f32 %v10506_v28, %v7294_v34 }
 0x3b5   : > { %v10510_v2 = vpop.eup %10509  ;;  %10535 = vrcp.f32 %v6351_v18 }
 0x3b6   : > { %v10512_v32 = vpop.eup %10511  ;;  %8766 = vst [vmem:[%s10910_s1 + $0x1c0] sm:$0xff] %v8674_v5   ;;  %10537 = vpow2.f32 %v8118_v12  ;;  %v7256_v63 = vmul.f32 %v10510_v2, %v13881_v9  ;;  %v7302_v13 = vadd.f32 %v7298_v26, %v7250_v16 }
 0x3b7   : > { %v10514_v24 = vpop.eup %10513  ;;  %10539 = vpow2.f32 %v8122_v7  ;;  %v6344_v58 = vadd.f32 1.0, %v10512_v32 }
 0x3b8   : > { %v10516_v42 = vpop.eup %10515  ;;  %v7257_v56 = vmul.f32 %v10514_v24, %v13884_v36  ;;  %10541 = vrcp.f32 %v6348_v8  ;;  %v7346_v49 = vsub.f32 %v10508_v20, %v7302_v13 }
 0x3b9   : > { %v10518_v46 = vpop.eup %10517  ;;  %10543 = vpow2.f32 %v8124_v53  ;;  %v7254_v38 = vmul.f32 %v10516_v42, %v7250_v16 }
 0x3ba   : > { %v10520_v48 = vpop.eup %10519  ;;  %v8689_v62 = vpack.c.bf16 %v7257_v56, %v7256_v63  ;;  %v6350_v0 = vadd.f32 1.0, %v10518_v46  ;;  %10545 = vpow2.f32 %v8123_v54 }
 0x3bb   : > { %v10522_v33 = vpop.eup %10521  ;;  %v6353_v19 = vadd.f32 1.0, %v10520_v48  ;;  %10547 = vpow2.f32 %v8120_v11 }
 0x3bc   : > { %v10524_v37 = vpop.eup %10523  ;;  %8769 = vst [vmem:[%s10910_s1 + $0x1d8] sm:$0xff] %v8689_v62   ;;  %10549 = vrcp.f32 %v6350_v0  ;;  %v7299_v27 = vmul.f32 %v10522_v33, %v7295_v40 }
 0x3bd   : > { %v10526_v45 = vpop.eup %10525  ;;  %v7255_v12 = vmul.f32 %v10524_v37, %v7251_v3  ;;  %10551 = vrcp.f32 %v6353_v19 }
 0x3be   : > { %v10528_v52 = vpop.eup %10527  ;;  %10553 = vrcp.f32 %v6344_v58  ;;  %v6346_v21 = vadd.f32 1.0, %v10526_v45  ;;  %v7303_v29 = vadd.f32 %v7299_v27, %v7251_v3 }
 0x3bf   : > { %v10530_v31 = vpop.eup %10529  ;;  %v8684_v43 = vpack.c.bf16 %v7255_v12, %v7254_v38  ;;  %v7300_v14 = vmul.f32 %v10528_v52, %v7296_v41 }
 0x3c0   : > { %v10532_v57 = vpop.eup %10531  ;;  %10555 = vrcp.f32 %v6346_v21  ;;  %v7347_v18 = vsub.f32 %v10530_v31, %v7303_v29 }
 0x3c1   : > { %v10534_v61 = vpop.eup %10533  ;;  %8768 = vst [vmem:[%s10910_s1 + $0x1d0] sm:$0xff] %v8684_v43   ;;  %10557 = vtanh.f32 %v5678_v23  ;;  %v7301_v17 = vmul.f32 %v10532_v57, %v7297_v30  ;;  %v7304_v4 = vadd.f32 %v7300_v14, %v13881_v9 }
 0x3c2   : > { %v10536_v51 = vpop.eup %10535  ;;  %v6355_v10 = vadd.f32 1.0, %v10534_v61 }
 0x3c3   : > { %v10538_v55 = vpop.eup %10537  ;;  %v7350_v7 = vmul.f32 %v10536_v51, %v7346_v49  ;;  %v7305_v28 = vadd.f32 %v7301_v17, %v13884_v36 }
 0x3c4   : > { %v10540_v35 = vpop.eup %10539  ;;  %10559 = vrcp.f32 %v6355_v10  ;;  %v6352_v25 = vadd.f32 1.0, %v10538_v55 }
 0x3c5   : > { %v10542_v59 = vpop.eup %10541  ;;  %v7354_v22 = vadd.f32 %v7350_v7, %v7302_v13  ;;  %10561 = vtanh.f32 %v5682_v50  ;;  %v6356_v20 = vadd.f32 1.0, %v10540_v35 }
 0x3c6   : > { %v10544_v39 = vpop.eup %10543  ;;  %10563 = vrcp.f32 %v6352_v25  ;;  %v7308_v5 = vmul.f32 %v10542_v59, %v7304_v4 }
 0x3c7   : > { %v10546_v44 = vpop.eup %10545  ;;  %7383 = vst [vmem:[#allocation2 + $0x10] sm:$0xff] %v7354_v22  ;;  %v6358_v2 = vadd.f32 1.0, %v10544_v39 }
 0x3c8   : > { %v10548_v1 = vpop.eup %10547  ;;  %v6357_v15 = vadd.f32 1.0, %v10546_v44 }
 0x3c9   : > { %v10550_v16 = vpop.eup %10549  ;;  %v6354_v6 = vadd.f32 1.0, %v10548_v1 }
 0x3ca   : > { %v10552_v47 = vpop.eup %10551  ;;  %v7309_v8 = vmul.f32 %v10550_v16, %v7305_v28  ;;  %10565 = vrcp.f32 %v6357_v15 }
 0x3cb   : > { %v10554_v53 = vpop.eup %10553  ;;  %v7351_v32 = vmul.f32 %v10552_v47, %v7347_v18  ;;  %10567 = vrcp.f32 %v6354_v6 }
 0x3cc   : > { %v8699_v9 = vpack.c.bf16 %v7309_v8, %v7308_v5  ;;  %10569 = vrcp.f32 %v6356_v20  ;;  %v7306_v24 = vmul.f32 %v10554_v53, %v7302_v13 }
 0x3cd   : > { %v10556_v54 = vpop.eup %10555  ;;  %v7355_v36 = vadd.f32 %v7351_v32, %v7303_v29  ;;  %10571 = vrcp.f32 %v6358_v2 }
 0x3ce   : > { %8771 = vst [vmem:[%s10910_s1 + $0x1e8] sm:$0xff] %v8699_v9   ;;  %v7307_v60 = vmul.f32 %v10556_v54, %v7303_v29  ;;  %v10558_v34 = vpop.eup %10557 }
 0x3cf   : > { %7384 = vst [vmem:[#allocation2] sm:$0xff] %v7355_v36  ;;  %v7348_v42 = vsub.f32 %v10558_v34, %v7304_v4 }
 0x3d0   : > { %v8694_v11 = vpack.c.bf16 %v7307_v60, %v7306_v24 }
 0x3d1   : > { %v10560_v63 = vpop.eup %10559 }
 0x3d2   : > { %8770 = vst [vmem:[%s10910_s1 + $0x1e0] sm:$0xff] %v8694_v11   ;;  %v7352_v56 = vmul.f32 %v10560_v63, %v7348_v42  ;;  %v10562_v26 = vpop.eup %10561 }
 0x3d3   : > { %v10564_v48 = vpop.eup %10563  ;;  %v7349_v62 = vsub.f32 %v10562_v26, %v7305_v28 }
 0x3d4   : > { %v7356_v46 = vadd.f32 %v7352_v56, %v7304_v4  ;;  %v7358_v3 = vmul.f32 %v10564_v48, %v7354_v22 }
 0x3d6   : > { %7385 = vst [vmem:[#allocation2 + $0x18] sm:$0xff] %v7356_v46 }
 0x3d7   : > { %v10566_v58 = vpop.eup %10565 }
 0x3d8   : > { %v10568_v0 = vpop.eup %10567  ;;  %v7353_v33 = vmul.f32 %v10566_v58, %v7349_v62 }
 0x3d9   : > { %v7359_v19 = vmul.f32 %v10568_v0, %v7355_v36  ;;  %v10570_v37 = vpop.eup %10569 }
 0x3da   : > { %v7357_v45 = vadd.f32 %v7353_v33, %v7305_v28  ;;  %v10572_v38 = vpop.eup %10571  ;;  %v7360_v13 = vmul.f32 %v10570_v37, %v7356_v46 }
 0x3db   : > { %v8704_v12 = vpack.c.bf16 %v7359_v19, %v7358_v3 }
 0x3dc   : > { %v7361_v52 = vmul.f32 %v10572_v38, %v7357_v45  ;;  %7386 = vst [vmem:[#allocation2 + $0x8] sm:$0xff] %v7357_v45  ;;  %7390 = sbr.rel (%p8253_p1) target bundleno = 997 (0x3e5), region = 48 }
 0x3dd   : > { %8772 = vst [vmem:[%s10910_s1 + $0x1f0] sm:$0xff] %v8704_v12  }
 0x3de   : > { %v8709_v21 = vpack.c.bf16 %v7361_v52, %v7360_v13 }
 0x3e0   : > { %8773 = vst [vmem:[%s10910_s1 + $0x1f8] sm:$0xff] %v8709_v21  }
 0x3e1   : > { %v7391_v23 = vld [vmem:[#allocation2 + $0x10] sm:$0xff]  ;;  %v7392_v31 = vld [vmem:[#allocation2] sm:$0xff]  ;;  %v7393_v40 = vld [vmem:[#allocation2 + $0x18] sm:$0xff] }
 0x3e2   : > { %7395 = vst [vmem:[#allocation10] sm:$0xff] %v7391_v23  ;;  %7396 = vst [vmem:[#allocation10 + $0x8] sm:$0xff] %v7392_v31 }
 0x3e3   : > { %7397 = vst [vmem:[#allocation10 + $0x10] sm:$0xff] %v7393_v40  ;;  %v7394_v43 = vld [vmem:[#allocation2 + $0x8] sm:$0xff] }
 0x3e4   : > { %7398 = vst [vmem:[#allocation10 + $0x18] sm:$0xff] %v7394_v43 }
 0x3e5 PF: > { %s8390_s12 = sshll.u32 %s10732_s18, 13  ;;  %s7415_s6 = sshll.u32 %s10910_s1, 4  ;;  %s13915_s6 = int_to_ptr.vmem [resolvable:$true] %s7415_s6 }
 0x3e6   : > { %s13912_s5 = scalar_lea.hbm %s13977_s3, %s8390_s12  ;;  %s7400_s23 = scalar_lea.sflag [#allocation6], %s10896_s21 }
 0x3e7   : > { %s10628_s25 = scalar_lea.vmem %s13915_s6, 8192  ;;  %s10750_s27 = smov [#allocation9]  }
 0x3e8   : > { %p10629_p8 = scmp.ne.s32.totalorder %s13915_s6, %s10628_s25  ;;  %s10632_s7 = sshll.u32 %s10750_s27, 4  ;;  %s10633_s7 = int_to_ptr.vmem [resolvable:$false] %s10632_s7 }
 0x3e9   : > { %s10634_s18 = scalar_lea.vmem %s10633_s7, 16384  ;;  %p10635_p3 = scmp.lt.s32.totalorder %s13915_s6, %s10633_s7 }
 0x3ea   : > { %p10630_p12 = pnand %p10629_p8, %p10868_p13  ;;  %p10636_p5 = scmp.lt.s32.totalorder %s10634_s18, %s10628_s25 }
 0x3ec   : > { %p10631_p0 = pneg %p10630_p12  ;;  %p10637_p7 = por %p10636_p5, %p10635_p3 }
 0x3ee   : > { %p10638_p6 = pnand %p10637_p7, %p10631_p0 }
 0x3f0   : > { %10641 = shalt.err (!%p10638_p6)
}
 0x3f1   : > { %s10642_s1 = scalar_lea.hbm %s13912_s5, 8192  ;;  %s10646_s10 = scalar_lea.hbm %s13977_s3, 16384 }
 0x3f2   : > { %p10643_p4 = scmp.ne.s32.totalorder %s13912_s5, %s10642_s1  ;;  %p10647_p10 = scmp.lt.s32.totalorder %s13912_s5, %s13977_s3 }
 0x3f3   : > { %p10648_p2 = scmp.lt.s32.totalorder %s10646_s10, %s10642_s1 }
 0x3f4   : > { %p10644_p9 = pnand %p10643_p4, %p10868_p13 }
 0x3f5   : > { %p10649_p1 = por %p10648_p2, %p10647_p10 }
 0x3f6   : > { %p10645_p11 = pneg %p10644_p9 }
 0x3f8   : > { %p10650_p8 = pnand %p10649_p1, %p10645_p11 }
 0x3fa   : > { %10653 = shalt.err (!%p10650_p8)
}
 0x3fb   : > { %s10751_s29 = smov 64   ;;  %s10752_s12 = smov 4  }
 0x3fc   : > { %9068 = dma.vmem_to_hbm [thread:$0]  (%p10868_p13), %s13915_s6, 8192, %s13912_s5, %s7400_s23, %s10751_s29, %s10751_s29, %s10752_s12  }
 0x3fd   : > { %s10753_s22 = smov [#allocation10]   ;;  %p14247_p0 = scmp.ne.s32.totalorder %s13998_s24, 0 }
 0x3fe   : > { %s7431_s30 = sshll.u32 %s10753_s22, 4  ;;  %s7432_s30 = int_to_ptr.vmem [resolvable:$true] %s7431_s30 }
 0x3ff   : > { %s10654_s25 = scalar_lea.vmem %s7432_s30, 512  ;;  %p10661_p7 = scmp.lt.s32.totalorder %s7432_s30, %s7432_s30 }
 0x400   : > { %p10655_p12 = scmp.ne.s32.totalorder %s7432_s30, %s10654_s25  ;;  %p10662_p6 = scmp.lt.s32.totalorder %s10654_s25, %s10654_s25 }
 0x402   : > { %p10656_p3 = pnand %p10655_p12, %p14247_p0  ;;  %p10663_p4 = por %p10662_p6, %p10661_p7 }
 0x404   : > { %p10657_p5 = pneg %p10656_p3 }
 0x406   : > { %p10664_p9 = pnand %p10663_p4, %p10657_p5 }
 0x408   : > { %10667 = shalt.err (!%p10664_p9)
}
 0x409   : > { %s10754_s27 = smov 128   ;;  %s10755_s7 = smov 8  }
 0x40a   : > { %9070 = dma.vmem_to_hbm [thread:$0]  (%p14247_p0), %s7432_s30, 512, %s13978_s4, [#allocation11], %s10754_s27, %s10754_s27, %s10755_s7  }
 0x40b   : > { %10711 = dma.done.wait (%p14247_p0), [#allocation11], 512  }
 0x40c   : > { %10713 = vsyncadd (%p14247_p0), [#allocation11], 4294966784 }
 0x40d PF: > { %s7450_s5 = sand.u32 1, %s10720_s15   ;;  %p14248_p13 = scmp.ne.s32.totalorder %s14000_s26, 0 }
 0x40e   : > { %p14249_p11 = scmp.ge.s32.totalorder %s10740_s20, 2  ;;  %s7451_s6 = scalar_lea.sflag [#allocation6], %s7450_s5 }
 0x410   : > { %p9083_p10 = pnand %p14249_p11, %p14248_p13 }
 0x412   : > { %p9084_p2 = pneg %p9083_p10 }
 0x414   : > { %10715 = dma.done.wait (%p9084_p2), %s7451_s6, 8192  }
 0x415   : > { %10717 = vsyncadd (%p9084_p2), %s7451_s6, 4294959104  ;;  %s23_s20 = sadd.s32 1, %s10740_s20   ;;  %s14250_s24 = sld [smem:[#allocation16_spill]] }
 0x416   : > { %p20_p1 = scmp.ge.s32.totalorder %s23_s20, 4   ;;  %s14251_s15 = smov %s10724_s16 }
 0x417   : > { %s14252_s16 = smov %s10728_s17  ;;  %s14253_s17 = smov %s10877_s28 }
 0x418   : > { %s14254_s18 = smov %s10736_s19  ;;  %22 = sbr.rel (!%p20_p1) target bundleno = 10 (0xa), region = 161 }
 0x41b   : > { %s14255_s19 = smov %s14250_s24 }
 0x41d   :  { %7456 = vsyncpa [#allocation5], 1 }
 0x41e   :  { %7458 = vsyncpa [#allocation5 + $0x1], 1 }
 0x41f   :  { %7459 = vsyncpa [#allocation8], 1 }
 0x420   :  { %7460 = vsyncpa [#allocation6], 1 }
 0x421   :  { %7462 = vsyncpa [#allocation6 + $0x1], 1 }
 0x422   :  { %7463 = vsyncpa [#allocation11], 1 }

</bundles_post_ra>
